<compile_context>
chip_gen: v6e
topology: v6e:2x2x1
jax: 0.10.0
libtpu: 0.0.40
codegen_flags: <defaults>
</compile_context>

<pallas_src>
import math

import jax
import jax.numpy as jnp
from jax.experimental import pallas as pl
from jax.experimental.pallas import tpu as pltpu

MXU_BF16 = True  # bf16 MXU operands, f32 accumulation (±~1e-2 rel. error)

# Half-resolution tap tables for a 3x3 kernel on an even/odd interleaved grid:
# for output parity q and kernel offset d: (source parity, half-res offset).
_PAR = ((1, 0, 1), (0, 1, 0))
_OFF = ((-1, 0, 0), (0, 0, 1))


# ---------------------------------------------------------------------------
# Fused DRFD kernel
# ---------------------------------------------------------------------------
def _drfd_fused_kernel(x_hbm, wconv_ref, bconv_ref, wconvx_ref, bconvx_ref,
                       wcut_ref, wfuse_ref, btot_ref, o_ref,
                       xbuf, acc_ref, sem):
    # x_hbm     : (B, 4, Hh+2, Wh+2, C) padded phase tensor, left in HBM
    #             (phase order = torch Cut order [x00, x10, x01, x11];
    #              slab row r <-> band-local half-res row r-1, col likewise)
    # wconv_ref : (2, 9, C)   depthwise 3x3/s1 weights (de-interleaved halves)
    # bconv_ref : (2, C)
    # wconvx_ref: (2, 9, C)   depthwise 3x3/s2 (conv_x) weights
    # bconvx_ref: (2, C)
    # wcut_ref  : (4C, C2)    Cut 1x1 conv with BN_c + fusion weight folded in
    # wfuse_ref : (2, 2C, C2) fusion weights, [GELU ; maxpool] stacked along K
    # btot_ref  : (1, C2)     all folded biases
    # o_ref     : (1, T*Wh, C2)
    # xbuf      : (2, 4, T+2, Wh+2, C) double-buffered VMEM band slab
    # acc_ref   : (T*Wh, C2) f32 accumulator scratch
    # sem       : (2,) DMA semaphores
    f32 = jnp.float32
    b = pl.program_id(0)
    band = pl.program_id(1)
    nb = pl.num_programs(1)

    T = xbuf.shape[2] - 2
    Wh = xbuf.shape[3] - 2
    C = xbuf.shape[4]
    C2 = o_ref.shape[2]
    npix = T * Wh
    dot_dt = jnp.bfloat16 if MXU_BF16 else f32

    # ---- manual banded DMA (overlapping halo windows), double-buffered ------
    def band_copy(j, slot):
        return pltpu.make_async_copy(
            x_hbm.at[b, :, pl.ds(j * T, T + 2)], xbuf.at[slot], sem.at[slot])

    slot = band % 2

    @pl.when(band == 0)
    def _():                       # first band of this batch row: nothing was prefetched
        band_copy(band, slot).start()

    band_copy(band, slot).wait()

    @pl.when(band + 1 < nb)
    def _():                       # prefetch next band of the same batch row
        band_copy(band + 1, 1 - slot).start()

    def xwin(phase, r0, nr, c0, nc):
        # direct window read from the VMEM band buffer: no slab / phase copies
        return xbuf[slot, phase, r0:r0 + nr, c0:c0 + nc, :].astype(f32)

    # ---- Cut path: one K=4C matmul (1x1 conv + BN folded into the weights) --
    xc = jnp.concatenate(
        [xwin(p, 1, T, 1, Wh).reshape(npix, C) for p in range(4)], axis=-1)
    acc_ref[...] = btot_ref[...].astype(f32) + jnp.dot(
        xc.astype(dot_dt), wcut_ref[...].astype(dot_dt),
        preferred_element_type=f32)

    for s in range(2):                       # de-interleaved depthwise halves
        wconv_s = wconv_ref[s].astype(f32)       # (9, C)
        bconv_s = bconv_ref[s, :].astype(f32)    # (C,)

        # ---- m = depthwise 3x3/s1 conv of x, phase(rp,cp) form --------------
        def m_phase(rp, cp):
            rlo = -1 if rp else 0       # rp==1 phases carry a 1-row top halo
            clo = -1 if cp else 0       # cp==1 phases carry a 1-col left halo
            nr, nc = T - rlo, Wh - clo
            acc = None
            for dh in range(3):
                rpar, r0 = _PAR[rp][dh], rlo + _OFF[rp][dh] + 1
                for dw in range(3):
                    cpar, c0 = _PAR[cp][dw], clo + _OFF[cp][dw] + 1
                    term = (xwin(cpar * 2 + rpar, r0, nr, c0, nc)
                            * wconv_s[dh * 3 + dw, :])
                    acc = term if acc is None else acc + term
            acc = acc + bconv_s
            # conv_x sees m zero-padded by 1: its row -1 / col -1 must be 0
            if cp:
                cidx = jax.lax.broadcasted_iota(jnp.int32, (1, nc, 1), 1)
                acc = jnp.where(cidx == 0, 0.0, acc)
            if rp:
                ridx = jax.lax.broadcasted_iota(jnp.int32, (nr, 1, 1), 0)
                acc = jnp.where(jnp.logical_and(ridx == 0, band == 0), 0.0, acc)
            return acc

        mph = {(rp, cp): m_phase(rp, cp) for rp in range(2) for cp in range(2)}

        def m_window(rp, cp, roff, coff):
            a = mph[(rp, cp)]
            r0 = roff + (1 if rp else 0)
            c0 = coff + (1 if cp else 0)
            return a[r0:r0 + T, c0:c0 + Wh, :]

        # ---- conv_x: depthwise 3x3 / stride 2 on m, tanh-approx GELU --------
        wx = wconvx_ref[s].astype(f32)
        z = None
        for dh in range(3):
            rpar, roff = _PAR[0][dh], _OFF[0][dh]
            for dw in range(3):
                cpar, coff = _PAR[0][dw], _OFF[0][dw]
                term = m_window(rpar, cpar, roff, coff) * wx[dh * 3 + dw, :]
                z = term if z is None else z + term
        z = z + bconvx_ref[s, :].astype(f32)
        g = jax.nn.gelu(z, approximate=True)   # tanh -> EUP (~1e-3 vs exact erf)

        # ---- maxpool 2x2 / stride 2 on m -------------------------------------
        mm = jnp.maximum(
            jnp.maximum(m_window(0, 0, 0, 0), m_window(0, 1, 0, 0)),
            jnp.maximum(m_window(1, 0, 0, 0), m_window(1, 1, 0, 0)))

        # ---- fusion 1x1 conv: one K=2C dot per half (BN folded in weights) --
        gm = jnp.concatenate([g.reshape(npix, C), mm.reshape(npix, C)], axis=-1)
        acc_ref[...] += jnp.dot(gm.astype(dot_dt), wfuse_ref[s].astype(dot_dt),
                                preferred_element_type=f32)

    o_ref[0] = acc_ref[...].astype(o_ref.dtype)


# ---------------------------------------------------------------------------
# Wrapper glue: layout, banding, parameter folding
# ---------------------------------------------------------------------------
def _bn_fold(gamma, beta, mean, var, eps=1e-5):
    scale = gamma * jax.lax.rsqrt(var + eps)
    return scale, beta - mean * scale


def _vmem_budget():
    """Generation-aware VMEM limit / per-band budget (v5e/v6e 128 MiB, v7x 64)."""
    cap = 64 * 1024 * 1024
    try:
        cap = int(pltpu.get_tpu_info().vmem_capacity_bytes)
    except Exception:        # non-TPU / older jax: stay v7x-conservative
        pass
    limit = min(int(cap * 3 // 4), 100 * 1024 * 1024)
    budget = max(limit // 6, 4 * 1024 * 1024)
    return limit, budget


def _pick_band_rows(Hh, Wh, C, budget):
    # rough per-band live-bytes: 2x input band slab (double buffer), 4 live
    # m phases for one half, conv_x/GELU/pool/Cut temporaries, f32 accumulator
    # and the double-buffered output block.
    def est(t):
        slab = 4 * (t + 2) * (Wh + 2) * C * 4
        mphases = 4 * (t + 1) * (Wh + 1) * C * 4
        temps = 8 * t * Wh * C * 4
        outb = 3 * t * Wh * (2 * C) * 4
        return 2 * slab + mphases + temps + outb

    if est(Hh) <= budget:
        return Hh
    divs = [d for d in range(1, Hh) if Hh % d == 0 and (d * Wh) % 8 == 0]
    fit = [d for d in divs if est(d) <= budget]
    if fit:
        return max(fit)
    return min(divs) if divs else Hh


def drfd_forward(x_nhwc, p, band_rows=None):
    """DRFD(dim, 2*dim): (B, H, W, dim) NHWC -> (B, H/2, W/2, 2*dim) NHWC."""
    B, H, W, C = x_nhwc.shape
    C2 = 2 * C
    Hh, Wh = H // 2, W // 2
    f32 = jnp.float32

    vmem_limit, band_budget = _vmem_budget()
    T = band_rows if band_rows is not None else _pick_band_rows(Hh, Wh, C,
                                                                band_budget)
    assert Hh % T == 0 and (T == Hh or (T * Wh) % 8 == 0)
    nb = Hh // T

    # Space-to-depth (torch Cut phase order) with a 1-element half-res halo.
    # Under jit the strided slices, stack and pad fuse into one copy; no
    # per-band rewrite of the activation happens any more -- the kernel DMAs
    # the overlapping band windows straight out of this HBM array.
    xq = jnp.stack([x_nhwc[:, 0::2, 0::2, :], x_nhwc[:, 1::2, 0::2, :],
                    x_nhwc[:, 0::2, 1::2, :], x_nhwc[:, 1::2, 1::2, :]], axis=1)
    xqp = jnp.pad(xq, ((0, 0), (0, 0), (1, 1), (1, 1), (0, 0)))

    # ---- fold parameters (no BN / concat left for the kernel) ---------------
    s_c, t_c = _bn_fold(*p["bn_c"])
    s_x, t_x = _bn_fold(*p["bn_x"])
    s_m, t_m = _bn_fold(*p["bn_m"])
    W1 = jnp.transpose(p["cut_w"].reshape(C2, 4 * C)).astype(f32)      # (4C, C2)
    Wf = jnp.transpose(p["fusion_w"].reshape(C2, 3 * C2)).astype(f32)  # (3C2, C2)
    Wf_c, Wf_x, Wf_m = Wf[:C2], Wf[C2:2 * C2], Wf[2 * C2:]
    w_cut = W1 @ (s_c[:, None] * Wf_c)                                 # (4C, C2)
    b_tot = (p["fusion_b"] + (p["cut_b"] * s_c + t_c) @ Wf_c
             + t_x @ Wf_x + t_m @ Wf_m).reshape(1, C2).astype(f32)

    # de-interleave the depthwise channel axis: k = s*C + c  <->  torch 2c + s
    perm = (2 * jnp.arange(C)[None, :] + jnp.arange(2)[:, None]).reshape(-1)
    w_conv = p["conv_w"].reshape(C2, 9)[perm].reshape(2, C, 9).transpose(0, 2, 1)
    b_conv = p["conv_b"][perm].reshape(2, C)
    w_convx = p["convx_w"].reshape(C2, 9)[perm].reshape(2, C, 9).transpose(0, 2, 1)
    b_convx = p["convx_b"][perm].reshape(2, C)
    w_fx = (s_x[:, None] * Wf_x)[perm].reshape(2, C, C2)
    w_fm = (s_m[:, None] * Wf_m)[perm].reshape(2, C, C2)
    # stack GELU and maxpool fusion weights along K -> one K=2C dot per half
    w_fuse = jnp.concatenate([w_fx, w_fm], axis=1)                     # (2, 2C, C2)

    mxu_dt = jnp.bfloat16 if MXU_BF16 else f32
    w_cut = w_cut.astype(mxu_dt)
    w_fuse = w_fuse.astype(mxu_dt)

    # TODO(synk): if C2 < 128, pack two spatial positions into the lane dim of
    # the output block to avoid masked partial stores (lane-dense out_spec).
    # TODO(synk): for B == 1 on v7x, split the band axis across the two
    # TensorCores (core_map) instead of relying on the batch axis for megacore.
    out_flat = pl.pallas_call(
        _drfd_fused_kernel,
        out_shape=jax.ShapeDtypeStruct((B, Hh * Wh, C2), x_nhwc.dtype),
        grid=(B, nb),
        in_specs=[
            pl.BlockSpec(memory_space=pl.ANY),             # xqp stays in HBM
            pl.BlockSpec((2, 9, C), lambda b, j: (0, 0, 0)),
            pl.BlockSpec((2, C), lambda b, j: (0, 0)),
            pl.BlockSpec((2, 9, C), lambda b, j: (0, 0, 0)),
            pl.BlockSpec((2, C), lambda b, j: (0, 0)),
            pl.BlockSpec((4 * C, C2), lambda b, j: (0, 0)),
            pl.BlockSpec((2, 2 * C, C2), lambda b, j: (0, 0, 0)),
            pl.BlockSpec((1, C2), lambda b, j: (0, 0)),
        ],
        out_specs=pl.BlockSpec((1, T * Wh, C2), lambda b, j: (b, j, 0)),
        scratch_shapes=[
            pltpu.VMEM((2, 4, T + 2, Wh + 2, C), x_nhwc.dtype),
            pltpu.VMEM((T * Wh, C2), jnp.float32),
            pltpu.SemaphoreType.DMA((2,)),
        ],
        compiler_params=pltpu.CompilerParams(
            dimension_semantics=("parallel", "arbitrary"),
            vmem_limit_bytes=vmem_limit),
    )(xqp, w_conv, b_conv, w_convx, b_convx, w_cut, w_fuse, b_tot)

    return out_flat.reshape(B, Hh, Wh, C2)


def patch_merging_forward(x_nchw, params, band_rows=None):
    """PatchMerging.forward: (B, C, H, W) NCHW -> (B, 2C, H/2, W/2) NCHW."""
    B, C, H, W = x_nchw.shape
    assert H % 2 == 0 and W % 2 == 0, f"x size ({H}*{W}) are not even."
    # TODO(synk): drop these boundary transposes if the surrounding model is NHWC.
    x_nhwc = jnp.transpose(x_nchw, (0, 2, 3, 1))
    out_nhwc = drfd_forward(x_nhwc, params, band_rows=band_rows)
    return jnp.transpose(out_nhwc, (0, 3, 1, 2))


# ---------------------------------------------------------------------------
# Pure-JAX reference (mirrors the PyTorch module in eval mode, exact-erf GELU)
# ---------------------------------------------------------------------------
def _bn_ref(v, bn, eps=1e-5):
    gamma, beta, mean, var = bn
    s = gamma * jax.lax.rsqrt(var + eps)
    return v * s[None, :, None, None] + (beta - mean * s)[None, :, None, None]


def drfd_reference(x, p):
    hi = jax.lax.Precision.HIGHEST
    dn = ("NCHW", "OIHW", "NCHW")
    B, C, H, W = x.shape
    C2 = 2 * C
    m = jax.lax.conv_general_dilated(x, p["conv_w"], (1, 1), ((1, 1), (1, 1)),
                                     dimension_numbers=dn, feature_group_count=C,
                                     precision=hi)
    m = m + p["conv_b"][None, :, None, None]
    xc = jnp.concatenate([x[:, :, 0::2, 0::2], x[:, :, 1::2, 0::2],
                          x[:, :, 0::2, 1::2], x[:, :, 1::2, 1::2]], axis=1)
    c = jax.lax.conv_general_dilated(xc, p["cut_w"], (1, 1), "VALID",
                                     dimension_numbers=dn, precision=hi)
    c = _bn_ref(c + p["cut_b"][None, :, None, None], p["bn_c"])
    xx = jax.lax.conv_general_dilated(m, p["convx_w"], (2, 2), ((1, 1), (1, 1)),
                                      dimension_numbers=dn,
                                      feature_group_count=C2, precision=hi)
    xx = xx + p["convx_b"][None, :, None, None]
    xx = 0.5 * xx * (1.0 + jax.lax.erf(xx * (1.0 / math.sqrt(2.0))))
    xx = _bn_ref(xx, p["bn_x"])
    mm = jax.lax.reduce_window(m, jnp.array(-jnp.inf, m.dtype), jax.lax.max,
                               (1, 1, 2, 2), (1, 1, 2, 2), "VALID")
    mm = _bn_ref(mm, p["bn_m"])
    cat = jnp.concatenate([c, xx, mm], axis=1)
    out = jax.lax.conv_general_dilated(cat, p["fusion_w"], (1, 1), "VALID",
                                       dimension_numbers=dn, precision=hi)
    return out + p["fusion_b"][None, :, None, None]


# ---------------------------------------------------------------------------
# Deterministic parameter init (shapes from the PyTorch __init__)
# ---------------------------------------------------------------------------
def init_params(key, dim):
    C2 = 2 * dim
    ks = jax.random.split(key, 11)

    def nrm(k, shape, scale=0.1):
        return scale * jax.random.normal(k, shape, jnp.float32)

    def bn(k):
        k1, k2, k3, k4 = jax.random.split(k, 4)
        gamma = 1.0 + nrm(k1, (C2,))
        beta = nrm(k2, (C2,))
        mean = nrm(k3, (C2,))
        var = 0.5 + jax.random.uniform(k4, (C2,), jnp.float32)
        return (gamma, beta, mean, var)

    return dict(
        conv_w=nrm(ks[0], (C2, 1, 3, 3)),        # depthwise conv, groups=dim
        conv_b=nrm(ks[1], (C2,)),
        cut_w=nrm(ks[2], (C2, 4 * dim, 1, 1)),   # Cut.conv_fusion
        cut_b=nrm(ks[3], (C2,)),
        convx_w=nrm(ks[4], (C2, 1, 3, 3)),       # conv_x, depthwise stride 2
        convx_b=nrm(ks[5], (C2,)),
        fusion_w=nrm(ks[6], (C2, 3 * C2, 1, 1)),
        fusion_b=nrm(ks[7], (C2,)),
        bn_c=bn(ks[8]),                          # Cut.batch_norm (eval mode)
        bn_x=bn(ks[9]),                          # batch_norm_x   (eval mode)
        bn_m=bn(ks[10]),                         # batch_norm_m   (eval mode)
    )


if __name__ == "__main__":
    key = jax.random.PRNGKey(0)
    kx, kp = jax.random.split(key)

    B, C, H, W = 2, 4, 16, 16                    # small shapes; dim = C
    x = jax.random.normal(kx, (B, C, H, W), jnp.float32)
    params = init_params(kp, C)

    fwd = jax.jit(patch_merging_forward, static_argnames=("band_rows",))

    out = jax.block_until_ready(fwd(x, params))
    assert out.shape == (B, 2 * C, H // 2, W // 2), out.shape
    assert bool(jnp.all(jnp.isfinite(out)))

    # self-check against a pure-JAX reference (tolerance covers bf16 MXU ops
    # and the tanh-approx GELU vs nn.GELU's exact erf)
    ref = jax.block_until_ready(drfd_reference(x, params))
    scale = float(jnp.max(jnp.abs(ref)))
    err = float(jnp.max(jnp.abs(out - ref)))
    assert err <= 3e-2 * max(1.0, scale), f"mismatch: {err} (ref scale {scale})"

    # also exercise the banded / double-buffered manual-DMA path (nb = 2)
    out_b = jax.block_until_ready(fwd(x, params, band_rows=4))
    err_b = float(jnp.max(jnp.abs(out_b - ref)))
    assert err_b <= 3e-2 * max(1.0, scale), f"banded mismatch: {err_b}"

    print("KERNEL_OK")
</pallas_src>

<mosaic_0001>
module attributes {stable_mosaic.version = 11 : i64} {
  func.func @_drfd_fused_kernel(%arg0: i32, %arg1: i32, %arg2: memref<2x4x10x10x4xf32, #tpu.memory_space<any>>, %arg3: memref<2x9x4xf32, #tpu.memory_space<vmem>>, %arg4: memref<2x4xf32, #tpu.memory_space<vmem>>, %arg5: memref<2x9x4xf32, #tpu.memory_space<vmem>>, %arg6: memref<2x4xf32, #tpu.memory_space<vmem>>, %arg7: memref<16x8xbf16, #tpu.memory_space<vmem>>, %arg8: memref<2x8x8xbf16, #tpu.memory_space<vmem>>, %arg9: memref<1x8xf32, #tpu.memory_space<vmem>>, %arg10: memref<1x64x8xf32, #tpu.memory_space<vmem>>, %arg11: memref<2x4x10x10x4xf32, #tpu.memory_space<vmem>>, %arg12: memref<64x8xf32, #tpu.memory_space<vmem>>, %arg13: memref<2x!tpu.dma_semaphore, #tpu.memory_space<semaphore_mem>>) attributes {dimension_semantics = [#tpu.dimension_semantics<parallel>, #tpu.dimension_semantics<arbitrary>], iteration_bounds = array<i64: 2, 1>, scalar_prefetch = 0 : i64, scratch_operands = 3 : i64, tpu.core_type = #tpu.core_type<tc>, window_params = [{}, {pipeline_mode = #tpu.pipeline_mode<synchronous>, transform_indices = @transform_1, window_bounds = array<i64: 2, 9, 4>}, {pipeline_mode = #tpu.pipeline_mode<synchronous>, transform_indices = @transform_2, window_bounds = array<i64: 2, 4>}, {pipeline_mode = #tpu.pipeline_mode<synchronous>, transform_indices = @transform_3, window_bounds = array<i64: 2, 9, 4>}, {pipeline_mode = #tpu.pipeline_mode<synchronous>, transform_indices = @transform_4, window_bounds = array<i64: 2, 4>}, {pipeline_mode = #tpu.pipeline_mode<synchronous>, transform_indices = @transform_5, window_bounds = array<i64: 16, 8>}, {pipeline_mode = #tpu.pipeline_mode<synchronous>, transform_indices = @transform_6, window_bounds = array<i64: 2, 8, 8>}, {pipeline_mode = #tpu.pipeline_mode<synchronous>, transform_indices = @transform_7, window_bounds = array<i64: 1, 8>}, {transform_indices = @transform_8, window_bounds = array<i64: 1, 64, 8>}]} {
    %c2_i32 = arith.constant 2 : i32
    %c0_i32 = arith.constant 0 : i32
    %0 = arith.cmpi eq, %c2_i32, %c0_i32 : i32
    %c1_i32 = arith.constant 1 : i32
    %1 = arith.select %0, %c1_i32, %c2_i32 : i32
    %2 = arith.remsi %arg1, %1 : i32
    %c0_i32_0 = arith.constant 0 : i32
    %3 = arith.cmpi ne, %2, %c0_i32_0 : i32
    %c0_i32_1 = arith.constant 0 : i32
    %4 = arith.cmpi slt, %2, %c0_i32_1 : i32
    %c0_i32_2 = arith.constant 0 : i32
    %5 = arith.cmpi slt, %1, %c0_i32_2 : i32
    %6 = arith.xori %4, %5 : i1
    %7 = arith.andi %6, %3 : i1
    %8 = arith.addi %2, %1 : i32
    %9 = arith.select %7, %8, %2 : i32
    %c0_i32_3 = arith.constant 0 : i32
    %10 = arith.cmpi eq, %arg1, %c0_i32_3 : i32
    %11 = arith.extui %10 : i1 to i32
    %c0_i32_4 = arith.constant 0 : i32
    %12 = arith.cmpi ne, %11, %c0_i32_4 : i32
    scf.if %12 {
      %c8_i32_390 = arith.constant 8 : i32
      %986 = arith.muli %arg1, %c8_i32_390 : i32
      %c0_i32_391 = arith.constant 0 : i32
      %c0_i32_392 = arith.constant 0 : i32
      %c0_i32_393 = arith.constant 0 : i32
      %987 = tpu.memref_slice %arg2[%arg0, %c0_i32_391, %986, %c0_i32_392, %c0_i32_393] : memref<2x4x10x10x4xf32, #tpu.memory_space<any>> -> memref<1x4x10x10x4xf32, #tpu.memory_space<any>>
      %988 = tpu.memref_squeeze %987 : memref<1x4x10x10x4xf32, #tpu.memory_space<any>> -> memref<4x10x10x4xf32, #tpu.memory_space<any>>
      %c0_i32_394 = arith.constant 0 : i32
      %c0_i32_395 = arith.constant 0 : i32
      %c0_i32_396 = arith.constant 0 : i32
      %c0_i32_397 = arith.constant 0 : i32
      %989 = tpu.memref_slice %arg11[%9, %c0_i32_394, %c0_i32_395, %c0_i32_396, %c0_i32_397] : memref<2x4x10x10x4xf32, #tpu.memory_space<vmem>> -> memref<1x4x10x10x4xf32, #tpu.memory_space<vmem>>
      %990 = tpu.memref_squeeze %989 : memref<1x4x10x10x4xf32, #tpu.memory_space<vmem>> -> memref<4x10x10x4xf32, #tpu.memory_space<vmem>>
      %991 = tpu.memref_slice %arg13[%9] : memref<2x!tpu.dma_semaphore, #tpu.memory_space<semaphore_mem>> -> memref<1x!tpu.dma_semaphore, #tpu.memory_space<semaphore_mem>>
      %992 = tpu.memref_squeeze %991 : memref<1x!tpu.dma_semaphore, #tpu.memory_space<semaphore_mem>> -> memref<!tpu.dma_semaphore, #tpu.memory_space<semaphore_mem>>
      tpu.enqueue_dma source(%988 : memref<4x10x10x4xf32, #tpu.memory_space<any>>) target(%990 : memref<4x10x10x4xf32, #tpu.memory_space<vmem>>) target_semaphore(%992 : memref<!tpu.dma_semaphore, #tpu.memory_space<semaphore_mem>>)
    } else {
    }
    %c8_i32 = arith.constant 8 : i32
    %13 = arith.muli %arg1, %c8_i32 : i32
    %c0_i32_5 = arith.constant 0 : i32
    %c0_i32_6 = arith.constant 0 : i32
    %c0_i32_7 = arith.constant 0 : i32
    %14 = tpu.memref_slice %arg2[%arg0, %c0_i32_5, %13, %c0_i32_6, %c0_i32_7] : memref<2x4x10x10x4xf32, #tpu.memory_space<any>> -> memref<1x4x10x10x4xf32, #tpu.memory_space<any>>
    %15 = tpu.memref_squeeze %14 : memref<1x4x10x10x4xf32, #tpu.memory_space<any>> -> memref<4x10x10x4xf32, #tpu.memory_space<any>>
    %c0_i32_8 = arith.constant 0 : i32
    %c0_i32_9 = arith.constant 0 : i32
    %c0_i32_10 = arith.constant 0 : i32
    %c0_i32_11 = arith.constant 0 : i32
    %16 = tpu.memref_slice %arg11[%9, %c0_i32_8, %c0_i32_9, %c0_i32_10, %c0_i32_11] : memref<2x4x10x10x4xf32, #tpu.memory_space<vmem>> -> memref<1x4x10x10x4xf32, #tpu.memory_space<vmem>>
    %17 = tpu.memref_squeeze %16 : memref<1x4x10x10x4xf32, #tpu.memory_space<vmem>> -> memref<4x10x10x4xf32, #tpu.memory_space<vmem>>
    %18 = tpu.memref_slice %arg13[%9] : memref<2x!tpu.dma_semaphore, #tpu.memory_space<semaphore_mem>> -> memref<1x!tpu.dma_semaphore, #tpu.memory_space<semaphore_mem>>
    %19 = tpu.memref_squeeze %18 : memref<1x!tpu.dma_semaphore, #tpu.memory_space<semaphore_mem>> -> memref<!tpu.dma_semaphore, #tpu.memory_space<semaphore_mem>>
    tpu.wait_dma2 semaphore(%19 : memref<!tpu.dma_semaphore, #tpu.memory_space<semaphore_mem>>) src(%15 : memref<4x10x10x4xf32, #tpu.memory_space<any>>) dst(%17 : memref<4x10x10x4xf32, #tpu.memory_space<vmem>>)
    %c1_i32_12 = arith.constant 1 : i32
    %20 = arith.addi %arg1, %c1_i32_12 : i32
    %c1_i32_13 = arith.constant 1 : i32
    %21 = arith.cmpi slt, %20, %c1_i32_13 : i32
    %22 = arith.extui %21 : i1 to i32
    %c0_i32_14 = arith.constant 0 : i32
    %23 = arith.cmpi ne, %22, %c0_i32_14 : i32
    scf.if %23 {
      %c1_i32_390 = arith.constant 1 : i32
      %986 = arith.addi %arg1, %c1_i32_390 : i32
      %c1_i32_391 = arith.constant 1 : i32
      %987 = arith.subi %c1_i32_391, %9 : i32
      %c8_i32_392 = arith.constant 8 : i32
      %988 = arith.muli %986, %c8_i32_392 : i32
      %c0_i32_393 = arith.constant 0 : i32
      %c0_i32_394 = arith.constant 0 : i32
      %c0_i32_395 = arith.constant 0 : i32
      %989 = tpu.memref_slice %arg2[%arg0, %c0_i32_393, %988, %c0_i32_394, %c0_i32_395] : memref<2x4x10x10x4xf32, #tpu.memory_space<any>> -> memref<1x4x10x10x4xf32, #tpu.memory_space<any>>
      %990 = tpu.memref_squeeze %989 : memref<1x4x10x10x4xf32, #tpu.memory_space<any>> -> memref<4x10x10x4xf32, #tpu.memory_space<any>>
      %c0_i32_396 = arith.constant 0 : i32
      %c0_i32_397 = arith.constant 0 : i32
      %c0_i32_398 = arith.constant 0 : i32
      %c0_i32_399 = arith.constant 0 : i32
      %991 = tpu.memref_slice %arg11[%987, %c0_i32_396, %c0_i32_397, %c0_i32_398, %c0_i32_399] : memref<2x4x10x10x4xf32, #tpu.memory_space<vmem>> -> memref<1x4x10x10x4xf32, #tpu.memory_space<vmem>>
      %992 = tpu.memref_squeeze %991 : memref<1x4x10x10x4xf32, #tpu.memory_space<vmem>> -> memref<4x10x10x4xf32, #tpu.memory_space<vmem>>
      %993 = tpu.memref_slice %arg13[%987] : memref<2x!tpu.dma_semaphore, #tpu.memory_space<semaphore_mem>> -> memref<1x!tpu.dma_semaphore, #tpu.memory_space<semaphore_mem>>
      %994 = tpu.memref_squeeze %993 : memref<1x!tpu.dma_semaphore, #tpu.memory_space<semaphore_mem>> -> memref<!tpu.dma_semaphore, #tpu.memory_space<semaphore_mem>>
      tpu.enqueue_dma source(%990 : memref<4x10x10x4xf32, #tpu.memory_space<any>>) target(%992 : memref<4x10x10x4xf32, #tpu.memory_space<vmem>>) target_semaphore(%994 : memref<!tpu.dma_semaphore, #tpu.memory_space<semaphore_mem>>)
    } else {
    }
    %24 = arith.index_cast %9 : i32 to index
    %c0 = arith.constant 0 : index
    %c1 = arith.constant 1 : index
    %c1_15 = arith.constant 1 : index
    %c0_16 = arith.constant 0 : index
    %25 = vector.load %arg11[%24, %c0, %c1, %c1_15, %c0_16] : memref<2x4x10x10x4xf32, #tpu.memory_space<vmem>>, vector<1x1x8x8x4xf32>
    %26 = vector.shape_cast %25 : vector<1x1x8x8x4xf32> to vector<8x8x4xf32>
    %27 = vector.shape_cast %26 : vector<8x8x4xf32> to vector<64x4xf32>
    %28 = arith.index_cast %9 : i32 to index
    %c1_17 = arith.constant 1 : index
    %c1_18 = arith.constant 1 : index
    %c1_19 = arith.constant 1 : index
    %c0_20 = arith.constant 0 : index
    %29 = vector.load %arg11[%28, %c1_17, %c1_18, %c1_19, %c0_20] : memref<2x4x10x10x4xf32, #tpu.memory_space<vmem>>, vector<1x1x8x8x4xf32>
    %30 = vector.shape_cast %29 : vector<1x1x8x8x4xf32> to vector<8x8x4xf32>
    %31 = vector.shape_cast %30 : vector<8x8x4xf32> to vector<64x4xf32>
    %32 = arith.index_cast %9 : i32 to index
    %c2 = arith.constant 2 : index
    %c1_21 = arith.constant 1 : index
    %c1_22 = arith.constant 1 : index
    %c0_23 = arith.constant 0 : index
    %33 = vector.load %arg11[%32, %c2, %c1_21, %c1_22, %c0_23] : memref<2x4x10x10x4xf32, #tpu.memory_space<vmem>>, vector<1x1x8x8x4xf32>
    %34 = vector.shape_cast %33 : vector<1x1x8x8x4xf32> to vector<8x8x4xf32>
    %35 = vector.shape_cast %34 : vector<8x8x4xf32> to vector<64x4xf32>
    %36 = arith.index_cast %9 : i32 to index
    %c3 = arith.constant 3 : index
    %c1_24 = arith.constant 1 : index
    %c1_25 = arith.constant 1 : index
    %c0_26 = arith.constant 0 : index
    %37 = vector.load %arg11[%36, %c3, %c1_24, %c1_25, %c0_26] : memref<2x4x10x10x4xf32, #tpu.memory_space<vmem>>, vector<1x1x8x8x4xf32>
    %38 = vector.shape_cast %37 : vector<1x1x8x8x4xf32> to vector<8x8x4xf32>
    %39 = vector.shape_cast %38 : vector<8x8x4xf32> to vector<64x4xf32>
    %40 = tpu.concatenate %27, %31, %35, %39 in 1 : vector<64x4xf32>, vector<64x4xf32>, vector<64x4xf32>, vector<64x4xf32> -> vector<64x16xf32>
    %c0_27 = arith.constant 0 : index
    %c0_28 = arith.constant 0 : index
    %41 = vector.load %arg9[%c0_27, %c0_28] : memref<1x8xf32, #tpu.memory_space<vmem>>, vector<1x8xf32>
    %42 = arith.truncf %40 : vector<64x16xf32> to vector<64x16xbf16>
    %c0_29 = arith.constant 0 : index
    %c0_30 = arith.constant 0 : index
    %43 = vector.load %arg7[%c0_29, %c0_30] : memref<16x8xbf16, #tpu.memory_space<vmem>>, vector<16x8xbf16>
    %cst = arith.constant dense<0.000000e+00> : vector<64x8xf32>
    %44 = tpu.matmul %42, %43, %cst {dimension_numbers = #tpu.dot_dimension_numbers<[1], [0], [0], [1], [0, 0, 1, 1], [], []>} : vector<64x16xbf16>, vector<16x8xbf16>, vector<64x8xf32> -> vector<64x8xf32>
    %45 = vector.broadcast %41 : vector<1x8xf32> to vector<64x8xf32>
    %46 = arith.addf %45, %44 : vector<64x8xf32>
    %c0_31 = arith.constant 0 : index
    %c0_32 = arith.constant 0 : index
    %47 = vector.load %arg12[%c0_31, %c0_32] : memref<64x8xf32, #tpu.memory_space<vmem>>, vector<64x8xf32>
    tpu.vector_store %arg12[%c0_31, %c0_32], %46 {strides = array<i32>} : memref<64x8xf32, #tpu.memory_space<vmem>>, vector<64x8xf32>,
    %c0_33 = arith.constant 0 : index
    %c0_34 = arith.constant 0 : index
    %c0_35 = arith.constant 0 : index
    %48 = vector.load %arg3[%c0_33, %c0_34, %c0_35] : memref<2x9x4xf32, #tpu.memory_space<vmem>>, vector<1x9x4xf32>
    %49 = vector.shape_cast %48 : vector<1x9x4xf32> to vector<9x4xf32>
    %c0_36 = arith.constant 0 : index
    %c0_37 = arith.constant 0 : index
    %50 = vector.load %arg4[%c0_36, %c0_37] : memref<2x4xf32, #tpu.memory_space<vmem>>, vector<1x4xf32>
    %51 = vector.shape_cast %50 : vector<1x4xf32> to vector<4xf32>
    %52 = arith.index_cast %9 : i32 to index
    %c3_38 = arith.constant 3 : index
    %c0_39 = arith.constant 0 : index
    %c0_40 = arith.constant 0 : index
    %c0_41 = arith.constant 0 : index
    %53 = vector.load %arg11[%52, %c3_38, %c0_39, %c0_40, %c0_41] : memref<2x4x10x10x4xf32, #tpu.memory_space<vmem>>, vector<1x1x8x8x4xf32>
    %54 = vector.shape_cast %53 : vector<1x1x8x8x4xf32> to vector<8x8x4xf32>
    %55 = vector.extract_strided_slice %49 {offsets = [0, 0], sizes = [1, 4], strides = [1, 1]} : vector<9x4xf32> to vector<1x4xf32>
    %56 = vector.shape_cast %55 : vector<1x4xf32> to vector<4xf32>
    %57 = vector.shape_cast %56 : vector<4xf32> to vector<1x1x4xf32>
    %58 = vector.broadcast %57 : vector<1x1x4xf32> to vector<8x8x4xf32>
    %59 = arith.mulf %54, %58 : vector<8x8x4xf32>
    %60 = arith.index_cast %9 : i32 to index
    %c1_42 = arith.constant 1 : index
    %c0_43 = arith.constant 0 : index
    %c1_44 = arith.constant 1 : index
    %c0_45 = arith.constant 0 : index
    %61 = vector.load %arg11[%60, %c1_42, %c0_43, %c1_44, %c0_45] : memref<2x4x10x10x4xf32, #tpu.memory_space<vmem>>, vector<1x1x8x8x4xf32>
    %62 = vector.shape_cast %61 : vector<1x1x8x8x4xf32> to vector<8x8x4xf32>
    %63 = vector.extract_strided_slice %49 {offsets = [1, 0], sizes = [1, 4], strides = [1, 1]} : vector<9x4xf32> to vector<1x4xf32>
    %64 = vector.shape_cast %63 : vector<1x4xf32> to vector<4xf32>
    %65 = vector.shape_cast %64 : vector<4xf32> to vector<1x1x4xf32>
    %66 = vector.broadcast %65 : vector<1x1x4xf32> to vector<8x8x4xf32>
    %67 = arith.mulf %62, %66 : vector<8x8x4xf32>
    %68 = arith.addf %59, %67 : vector<8x8x4xf32>
    %69 = arith.index_cast %9 : i32 to index
    %c3_46 = arith.constant 3 : index
    %c0_47 = arith.constant 0 : index
    %c1_48 = arith.constant 1 : index
    %c0_49 = arith.constant 0 : index
    %70 = vector.load %arg11[%69, %c3_46, %c0_47, %c1_48, %c0_49] : memref<2x4x10x10x4xf32, #tpu.memory_space<vmem>>, vector<1x1x8x8x4xf32>
    %71 = vector.shape_cast %70 : vector<1x1x8x8x4xf32> to vector<8x8x4xf32>
    %72 = vector.extract_strided_slice %49 {offsets = [2, 0], sizes = [1, 4], strides = [1, 1]} : vector<9x4xf32> to vector<1x4xf32>
    %73 = vector.shape_cast %72 : vector<1x4xf32> to vector<4xf32>
    %74 = vector.shape_cast %73 : vector<4xf32> to vector<1x1x4xf32>
    %75 = vector.broadcast %74 : vector<1x1x4xf32> to vector<8x8x4xf32>
    %76 = arith.mulf %71, %75 : vector<8x8x4xf32>
    %77 = arith.addf %68, %76 : vector<8x8x4xf32>
    %78 = arith.index_cast %9 : i32 to index
    %c2_50 = arith.constant 2 : index
    %c1_51 = arith.constant 1 : index
    %c0_52 = arith.constant 0 : index
    %c0_53 = arith.constant 0 : index
    %79 = vector.load %arg11[%78, %c2_50, %c1_51, %c0_52, %c0_53] : memref<2x4x10x10x4xf32, #tpu.memory_space<vmem>>, vector<1x1x8x8x4xf32>
    %80 = vector.shape_cast %79 : vector<1x1x8x8x4xf32> to vector<8x8x4xf32>
    %81 = vector.extract_strided_slice %49 {offsets = [3, 0], sizes = [1, 4], strides = [1, 1]} : vector<9x4xf32> to vector<1x4xf32>
    %82 = vector.shape_cast %81 : vector<1x4xf32> to vector<4xf32>
    %83 = vector.shape_cast %82 : vector<4xf32> to vector<1x1x4xf32>
    %84 = vector.broadcast %83 : vector<1x1x4xf32> to vector<8x8x4xf32>
    %85 = arith.mulf %80, %84 : vector<8x8x4xf32>
    %86 = arith.addf %77, %85 : vector<8x8x4xf32>
    %87 = arith.index_cast %9 : i32 to index
    %c0_54 = arith.constant 0 : index
    %c1_55 = arith.constant 1 : index
    %c1_56 = arith.constant 1 : index
    %c0_57 = arith.constant 0 : index
    %88 = vector.load %arg11[%87, %c0_54, %c1_55, %c1_56, %c0_57] : memref<2x4x10x10x4xf32, #tpu.memory_space<vmem>>, vector<1x1x8x8x4xf32>
    %89 = vector.shape_cast %88 : vector<1x1x8x8x4xf32> to vector<8x8x4xf32>
    %90 = vector.extract_strided_slice %49 {offsets = [4, 0], sizes = [1, 4], strides = [1, 1]} : vector<9x4xf32> to vector<1x4xf32>
    %91 = vector.shape_cast %90 : vector<1x4xf32> to vector<4xf32>
    %92 = vector.shape_cast %91 : vector<4xf32> to vector<1x1x4xf32>
    %93 = vector.broadcast %92 : vector<1x1x4xf32> to vector<8x8x4xf32>
    %94 = arith.mulf %89, %93 : vector<8x8x4xf32>
    %95 = arith.addf %86, %94 : vector<8x8x4xf32>
    %96 = arith.index_cast %9 : i32 to index
    %c2_58 = arith.constant 2 : index
    %c1_59 = arith.constant 1 : index
    %c1_60 = arith.constant 1 : index
    %c0_61 = arith.constant 0 : index
    %97 = vector.load %arg11[%96, %c2_58, %c1_59, %c1_60, %c0_61] : memref<2x4x10x10x4xf32, #tpu.memory_space<vmem>>, vector<1x1x8x8x4xf32>
    %98 = vector.shape_cast %97 : vector<1x1x8x8x4xf32> to vector<8x8x4xf32>
    %99 = vector.extract_strided_slice %49 {offsets = [5, 0], sizes = [1, 4], strides = [1, 1]} : vector<9x4xf32> to vector<1x4xf32>
    %100 = vector.shape_cast %99 : vector<1x4xf32> to vector<4xf32>
    %101 = vector.shape_cast %100 : vector<4xf32> to vector<1x1x4xf32>
    %102 = vector.broadcast %101 : vector<1x1x4xf32> to vector<8x8x4xf32>
    %103 = arith.mulf %98, %102 : vector<8x8x4xf32>
    %104 = arith.addf %95, %103 : vector<8x8x4xf32>
    %105 = arith.index_cast %9 : i32 to index
    %c3_62 = arith.constant 3 : index
    %c1_63 = arith.constant 1 : index
    %c0_64 = arith.constant 0 : index
    %c0_65 = arith.constant 0 : index
    %106 = vector.load %arg11[%105, %c3_62, %c1_63, %c0_64, %c0_65] : memref<2x4x10x10x4xf32, #tpu.memory_space<vmem>>, vector<1x1x8x8x4xf32>
    %107 = vector.shape_cast %106 : vector<1x1x8x8x4xf32> to vector<8x8x4xf32>
    %108 = vector.extract_strided_slice %49 {offsets = [6, 0], sizes = [1, 4], strides = [1, 1]} : vector<9x4xf32> to vector<1x4xf32>
    %109 = vector.shape_cast %108 : vector<1x4xf32> to vector<4xf32>
    %110 = vector.shape_cast %109 : vector<4xf32> to vector<1x1x4xf32>
    %111 = vector.broadcast %110 : vector<1x1x4xf32> to vector<8x8x4xf32>
    %112 = arith.mulf %107, %111 : vector<8x8x4xf32>
    %113 = arith.addf %104, %112 : vector<8x8x4xf32>
    %114 = arith.index_cast %9 : i32 to index
    %c1_66 = arith.constant 1 : index
    %c1_67 = arith.constant 1 : index
    %c1_68 = arith.constant 1 : index
    %c0_69 = arith.constant 0 : index
    %115 = vector.load %arg11[%114, %c1_66, %c1_67, %c1_68, %c0_69] : memref<2x4x10x10x4xf32, #tpu.memory_space<vmem>>, vector<1x1x8x8x4xf32>
    %116 = vector.shape_cast %115 : vector<1x1x8x8x4xf32> to vector<8x8x4xf32>
    %117 = vector.extract_strided_slice %49 {offsets = [7, 0], sizes = [1, 4], strides = [1, 1]} : vector<9x4xf32> to vector<1x4xf32>
    %118 = vector.shape_cast %117 : vector<1x4xf32> to vector<4xf32>
    %119 = vector.shape_cast %118 : vector<4xf32> to vector<1x1x4xf32>
    %120 = vector.broadcast %119 : vector<1x1x4xf32> to vector<8x8x4xf32>
    %121 = arith.mulf %116, %120 : vector<8x8x4xf32>
    %122 = arith.addf %113, %121 : vector<8x8x4xf32>
    %123 = arith.index_cast %9 : i32 to index
    %c3_70 = arith.constant 3 : index
    %c1_71 = arith.constant 1 : index
    %c1_72 = arith.constant 1 : index
    %c0_73 = arith.constant 0 : index
    %124 = vector.load %arg11[%123, %c3_70, %c1_71, %c1_72, %c0_73] : memref<2x4x10x10x4xf32, #tpu.memory_space<vmem>>, vector<1x1x8x8x4xf32>
    %125 = vector.shape_cast %124 : vector<1x1x8x8x4xf32> to vector<8x8x4xf32>
    %126 = vector.extract_strided_slice %49 {offsets = [8, 0], sizes = [1, 4], strides = [1, 1]} : vector<9x4xf32> to vector<1x4xf32>
    %127 = vector.shape_cast %126 : vector<1x4xf32> to vector<4xf32>
    %128 = vector.shape_cast %127 : vector<4xf32> to vector<1x1x4xf32>
    %129 = vector.broadcast %128 : vector<1x1x4xf32> to vector<8x8x4xf32>
    %130 = arith.mulf %125, %129 : vector<8x8x4xf32>
    %131 = arith.addf %122, %130 : vector<8x8x4xf32>
    %132 = vector.shape_cast %51 : vector<4xf32> to vector<1x1x4xf32>
    %133 = vector.broadcast %132 : vector<1x1x4xf32> to vector<8x8x4xf32>
    %134 = arith.addf %131, %133 : vector<8x8x4xf32>
    %135 = arith.index_cast %9 : i32 to index
    %c1_74 = arith.constant 1 : index
    %c0_75 = arith.constant 0 : index
    %c0_76 = arith.constant 0 : index
    %c0_77 = arith.constant 0 : index
    %136 = vector.load %arg11[%135, %c1_74, %c0_75, %c0_76, %c0_77] : memref<2x4x10x10x4xf32, #tpu.memory_space<vmem>>, vector<1x1x8x9x4xf32>
    %137 = vector.shape_cast %136 : vector<1x1x8x9x4xf32> to vector<8x9x4xf32>
    %138 = vector.extract_strided_slice %49 {offsets = [0, 0], sizes = [1, 4], strides = [1, 1]} : vector<9x4xf32> to vector<1x4xf32>
    %139 = vector.shape_cast %138 : vector<1x4xf32> to vector<4xf32>
    %140 = vector.shape_cast %139 : vector<4xf32> to vector<1x1x4xf32>
    %141 = vector.broadcast %140 : vector<1x1x4xf32> to vector<8x9x4xf32>
    %142 = arith.mulf %137, %141 : vector<8x9x4xf32>
    %143 = arith.index_cast %9 : i32 to index
    %c3_78 = arith.constant 3 : index
    %c0_79 = arith.constant 0 : index
    %c0_80 = arith.constant 0 : index
    %c0_81 = arith.constant 0 : index
    %144 = vector.load %arg11[%143, %c3_78, %c0_79, %c0_80, %c0_81] : memref<2x4x10x10x4xf32, #tpu.memory_space<vmem>>, vector<1x1x8x9x4xf32>
    %145 = vector.shape_cast %144 : vector<1x1x8x9x4xf32> to vector<8x9x4xf32>
    %146 = vector.extract_strided_slice %49 {offsets = [1, 0], sizes = [1, 4], strides = [1, 1]} : vector<9x4xf32> to vector<1x4xf32>
    %147 = vector.shape_cast %146 : vector<1x4xf32> to vector<4xf32>
    %148 = vector.shape_cast %147 : vector<4xf32> to vector<1x1x4xf32>
    %149 = vector.broadcast %148 : vector<1x1x4xf32> to vector<8x9x4xf32>
    %150 = arith.mulf %145, %149 : vector<8x9x4xf32>
    %151 = arith.addf %142, %150 : vector<8x9x4xf32>
    %152 = arith.index_cast %9 : i32 to index
    %c1_82 = arith.constant 1 : index
    %c0_83 = arith.constant 0 : index
    %c1_84 = arith.constant 1 : index
    %c0_85 = arith.constant 0 : index
    %153 = vector.load %arg11[%152, %c1_82, %c0_83, %c1_84, %c0_85] : memref<2x4x10x10x4xf32, #tpu.memory_space<vmem>>, vector<1x1x8x9x4xf32>
    %154 = vector.shape_cast %153 : vector<1x1x8x9x4xf32> to vector<8x9x4xf32>
    %155 = vector.extract_strided_slice %49 {offsets = [2, 0], sizes = [1, 4], strides = [1, 1]} : vector<9x4xf32> to vector<1x4xf32>
    %156 = vector.shape_cast %155 : vector<1x4xf32> to vector<4xf32>
    %157 = vector.shape_cast %156 : vector<4xf32> to vector<1x1x4xf32>
    %158 = vector.broadcast %157 : vector<1x1x4xf32> to vector<8x9x4xf32>
    %159 = arith.mulf %154, %158 : vector<8x9x4xf32>
    %160 = arith.addf %151, %159 : vector<8x9x4xf32>
    %161 = arith.index_cast %9 : i32 to index
    %c0_86 = arith.constant 0 : index
    %c1_87 = arith.constant 1 : index
    %c0_88 = arith.constant 0 : index
    %c0_89 = arith.constant 0 : index
    %162 = vector.load %arg11[%161, %c0_86, %c1_87, %c0_88, %c0_89] : memref<2x4x10x10x4xf32, #tpu.memory_space<vmem>>, vector<1x1x8x9x4xf32>
    %163 = vector.shape_cast %162 : vector<1x1x8x9x4xf32> to vector<8x9x4xf32>
    %164 = vector.extract_strided_slice %49 {offsets = [3, 0], sizes = [1, 4], strides = [1, 1]} : vector<9x4xf32> to vector<1x4xf32>
    %165 = vector.shape_cast %164 : vector<1x4xf32> to vector<4xf32>
    %166 = vector.shape_cast %165 : vector<4xf32> to vector<1x1x4xf32>
    %167 = vector.broadcast %166 : vector<1x1x4xf32> to vector<8x9x4xf32>
    %168 = arith.mulf %163, %167 : vector<8x9x4xf32>
    %169 = arith.addf %160, %168 : vector<8x9x4xf32>
    %170 = arith.index_cast %9 : i32 to index
    %c2_90 = arith.constant 2 : index
    %c1_91 = arith.constant 1 : index
    %c0_92 = arith.constant 0 : index
    %c0_93 = arith.constant 0 : index
    %171 = vector.load %arg11[%170, %c2_90, %c1_91, %c0_92, %c0_93] : memref<2x4x10x10x4xf32, #tpu.memory_space<vmem>>, vector<1x1x8x9x4xf32>
    %172 = vector.shape_cast %171 : vector<1x1x8x9x4xf32> to vector<8x9x4xf32>
    %173 = vector.extract_strided_slice %49 {offsets = [4, 0], sizes = [1, 4], strides = [1, 1]} : vector<9x4xf32> to vector<1x4xf32>
    %174 = vector.shape_cast %173 : vector<1x4xf32> to vector<4xf32>
    %175 = vector.shape_cast %174 : vector<4xf32> to vector<1x1x4xf32>
    %176 = vector.broadcast %175 : vector<1x1x4xf32> to vector<8x9x4xf32>
    %177 = arith.mulf %172, %176 : vector<8x9x4xf32>
    %178 = arith.addf %169, %177 : vector<8x9x4xf32>
    %179 = arith.index_cast %9 : i32 to index
    %c0_94 = arith.constant 0 : index
    %c1_95 = arith.constant 1 : index
    %c1_96 = arith.constant 1 : index
    %c0_97 = arith.constant 0 : index
    %180 = vector.load %arg11[%179, %c0_94, %c1_95, %c1_96, %c0_97] : memref<2x4x10x10x4xf32, #tpu.memory_space<vmem>>, vector<1x1x8x9x4xf32>
    %181 = vector.shape_cast %180 : vector<1x1x8x9x4xf32> to vector<8x9x4xf32>
    %182 = vector.extract_strided_slice %49 {offsets = [5, 0], sizes = [1, 4], strides = [1, 1]} : vector<9x4xf32> to vector<1x4xf32>
    %183 = vector.shape_cast %182 : vector<1x4xf32> to vector<4xf32>
    %184 = vector.shape_cast %183 : vector<4xf32> to vector<1x1x4xf32>
    %185 = vector.broadcast %184 : vector<1x1x4xf32> to vector<8x9x4xf32>
    %186 = arith.mulf %181, %185 : vector<8x9x4xf32>
    %187 = arith.addf %178, %186 : vector<8x9x4xf32>
    %188 = arith.index_cast %9 : i32 to index
    %c1_98 = arith.constant 1 : index
    %c1_99 = arith.constant 1 : index
    %c0_100 = arith.constant 0 : index
    %c0_101 = arith.constant 0 : index
    %189 = vector.load %arg11[%188, %c1_98, %c1_99, %c0_100, %c0_101] : memref<2x4x10x10x4xf32, #tpu.memory_space<vmem>>, vector<1x1x8x9x4xf32>
    %190 = vector.shape_cast %189 : vector<1x1x8x9x4xf32> to vector<8x9x4xf32>
    %191 = vector.extract_strided_slice %49 {offsets = [6, 0], sizes = [1, 4], strides = [1, 1]} : vector<9x4xf32> to vector<1x4xf32>
    %192 = vector.shape_cast %191 : vector<1x4xf32> to vector<4xf32>
    %193 = vector.shape_cast %192 : vector<4xf32> to vector<1x1x4xf32>
    %194 = vector.broadcast %193 : vector<1x1x4xf32> to vector<8x9x4xf32>
    %195 = arith.mulf %190, %194 : vector<8x9x4xf32>
    %196 = arith.addf %187, %195 : vector<8x9x4xf32>
    %197 = arith.index_cast %9 : i32 to index
    %c3_102 = arith.constant 3 : index
    %c1_103 = arith.constant 1 : index
    %c0_104 = arith.constant 0 : index
    %c0_105 = arith.constant 0 : index
    %198 = vector.load %arg11[%197, %c3_102, %c1_103, %c0_104, %c0_105] : memref<2x4x10x10x4xf32, #tpu.memory_space<vmem>>, vector<1x1x8x9x4xf32>
    %199 = vector.shape_cast %198 : vector<1x1x8x9x4xf32> to vector<8x9x4xf32>
    %200 = vector.extract_strided_slice %49 {offsets = [7, 0], sizes = [1, 4], strides = [1, 1]} : vector<9x4xf32> to vector<1x4xf32>
    %201 = vector.shape_cast %200 : vector<1x4xf32> to vector<4xf32>
    %202 = vector.shape_cast %201 : vector<4xf32> to vector<1x1x4xf32>
    %203 = vector.broadcast %202 : vector<1x1x4xf32> to vector<8x9x4xf32>
    %204 = arith.mulf %199, %203 : vector<8x9x4xf32>
    %205 = arith.addf %196, %204 : vector<8x9x4xf32>
    %206 = arith.index_cast %9 : i32 to index
    %c1_106 = arith.constant 1 : index
    %c1_107 = arith.constant 1 : index
    %c1_108 = arith.constant 1 : index
    %c0_109 = arith.constant 0 : index
    %207 = vector.load %arg11[%206, %c1_106, %c1_107, %c1_108, %c0_109] : memref<2x4x10x10x4xf32, #tpu.memory_space<vmem>>, vector<1x1x8x9x4xf32>
    %208 = vector.shape_cast %207 : vector<1x1x8x9x4xf32> to vector<8x9x4xf32>
    %209 = vector.extract_strided_slice %49 {offsets = [8, 0], sizes = [1, 4], strides = [1, 1]} : vector<9x4xf32> to vector<1x4xf32>
    %210 = vector.shape_cast %209 : vector<1x4xf32> to vector<4xf32>
    %211 = vector.shape_cast %210 : vector<4xf32> to vector<1x1x4xf32>
    %212 = vector.broadcast %211 : vector<1x1x4xf32> to vector<8x9x4xf32>
    %213 = arith.mulf %208, %212 : vector<8x9x4xf32>
    %214 = arith.addf %205, %213 : vector<8x9x4xf32>
    %215 = vector.shape_cast %51 : vector<4xf32> to vector<1x1x4xf32>
    %216 = vector.broadcast %215 : vector<1x1x4xf32> to vector<8x9x4xf32>
    %217 = arith.addf %214, %216 : vector<8x9x4xf32>
    %218 = tpu.iota {dimensions = array<i32: 1>} : vector<1x9x1xi32>
    %c0_i32_110 = arith.constant 0 : i32
    %219 = vector.broadcast %c0_i32_110 : i32 to vector<1x9x1xi32>
    %220 = arith.cmpi eq, %218, %219 : vector<1x9x1xi32>
    %cst_111 = arith.constant 0.000000e+00 : f32
    %221 = vector.shape_cast %220 : vector<1x9x1xi1> to vector<1x9x1xi1>
    %222 = vector.broadcast %221 : vector<1x9x1xi1> to vector<8x9x4xi1>
    %223 = vector.broadcast %cst_111 : f32 to vector<8x9x4xf32>
    %224 = arith.select %222, %223, %217 : vector<8x9x4xi1>, vector<8x9x4xf32>
    %225 = arith.index_cast %9 : i32 to index
    %c2_112 = arith.constant 2 : index
    %c0_113 = arith.constant 0 : index
    %c0_114 = arith.constant 0 : index
    %c0_115 = arith.constant 0 : index
    %226 = vector.load %arg11[%225, %c2_112, %c0_113, %c0_114, %c0_115] : memref<2x4x10x10x4xf32, #tpu.memory_space<vmem>>, vector<1x1x9x8x4xf32>
    %227 = vector.shape_cast %226 : vector<1x1x9x8x4xf32> to vector<9x8x4xf32>
    %228 = vector.extract_strided_slice %49 {offsets = [0, 0], sizes = [1, 4], strides = [1, 1]} : vector<9x4xf32> to vector<1x4xf32>
    %229 = vector.shape_cast %228 : vector<1x4xf32> to vector<4xf32>
    %230 = vector.shape_cast %229 : vector<4xf32> to vector<1x1x4xf32>
    %231 = vector.broadcast %230 : vector<1x1x4xf32> to vector<9x8x4xf32>
    %232 = arith.mulf %227, %231 : vector<9x8x4xf32>
    %233 = arith.index_cast %9 : i32 to index
    %c0_116 = arith.constant 0 : index
    %c0_117 = arith.constant 0 : index
    %c1_118 = arith.constant 1 : index
    %c0_119 = arith.constant 0 : index
    %234 = vector.load %arg11[%233, %c0_116, %c0_117, %c1_118, %c0_119] : memref<2x4x10x10x4xf32, #tpu.memory_space<vmem>>, vector<1x1x9x8x4xf32>
    %235 = vector.shape_cast %234 : vector<1x1x9x8x4xf32> to vector<9x8x4xf32>
    %236 = vector.extract_strided_slice %49 {offsets = [1, 0], sizes = [1, 4], strides = [1, 1]} : vector<9x4xf32> to vector<1x4xf32>
    %237 = vector.shape_cast %236 : vector<1x4xf32> to vector<4xf32>
    %238 = vector.shape_cast %237 : vector<4xf32> to vector<1x1x4xf32>
    %239 = vector.broadcast %238 : vector<1x1x4xf32> to vector<9x8x4xf32>
    %240 = arith.mulf %235, %239 : vector<9x8x4xf32>
    %241 = arith.addf %232, %240 : vector<9x8x4xf32>
    %242 = arith.index_cast %9 : i32 to index
    %c2_120 = arith.constant 2 : index
    %c0_121 = arith.constant 0 : index
    %c1_122 = arith.constant 1 : index
    %c0_123 = arith.constant 0 : index
    %243 = vector.load %arg11[%242, %c2_120, %c0_121, %c1_122, %c0_123] : memref<2x4x10x10x4xf32, #tpu.memory_space<vmem>>, vector<1x1x9x8x4xf32>
    %244 = vector.shape_cast %243 : vector<1x1x9x8x4xf32> to vector<9x8x4xf32>
    %245 = vector.extract_strided_slice %49 {offsets = [2, 0], sizes = [1, 4], strides = [1, 1]} : vector<9x4xf32> to vector<1x4xf32>
    %246 = vector.shape_cast %245 : vector<1x4xf32> to vector<4xf32>
    %247 = vector.shape_cast %246 : vector<4xf32> to vector<1x1x4xf32>
    %248 = vector.broadcast %247 : vector<1x1x4xf32> to vector<9x8x4xf32>
    %249 = arith.mulf %244, %248 : vector<9x8x4xf32>
    %250 = arith.addf %241, %249 : vector<9x8x4xf32>
    %251 = arith.index_cast %9 : i32 to index
    %c3_124 = arith.constant 3 : index
    %c0_125 = arith.constant 0 : index
    %c0_126 = arith.constant 0 : index
    %c0_127 = arith.constant 0 : index
    %252 = vector.load %arg11[%251, %c3_124, %c0_125, %c0_126, %c0_127] : memref<2x4x10x10x4xf32, #tpu.memory_space<vmem>>, vector<1x1x9x8x4xf32>
    %253 = vector.shape_cast %252 : vector<1x1x9x8x4xf32> to vector<9x8x4xf32>
    %254 = vector.extract_strided_slice %49 {offsets = [3, 0], sizes = [1, 4], strides = [1, 1]} : vector<9x4xf32> to vector<1x4xf32>
    %255 = vector.shape_cast %254 : vector<1x4xf32> to vector<4xf32>
    %256 = vector.shape_cast %255 : vector<4xf32> to vector<1x1x4xf32>
    %257 = vector.broadcast %256 : vector<1x1x4xf32> to vector<9x8x4xf32>
    %258 = arith.mulf %253, %257 : vector<9x8x4xf32>
    %259 = arith.addf %250, %258 : vector<9x8x4xf32>
    %260 = arith.index_cast %9 : i32 to index
    %c1_128 = arith.constant 1 : index
    %c0_129 = arith.constant 0 : index
    %c1_130 = arith.constant 1 : index
    %c0_131 = arith.constant 0 : index
    %261 = vector.load %arg11[%260, %c1_128, %c0_129, %c1_130, %c0_131] : memref<2x4x10x10x4xf32, #tpu.memory_space<vmem>>, vector<1x1x9x8x4xf32>
    %262 = vector.shape_cast %261 : vector<1x1x9x8x4xf32> to vector<9x8x4xf32>
    %263 = vector.extract_strided_slice %49 {offsets = [4, 0], sizes = [1, 4], strides = [1, 1]} : vector<9x4xf32> to vector<1x4xf32>
    %264 = vector.shape_cast %263 : vector<1x4xf32> to vector<4xf32>
    %265 = vector.shape_cast %264 : vector<4xf32> to vector<1x1x4xf32>
    %266 = vector.broadcast %265 : vector<1x1x4xf32> to vector<9x8x4xf32>
    %267 = arith.mulf %262, %266 : vector<9x8x4xf32>
    %268 = arith.addf %259, %267 : vector<9x8x4xf32>
    %269 = arith.index_cast %9 : i32 to index
    %c3_132 = arith.constant 3 : index
    %c0_133 = arith.constant 0 : index
    %c1_134 = arith.constant 1 : index
    %c0_135 = arith.constant 0 : index
    %270 = vector.load %arg11[%269, %c3_132, %c0_133, %c1_134, %c0_135] : memref<2x4x10x10x4xf32, #tpu.memory_space<vmem>>, vector<1x1x9x8x4xf32>
    %271 = vector.shape_cast %270 : vector<1x1x9x8x4xf32> to vector<9x8x4xf32>
    %272 = vector.extract_strided_slice %49 {offsets = [5, 0], sizes = [1, 4], strides = [1, 1]} : vector<9x4xf32> to vector<1x4xf32>
    %273 = vector.shape_cast %272 : vector<1x4xf32> to vector<4xf32>
    %274 = vector.shape_cast %273 : vector<4xf32> to vector<1x1x4xf32>
    %275 = vector.broadcast %274 : vector<1x1x4xf32> to vector<9x8x4xf32>
    %276 = arith.mulf %271, %275 : vector<9x8x4xf32>
    %277 = arith.addf %268, %276 : vector<9x8x4xf32>
    %278 = arith.index_cast %9 : i32 to index
    %c2_136 = arith.constant 2 : index
    %c1_137 = arith.constant 1 : index
    %c0_138 = arith.constant 0 : index
    %c0_139 = arith.constant 0 : index
    %279 = vector.load %arg11[%278, %c2_136, %c1_137, %c0_138, %c0_139] : memref<2x4x10x10x4xf32, #tpu.memory_space<vmem>>, vector<1x1x9x8x4xf32>
    %280 = vector.shape_cast %279 : vector<1x1x9x8x4xf32> to vector<9x8x4xf32>
    %281 = vector.extract_strided_slice %49 {offsets = [6, 0], sizes = [1, 4], strides = [1, 1]} : vector<9x4xf32> to vector<1x4xf32>
    %282 = vector.shape_cast %281 : vector<1x4xf32> to vector<4xf32>
    %283 = vector.shape_cast %282 : vector<4xf32> to vector<1x1x4xf32>
    %284 = vector.broadcast %283 : vector<1x1x4xf32> to vector<9x8x4xf32>
    %285 = arith.mulf %280, %284 : vector<9x8x4xf32>
    %286 = arith.addf %277, %285 : vector<9x8x4xf32>
    %287 = arith.index_cast %9 : i32 to index
    %c0_140 = arith.constant 0 : index
    %c1_141 = arith.constant 1 : index
    %c1_142 = arith.constant 1 : index
    %c0_143 = arith.constant 0 : index
    %288 = vector.load %arg11[%287, %c0_140, %c1_141, %c1_142, %c0_143] : memref<2x4x10x10x4xf32, #tpu.memory_space<vmem>>, vector<1x1x9x8x4xf32>
    %289 = vector.shape_cast %288 : vector<1x1x9x8x4xf32> to vector<9x8x4xf32>
    %290 = vector.extract_strided_slice %49 {offsets = [7, 0], sizes = [1, 4], strides = [1, 1]} : vector<9x4xf32> to vector<1x4xf32>
    %291 = vector.shape_cast %290 : vector<1x4xf32> to vector<4xf32>
    %292 = vector.shape_cast %291 : vector<4xf32> to vector<1x1x4xf32>
    %293 = vector.broadcast %292 : vector<1x1x4xf32> to vector<9x8x4xf32>
    %294 = arith.mulf %289, %293 : vector<9x8x4xf32>
    %295 = arith.addf %286, %294 : vector<9x8x4xf32>
    %296 = arith.index_cast %9 : i32 to index
    %c2_144 = arith.constant 2 : index
    %c1_145 = arith.constant 1 : index
    %c1_146 = arith.constant 1 : index
    %c0_147 = arith.constant 0 : index
    %297 = vector.load %arg11[%296, %c2_144, %c1_145, %c1_146, %c0_147] : memref<2x4x10x10x4xf32, #tpu.memory_space<vmem>>, vector<1x1x9x8x4xf32>
    %298 = vector.shape_cast %297 : vector<1x1x9x8x4xf32> to vector<9x8x4xf32>
    %299 = vector.extract_strided_slice %49 {offsets = [8, 0], sizes = [1, 4], strides = [1, 1]} : vector<9x4xf32> to vector<1x4xf32>
    %300 = vector.shape_cast %299 : vector<1x4xf32> to vector<4xf32>
    %301 = vector.shape_cast %300 : vector<4xf32> to vector<1x1x4xf32>
    %302 = vector.broadcast %301 : vector<1x1x4xf32> to vector<9x8x4xf32>
    %303 = arith.mulf %298, %302 : vector<9x8x4xf32>
    %304 = arith.addf %295, %303 : vector<9x8x4xf32>
    %305 = vector.shape_cast %51 : vector<4xf32> to vector<1x1x4xf32>
    %306 = vector.broadcast %305 : vector<1x1x4xf32> to vector<9x8x4xf32>
    %307 = arith.addf %304, %306 : vector<9x8x4xf32>
    %308 = tpu.iota {dimensions = array<i32: 0>} : vector<9x1x1xi32>
    %c0_i32_148 = arith.constant 0 : i32
    %309 = vector.broadcast %c0_i32_148 : i32 to vector<9x1x1xi32>
    %310 = arith.cmpi eq, %308, %309 : vector<9x1x1xi32>
    %c0_i32_149 = arith.constant 0 : i32
    %311 = arith.cmpi eq, %arg1, %c0_i32_149 : i32
    %312 = vector.broadcast %311 : i1 to vector<9x1x1xi1>
    %313 = arith.andi %310, %312 : vector<9x1x1xi1>
    %cst_150 = arith.constant 0.000000e+00 : f32
    %314 = vector.shape_cast %313 : vector<9x1x1xi1> to vector<9x1x1xi1>
    %315 = vector.broadcast %314 : vector<9x1x1xi1> to vector<9x8x4xi1>
    %316 = vector.broadcast %cst_150 : f32 to vector<9x8x4xf32>
    %317 = arith.select %315, %316, %307 : vector<9x8x4xi1>, vector<9x8x4xf32>
    %318 = arith.index_cast %9 : i32 to index
    %c0_151 = arith.constant 0 : index
    %c0_152 = arith.constant 0 : index
    %c0_153 = arith.constant 0 : index
    %c0_154 = arith.constant 0 : index
    %319 = vector.load %arg11[%318, %c0_151, %c0_152, %c0_153, %c0_154] : memref<2x4x10x10x4xf32, #tpu.memory_space<vmem>>, vector<1x1x9x9x4xf32>
    %320 = vector.shape_cast %319 : vector<1x1x9x9x4xf32> to vector<9x9x4xf32>
    %321 = vector.extract_strided_slice %49 {offsets = [0, 0], sizes = [1, 4], strides = [1, 1]} : vector<9x4xf32> to vector<1x4xf32>
    %322 = vector.shape_cast %321 : vector<1x4xf32> to vector<4xf32>
    %323 = vector.shape_cast %322 : vector<4xf32> to vector<1x1x4xf32>
    %324 = vector.broadcast %323 : vector<1x1x4xf32> to vector<9x9x4xf32>
    %325 = arith.mulf %320, %324 : vector<9x9x4xf32>
    %326 = arith.index_cast %9 : i32 to index
    %c2_155 = arith.constant 2 : index
    %c0_156 = arith.constant 0 : index
    %c0_157 = arith.constant 0 : index
    %c0_158 = arith.constant 0 : index
    %327 = vector.load %arg11[%326, %c2_155, %c0_156, %c0_157, %c0_158] : memref<2x4x10x10x4xf32, #tpu.memory_space<vmem>>, vector<1x1x9x9x4xf32>
    %328 = vector.shape_cast %327 : vector<1x1x9x9x4xf32> to vector<9x9x4xf32>
    %329 = vector.extract_strided_slice %49 {offsets = [1, 0], sizes = [1, 4], strides = [1, 1]} : vector<9x4xf32> to vector<1x4xf32>
    %330 = vector.shape_cast %329 : vector<1x4xf32> to vector<4xf32>
    %331 = vector.shape_cast %330 : vector<4xf32> to vector<1x1x4xf32>
    %332 = vector.broadcast %331 : vector<1x1x4xf32> to vector<9x9x4xf32>
    %333 = arith.mulf %328, %332 : vector<9x9x4xf32>
    %334 = arith.addf %325, %333 : vector<9x9x4xf32>
    %335 = arith.index_cast %9 : i32 to index
    %c0_159 = arith.constant 0 : index
    %c0_160 = arith.constant 0 : index
    %c1_161 = arith.constant 1 : index
    %c0_162 = arith.constant 0 : index
    %336 = vector.load %arg11[%335, %c0_159, %c0_160, %c1_161, %c0_162] : memref<2x4x10x10x4xf32, #tpu.memory_space<vmem>>, vector<1x1x9x9x4xf32>
    %337 = vector.shape_cast %336 : vector<1x1x9x9x4xf32> to vector<9x9x4xf32>
    %338 = vector.extract_strided_slice %49 {offsets = [2, 0], sizes = [1, 4], strides = [1, 1]} : vector<9x4xf32> to vector<1x4xf32>
    %339 = vector.shape_cast %338 : vector<1x4xf32> to vector<4xf32>
    %340 = vector.shape_cast %339 : vector<4xf32> to vector<1x1x4xf32>
    %341 = vector.broadcast %340 : vector<1x1x4xf32> to vector<9x9x4xf32>
    %342 = arith.mulf %337, %341 : vector<9x9x4xf32>
    %343 = arith.addf %334, %342 : vector<9x9x4xf32>
    %344 = arith.index_cast %9 : i32 to index
    %c1_163 = arith.constant 1 : index
    %c0_164 = arith.constant 0 : index
    %c0_165 = arith.constant 0 : index
    %c0_166 = arith.constant 0 : index
    %345 = vector.load %arg11[%344, %c1_163, %c0_164, %c0_165, %c0_166] : memref<2x4x10x10x4xf32, #tpu.memory_space<vmem>>, vector<1x1x9x9x4xf32>
    %346 = vector.shape_cast %345 : vector<1x1x9x9x4xf32> to vector<9x9x4xf32>
    %347 = vector.extract_strided_slice %49 {offsets = [3, 0], sizes = [1, 4], strides = [1, 1]} : vector<9x4xf32> to vector<1x4xf32>
    %348 = vector.shape_cast %347 : vector<1x4xf32> to vector<4xf32>
    %349 = vector.shape_cast %348 : vector<4xf32> to vector<1x1x4xf32>
    %350 = vector.broadcast %349 : vector<1x1x4xf32> to vector<9x9x4xf32>
    %351 = arith.mulf %346, %350 : vector<9x9x4xf32>
    %352 = arith.addf %343, %351 : vector<9x9x4xf32>
    %353 = arith.index_cast %9 : i32 to index
    %c3_167 = arith.constant 3 : index
    %c0_168 = arith.constant 0 : index
    %c0_169 = arith.constant 0 : index
    %c0_170 = arith.constant 0 : index
    %354 = vector.load %arg11[%353, %c3_167, %c0_168, %c0_169, %c0_170] : memref<2x4x10x10x4xf32, #tpu.memory_space<vmem>>, vector<1x1x9x9x4xf32>
    %355 = vector.shape_cast %354 : vector<1x1x9x9x4xf32> to vector<9x9x4xf32>
    %356 = vector.extract_strided_slice %49 {offsets = [4, 0], sizes = [1, 4], strides = [1, 1]} : vector<9x4xf32> to vector<1x4xf32>
    %357 = vector.shape_cast %356 : vector<1x4xf32> to vector<4xf32>
    %358 = vector.shape_cast %357 : vector<4xf32> to vector<1x1x4xf32>
    %359 = vector.broadcast %358 : vector<1x1x4xf32> to vector<9x9x4xf32>
    %360 = arith.mulf %355, %359 : vector<9x9x4xf32>
    %361 = arith.addf %352, %360 : vector<9x9x4xf32>
    %362 = arith.index_cast %9 : i32 to index
    %c1_171 = arith.constant 1 : index
    %c0_172 = arith.constant 0 : index
    %c1_173 = arith.constant 1 : index
    %c0_174 = arith.constant 0 : index
    %363 = vector.load %arg11[%362, %c1_171, %c0_172, %c1_173, %c0_174] : memref<2x4x10x10x4xf32, #tpu.memory_space<vmem>>, vector<1x1x9x9x4xf32>
    %364 = vector.shape_cast %363 : vector<1x1x9x9x4xf32> to vector<9x9x4xf32>
    %365 = vector.extract_strided_slice %49 {offsets = [5, 0], sizes = [1, 4], strides = [1, 1]} : vector<9x4xf32> to vector<1x4xf32>
    %366 = vector.shape_cast %365 : vector<1x4xf32> to vector<4xf32>
    %367 = vector.shape_cast %366 : vector<4xf32> to vector<1x1x4xf32>
    %368 = vector.broadcast %367 : vector<1x1x4xf32> to vector<9x9x4xf32>
    %369 = arith.mulf %364, %368 : vector<9x9x4xf32>
    %370 = arith.addf %361, %369 : vector<9x9x4xf32>
    %371 = arith.index_cast %9 : i32 to index
    %c0_175 = arith.constant 0 : index
    %c1_176 = arith.constant 1 : index
    %c0_177 = arith.constant 0 : index
    %c0_178 = arith.constant 0 : index
    %372 = vector.load %arg11[%371, %c0_175, %c1_176, %c0_177, %c0_178] : memref<2x4x10x10x4xf32, #tpu.memory_space<vmem>>, vector<1x1x9x9x4xf32>
    %373 = vector.shape_cast %372 : vector<1x1x9x9x4xf32> to vector<9x9x4xf32>
    %374 = vector.extract_strided_slice %49 {offsets = [6, 0], sizes = [1, 4], strides = [1, 1]} : vector<9x4xf32> to vector<1x4xf32>
    %375 = vector.shape_cast %374 : vector<1x4xf32> to vector<4xf32>
    %376 = vector.shape_cast %375 : vector<4xf32> to vector<1x1x4xf32>
    %377 = vector.broadcast %376 : vector<1x1x4xf32> to vector<9x9x4xf32>
    %378 = arith.mulf %373, %377 : vector<9x9x4xf32>
    %379 = arith.addf %370, %378 : vector<9x9x4xf32>
    %380 = arith.index_cast %9 : i32 to index
    %c2_179 = arith.constant 2 : index
    %c1_180 = arith.constant 1 : index
    %c0_181 = arith.constant 0 : index
    %c0_182 = arith.constant 0 : index
    %381 = vector.load %arg11[%380, %c2_179, %c1_180, %c0_181, %c0_182] : memref<2x4x10x10x4xf32, #tpu.memory_space<vmem>>, vector<1x1x9x9x4xf32>
    %382 = vector.shape_cast %381 : vector<1x1x9x9x4xf32> to vector<9x9x4xf32>
    %383 = vector.extract_strided_slice %49 {offsets = [7, 0], sizes = [1, 4], strides = [1, 1]} : vector<9x4xf32> to vector<1x4xf32>
    %384 = vector.shape_cast %383 : vector<1x4xf32> to vector<4xf32>
    %385 = vector.shape_cast %384 : vector<4xf32> to vector<1x1x4xf32>
    %386 = vector.broadcast %385 : vector<1x1x4xf32> to vector<9x9x4xf32>
    %387 = arith.mulf %382, %386 : vector<9x9x4xf32>
    %388 = arith.addf %379, %387 : vector<9x9x4xf32>
    %389 = arith.index_cast %9 : i32 to index
    %c0_183 = arith.constant 0 : index
    %c1_184 = arith.constant 1 : index
    %c1_185 = arith.constant 1 : index
    %c0_186 = arith.constant 0 : index
    %390 = vector.load %arg11[%389, %c0_183, %c1_184, %c1_185, %c0_186] : memref<2x4x10x10x4xf32, #tpu.memory_space<vmem>>, vector<1x1x9x9x4xf32>
    %391 = vector.shape_cast %390 : vector<1x1x9x9x4xf32> to vector<9x9x4xf32>
    %392 = vector.extract_strided_slice %49 {offsets = [8, 0], sizes = [1, 4], strides = [1, 1]} : vector<9x4xf32> to vector<1x4xf32>
    %393 = vector.shape_cast %392 : vector<1x4xf32> to vector<4xf32>
    %394 = vector.shape_cast %393 : vector<4xf32> to vector<1x1x4xf32>
    %395 = vector.broadcast %394 : vector<1x1x4xf32> to vector<9x9x4xf32>
    %396 = arith.mulf %391, %395 : vector<9x9x4xf32>
    %397 = arith.addf %388, %396 : vector<9x9x4xf32>
    %398 = vector.shape_cast %51 : vector<4xf32> to vector<1x1x4xf32>
    %399 = vector.broadcast %398 : vector<1x1x4xf32> to vector<9x9x4xf32>
    %400 = arith.addf %397, %399 : vector<9x9x4xf32>
    %401 = tpu.iota {dimensions = array<i32: 1>} : vector<1x9x1xi32>
    %c0_i32_187 = arith.constant 0 : i32
    %402 = vector.broadcast %c0_i32_187 : i32 to vector<1x9x1xi32>
    %403 = arith.cmpi eq, %401, %402 : vector<1x9x1xi32>
    %cst_188 = arith.constant 0.000000e+00 : f32
    %404 = vector.shape_cast %403 : vector<1x9x1xi1> to vector<1x9x1xi1>
    %405 = vector.broadcast %404 : vector<1x9x1xi1> to vector<9x9x4xi1>
    %406 = vector.broadcast %cst_188 : f32 to vector<9x9x4xf32>
    %407 = arith.select %405, %406, %400 : vector<9x9x4xi1>, vector<9x9x4xf32>
    %408 = tpu.iota {dimensions = array<i32: 0>} : vector<9x1x1xi32>
    %c0_i32_189 = arith.constant 0 : i32
    %409 = vector.broadcast %c0_i32_189 : i32 to vector<9x1x1xi32>
    %410 = arith.cmpi eq, %408, %409 : vector<9x1x1xi32>
    %c0_i32_190 = arith.constant 0 : i32
    %411 = arith.cmpi eq, %arg1, %c0_i32_190 : i32
    %412 = vector.broadcast %411 : i1 to vector<9x1x1xi1>
    %413 = arith.andi %410, %412 : vector<9x1x1xi1>
    %cst_191 = arith.constant 0.000000e+00 : f32
    %414 = vector.shape_cast %413 : vector<9x1x1xi1> to vector<9x1x1xi1>
    %415 = vector.broadcast %414 : vector<9x1x1xi1> to vector<9x9x4xi1>
    %416 = vector.broadcast %cst_191 : f32 to vector<9x9x4xf32>
    %417 = arith.select %415, %416, %407 : vector<9x9x4xi1>, vector<9x9x4xf32>
    %c0_192 = arith.constant 0 : index
    %c0_193 = arith.constant 0 : index
    %c0_194 = arith.constant 0 : index
    %418 = vector.load %arg5[%c0_192, %c0_193, %c0_194] : memref<2x9x4xf32, #tpu.memory_space<vmem>>, vector<1x9x4xf32>
    %419 = vector.shape_cast %418 : vector<1x9x4xf32> to vector<9x4xf32>
    %420 = vector.extract_strided_slice %417 {offsets = [0, 0, 0], sizes = [8, 8, 4], strides = [1, 1, 1]} : vector<9x9x4xf32> to vector<8x8x4xf32>
    %421 = vector.extract_strided_slice %419 {offsets = [0, 0], sizes = [1, 4], strides = [1, 1]} : vector<9x4xf32> to vector<1x4xf32>
    %422 = vector.shape_cast %421 : vector<1x4xf32> to vector<4xf32>
    %423 = vector.shape_cast %422 : vector<4xf32> to vector<1x1x4xf32>
    %424 = vector.broadcast %423 : vector<1x1x4xf32> to vector<8x8x4xf32>
    %425 = arith.mulf %420, %424 : vector<8x8x4xf32>
    %426 = vector.extract_strided_slice %317 {offsets = [0, 0, 0], sizes = [8, 8, 4], strides = [1, 1, 1]} : vector<9x8x4xf32> to vector<8x8x4xf32>
    %427 = vector.extract_strided_slice %419 {offsets = [1, 0], sizes = [1, 4], strides = [1, 1]} : vector<9x4xf32> to vector<1x4xf32>
    %428 = vector.shape_cast %427 : vector<1x4xf32> to vector<4xf32>
    %429 = vector.shape_cast %428 : vector<4xf32> to vector<1x1x4xf32>
    %430 = vector.broadcast %429 : vector<1x1x4xf32> to vector<8x8x4xf32>
    %431 = arith.mulf %426, %430 : vector<8x8x4xf32>
    %432 = arith.addf %425, %431 : vector<8x8x4xf32>
    %433 = vector.extract_strided_slice %417 {offsets = [0, 1, 0], sizes = [8, 8, 4], strides = [1, 1, 1]} : vector<9x9x4xf32> to vector<8x8x4xf32>
    %434 = vector.extract_strided_slice %419 {offsets = [2, 0], sizes = [1, 4], strides = [1, 1]} : vector<9x4xf32> to vector<1x4xf32>
    %435 = vector.shape_cast %434 : vector<1x4xf32> to vector<4xf32>
    %436 = vector.shape_cast %435 : vector<4xf32> to vector<1x1x4xf32>
    %437 = vector.broadcast %436 : vector<1x1x4xf32> to vector<8x8x4xf32>
    %438 = arith.mulf %433, %437 : vector<8x8x4xf32>
    %439 = arith.addf %432, %438 : vector<8x8x4xf32>
    %440 = vector.extract_strided_slice %224 {offsets = [0, 0, 0], sizes = [8, 8, 4], strides = [1, 1, 1]} : vector<8x9x4xf32> to vector<8x8x4xf32>
    %441 = vector.extract_strided_slice %419 {offsets = [3, 0], sizes = [1, 4], strides = [1, 1]} : vector<9x4xf32> to vector<1x4xf32>
    %442 = vector.shape_cast %441 : vector<1x4xf32> to vector<4xf32>
    %443 = vector.shape_cast %442 : vector<4xf32> to vector<1x1x4xf32>
    %444 = vector.broadcast %443 : vector<1x1x4xf32> to vector<8x8x4xf32>
    %445 = arith.mulf %440, %444 : vector<8x8x4xf32>
    %446 = arith.addf %439, %445 : vector<8x8x4xf32>
    %447 = vector.extract_strided_slice %419 {offsets = [4, 0], sizes = [1, 4], strides = [1, 1]} : vector<9x4xf32> to vector<1x4xf32>
    %448 = vector.shape_cast %447 : vector<1x4xf32> to vector<4xf32>
    %449 = vector.shape_cast %448 : vector<4xf32> to vector<1x1x4xf32>
    %450 = vector.broadcast %449 : vector<1x1x4xf32> to vector<8x8x4xf32>
    %451 = arith.mulf %134, %450 : vector<8x8x4xf32>
    %452 = arith.addf %446, %451 : vector<8x8x4xf32>
    %453 = vector.extract_strided_slice %224 {offsets = [0, 1, 0], sizes = [8, 8, 4], strides = [1, 1, 1]} : vector<8x9x4xf32> to vector<8x8x4xf32>
    %454 = vector.extract_strided_slice %419 {offsets = [5, 0], sizes = [1, 4], strides = [1, 1]} : vector<9x4xf32> to vector<1x4xf32>
    %455 = vector.shape_cast %454 : vector<1x4xf32> to vector<4xf32>
    %456 = vector.shape_cast %455 : vector<4xf32> to vector<1x1x4xf32>
    %457 = vector.broadcast %456 : vector<1x1x4xf32> to vector<8x8x4xf32>
    %458 = arith.mulf %453, %457 : vector<8x8x4xf32>
    %459 = arith.addf %452, %458 : vector<8x8x4xf32>
    %460 = vector.extract_strided_slice %417 {offsets = [1, 0, 0], sizes = [8, 8, 4], strides = [1, 1, 1]} : vector<9x9x4xf32> to vector<8x8x4xf32>
    %461 = vector.extract_strided_slice %419 {offsets = [6, 0], sizes = [1, 4], strides = [1, 1]} : vector<9x4xf32> to vector<1x4xf32>
    %462 = vector.shape_cast %461 : vector<1x4xf32> to vector<4xf32>
    %463 = vector.shape_cast %462 : vector<4xf32> to vector<1x1x4xf32>
    %464 = vector.broadcast %463 : vector<1x1x4xf32> to vector<8x8x4xf32>
    %465 = arith.mulf %460, %464 : vector<8x8x4xf32>
    %466 = arith.addf %459, %465 : vector<8x8x4xf32>
    %467 = vector.extract_strided_slice %317 {offsets = [1, 0, 0], sizes = [8, 8, 4], strides = [1, 1, 1]} : vector<9x8x4xf32> to vector<8x8x4xf32>
    %468 = vector.extract_strided_slice %419 {offsets = [7, 0], sizes = [1, 4], strides = [1, 1]} : vector<9x4xf32> to vector<1x4xf32>
    %469 = vector.shape_cast %468 : vector<1x4xf32> to vector<4xf32>
    %470 = vector.shape_cast %469 : vector<4xf32> to vector<1x1x4xf32>
    %471 = vector.broadcast %470 : vector<1x1x4xf32> to vector<8x8x4xf32>
    %472 = arith.mulf %467, %471 : vector<8x8x4xf32>
    %473 = arith.addf %466, %472 : vector<8x8x4xf32>
    %474 = vector.extract_strided_slice %417 {offsets = [1, 1, 0], sizes = [8, 8, 4], strides = [1, 1, 1]} : vector<9x9x4xf32> to vector<8x8x4xf32>
    %475 = vector.extract_strided_slice %419 {offsets = [8, 0], sizes = [1, 4], strides = [1, 1]} : vector<9x4xf32> to vector<1x4xf32>
    %476 = vector.shape_cast %475 : vector<1x4xf32> to vector<4xf32>
    %477 = vector.shape_cast %476 : vector<4xf32> to vector<1x1x4xf32>
    %478 = vector.broadcast %477 : vector<1x1x4xf32> to vector<8x8x4xf32>
    %479 = arith.mulf %474, %478 : vector<8x8x4xf32>
    %480 = arith.addf %473, %479 : vector<8x8x4xf32>
    %c0_195 = arith.constant 0 : index
    %c0_196 = arith.constant 0 : index
    %481 = vector.load %arg6[%c0_195, %c0_196] : memref<2x4xf32, #tpu.memory_space<vmem>>, vector<1x4xf32>
    %482 = vector.shape_cast %481 : vector<1x4xf32> to vector<4xf32>
    %483 = vector.shape_cast %482 : vector<4xf32> to vector<1x1x4xf32>
    %484 = vector.broadcast %483 : vector<1x1x4xf32> to vector<8x8x4xf32>
    %485 = arith.addf %480, %484 : vector<8x8x4xf32>
    %486 = arith.mulf %485, %485 : vector<8x8x4xf32>
    %487 = arith.mulf %485, %486 : vector<8x8x4xf32>
    %cst_197 = arith.constant 4.471500e-02 : f32
    %488 = vector.broadcast %cst_197 : f32 to vector<8x8x4xf32>
    %489 = arith.mulf %488, %487 : vector<8x8x4xf32>
    %490 = arith.addf %485, %489 : vector<8x8x4xf32>
    %cst_198 = arith.constant 0.797884583 : f32
    %491 = vector.broadcast %cst_198 : f32 to vector<8x8x4xf32>
    %492 = arith.mulf %491, %490 : vector<8x8x4xf32>
    %493 = math.tanh %492 : vector<8x8x4xf32>
    %cst_199 = arith.constant 1.000000e+00 : f32
    %494 = vector.broadcast %cst_199 : f32 to vector<8x8x4xf32>
    %495 = arith.addf %494, %493 : vector<8x8x4xf32>
    %cst_200 = arith.constant 5.000000e-01 : f32
    %496 = vector.broadcast %cst_200 : f32 to vector<8x8x4xf32>
    %497 = arith.mulf %496, %495 : vector<8x8x4xf32>
    %498 = arith.mulf %485, %497 : vector<8x8x4xf32>
    %499 = vector.extract_strided_slice %224 {offsets = [0, 1, 0], sizes = [8, 8, 4], strides = [1, 1, 1]} : vector<8x9x4xf32> to vector<8x8x4xf32>
    %500 = arith.maximumf %134, %499 : vector<8x8x4xf32>
    %501 = vector.extract_strided_slice %317 {offsets = [1, 0, 0], sizes = [8, 8, 4], strides = [1, 1, 1]} : vector<9x8x4xf32> to vector<8x8x4xf32>
    %502 = vector.extract_strided_slice %417 {offsets = [1, 1, 0], sizes = [8, 8, 4], strides = [1, 1, 1]} : vector<9x9x4xf32> to vector<8x8x4xf32>
    %503 = arith.maximumf %501, %502 : vector<8x8x4xf32>
    %504 = arith.maximumf %500, %503 : vector<8x8x4xf32>
    %505 = vector.shape_cast %498 : vector<8x8x4xf32> to vector<64x4xf32>
    %506 = vector.shape_cast %504 : vector<8x8x4xf32> to vector<64x4xf32>
    %507 = tpu.concatenate %505, %506 in 1 : vector<64x4xf32>, vector<64x4xf32> -> vector<64x8xf32>
    %c0_201 = arith.constant 0 : index
    %c0_202 = arith.constant 0 : index
    %508 = vector.load %arg12[%c0_201, %c0_202] : memref<64x8xf32, #tpu.memory_space<vmem>>, vector<64x8xf32>
    %509 = arith.truncf %507 : vector<64x8xf32> to vector<64x8xbf16>
    %c0_203 = arith.constant 0 : index
    %c0_204 = arith.constant 0 : index
    %c0_205 = arith.constant 0 : index
    %510 = vector.load %arg8[%c0_203, %c0_204, %c0_205] : memref<2x8x8xbf16, #tpu.memory_space<vmem>>, vector<1x8x8xbf16>
    %511 = vector.shape_cast %510 : vector<1x8x8xbf16> to vector<8x8xbf16>
    %cst_206 = arith.constant dense<0.000000e+00> : vector<64x8xf32>
    %512 = tpu.matmul %509, %511, %cst_206 {dimension_numbers = #tpu.dot_dimension_numbers<[1], [0], [0], [1], [0, 0, 1, 1], [], []>} : vector<64x8xbf16>, vector<8x8xbf16>, vector<64x8xf32> -> vector<64x8xf32>
    %513 = arith.addf %508, %512 : vector<64x8xf32>
    %c0_207 = arith.constant 0 : index
    %c0_208 = arith.constant 0 : index
    %514 = vector.load %arg12[%c0_207, %c0_208] : memref<64x8xf32, #tpu.memory_space<vmem>>, vector<64x8xf32>
    tpu.vector_store %arg12[%c0_207, %c0_208], %513 {strides = array<i32>} : memref<64x8xf32, #tpu.memory_space<vmem>>, vector<64x8xf32>,
    %c1_209 = arith.constant 1 : index
    %c0_210 = arith.constant 0 : index
    %c0_211 = arith.constant 0 : index
    %515 = vector.load %arg3[%c1_209, %c0_210, %c0_211] : memref<2x9x4xf32, #tpu.memory_space<vmem>>, vector<1x9x4xf32>
    %516 = vector.shape_cast %515 : vector<1x9x4xf32> to vector<9x4xf32>
    %c1_212 = arith.constant 1 : index
    %c0_213 = arith.constant 0 : index
    %517 = vector.load %arg4[%c1_212, %c0_213] : memref<2x4xf32, #tpu.memory_space<vmem>>, vector<1x4xf32>
    %518 = vector.shape_cast %517 : vector<1x4xf32> to vector<4xf32>
    %519 = arith.index_cast %9 : i32 to index
    %c3_214 = arith.constant 3 : index
    %c0_215 = arith.constant 0 : index
    %c0_216 = arith.constant 0 : index
    %c0_217 = arith.constant 0 : index
    %520 = vector.load %arg11[%519, %c3_214, %c0_215, %c0_216, %c0_217] : memref<2x4x10x10x4xf32, #tpu.memory_space<vmem>>, vector<1x1x8x8x4xf32>
    %521 = vector.shape_cast %520 : vector<1x1x8x8x4xf32> to vector<8x8x4xf32>
    %522 = vector.extract_strided_slice %516 {offsets = [0, 0], sizes = [1, 4], strides = [1, 1]} : vector<9x4xf32> to vector<1x4xf32>
    %523 = vector.shape_cast %522 : vector<1x4xf32> to vector<4xf32>
    %524 = vector.shape_cast %523 : vector<4xf32> to vector<1x1x4xf32>
    %525 = vector.broadcast %524 : vector<1x1x4xf32> to vector<8x8x4xf32>
    %526 = arith.mulf %521, %525 : vector<8x8x4xf32>
    %527 = arith.index_cast %9 : i32 to index
    %c1_218 = arith.constant 1 : index
    %c0_219 = arith.constant 0 : index
    %c1_220 = arith.constant 1 : index
    %c0_221 = arith.constant 0 : index
    %528 = vector.load %arg11[%527, %c1_218, %c0_219, %c1_220, %c0_221] : memref<2x4x10x10x4xf32, #tpu.memory_space<vmem>>, vector<1x1x8x8x4xf32>
    %529 = vector.shape_cast %528 : vector<1x1x8x8x4xf32> to vector<8x8x4xf32>
    %530 = vector.extract_strided_slice %516 {offsets = [1, 0], sizes = [1, 4], strides = [1, 1]} : vector<9x4xf32> to vector<1x4xf32>
    %531 = vector.shape_cast %530 : vector<1x4xf32> to vector<4xf32>
    %532 = vector.shape_cast %531 : vector<4xf32> to vector<1x1x4xf32>
    %533 = vector.broadcast %532 : vector<1x1x4xf32> to vector<8x8x4xf32>
    %534 = arith.mulf %529, %533 : vector<8x8x4xf32>
    %535 = arith.addf %526, %534 : vector<8x8x4xf32>
    %536 = arith.index_cast %9 : i32 to index
    %c3_222 = arith.constant 3 : index
    %c0_223 = arith.constant 0 : index
    %c1_224 = arith.constant 1 : index
    %c0_225 = arith.constant 0 : index
    %537 = vector.load %arg11[%536, %c3_222, %c0_223, %c1_224, %c0_225] : memref<2x4x10x10x4xf32, #tpu.memory_space<vmem>>, vector<1x1x8x8x4xf32>
    %538 = vector.shape_cast %537 : vector<1x1x8x8x4xf32> to vector<8x8x4xf32>
    %539 = vector.extract_strided_slice %516 {offsets = [2, 0], sizes = [1, 4], strides = [1, 1]} : vector<9x4xf32> to vector<1x4xf32>
    %540 = vector.shape_cast %539 : vector<1x4xf32> to vector<4xf32>
    %541 = vector.shape_cast %540 : vector<4xf32> to vector<1x1x4xf32>
    %542 = vector.broadcast %541 : vector<1x1x4xf32> to vector<8x8x4xf32>
    %543 = arith.mulf %538, %542 : vector<8x8x4xf32>
    %544 = arith.addf %535, %543 : vector<8x8x4xf32>
    %545 = arith.index_cast %9 : i32 to index
    %c2_226 = arith.constant 2 : index
    %c1_227 = arith.constant 1 : index
    %c0_228 = arith.constant 0 : index
    %c0_229 = arith.constant 0 : index
    %546 = vector.load %arg11[%545, %c2_226, %c1_227, %c0_228, %c0_229] : memref<2x4x10x10x4xf32, #tpu.memory_space<vmem>>, vector<1x1x8x8x4xf32>
    %547 = vector.shape_cast %546 : vector<1x1x8x8x4xf32> to vector<8x8x4xf32>
    %548 = vector.extract_strided_slice %516 {offsets = [3, 0], sizes = [1, 4], strides = [1, 1]} : vector<9x4xf32> to vector<1x4xf32>
    %549 = vector.shape_cast %548 : vector<1x4xf32> to vector<4xf32>
    %550 = vector.shape_cast %549 : vector<4xf32> to vector<1x1x4xf32>
    %551 = vector.broadcast %550 : vector<1x1x4xf32> to vector<8x8x4xf32>
    %552 = arith.mulf %547, %551 : vector<8x8x4xf32>
    %553 = arith.addf %544, %552 : vector<8x8x4xf32>
    %554 = arith.index_cast %9 : i32 to index
    %c0_230 = arith.constant 0 : index
    %c1_231 = arith.constant 1 : index
    %c1_232 = arith.constant 1 : index
    %c0_233 = arith.constant 0 : index
    %555 = vector.load %arg11[%554, %c0_230, %c1_231, %c1_232, %c0_233] : memref<2x4x10x10x4xf32, #tpu.memory_space<vmem>>, vector<1x1x8x8x4xf32>
    %556 = vector.shape_cast %555 : vector<1x1x8x8x4xf32> to vector<8x8x4xf32>
    %557 = vector.extract_strided_slice %516 {offsets = [4, 0], sizes = [1, 4], strides = [1, 1]} : vector<9x4xf32> to vector<1x4xf32>
    %558 = vector.shape_cast %557 : vector<1x4xf32> to vector<4xf32>
    %559 = vector.shape_cast %558 : vector<4xf32> to vector<1x1x4xf32>
    %560 = vector.broadcast %559 : vector<1x1x4xf32> to vector<8x8x4xf32>
    %561 = arith.mulf %556, %560 : vector<8x8x4xf32>
    %562 = arith.addf %553, %561 : vector<8x8x4xf32>
    %563 = arith.index_cast %9 : i32 to index
    %c2_234 = arith.constant 2 : index
    %c1_235 = arith.constant 1 : index
    %c1_236 = arith.constant 1 : index
    %c0_237 = arith.constant 0 : index
    %564 = vector.load %arg11[%563, %c2_234, %c1_235, %c1_236, %c0_237] : memref<2x4x10x10x4xf32, #tpu.memory_space<vmem>>, vector<1x1x8x8x4xf32>
    %565 = vector.shape_cast %564 : vector<1x1x8x8x4xf32> to vector<8x8x4xf32>
    %566 = vector.extract_strided_slice %516 {offsets = [5, 0], sizes = [1, 4], strides = [1, 1]} : vector<9x4xf32> to vector<1x4xf32>
    %567 = vector.shape_cast %566 : vector<1x4xf32> to vector<4xf32>
    %568 = vector.shape_cast %567 : vector<4xf32> to vector<1x1x4xf32>
    %569 = vector.broadcast %568 : vector<1x1x4xf32> to vector<8x8x4xf32>
    %570 = arith.mulf %565, %569 : vector<8x8x4xf32>
    %571 = arith.addf %562, %570 : vector<8x8x4xf32>
    %572 = arith.index_cast %9 : i32 to index
    %c3_238 = arith.constant 3 : index
    %c1_239 = arith.constant 1 : index
    %c0_240 = arith.constant 0 : index
    %c0_241 = arith.constant 0 : index
    %573 = vector.load %arg11[%572, %c3_238, %c1_239, %c0_240, %c0_241] : memref<2x4x10x10x4xf32, #tpu.memory_space<vmem>>, vector<1x1x8x8x4xf32>
    %574 = vector.shape_cast %573 : vector<1x1x8x8x4xf32> to vector<8x8x4xf32>
    %575 = vector.extract_strided_slice %516 {offsets = [6, 0], sizes = [1, 4], strides = [1, 1]} : vector<9x4xf32> to vector<1x4xf32>
    %576 = vector.shape_cast %575 : vector<1x4xf32> to vector<4xf32>
    %577 = vector.shape_cast %576 : vector<4xf32> to vector<1x1x4xf32>
    %578 = vector.broadcast %577 : vector<1x1x4xf32> to vector<8x8x4xf32>
    %579 = arith.mulf %574, %578 : vector<8x8x4xf32>
    %580 = arith.addf %571, %579 : vector<8x8x4xf32>
    %581 = arith.index_cast %9 : i32 to index
    %c1_242 = arith.constant 1 : index
    %c1_243 = arith.constant 1 : index
    %c1_244 = arith.constant 1 : index
    %c0_245 = arith.constant 0 : index
    %582 = vector.load %arg11[%581, %c1_242, %c1_243, %c1_244, %c0_245] : memref<2x4x10x10x4xf32, #tpu.memory_space<vmem>>, vector<1x1x8x8x4xf32>
    %583 = vector.shape_cast %582 : vector<1x1x8x8x4xf32> to vector<8x8x4xf32>
    %584 = vector.extract_strided_slice %516 {offsets = [7, 0], sizes = [1, 4], strides = [1, 1]} : vector<9x4xf32> to vector<1x4xf32>
    %585 = vector.shape_cast %584 : vector<1x4xf32> to vector<4xf32>
    %586 = vector.shape_cast %585 : vector<4xf32> to vector<1x1x4xf32>
    %587 = vector.broadcast %586 : vector<1x1x4xf32> to vector<8x8x4xf32>
    %588 = arith.mulf %583, %587 : vector<8x8x4xf32>
    %589 = arith.addf %580, %588 : vector<8x8x4xf32>
    %590 = arith.index_cast %9 : i32 to index
    %c3_246 = arith.constant 3 : index
    %c1_247 = arith.constant 1 : index
    %c1_248 = arith.constant 1 : index
    %c0_249 = arith.constant 0 : index
    %591 = vector.load %arg11[%590, %c3_246, %c1_247, %c1_248, %c0_249] : memref<2x4x10x10x4xf32, #tpu.memory_space<vmem>>, vector<1x1x8x8x4xf32>
    %592 = vector.shape_cast %591 : vector<1x1x8x8x4xf32> to vector<8x8x4xf32>
    %593 = vector.extract_strided_slice %516 {offsets = [8, 0], sizes = [1, 4], strides = [1, 1]} : vector<9x4xf32> to vector<1x4xf32>
    %594 = vector.shape_cast %593 : vector<1x4xf32> to vector<4xf32>
    %595 = vector.shape_cast %594 : vector<4xf32> to vector<1x1x4xf32>
    %596 = vector.broadcast %595 : vector<1x1x4xf32> to vector<8x8x4xf32>
    %597 = arith.mulf %592, %596 : vector<8x8x4xf32>
    %598 = arith.addf %589, %597 : vector<8x8x4xf32>
    %599 = vector.shape_cast %518 : vector<4xf32> to vector<1x1x4xf32>
    %600 = vector.broadcast %599 : vector<1x1x4xf32> to vector<8x8x4xf32>
    %601 = arith.addf %598, %600 : vector<8x8x4xf32>
    %602 = arith.index_cast %9 : i32 to index
    %c1_250 = arith.constant 1 : index
    %c0_251 = arith.constant 0 : index
    %c0_252 = arith.constant 0 : index
    %c0_253 = arith.constant 0 : index
    %603 = vector.load %arg11[%602, %c1_250, %c0_251, %c0_252, %c0_253] : memref<2x4x10x10x4xf32, #tpu.memory_space<vmem>>, vector<1x1x8x9x4xf32>
    %604 = vector.shape_cast %603 : vector<1x1x8x9x4xf32> to vector<8x9x4xf32>
    %605 = vector.extract_strided_slice %516 {offsets = [0, 0], sizes = [1, 4], strides = [1, 1]} : vector<9x4xf32> to vector<1x4xf32>
    %606 = vector.shape_cast %605 : vector<1x4xf32> to vector<4xf32>
    %607 = vector.shape_cast %606 : vector<4xf32> to vector<1x1x4xf32>
    %608 = vector.broadcast %607 : vector<1x1x4xf32> to vector<8x9x4xf32>
    %609 = arith.mulf %604, %608 : vector<8x9x4xf32>
    %610 = arith.index_cast %9 : i32 to index
    %c3_254 = arith.constant 3 : index
    %c0_255 = arith.constant 0 : index
    %c0_256 = arith.constant 0 : index
    %c0_257 = arith.constant 0 : index
    %611 = vector.load %arg11[%610, %c3_254, %c0_255, %c0_256, %c0_257] : memref<2x4x10x10x4xf32, #tpu.memory_space<vmem>>, vector<1x1x8x9x4xf32>
    %612 = vector.shape_cast %611 : vector<1x1x8x9x4xf32> to vector<8x9x4xf32>
    %613 = vector.extract_strided_slice %516 {offsets = [1, 0], sizes = [1, 4], strides = [1, 1]} : vector<9x4xf32> to vector<1x4xf32>
    %614 = vector.shape_cast %613 : vector<1x4xf32> to vector<4xf32>
    %615 = vector.shape_cast %614 : vector<4xf32> to vector<1x1x4xf32>
    %616 = vector.broadcast %615 : vector<1x1x4xf32> to vector<8x9x4xf32>
    %617 = arith.mulf %612, %616 : vector<8x9x4xf32>
    %618 = arith.addf %609, %617 : vector<8x9x4xf32>
    %619 = arith.index_cast %9 : i32 to index
    %c1_258 = arith.constant 1 : index
    %c0_259 = arith.constant 0 : index
    %c1_260 = arith.constant 1 : index
    %c0_261 = arith.constant 0 : index
    %620 = vector.load %arg11[%619, %c1_258, %c0_259, %c1_260, %c0_261] : memref<2x4x10x10x4xf32, #tpu.memory_space<vmem>>, vector<1x1x8x9x4xf32>
    %621 = vector.shape_cast %620 : vector<1x1x8x9x4xf32> to vector<8x9x4xf32>
    %622 = vector.extract_strided_slice %516 {offsets = [2, 0], sizes = [1, 4], strides = [1, 1]} : vector<9x4xf32> to vector<1x4xf32>
    %623 = vector.shape_cast %622 : vector<1x4xf32> to vector<4xf32>
    %624 = vector.shape_cast %623 : vector<4xf32> to vector<1x1x4xf32>
    %625 = vector.broadcast %624 : vector<1x1x4xf32> to vector<8x9x4xf32>
    %626 = arith.mulf %621, %625 : vector<8x9x4xf32>
    %627 = arith.addf %618, %626 : vector<8x9x4xf32>
    %628 = arith.index_cast %9 : i32 to index
    %c0_262 = arith.constant 0 : index
    %c1_263 = arith.constant 1 : index
    %c0_264 = arith.constant 0 : index
    %c0_265 = arith.constant 0 : index
    %629 = vector.load %arg11[%628, %c0_262, %c1_263, %c0_264, %c0_265] : memref<2x4x10x10x4xf32, #tpu.memory_space<vmem>>, vector<1x1x8x9x4xf32>
    %630 = vector.shape_cast %629 : vector<1x1x8x9x4xf32> to vector<8x9x4xf32>
    %631 = vector.extract_strided_slice %516 {offsets = [3, 0], sizes = [1, 4], strides = [1, 1]} : vector<9x4xf32> to vector<1x4xf32>
    %632 = vector.shape_cast %631 : vector<1x4xf32> to vector<4xf32>
    %633 = vector.shape_cast %632 : vector<4xf32> to vector<1x1x4xf32>
    %634 = vector.broadcast %633 : vector<1x1x4xf32> to vector<8x9x4xf32>
    %635 = arith.mulf %630, %634 : vector<8x9x4xf32>
    %636 = arith.addf %627, %635 : vector<8x9x4xf32>
    %637 = arith.index_cast %9 : i32 to index
    %c2_266 = arith.constant 2 : index
    %c1_267 = arith.constant 1 : index
    %c0_268 = arith.constant 0 : index
    %c0_269 = arith.constant 0 : index
    %638 = vector.load %arg11[%637, %c2_266, %c1_267, %c0_268, %c0_269] : memref<2x4x10x10x4xf32, #tpu.memory_space<vmem>>, vector<1x1x8x9x4xf32>
    %639 = vector.shape_cast %638 : vector<1x1x8x9x4xf32> to vector<8x9x4xf32>
    %640 = vector.extract_strided_slice %516 {offsets = [4, 0], sizes = [1, 4], strides = [1, 1]} : vector<9x4xf32> to vector<1x4xf32>
    %641 = vector.shape_cast %640 : vector<1x4xf32> to vector<4xf32>
    %642 = vector.shape_cast %641 : vector<4xf32> to vector<1x1x4xf32>
    %643 = vector.broadcast %642 : vector<1x1x4xf32> to vector<8x9x4xf32>
    %644 = arith.mulf %639, %643 : vector<8x9x4xf32>
    %645 = arith.addf %636, %644 : vector<8x9x4xf32>
    %646 = arith.index_cast %9 : i32 to index
    %c0_270 = arith.constant 0 : index
    %c1_271 = arith.constant 1 : index
    %c1_272 = arith.constant 1 : index
    %c0_273 = arith.constant 0 : index
    %647 = vector.load %arg11[%646, %c0_270, %c1_271, %c1_272, %c0_273] : memref<2x4x10x10x4xf32, #tpu.memory_space<vmem>>, vector<1x1x8x9x4xf32>
    %648 = vector.shape_cast %647 : vector<1x1x8x9x4xf32> to vector<8x9x4xf32>
    %649 = vector.extract_strided_slice %516 {offsets = [5, 0], sizes = [1, 4], strides = [1, 1]} : vector<9x4xf32> to vector<1x4xf32>
    %650 = vector.shape_cast %649 : vector<1x4xf32> to vector<4xf32>
    %651 = vector.shape_cast %650 : vector<4xf32> to vector<1x1x4xf32>
    %652 = vector.broadcast %651 : vector<1x1x4xf32> to vector<8x9x4xf32>
    %653 = arith.mulf %648, %652 : vector<8x9x4xf32>
    %654 = arith.addf %645, %653 : vector<8x9x4xf32>
    %655 = arith.index_cast %9 : i32 to index
    %c1_274 = arith.constant 1 : index
    %c1_275 = arith.constant 1 : index
    %c0_276 = arith.constant 0 : index
    %c0_277 = arith.constant 0 : index
    %656 = vector.load %arg11[%655, %c1_274, %c1_275, %c0_276, %c0_277] : memref<2x4x10x10x4xf32, #tpu.memory_space<vmem>>, vector<1x1x8x9x4xf32>
    %657 = vector.shape_cast %656 : vector<1x1x8x9x4xf32> to vector<8x9x4xf32>
    %658 = vector.extract_strided_slice %516 {offsets = [6, 0], sizes = [1, 4], strides = [1, 1]} : vector<9x4xf32> to vector<1x4xf32>
    %659 = vector.shape_cast %658 : vector<1x4xf32> to vector<4xf32>
    %660 = vector.shape_cast %659 : vector<4xf32> to vector<1x1x4xf32>
    %661 = vector.broadcast %660 : vector<1x1x4xf32> to vector<8x9x4xf32>
    %662 = arith.mulf %657, %661 : vector<8x9x4xf32>
    %663 = arith.addf %654, %662 : vector<8x9x4xf32>
    %664 = arith.index_cast %9 : i32 to index
    %c3_278 = arith.constant 3 : index
    %c1_279 = arith.constant 1 : index
    %c0_280 = arith.constant 0 : index
    %c0_281 = arith.constant 0 : index
    %665 = vector.load %arg11[%664, %c3_278, %c1_279, %c0_280, %c0_281] : memref<2x4x10x10x4xf32, #tpu.memory_space<vmem>>, vector<1x1x8x9x4xf32>
    %666 = vector.shape_cast %665 : vector<1x1x8x9x4xf32> to vector<8x9x4xf32>
    %667 = vector.extract_strided_slice %516 {offsets = [7, 0], sizes = [1, 4], strides = [1, 1]} : vector<9x4xf32> to vector<1x4xf32>
    %668 = vector.shape_cast %667 : vector<1x4xf32> to vector<4xf32>
    %669 = vector.shape_cast %668 : vector<4xf32> to vector<1x1x4xf32>
    %670 = vector.broadcast %669 : vector<1x1x4xf32> to vector<8x9x4xf32>
    %671 = arith.mulf %666, %670 : vector<8x9x4xf32>
    %672 = arith.addf %663, %671 : vector<8x9x4xf32>
    %673 = arith.index_cast %9 : i32 to index
    %c1_282 = arith.constant 1 : index
    %c1_283 = arith.constant 1 : index
    %c1_284 = arith.constant 1 : index
    %c0_285 = arith.constant 0 : index
    %674 = vector.load %arg11[%673, %c1_282, %c1_283, %c1_284, %c0_285] : memref<2x4x10x10x4xf32, #tpu.memory_space<vmem>>, vector<1x1x8x9x4xf32>
    %675 = vector.shape_cast %674 : vector<1x1x8x9x4xf32> to vector<8x9x4xf32>
    %676 = vector.extract_strided_slice %516 {offsets = [8, 0], sizes = [1, 4], strides = [1, 1]} : vector<9x4xf32> to vector<1x4xf32>
    %677 = vector.shape_cast %676 : vector<1x4xf32> to vector<4xf32>
    %678 = vector.shape_cast %677 : vector<4xf32> to vector<1x1x4xf32>
    %679 = vector.broadcast %678 : vector<1x1x4xf32> to vector<8x9x4xf32>
    %680 = arith.mulf %675, %679 : vector<8x9x4xf32>
    %681 = arith.addf %672, %680 : vector<8x9x4xf32>
    %682 = vector.shape_cast %518 : vector<4xf32> to vector<1x1x4xf32>
    %683 = vector.broadcast %682 : vector<1x1x4xf32> to vector<8x9x4xf32>
    %684 = arith.addf %681, %683 : vector<8x9x4xf32>
    %685 = tpu.iota {dimensions = array<i32: 1>} : vector<1x9x1xi32>
    %c0_i32_286 = arith.constant 0 : i32
    %686 = vector.broadcast %c0_i32_286 : i32 to vector<1x9x1xi32>
    %687 = arith.cmpi eq, %685, %686 : vector<1x9x1xi32>
    %cst_287 = arith.constant 0.000000e+00 : f32
    %688 = vector.shape_cast %687 : vector<1x9x1xi1> to vector<1x9x1xi1>
    %689 = vector.broadcast %688 : vector<1x9x1xi1> to vector<8x9x4xi1>
    %690 = vector.broadcast %cst_287 : f32 to vector<8x9x4xf32>
    %691 = arith.select %689, %690, %684 : vector<8x9x4xi1>, vector<8x9x4xf32>
    %692 = arith.index_cast %9 : i32 to index
    %c2_288 = arith.constant 2 : index
    %c0_289 = arith.constant 0 : index
    %c0_290 = arith.constant 0 : index
    %c0_291 = arith.constant 0 : index
    %693 = vector.load %arg11[%692, %c2_288, %c0_289, %c0_290, %c0_291] : memref<2x4x10x10x4xf32, #tpu.memory_space<vmem>>, vector<1x1x9x8x4xf32>
    %694 = vector.shape_cast %693 : vector<1x1x9x8x4xf32> to vector<9x8x4xf32>
    %695 = vector.extract_strided_slice %516 {offsets = [0, 0], sizes = [1, 4], strides = [1, 1]} : vector<9x4xf32> to vector<1x4xf32>
    %696 = vector.shape_cast %695 : vector<1x4xf32> to vector<4xf32>
    %697 = vector.shape_cast %696 : vector<4xf32> to vector<1x1x4xf32>
    %698 = vector.broadcast %697 : vector<1x1x4xf32> to vector<9x8x4xf32>
    %699 = arith.mulf %694, %698 : vector<9x8x4xf32>
    %700 = arith.index_cast %9 : i32 to index
    %c0_292 = arith.constant 0 : index
    %c0_293 = arith.constant 0 : index
    %c1_294 = arith.constant 1 : index
    %c0_295 = arith.constant 0 : index
    %701 = vector.load %arg11[%700, %c0_292, %c0_293, %c1_294, %c0_295] : memref<2x4x10x10x4xf32, #tpu.memory_space<vmem>>, vector<1x1x9x8x4xf32>
    %702 = vector.shape_cast %701 : vector<1x1x9x8x4xf32> to vector<9x8x4xf32>
    %703 = vector.extract_strided_slice %516 {offsets = [1, 0], sizes = [1, 4], strides = [1, 1]} : vector<9x4xf32> to vector<1x4xf32>
    %704 = vector.shape_cast %703 : vector<1x4xf32> to vector<4xf32>
    %705 = vector.shape_cast %704 : vector<4xf32> to vector<1x1x4xf32>
    %706 = vector.broadcast %705 : vector<1x1x4xf32> to vector<9x8x4xf32>
    %707 = arith.mulf %702, %706 : vector<9x8x4xf32>
    %708 = arith.addf %699, %707 : vector<9x8x4xf32>
    %709 = arith.index_cast %9 : i32 to index
    %c2_296 = arith.constant 2 : index
    %c0_297 = arith.constant 0 : index
    %c1_298 = arith.constant 1 : index
    %c0_299 = arith.constant 0 : index
    %710 = vector.load %arg11[%709, %c2_296, %c0_297, %c1_298, %c0_299] : memref<2x4x10x10x4xf32, #tpu.memory_space<vmem>>, vector<1x1x9x8x4xf32>
    %711 = vector.shape_cast %710 : vector<1x1x9x8x4xf32> to vector<9x8x4xf32>
    %712 = vector.extract_strided_slice %516 {offsets = [2, 0], sizes = [1, 4], strides = [1, 1]} : vector<9x4xf32> to vector<1x4xf32>
    %713 = vector.shape_cast %712 : vector<1x4xf32> to vector<4xf32>
    %714 = vector.shape_cast %713 : vector<4xf32> to vector<1x1x4xf32>
    %715 = vector.broadcast %714 : vector<1x1x4xf32> to vector<9x8x4xf32>
    %716 = arith.mulf %711, %715 : vector<9x8x4xf32>
    %717 = arith.addf %708, %716 : vector<9x8x4xf32>
    %718 = arith.index_cast %9 : i32 to index
    %c3_300 = arith.constant 3 : index
    %c0_301 = arith.constant 0 : index
    %c0_302 = arith.constant 0 : index
    %c0_303 = arith.constant 0 : index
    %719 = vector.load %arg11[%718, %c3_300, %c0_301, %c0_302, %c0_303] : memref<2x4x10x10x4xf32, #tpu.memory_space<vmem>>, vector<1x1x9x8x4xf32>
    %720 = vector.shape_cast %719 : vector<1x1x9x8x4xf32> to vector<9x8x4xf32>
    %721 = vector.extract_strided_slice %516 {offsets = [3, 0], sizes = [1, 4], strides = [1, 1]} : vector<9x4xf32> to vector<1x4xf32>
    %722 = vector.shape_cast %721 : vector<1x4xf32> to vector<4xf32>
    %723 = vector.shape_cast %722 : vector<4xf32> to vector<1x1x4xf32>
    %724 = vector.broadcast %723 : vector<1x1x4xf32> to vector<9x8x4xf32>
    %725 = arith.mulf %720, %724 : vector<9x8x4xf32>
    %726 = arith.addf %717, %725 : vector<9x8x4xf32>
    %727 = arith.index_cast %9 : i32 to index
    %c1_304 = arith.constant 1 : index
    %c0_305 = arith.constant 0 : index
    %c1_306 = arith.constant 1 : index
    %c0_307 = arith.constant 0 : index
    %728 = vector.load %arg11[%727, %c1_304, %c0_305, %c1_306, %c0_307] : memref<2x4x10x10x4xf32, #tpu.memory_space<vmem>>, vector<1x1x9x8x4xf32>
    %729 = vector.shape_cast %728 : vector<1x1x9x8x4xf32> to vector<9x8x4xf32>
    %730 = vector.extract_strided_slice %516 {offsets = [4, 0], sizes = [1, 4], strides = [1, 1]} : vector<9x4xf32> to vector<1x4xf32>
    %731 = vector.shape_cast %730 : vector<1x4xf32> to vector<4xf32>
    %732 = vector.shape_cast %731 : vector<4xf32> to vector<1x1x4xf32>
    %733 = vector.broadcast %732 : vector<1x1x4xf32> to vector<9x8x4xf32>
    %734 = arith.mulf %729, %733 : vector<9x8x4xf32>
    %735 = arith.addf %726, %734 : vector<9x8x4xf32>
    %736 = arith.index_cast %9 : i32 to index
    %c3_308 = arith.constant 3 : index
    %c0_309 = arith.constant 0 : index
    %c1_310 = arith.constant 1 : index
    %c0_311 = arith.constant 0 : index
    %737 = vector.load %arg11[%736, %c3_308, %c0_309, %c1_310, %c0_311] : memref<2x4x10x10x4xf32, #tpu.memory_space<vmem>>, vector<1x1x9x8x4xf32>
    %738 = vector.shape_cast %737 : vector<1x1x9x8x4xf32> to vector<9x8x4xf32>
    %739 = vector.extract_strided_slice %516 {offsets = [5, 0], sizes = [1, 4], strides = [1, 1]} : vector<9x4xf32> to vector<1x4xf32>
    %740 = vector.shape_cast %739 : vector<1x4xf32> to vector<4xf32>
    %741 = vector.shape_cast %740 : vector<4xf32> to vector<1x1x4xf32>
    %742 = vector.broadcast %741 : vector<1x1x4xf32> to vector<9x8x4xf32>
    %743 = arith.mulf %738, %742 : vector<9x8x4xf32>
    %744 = arith.addf %735, %743 : vector<9x8x4xf32>
    %745 = arith.index_cast %9 : i32 to index
    %c2_312 = arith.constant 2 : index
    %c1_313 = arith.constant 1 : index
    %c0_314 = arith.constant 0 : index
    %c0_315 = arith.constant 0 : index
    %746 = vector.load %arg11[%745, %c2_312, %c1_313, %c0_314, %c0_315] : memref<2x4x10x10x4xf32, #tpu.memory_space<vmem>>, vector<1x1x9x8x4xf32>
    %747 = vector.shape_cast %746 : vector<1x1x9x8x4xf32> to vector<9x8x4xf32>
    %748 = vector.extract_strided_slice %516 {offsets = [6, 0], sizes = [1, 4], strides = [1, 1]} : vector<9x4xf32> to vector<1x4xf32>
    %749 = vector.shape_cast %748 : vector<1x4xf32> to vector<4xf32>
    %750 = vector.shape_cast %749 : vector<4xf32> to vector<1x1x4xf32>
    %751 = vector.broadcast %750 : vector<1x1x4xf32> to vector<9x8x4xf32>
    %752 = arith.mulf %747, %751 : vector<9x8x4xf32>
    %753 = arith.addf %744, %752 : vector<9x8x4xf32>
    %754 = arith.index_cast %9 : i32 to index
    %c0_316 = arith.constant 0 : index
    %c1_317 = arith.constant 1 : index
    %c1_318 = arith.constant 1 : index
    %c0_319 = arith.constant 0 : index
    %755 = vector.load %arg11[%754, %c0_316, %c1_317, %c1_318, %c0_319] : memref<2x4x10x10x4xf32, #tpu.memory_space<vmem>>, vector<1x1x9x8x4xf32>
    %756 = vector.shape_cast %755 : vector<1x1x9x8x4xf32> to vector<9x8x4xf32>
    %757 = vector.extract_strided_slice %516 {offsets = [7, 0], sizes = [1, 4], strides = [1, 1]} : vector<9x4xf32> to vector<1x4xf32>
    %758 = vector.shape_cast %757 : vector<1x4xf32> to vector<4xf32>
    %759 = vector.shape_cast %758 : vector<4xf32> to vector<1x1x4xf32>
    %760 = vector.broadcast %759 : vector<1x1x4xf32> to vector<9x8x4xf32>
    %761 = arith.mulf %756, %760 : vector<9x8x4xf32>
    %762 = arith.addf %753, %761 : vector<9x8x4xf32>
    %763 = arith.index_cast %9 : i32 to index
    %c2_320 = arith.constant 2 : index
    %c1_321 = arith.constant 1 : index
    %c1_322 = arith.constant 1 : index
    %c0_323 = arith.constant 0 : index
    %764 = vector.load %arg11[%763, %c2_320, %c1_321, %c1_322, %c0_323] : memref<2x4x10x10x4xf32, #tpu.memory_space<vmem>>, vector<1x1x9x8x4xf32>
    %765 = vector.shape_cast %764 : vector<1x1x9x8x4xf32> to vector<9x8x4xf32>
    %766 = vector.extract_strided_slice %516 {offsets = [8, 0], sizes = [1, 4], strides = [1, 1]} : vector<9x4xf32> to vector<1x4xf32>
    %767 = vector.shape_cast %766 : vector<1x4xf32> to vector<4xf32>
    %768 = vector.shape_cast %767 : vector<4xf32> to vector<1x1x4xf32>
    %769 = vector.broadcast %768 : vector<1x1x4xf32> to vector<9x8x4xf32>
    %770 = arith.mulf %765, %769 : vector<9x8x4xf32>
    %771 = arith.addf %762, %770 : vector<9x8x4xf32>
    %772 = vector.shape_cast %518 : vector<4xf32> to vector<1x1x4xf32>
    %773 = vector.broadcast %772 : vector<1x1x4xf32> to vector<9x8x4xf32>
    %774 = arith.addf %771, %773 : vector<9x8x4xf32>
    %775 = tpu.iota {dimensions = array<i32: 0>} : vector<9x1x1xi32>
    %c0_i32_324 = arith.constant 0 : i32
    %776 = vector.broadcast %c0_i32_324 : i32 to vector<9x1x1xi32>
    %777 = arith.cmpi eq, %775, %776 : vector<9x1x1xi32>
    %c0_i32_325 = arith.constant 0 : i32
    %778 = arith.cmpi eq, %arg1, %c0_i32_325 : i32
    %779 = vector.broadcast %778 : i1 to vector<9x1x1xi1>
    %780 = arith.andi %777, %779 : vector<9x1x1xi1>
    %cst_326 = arith.constant 0.000000e+00 : f32
    %781 = vector.shape_cast %780 : vector<9x1x1xi1> to vector<9x1x1xi1>
    %782 = vector.broadcast %781 : vector<9x1x1xi1> to vector<9x8x4xi1>
    %783 = vector.broadcast %cst_326 : f32 to vector<9x8x4xf32>
    %784 = arith.select %782, %783, %774 : vector<9x8x4xi1>, vector<9x8x4xf32>
    %785 = arith.index_cast %9 : i32 to index
    %c0_327 = arith.constant 0 : index
    %c0_328 = arith.constant 0 : index
    %c0_329 = arith.constant 0 : index
    %c0_330 = arith.constant 0 : index
    %786 = vector.load %arg11[%785, %c0_327, %c0_328, %c0_329, %c0_330] : memref<2x4x10x10x4xf32, #tpu.memory_space<vmem>>, vector<1x1x9x9x4xf32>
    %787 = vector.shape_cast %786 : vector<1x1x9x9x4xf32> to vector<9x9x4xf32>
    %788 = vector.extract_strided_slice %516 {offsets = [0, 0], sizes = [1, 4], strides = [1, 1]} : vector<9x4xf32> to vector<1x4xf32>
    %789 = vector.shape_cast %788 : vector<1x4xf32> to vector<4xf32>
    %790 = vector.shape_cast %789 : vector<4xf32> to vector<1x1x4xf32>
    %791 = vector.broadcast %790 : vector<1x1x4xf32> to vector<9x9x4xf32>
    %792 = arith.mulf %787, %791 : vector<9x9x4xf32>
    %793 = arith.index_cast %9 : i32 to index
    %c2_331 = arith.constant 2 : index
    %c0_332 = arith.constant 0 : index
    %c0_333 = arith.constant 0 : index
    %c0_334 = arith.constant 0 : index
    %794 = vector.load %arg11[%793, %c2_331, %c0_332, %c0_333, %c0_334] : memref<2x4x10x10x4xf32, #tpu.memory_space<vmem>>, vector<1x1x9x9x4xf32>
    %795 = vector.shape_cast %794 : vector<1x1x9x9x4xf32> to vector<9x9x4xf32>
    %796 = vector.extract_strided_slice %516 {offsets = [1, 0], sizes = [1, 4], strides = [1, 1]} : vector<9x4xf32> to vector<1x4xf32>
    %797 = vector.shape_cast %796 : vector<1x4xf32> to vector<4xf32>
    %798 = vector.shape_cast %797 : vector<4xf32> to vector<1x1x4xf32>
    %799 = vector.broadcast %798 : vector<1x1x4xf32> to vector<9x9x4xf32>
    %800 = arith.mulf %795, %799 : vector<9x9x4xf32>
    %801 = arith.addf %792, %800 : vector<9x9x4xf32>
    %802 = arith.index_cast %9 : i32 to index
    %c0_335 = arith.constant 0 : index
    %c0_336 = arith.constant 0 : index
    %c1_337 = arith.constant 1 : index
    %c0_338 = arith.constant 0 : index
    %803 = vector.load %arg11[%802, %c0_335, %c0_336, %c1_337, %c0_338] : memref<2x4x10x10x4xf32, #tpu.memory_space<vmem>>, vector<1x1x9x9x4xf32>
    %804 = vector.shape_cast %803 : vector<1x1x9x9x4xf32> to vector<9x9x4xf32>
    %805 = vector.extract_strided_slice %516 {offsets = [2, 0], sizes = [1, 4], strides = [1, 1]} : vector<9x4xf32> to vector<1x4xf32>
    %806 = vector.shape_cast %805 : vector<1x4xf32> to vector<4xf32>
    %807 = vector.shape_cast %806 : vector<4xf32> to vector<1x1x4xf32>
    %808 = vector.broadcast %807 : vector<1x1x4xf32> to vector<9x9x4xf32>
    %809 = arith.mulf %804, %808 : vector<9x9x4xf32>
    %810 = arith.addf %801, %809 : vector<9x9x4xf32>
    %811 = arith.index_cast %9 : i32 to index
    %c1_339 = arith.constant 1 : index
    %c0_340 = arith.constant 0 : index
    %c0_341 = arith.constant 0 : index
    %c0_342 = arith.constant 0 : index
    %812 = vector.load %arg11[%811, %c1_339, %c0_340, %c0_341, %c0_342] : memref<2x4x10x10x4xf32, #tpu.memory_space<vmem>>, vector<1x1x9x9x4xf32>
    %813 = vector.shape_cast %812 : vector<1x1x9x9x4xf32> to vector<9x9x4xf32>
    %814 = vector.extract_strided_slice %516 {offsets = [3, 0], sizes = [1, 4], strides = [1, 1]} : vector<9x4xf32> to vector<1x4xf32>
    %815 = vector.shape_cast %814 : vector<1x4xf32> to vector<4xf32>
    %816 = vector.shape_cast %815 : vector<4xf32> to vector<1x1x4xf32>
    %817 = vector.broadcast %816 : vector<1x1x4xf32> to vector<9x9x4xf32>
    %818 = arith.mulf %813, %817 : vector<9x9x4xf32>
    %819 = arith.addf %810, %818 : vector<9x9x4xf32>
    %820 = arith.index_cast %9 : i32 to index
    %c3_343 = arith.constant 3 : index
    %c0_344 = arith.constant 0 : index
    %c0_345 = arith.constant 0 : index
    %c0_346 = arith.constant 0 : index
    %821 = vector.load %arg11[%820, %c3_343, %c0_344, %c0_345, %c0_346] : memref<2x4x10x10x4xf32, #tpu.memory_space<vmem>>, vector<1x1x9x9x4xf32>
    %822 = vector.shape_cast %821 : vector<1x1x9x9x4xf32> to vector<9x9x4xf32>
    %823 = vector.extract_strided_slice %516 {offsets = [4, 0], sizes = [1, 4], strides = [1, 1]} : vector<9x4xf32> to vector<1x4xf32>
    %824 = vector.shape_cast %823 : vector<1x4xf32> to vector<4xf32>
    %825 = vector.shape_cast %824 : vector<4xf32> to vector<1x1x4xf32>
    %826 = vector.broadcast %825 : vector<1x1x4xf32> to vector<9x9x4xf32>
    %827 = arith.mulf %822, %826 : vector<9x9x4xf32>
    %828 = arith.addf %819, %827 : vector<9x9x4xf32>
    %829 = arith.index_cast %9 : i32 to index
    %c1_347 = arith.constant 1 : index
    %c0_348 = arith.constant 0 : index
    %c1_349 = arith.constant 1 : index
    %c0_350 = arith.constant 0 : index
    %830 = vector.load %arg11[%829, %c1_347, %c0_348, %c1_349, %c0_350] : memref<2x4x10x10x4xf32, #tpu.memory_space<vmem>>, vector<1x1x9x9x4xf32>
    %831 = vector.shape_cast %830 : vector<1x1x9x9x4xf32> to vector<9x9x4xf32>
    %832 = vector.extract_strided_slice %516 {offsets = [5, 0], sizes = [1, 4], strides = [1, 1]} : vector<9x4xf32> to vector<1x4xf32>
    %833 = vector.shape_cast %832 : vector<1x4xf32> to vector<4xf32>
    %834 = vector.shape_cast %833 : vector<4xf32> to vector<1x1x4xf32>
    %835 = vector.broadcast %834 : vector<1x1x4xf32> to vector<9x9x4xf32>
    %836 = arith.mulf %831, %835 : vector<9x9x4xf32>
    %837 = arith.addf %828, %836 : vector<9x9x4xf32>
    %838 = arith.index_cast %9 : i32 to index
    %c0_351 = arith.constant 0 : index
    %c1_352 = arith.constant 1 : index
    %c0_353 = arith.constant 0 : index
    %c0_354 = arith.constant 0 : index
    %839 = vector.load %arg11[%838, %c0_351, %c1_352, %c0_353, %c0_354] : memref<2x4x10x10x4xf32, #tpu.memory_space<vmem>>, vector<1x1x9x9x4xf32>
    %840 = vector.shape_cast %839 : vector<1x1x9x9x4xf32> to vector<9x9x4xf32>
    %841 = vector.extract_strided_slice %516 {offsets = [6, 0], sizes = [1, 4], strides = [1, 1]} : vector<9x4xf32> to vector<1x4xf32>
    %842 = vector.shape_cast %841 : vector<1x4xf32> to vector<4xf32>
    %843 = vector.shape_cast %842 : vector<4xf32> to vector<1x1x4xf32>
    %844 = vector.broadcast %843 : vector<1x1x4xf32> to vector<9x9x4xf32>
    %845 = arith.mulf %840, %844 : vector<9x9x4xf32>
    %846 = arith.addf %837, %845 : vector<9x9x4xf32>
    %847 = arith.index_cast %9 : i32 to index
    %c2_355 = arith.constant 2 : index
    %c1_356 = arith.constant 1 : index
    %c0_357 = arith.constant 0 : index
    %c0_358 = arith.constant 0 : index
    %848 = vector.load %arg11[%847, %c2_355, %c1_356, %c0_357, %c0_358] : memref<2x4x10x10x4xf32, #tpu.memory_space<vmem>>, vector<1x1x9x9x4xf32>
    %849 = vector.shape_cast %848 : vector<1x1x9x9x4xf32> to vector<9x9x4xf32>
    %850 = vector.extract_strided_slice %516 {offsets = [7, 0], sizes = [1, 4], strides = [1, 1]} : vector<9x4xf32> to vector<1x4xf32>
    %851 = vector.shape_cast %850 : vector<1x4xf32> to vector<4xf32>
    %852 = vector.shape_cast %851 : vector<4xf32> to vector<1x1x4xf32>
    %853 = vector.broadcast %852 : vector<1x1x4xf32> to vector<9x9x4xf32>
    %854 = arith.mulf %849, %853 : vector<9x9x4xf32>
    %855 = arith.addf %846, %854 : vector<9x9x4xf32>
    %856 = arith.index_cast %9 : i32 to index
    %c0_359 = arith.constant 0 : index
    %c1_360 = arith.constant 1 : index
    %c1_361 = arith.constant 1 : index
    %c0_362 = arith.constant 0 : index
    %857 = vector.load %arg11[%856, %c0_359, %c1_360, %c1_361, %c0_362] : memref<2x4x10x10x4xf32, #tpu.memory_space<vmem>>, vector<1x1x9x9x4xf32>
    %858 = vector.shape_cast %857 : vector<1x1x9x9x4xf32> to vector<9x9x4xf32>
    %859 = vector.extract_strided_slice %516 {offsets = [8, 0], sizes = [1, 4], strides = [1, 1]} : vector<9x4xf32> to vector<1x4xf32>
    %860 = vector.shape_cast %859 : vector<1x4xf32> to vector<4xf32>
    %861 = vector.shape_cast %860 : vector<4xf32> to vector<1x1x4xf32>
    %862 = vector.broadcast %861 : vector<1x1x4xf32> to vector<9x9x4xf32>
    %863 = arith.mulf %858, %862 : vector<9x9x4xf32>
    %864 = arith.addf %855, %863 : vector<9x9x4xf32>
    %865 = vector.shape_cast %518 : vector<4xf32> to vector<1x1x4xf32>
    %866 = vector.broadcast %865 : vector<1x1x4xf32> to vector<9x9x4xf32>
    %867 = arith.addf %864, %866 : vector<9x9x4xf32>
    %868 = tpu.iota {dimensions = array<i32: 1>} : vector<1x9x1xi32>
    %c0_i32_363 = arith.constant 0 : i32
    %869 = vector.broadcast %c0_i32_363 : i32 to vector<1x9x1xi32>
    %870 = arith.cmpi eq, %868, %869 : vector<1x9x1xi32>
    %cst_364 = arith.constant 0.000000e+00 : f32
    %871 = vector.shape_cast %870 : vector<1x9x1xi1> to vector<1x9x1xi1>
    %872 = vector.broadcast %871 : vector<1x9x1xi1> to vector<9x9x4xi1>
    %873 = vector.broadcast %cst_364 : f32 to vector<9x9x4xf32>
    %874 = arith.select %872, %873, %867 : vector<9x9x4xi1>, vector<9x9x4xf32>
    %875 = tpu.iota {dimensions = array<i32: 0>} : vector<9x1x1xi32>
    %c0_i32_365 = arith.constant 0 : i32
    %876 = vector.broadcast %c0_i32_365 : i32 to vector<9x1x1xi32>
    %877 = arith.cmpi eq, %875, %876 : vector<9x1x1xi32>
    %c0_i32_366 = arith.constant 0 : i32
    %878 = arith.cmpi eq, %arg1, %c0_i32_366 : i32
    %879 = vector.broadcast %878 : i1 to vector<9x1x1xi1>
    %880 = arith.andi %877, %879 : vector<9x1x1xi1>
    %cst_367 = arith.constant 0.000000e+00 : f32
    %881 = vector.shape_cast %880 : vector<9x1x1xi1> to vector<9x1x1xi1>
    %882 = vector.broadcast %881 : vector<9x1x1xi1> to vector<9x9x4xi1>
    %883 = vector.broadcast %cst_367 : f32 to vector<9x9x4xf32>
    %884 = arith.select %882, %883, %874 : vector<9x9x4xi1>, vector<9x9x4xf32>
    %c1_368 = arith.constant 1 : index
    %c0_369 = arith.constant 0 : index
    %c0_370 = arith.constant 0 : index
    %885 = vector.load %arg5[%c1_368, %c0_369, %c0_370] : memref<2x9x4xf32, #tpu.memory_space<vmem>>, vector<1x9x4xf32>
    %886 = vector.shape_cast %885 : vector<1x9x4xf32> to vector<9x4xf32>
    %887 = vector.extract_strided_slice %884 {offsets = [0, 0, 0], sizes = [8, 8, 4], strides = [1, 1, 1]} : vector<9x9x4xf32> to vector<8x8x4xf32>
    %888 = vector.extract_strided_slice %886 {offsets = [0, 0], sizes = [1, 4], strides = [1, 1]} : vector<9x4xf32> to vector<1x4xf32>
    %889 = vector.shape_cast %888 : vector<1x4xf32> to vector<4xf32>
    %890 = vector.shape_cast %889 : vector<4xf32> to vector<1x1x4xf32>
    %891 = vector.broadcast %890 : vector<1x1x4xf32> to vector<8x8x4xf32>
    %892 = arith.mulf %887, %891 : vector<8x8x4xf32>
    %893 = vector.extract_strided_slice %784 {offsets = [0, 0, 0], sizes = [8, 8, 4], strides = [1, 1, 1]} : vector<9x8x4xf32> to vector<8x8x4xf32>
    %894 = vector.extract_strided_slice %886 {offsets = [1, 0], sizes = [1, 4], strides = [1, 1]} : vector<9x4xf32> to vector<1x4xf32>
    %895 = vector.shape_cast %894 : vector<1x4xf32> to vector<4xf32>
    %896 = vector.shape_cast %895 : vector<4xf32> to vector<1x1x4xf32>
    %897 = vector.broadcast %896 : vector<1x1x4xf32> to vector<8x8x4xf32>
    %898 = arith.mulf %893, %897 : vector<8x8x4xf32>
    %899 = arith.addf %892, %898 : vector<8x8x4xf32>
    %900 = vector.extract_strided_slice %884 {offsets = [0, 1, 0], sizes = [8, 8, 4], strides = [1, 1, 1]} : vector<9x9x4xf32> to vector<8x8x4xf32>
    %901 = vector.extract_strided_slice %886 {offsets = [2, 0], sizes = [1, 4], strides = [1, 1]} : vector<9x4xf32> to vector<1x4xf32>
    %902 = vector.shape_cast %901 : vector<1x4xf32> to vector<4xf32>
    %903 = vector.shape_cast %902 : vector<4xf32> to vector<1x1x4xf32>
    %904 = vector.broadcast %903 : vector<1x1x4xf32> to vector<8x8x4xf32>
    %905 = arith.mulf %900, %904 : vector<8x8x4xf32>
    %906 = arith.addf %899, %905 : vector<8x8x4xf32>
    %907 = vector.extract_strided_slice %691 {offsets = [0, 0, 0], sizes = [8, 8, 4], strides = [1, 1, 1]} : vector<8x9x4xf32> to vector<8x8x4xf32>
    %908 = vector.extract_strided_slice %886 {offsets = [3, 0], sizes = [1, 4], strides = [1, 1]} : vector<9x4xf32> to vector<1x4xf32>
    %909 = vector.shape_cast %908 : vector<1x4xf32> to vector<4xf32>
    %910 = vector.shape_cast %909 : vector<4xf32> to vector<1x1x4xf32>
    %911 = vector.broadcast %910 : vector<1x1x4xf32> to vector<8x8x4xf32>
    %912 = arith.mulf %907, %911 : vector<8x8x4xf32>
    %913 = arith.addf %906, %912 : vector<8x8x4xf32>
    %914 = vector.extract_strided_slice %886 {offsets = [4, 0], sizes = [1, 4], strides = [1, 1]} : vector<9x4xf32> to vector<1x4xf32>
    %915 = vector.shape_cast %914 : vector<1x4xf32> to vector<4xf32>
    %916 = vector.shape_cast %915 : vector<4xf32> to vector<1x1x4xf32>
    %917 = vector.broadcast %916 : vector<1x1x4xf32> to vector<8x8x4xf32>
    %918 = arith.mulf %601, %917 : vector<8x8x4xf32>
    %919 = arith.addf %913, %918 : vector<8x8x4xf32>
    %920 = vector.extract_strided_slice %691 {offsets = [0, 1, 0], sizes = [8, 8, 4], strides = [1, 1, 1]} : vector<8x9x4xf32> to vector<8x8x4xf32>
    %921 = vector.extract_strided_slice %886 {offsets = [5, 0], sizes = [1, 4], strides = [1, 1]} : vector<9x4xf32> to vector<1x4xf32>
    %922 = vector.shape_cast %921 : vector<1x4xf32> to vector<4xf32>
    %923 = vector.shape_cast %922 : vector<4xf32> to vector<1x1x4xf32>
    %924 = vector.broadcast %923 : vector<1x1x4xf32> to vector<8x8x4xf32>
    %925 = arith.mulf %920, %924 : vector<8x8x4xf32>
    %926 = arith.addf %919, %925 : vector<8x8x4xf32>
    %927 = vector.extract_strided_slice %884 {offsets = [1, 0, 0], sizes = [8, 8, 4], strides = [1, 1, 1]} : vector<9x9x4xf32> to vector<8x8x4xf32>
    %928 = vector.extract_strided_slice %886 {offsets = [6, 0], sizes = [1, 4], strides = [1, 1]} : vector<9x4xf32> to vector<1x4xf32>
    %929 = vector.shape_cast %928 : vector<1x4xf32> to vector<4xf32>
    %930 = vector.shape_cast %929 : vector<4xf32> to vector<1x1x4xf32>
    %931 = vector.broadcast %930 : vector<1x1x4xf32> to vector<8x8x4xf32>
    %932 = arith.mulf %927, %931 : vector<8x8x4xf32>
    %933 = arith.addf %926, %932 : vector<8x8x4xf32>
    %934 = vector.extract_strided_slice %784 {offsets = [1, 0, 0], sizes = [8, 8, 4], strides = [1, 1, 1]} : vector<9x8x4xf32> to vector<8x8x4xf32>
    %935 = vector.extract_strided_slice %886 {offsets = [7, 0], sizes = [1, 4], strides = [1, 1]} : vector<9x4xf32> to vector<1x4xf32>
    %936 = vector.shape_cast %935 : vector<1x4xf32> to vector<4xf32>
    %937 = vector.shape_cast %936 : vector<4xf32> to vector<1x1x4xf32>
    %938 = vector.broadcast %937 : vector<1x1x4xf32> to vector<8x8x4xf32>
    %939 = arith.mulf %934, %938 : vector<8x8x4xf32>
    %940 = arith.addf %933, %939 : vector<8x8x4xf32>
    %941 = vector.extract_strided_slice %884 {offsets = [1, 1, 0], sizes = [8, 8, 4], strides = [1, 1, 1]} : vector<9x9x4xf32> to vector<8x8x4xf32>
    %942 = vector.extract_strided_slice %886 {offsets = [8, 0], sizes = [1, 4], strides = [1, 1]} : vector<9x4xf32> to vector<1x4xf32>
    %943 = vector.shape_cast %942 : vector<1x4xf32> to vector<4xf32>
    %944 = vector.shape_cast %943 : vector<4xf32> to vector<1x1x4xf32>
    %945 = vector.broadcast %944 : vector<1x1x4xf32> to vector<8x8x4xf32>
    %946 = arith.mulf %941, %945 : vector<8x8x4xf32>
    %947 = arith.addf %940, %946 : vector<8x8x4xf32>
    %c1_371 = arith.constant 1 : index
    %c0_372 = arith.constant 0 : index
    %948 = vector.load %arg6[%c1_371, %c0_372] : memref<2x4xf32, #tpu.memory_space<vmem>>, vector<1x4xf32>
    %949 = vector.shape_cast %948 : vector<1x4xf32> to vector<4xf32>
    %950 = vector.shape_cast %949 : vector<4xf32> to vector<1x1x4xf32>
    %951 = vector.broadcast %950 : vector<1x1x4xf32> to vector<8x8x4xf32>
    %952 = arith.addf %947, %951 : vector<8x8x4xf32>
    %953 = arith.mulf %952, %952 : vector<8x8x4xf32>
    %954 = arith.mulf %952, %953 : vector<8x8x4xf32>
    %cst_373 = arith.constant 4.471500e-02 : f32
    %955 = vector.broadcast %cst_373 : f32 to vector<8x8x4xf32>
    %956 = arith.mulf %955, %954 : vector<8x8x4xf32>
    %957 = arith.addf %952, %956 : vector<8x8x4xf32>
    %cst_374 = arith.constant 0.797884583 : f32
    %958 = vector.broadcast %cst_374 : f32 to vector<8x8x4xf32>
    %959 = arith.mulf %958, %957 : vector<8x8x4xf32>
    %960 = math.tanh %959 : vector<8x8x4xf32>
    %cst_375 = arith.constant 1.000000e+00 : f32
    %961 = vector.broadcast %cst_375 : f32 to vector<8x8x4xf32>
    %962 = arith.addf %961, %960 : vector<8x8x4xf32>
    %cst_376 = arith.constant 5.000000e-01 : f32
    %963 = vector.broadcast %cst_376 : f32 to vector<8x8x4xf32>
    %964 = arith.mulf %963, %962 : vector<8x8x4xf32>
    %965 = arith.mulf %952, %964 : vector<8x8x4xf32>
    %966 = vector.extract_strided_slice %691 {offsets = [0, 1, 0], sizes = [8, 8, 4], strides = [1, 1, 1]} : vector<8x9x4xf32> to vector<8x8x4xf32>
    %967 = arith.maximumf %601, %966 : vector<8x8x4xf32>
    %968 = vector.extract_strided_slice %784 {offsets = [1, 0, 0], sizes = [8, 8, 4], strides = [1, 1, 1]} : vector<9x8x4xf32> to vector<8x8x4xf32>
    %969 = vector.extract_strided_slice %884 {offsets = [1, 1, 0], sizes = [8, 8, 4], strides = [1, 1, 1]} : vector<9x9x4xf32> to vector<8x8x4xf32>
    %970 = arith.maximumf %968, %969 : vector<8x8x4xf32>
    %971 = arith.maximumf %967, %970 : vector<8x8x4xf32>
    %972 = vector.shape_cast %965 : vector<8x8x4xf32> to vector<64x4xf32>
    %973 = vector.shape_cast %971 : vector<8x8x4xf32> to vector<64x4xf32>
    %974 = tpu.concatenate %972, %973 in 1 : vector<64x4xf32>, vector<64x4xf32> -> vector<64x8xf32>
    %c0_377 = arith.constant 0 : index
    %c0_378 = arith.constant 0 : index
    %975 = vector.load %arg12[%c0_377, %c0_378] : memref<64x8xf32, #tpu.memory_space<vmem>>, vector<64x8xf32>
    %976 = arith.truncf %974 : vector<64x8xf32> to vector<64x8xbf16>
    %c1_379 = arith.constant 1 : index
    %c0_380 = arith.constant 0 : index
    %c0_381 = arith.constant 0 : index
    %977 = vector.load %arg8[%c1_379, %c0_380, %c0_381] : memref<2x8x8xbf16, #tpu.memory_space<vmem>>, vector<1x8x8xbf16>
    %978 = vector.shape_cast %977 : vector<1x8x8xbf16> to vector<8x8xbf16>
    %cst_382 = arith.constant dense<0.000000e+00> : vector<64x8xf32>
    %979 = tpu.matmul %976, %978, %cst_382 {dimension_numbers = #tpu.dot_dimension_numbers<[1], [0], [0], [1], [0, 0, 1, 1], [], []>} : vector<64x8xbf16>, vector<8x8xbf16>, vector<64x8xf32> -> vector<64x8xf32>
    %980 = arith.addf %975, %979 : vector<64x8xf32>
    %c0_383 = arith.constant 0 : index
    %c0_384 = arith.constant 0 : index
    %981 = vector.load %arg12[%c0_383, %c0_384] : memref<64x8xf32, #tpu.memory_space<vmem>>, vector<64x8xf32>
    tpu.vector_store %arg12[%c0_383, %c0_384], %980 {strides = array<i32>} : memref<64x8xf32, #tpu.memory_space<vmem>>, vector<64x8xf32>,
    %c0_385 = arith.constant 0 : index
    %c0_386 = arith.constant 0 : index
    %982 = vector.load %arg12[%c0_385, %c0_386] : memref<64x8xf32, #tpu.memory_space<vmem>>, vector<64x8xf32>
    %c0_387 = arith.constant 0 : index
    %c0_388 = arith.constant 0 : index
    %c0_389 = arith.constant 0 : index
    %983 = vector.load %arg10[%c0_387, %c0_388, %c0_389] : memref<1x64x8xf32, #tpu.memory_space<vmem>>, vector<1x64x8xf32>
    %984 = vector.shape_cast %983 : vector<1x64x8xf32> to vector<64x8xf32>
    %985 = vector.shape_cast %982 : vector<64x8xf32> to vector<1x64x8xf32>
    tpu.vector_store %arg10[%c0_387, %c0_388, %c0_389], %985 {strides = array<i32>} : memref<1x64x8xf32, #tpu.memory_space<vmem>>, vector<1x64x8xf32>,
    return
  }
  func.func @transform_1(%arg0: i32, %arg1: i32) -> (i32, i32, i32) {
    %c0_i32 = arith.constant 0 : i32
    %c0_i32_0 = arith.constant 0 : i32
    %c0_i32_1 = arith.constant 0 : i32
    %c0_i32_2 = arith.constant 0 : i32
    return %c0_i32, %c0_i32_0, %c0_i32_1 : i32, i32, i32
  }
  func.func @transform_2(%arg0: i32, %arg1: i32) -> (i32, i32) {
    %c0_i32 = arith.constant 0 : i32
    %c0_i32_0 = arith.constant 0 : i32
    %c0_i32_1 = arith.constant 0 : i32
    return %c0_i32, %c0_i32_0 : i32, i32
  }
  func.func @transform_3(%arg0: i32, %arg1: i32) -> (i32, i32, i32) {
    %c0_i32 = arith.constant 0 : i32
    %c0_i32_0 = arith.constant 0 : i32
    %c0_i32_1 = arith.constant 0 : i32
    %c0_i32_2 = arith.constant 0 : i32
    return %c0_i32, %c0_i32_0, %c0_i32_1 : i32, i32, i32
  }
  func.func @transform_4(%arg0: i32, %arg1: i32) -> (i32, i32) {
    %c0_i32 = arith.constant 0 : i32
    %c0_i32_0 = arith.constant 0 : i32
    %c0_i32_1 = arith.constant 0 : i32
    return %c0_i32, %c0_i32_0 : i32, i32
  }
  func.func @transform_5(%arg0: i32, %arg1: i32) -> (i32, i32) {
    %c0_i32 = arith.constant 0 : i32
    %c0_i32_0 = arith.constant 0 : i32
    %c0_i32_1 = arith.constant 0 : i32
    return %c0_i32, %c0_i32_0 : i32, i32
  }
  func.func @transform_6(%arg0: i32, %arg1: i32) -> (i32, i32, i32) {
    %c0_i32 = arith.constant 0 : i32
    %c0_i32_0 = arith.constant 0 : i32
    %c0_i32_1 = arith.constant 0 : i32
    %c0_i32_2 = arith.constant 0 : i32
    return %c0_i32, %c0_i32_0, %c0_i32_1 : i32, i32, i32
  }
  func.func @transform_7(%arg0: i32, %arg1: i32) -> (i32, i32) {
    %c0_i32 = arith.constant 0 : i32
    %c0_i32_0 = arith.constant 0 : i32
    %c0_i32_1 = arith.constant 0 : i32
    return %c0_i32, %c0_i32_0 : i32, i32
  }
  func.func @transform_8(%arg0: i32, %arg1: i32) -> (i32, i32, i32) {
    %c0_i32 = arith.constant 0 : i32
    %c0_i32_0 = arith.constant 0 : i32
    return %arg0, %arg1, %c0_i32 : i32, i32, i32
  }
}

</mosaic_0001>

<bundles_post_ra>
// kernel: patch_merging_forward.1
= control target key start
LH: loop header
LB: loop body
LE: loop exit
PB: predicated region body
PF: predicated region fallthrough
CT: control target
= control target key end

     0   :  { %s6635_s27 = smov 0   ;;  %s6637_s28 = smov 0   ;;  %s10381_s0 = inlined_call_operand.vmem [shape: f32[2,4,10,10,4], index: 0, kind: input, shape index: {}]   ;;  %s10382_s1 = inlined_call_operand.vmem [shape: f32[2,9,4], index: 1, kind: input, shape index: {}]   ;;  %s10383_s2 = inlined_call_operand.vmem [shape: f32[2,4], index: 2, kind: input, shape index: {}]   ;;  %s10384_s3 = inlined_call_operand.vmem [shape: f32[2,9,4], index: 3, kind: input, shape index: {}]   ;;  %s10385_s4 = inlined_call_operand.vmem [shape: f32[2,4], index: 4, kind: input, shape index: {}]   ;;  %s10386_s5 = inlined_call_operand.vmem [shape: bf16[16,8], index: 5, kind: input, shape index: {}]   ;;  %s10387_s6 = inlined_call_operand.vmem [shape: bf16[2,8,8], index: 6, kind: input, shape index: {}]   ;;  %s10388_s7 = inlined_call_operand.vmem [shape: f32[1,8], index: 7, kind: input, shape index: {}]   ;;  %s10389_s8 = inlined_call_operand.vmem [shape: f32[2,64,8], index: 8, kind: output, shape index: {}]  }
   0x1   :  { %s6639_s29 = smov 0  }
   0x2 LB: > { %s30_s30 = sadd.s32 1, %s6581_s28  ;;  %p5418_p0 = scmp.ge.s32.totalorder %s6585_s29, 1  ;;  %s6585_s29 = sphi %s6639_s29, %s18_s29   ;;  %s6581_s28 = sphi %s6637_s28, %s10918_s28   ;;  %s6577_s27 = sphi %s6635_s27, %s10917_s27  }
   0x3   : > { %p32_p1 = scmp.ge.s32.totalorder %s30_s30, 2  ;;  %p242_p2 = scmp.lt.s32.totalorder %s6585_s29, 3 }
   0x5   : > { %s10920_s30 = smov (%p32_p1, %s30_s30), 0  ;;  %p243_p3 = pnand %p5418_p0, %p242_p2 }
   0x7   : > { %246 = sbr.rel (%p243_p3) target bundleno = 1000 (0x3e8), region = 48 }
   0xc   : > { %p274_p4 = scmp.lt.s32.totalorder %s6577_s27, 1  ;;  %s302_s9 = smul.u32 640, %s6577_s27 }
   0xe   : > { %s10922_s27 = smov (!%p274_p4, %s6577_s27), 1  ;;  %s6656_s12 = scalar_lea.vmem %s10381_s0, %s302_s9 }
   0xf   : > { %s6336_s13 = sshll.u32 %s10922_s27, 6  ;;  %v426_v0 = vld [vmem:[%s6656_s12 + $0x10] sm:$0xff]  ;;  %v428_v1 = vld [vmem:[%s6656_s12 + $0x20] sm:$0xff]  ;;  %v5423_v36 = vld [vmem:[%s6656_s12 + $0x18] sm:$0x3] }
  0x10   : > { %s6663_s16 = scalar_lea.vmem %s10389_s8, %s6336_s13  ;;  %427 = vst [vmem:[#allocation2 + $0x10] sm:$0xff] %v426_v0  ;;  %429 = vst [vmem:[#allocation2 + $0x20] sm:$0xff] %v428_v1  ;;  %v430_v2 = vld [vmem:[%s6656_s12 + $0x30] sm:$0xff]  ;;  %v432_v3 = vld [vmem:[%s6656_s12 + $0x40] sm:$0xff] }
  0x11   : > { %v434_v4 = vld [vmem:[%s6656_s12 + $0x50] sm:$0xff]  ;;  %431 = vst [vmem:[#allocation2 + $0x30] sm:$0xff] %v430_v2  ;;  %433 = vst [vmem:[#allocation2 + $0x40] sm:$0xff] %v432_v3  ;;  %v436_v5 = vld [vmem:[%s6656_s12 + $0x60] sm:$0xff] }
  0x12   : > { %435 = vst [vmem:[#allocation2 + $0x50] sm:$0xff] %v434_v4  ;;  %v438_v6 = vld [vmem:[%s6656_s12 + $0x70] sm:$0xff]  ;;  %v440_v7 = vld [vmem:[%s6656_s12 + $0x80] sm:$0xff]  ;;  %437 = vst [vmem:[#allocation2 + $0x60] sm:$0xff] %v436_v5 }
  0x13   : > { %439 = vst [vmem:[#allocation2 + $0x70] sm:$0xff] %v438_v6  ;;  %441 = vst [vmem:[#allocation2 + $0x80] sm:$0xff] %v440_v7  ;;  %v442_v8 = vld [vmem:[%s6656_s12 + $0x90] sm:$0xff]  ;;  %v444_v9 = vld [vmem:[%s6656_s12 + $0xa0] sm:$0xff] }
  0x14   : > { %v446_v10 = vld [vmem:[%s6656_s12 + $0xb0] sm:$0xff]  ;;  %443 = vst [vmem:[#allocation2 + $0x90] sm:$0xff] %v442_v8  ;;  %445 = vst [vmem:[#allocation2 + $0xa0] sm:$0xff] %v444_v9  ;;  %v448_v11 = vld [vmem:[%s6656_s12 + $0xc0] sm:$0xff] }
  0x15   : > { %447 = vst [vmem:[#allocation2 + $0xb0] sm:$0xff] %v446_v10  ;;  %v450_v12 = vld [vmem:[%s6656_s12 + $0xd0] sm:$0xff]  ;;  %v452_v13 = vld [vmem:[%s6656_s12 + $0xe0] sm:$0xff]  ;;  %449 = vst [vmem:[#allocation2 + $0xc0] sm:$0xff] %v448_v11 }
  0x16   : > { %451 = vst [vmem:[#allocation2 + $0xd0] sm:$0xff] %v450_v12  ;;  %453 = vst [vmem:[#allocation2 + $0xe0] sm:$0xff] %v452_v13  ;;  %v454_v14 = vld [vmem:[%s6656_s12 + $0xf0] sm:$0xff]  ;;  %v456_v15 = vld [vmem:[%s6656_s12 + $0x100] sm:$0xff] }
  0x17   : > { %v458_v16 = vld [vmem:[%s6656_s12 + $0x110] sm:$0xff]  ;;  %455 = vst [vmem:[#allocation2 + $0xf0] sm:$0xff] %v454_v14  ;;  %457 = vst [vmem:[#allocation2 + $0x100] sm:$0xff] %v456_v15  ;;  %v460_v17 = vld [vmem:[%s6656_s12 + $0x120] sm:$0xff] }
  0x18   : > { %459 = vst [vmem:[#allocation2 + $0x110] sm:$0xff] %v458_v16  ;;  %461 = vst [vmem:[#allocation2 + $0x120] sm:$0xff] %v460_v17  ;;  %v466_v18 = vld [vmem:[%s6656_s12 + $0x150] sm:$0xff]  ;;  %v468_v19 = vld [vmem:[%s6656_s12 + $0x160] sm:$0xff] }
  0x19   : > { %v470_v20 = vld [vmem:[%s6656_s12 + $0x170] sm:$0xff]  ;;  %467 = vst [vmem:[#allocation2 + $0x150] sm:$0xff] %v466_v18  ;;  %469 = vst [vmem:[#allocation2 + $0x160] sm:$0xff] %v468_v19  ;;  %v472_v21 = vld [vmem:[%s6656_s12 + $0x180] sm:$0xff] }
  0x1a   : > { %471 = vst [vmem:[#allocation2 + $0x170] sm:$0xff] %v470_v20  ;;  %v474_v22 = vld [vmem:[%s6656_s12 + $0x190] sm:$0xff]  ;;  %v476_v23 = vld [vmem:[%s6656_s12 + $0x1a0] sm:$0xff]  ;;  %473 = vst [vmem:[#allocation2 + $0x180] sm:$0xff] %v472_v21 }
  0x1b   : > { %475 = vst [vmem:[#allocation2 + $0x190] sm:$0xff] %v474_v22  ;;  %477 = vst [vmem:[#allocation2 + $0x1a0] sm:$0xff] %v476_v23  ;;  %v478_v24 = vld [vmem:[%s6656_s12 + $0x1b0] sm:$0xff]  ;;  %v480_v25 = vld [vmem:[%s6656_s12 + $0x1c0] sm:$0xff] }
  0x1c   : > { %v482_v26 = vld [vmem:[%s6656_s12 + $0x1d0] sm:$0xff]  ;;  %479 = vst [vmem:[#allocation2 + $0x1b0] sm:$0xff] %v478_v24  ;;  %481 = vst [vmem:[#allocation2 + $0x1c0] sm:$0xff] %v480_v25  ;;  %v484_v27 = vld [vmem:[%s6656_s12 + $0x1e0] sm:$0xff] }
  0x1d   : > { %483 = vst [vmem:[#allocation2 + $0x1d0] sm:$0xff] %v482_v26  ;;  %v486_v28 = vld [vmem:[%s6656_s12 + $0x1f0] sm:$0xff]  ;;  %v488_v29 = vld [vmem:[%s6656_s12 + $0x200] sm:$0xff]  ;;  %485 = vst [vmem:[#allocation2 + $0x1e0] sm:$0xff] %v484_v27 }
  0x1e   : > { %487 = vst [vmem:[#allocation2 + $0x1f0] sm:$0xff] %v486_v28  ;;  %489 = vst [vmem:[#allocation2 + $0x200] sm:$0xff] %v488_v29  ;;  %v490_v30 = vld [vmem:[%s6656_s12 + $0x210] sm:$0xff]  ;;  %v492_v31 = vld [vmem:[%s6656_s12 + $0x220] sm:$0xff] }
  0x1f   : > { %v494_v32 = vld [vmem:[%s6656_s12 + $0x230] sm:$0xff]  ;;  %491 = vst [vmem:[#allocation2 + $0x210] sm:$0xff] %v490_v30  ;;  %493 = vst [vmem:[#allocation2 + $0x220] sm:$0xff] %v492_v31  ;;  %v496_v33 = vld [vmem:[%s6656_s12 + $0x240] sm:$0xff] }
  0x20   : > { %495 = vst [vmem:[#allocation2 + $0x230] sm:$0xff] %v494_v32  ;;  %v498_v34 = vld [vmem:[%s6656_s12 + $0x250] sm:$0xff]  ;;  %v500_v35 = vld [vmem:[%s6656_s12 + $0x260] sm:$0xff]  ;;  %497 = vst [vmem:[#allocation2 + $0x240] sm:$0xff] %v496_v33 }
  0x21   : > { %499 = vst [vmem:[#allocation2 + $0x250] sm:$0xff] %v498_v34  ;;  %501 = vst [vmem:[#allocation2 + $0x260] sm:$0xff] %v500_v35  ;;  %v5425_v37 = vld [vmem:[%s6656_s12 + $0x28] sm:$0x3]  ;;  %v5427_v38 = vld [vmem:[%s6656_s12 + $0x38] sm:$0x3] }
  0x22   : > { %5424 = vst [vmem:[#allocation2 + $0x18] sm:$0x3] %v5423_v36  ;;  %v5429_v39 = vld [vmem:[%s6656_s12 + $0x48] sm:$0x3]  ;;  %5426 = vst [vmem:[#allocation2 + $0x28] sm:$0x3] %v5425_v37 }
  0x23   : > { %5428 = vst [vmem:[#allocation2 + $0x38] sm:$0x3] %v5427_v38  ;;  %5430 = vst [vmem:[#allocation2 + $0x48] sm:$0x3] %v5429_v39  ;;  %v5431_v40 = vld [vmem:[%s6656_s12 + $0x58] sm:$0x3] }
  0x24   : > { %v5433_v41 = vld [vmem:[%s6656_s12 + $0x68] sm:$0x3]  ;;  %v5435_v42 = vld [vmem:[%s6656_s12 + $0x78] sm:$0x3]  ;;  %5432 = vst [vmem:[#allocation2 + $0x58] sm:$0x3] %v5431_v40 }
  0x25   : > { %5434 = vst [vmem:[#allocation2 + $0x68] sm:$0x3] %v5433_v41  ;;  %5436 = vst [vmem:[#allocation2 + $0x78] sm:$0x3] %v5435_v42  ;;  %v5437_v43 = vld [vmem:[%s6656_s12 + $0x88] sm:$0x3] }
  0x26   : > { %v5439_v44 = vld [vmem:[%s6656_s12 + $0x98] sm:$0x3]  ;;  %v5441_v45 = vld [vmem:[%s6656_s12 + $0xa8] sm:$0x3]  ;;  %5438 = vst [vmem:[#allocation2 + $0x88] sm:$0x3] %v5437_v43 }
  0x27   : > { %5440 = vst [vmem:[#allocation2 + $0x98] sm:$0x3] %v5439_v44  ;;  %5442 = vst [vmem:[#allocation2 + $0xa8] sm:$0x3] %v5441_v45  ;;  %v5443_v46 = vld [vmem:[%s6656_s12 + $0xb8] sm:$0x3] }
  0x28   : > { %v5445_v47 = vld [vmem:[%s6656_s12 + $0xc8] sm:$0x3]  ;;  %v5447_v48 = vld [vmem:[%s6656_s12 + $0xd8] sm:$0x3]  ;;  %5444 = vst [vmem:[#allocation2 + $0xb8] sm:$0x3] %v5443_v46 }
  0x29   : > { %5446 = vst [vmem:[#allocation2 + $0xc8] sm:$0x3] %v5445_v47  ;;  %5448 = vst [vmem:[#allocation2 + $0xd8] sm:$0x3] %v5447_v48  ;;  %v5449_v49 = vld [vmem:[%s6656_s12 + $0xe8] sm:$0x3] }
  0x2a   : > { %v5451_v50 = vld [vmem:[%s6656_s12 + $0xf8] sm:$0x3]  ;;  %v5453_v51 = vld [vmem:[%s6656_s12 + $0x108] sm:$0x3]  ;;  %5450 = vst [vmem:[#allocation2 + $0xe8] sm:$0x3] %v5449_v49 }
  0x2b   : > { %5452 = vst [vmem:[#allocation2 + $0xf8] sm:$0x3] %v5451_v50  ;;  %5454 = vst [vmem:[#allocation2 + $0x108] sm:$0x3] %v5453_v51  ;;  %v5455_v52 = vld [vmem:[%s6656_s12 + $0x118] sm:$0x3] }
  0x2c   : > { %v5457_v53 = vld [vmem:[%s6656_s12 + $0x128] sm:$0x3]  ;;  %5456 = vst [vmem:[#allocation2 + $0x118] sm:$0x3] %v5455_v52  ;;  %v5463_v54 = vld [vmem:[%s6656_s12 + $0x158] sm:$0x3] }
  0x2d   : > { %5458 = vst [vmem:[#allocation2 + $0x128] sm:$0x3] %v5457_v53  ;;  %v5465_v55 = vld [vmem:[%s6656_s12 + $0x168] sm:$0x3]  ;;  %5464 = vst [vmem:[#allocation2 + $0x158] sm:$0x3] %v5463_v54 }
  0x2e   : > { %5466 = vst [vmem:[#allocation2 + $0x168] sm:$0x3] %v5465_v55  ;;  %v5467_v56 = vld [vmem:[%s6656_s12 + $0x178] sm:$0x3]  ;;  %v5469_v57 = vld [vmem:[%s6656_s12 + $0x188] sm:$0x3] }
  0x2f   : > { %v5471_v58 = vld [vmem:[%s6656_s12 + $0x198] sm:$0x3]  ;;  %5468 = vst [vmem:[#allocation2 + $0x178] sm:$0x3] %v5467_v56  ;;  %5470 = vst [vmem:[#allocation2 + $0x188] sm:$0x3] %v5469_v57 }
  0x30   : > { %5472 = vst [vmem:[#allocation2 + $0x198] sm:$0x3] %v5471_v58  ;;  %v5473_v59 = vld [vmem:[%s6656_s12 + $0x1a8] sm:$0x3]  ;;  %v5475_v60 = vld [vmem:[%s6656_s12 + $0x1b8] sm:$0x3] }
  0x31   : > { %v5477_v61 = vld [vmem:[%s6656_s12 + $0x1c8] sm:$0x3]  ;;  %5474 = vst [vmem:[#allocation2 + $0x1a8] sm:$0x3] %v5473_v59  ;;  %5476 = vst [vmem:[#allocation2 + $0x1b8] sm:$0x3] %v5475_v60 }
  0x32   : > { %5478 = vst [vmem:[#allocation2 + $0x1c8] sm:$0x3] %v5477_v61  ;;  %v5479_v62 = vld [vmem:[%s6656_s12 + $0x1d8] sm:$0x3]  ;;  %v5481_v63 = vld [vmem:[%s6656_s12 + $0x1e8] sm:$0x3] }
  0x33   : > { %v5483_v0 = vld [vmem:[%s6656_s12 + $0x1f8] sm:$0x3]  ;;  %5480 = vst [vmem:[#allocation2 + $0x1d8] sm:$0x3] %v5479_v62  ;;  %5482 = vst [vmem:[#allocation2 + $0x1e8] sm:$0x3] %v5481_v63 }
  0x34   : > { %5484 = vst [vmem:[#allocation2 + $0x1f8] sm:$0x3] %v5483_v0  ;;  %v5485_v1 = vld [vmem:[%s6656_s12 + $0x208] sm:$0x3]  ;;  %v5487_v2 = vld [vmem:[%s6656_s12 + $0x218] sm:$0x3] }
  0x35   : > { %v5489_v3 = vld [vmem:[%s6656_s12 + $0x228] sm:$0x3]  ;;  %5486 = vst [vmem:[#allocation2 + $0x208] sm:$0x3] %v5485_v1  ;;  %5488 = vst [vmem:[#allocation2 + $0x218] sm:$0x3] %v5487_v2 }
  0x36   : > { %5490 = vst [vmem:[#allocation2 + $0x228] sm:$0x3] %v5489_v3  ;;  %v5491_v4 = vld [vmem:[%s6656_s12 + $0x238] sm:$0x3]  ;;  %v5493_v5 = vld [vmem:[%s6656_s12 + $0x248] sm:$0x3] }
  0x37   : > { %v5495_v6 = vld [vmem:[%s6656_s12 + $0x258] sm:$0x3]  ;;  %5492 = vst [vmem:[#allocation2 + $0x238] sm:$0x3] %v5491_v4  ;;  %5494 = vst [vmem:[#allocation2 + $0x248] sm:$0x3] %v5493_v5 }
  0x38   : > { %5496 = vst [vmem:[#allocation2 + $0x258] sm:$0x3] %v5495_v6  ;;  %v5497_v7 = vld [vmem:[%s6656_s12 + $0x268] sm:$0x3] }
  0x39   : > { %5498 = vst [vmem:[#allocation2 + $0x268] sm:$0x3] %v5497_v7 }
  0x3a   : > { %597 = vsyncadd [#allocation4], 6400 }
  0x3b   : > { %6573 = dma.done.wait [#allocation4], 6400 }
  0x3c   : > { %6574 = vsyncadd [#allocation4], 4294960896  ;;  %v1198_v8 = vlaneseq  ;;  %v5755_v9 = vld [vmem:[#allocation2 + $0xf1] sm:$0xff]  ;;  %v5756_v10 = vld [vmem:[#allocation2 + $0x101] sm:$0xff]  ;;  %s6587_s17 = smov 4   ;;  %s6588_s18 = smov 8  }
  0x3d   : > { %v5763_v11 = vld [vmem:[#allocation2 + $0x191] sm:$0xff]  ;;  %v6413_v12 = vpack.i.bf16 %v5756_v10, %v5755_v9  ;;  %v5764_v13 = vld [vmem:[#allocation2 + $0x1a1] sm:$0xff]  ;;  %s6589_s21 = smov 12   ;;  %vm2655_vm1 = vcmask 1046528   ;;  %vm1045_vm2 = vcmask 31744   ;;  %vm1054_vm3 = vcmask 64512  }
  0x3e   : > { %v5757_v14 = vld [vmem:[#allocation2 + $0x111] sm:$0xff]  ;;  %v5758_v15 = vld [vmem:[#allocation2 + $0x121] sm:$0xff]  ;;  %v6735_v16 = vshrl.u32 %v1198_v8, 7  ;;  %v6423_v17 = vpack.i.bf16 %v5764_v13, %v5763_v11  ;;  %vm1063_vm4 = vcmask 97280   ;;  %vm1085_vm5 = vcmask 130048  }
  0x3f   : > { %v5765_v18 = vld [vmem:[#allocation2 + $0x1b1] sm:$0xff]  ;;  %v5766_v19 = vld [vmem:[#allocation2 + $0x1c1] sm:$0xff]  ;;  %6414 = vrot.lane.b32.xlu0 %v6413_v12, %s6587_s17  ;;  %v6418_v20 = vpack.i.bf16 %v5758_v15, %v5757_v14  ;;  %vm3198_vm6 = vcmask 1043456  }
  0x40   : > { %10544 = vst [vmem:[#allocation8_spill] sm:$0xff] %v6735_v16  ;;  %v5771_v21 = vld [vmem:[#allocation2 + $0x231] sm:$0xff]  ;;  %6424 = vrot.lane.b32.xlu1 %v6423_v17, %s6588_s18  ;;  %v6428_v22 = vpack.i.bf16 %v5766_v19, %v5765_v18  ;;  %v5772_v23 = vld [vmem:[#allocation2 + $0x241] sm:$0xff]  ;;  %v6748_v30 = vsub.s32 0, %v6735_v16  ;;  %v6751_v31 = vsub.s32 1, %v6735_v16  ;;  %v6754_v32 = vsub.s32 2, %v6735_v16 }
  0x41   : > { %v5773_v24 = vld [vmem:[#allocation2 + $0x251] sm:$0xff]  ;;  %v5774_v25 = vld [vmem:[#allocation2 + $0x261] sm:$0xff]  ;;  %v6763_v36 = vsub.s32 3, %v6735_v16  ;;  %v6766_v37 = vsub.s32 4, %v6735_v16  ;;  %v6769_v38 = vsub.s32 5, %v6735_v16  ;;  %v6433_v39 = vpack.i.bf16 %v5772_v23, %v5771_v21 }
  0x42   : > { %v6739_v26 = vld [vmem:[#allocation2 + $0xb1] sm:$0xff]  ;;  %v6741_v27 = vld [vmem:[#allocation2 + $0xc1] sm:$0xff]  ;;  %10547 = vst [vmem:[#allocation11_spill] sm:$0xff] %v6748_v30  ;;  %10548 = vst [vmem:[#allocation12_spill] sm:$0xff] %v6751_v31  ;;  %v6438_v40 = vpack.i.bf16 %v5774_v25, %v5773_v24  ;;  %v6779_v44 = vsub.s32 6, %v6735_v16  ;;  %v6782_v45 = vsub.s32 7, %v6735_v16 }
  0x43   : > { %v6743_v28 = vld [vmem:[#allocation2 + $0xd1] sm:$0xff]  ;;  %v6745_v29 = vld [vmem:[#allocation2 + $0xe1] sm:$0xff]  ;;  %10549 = vst [vmem:[#allocation13_spill] sm:$0xff] %v6754_v32  ;;  %10551 = vst [vmem:[#allocation15_spill] sm:$0xff] %v6763_v36  ;;  %6419 = vrot.lane.b32.xlu0 %v6418_v20, %s6587_s17  ;;  %v6443_v46 = vpack.i.bf16 %v6741_v27, %v6739_v26  ;;  %vm1835_vm0 = vcmp.eq.s32.totalorder %v6735_v16, 0 }
  0x44   : > { %10545 = vst [vmem:[#allocation9_spill] sm:$0xff] %v6743_v28  ;;  %10546 = vst [vmem:[#allocation10_spill] sm:$0xff] %v6745_v29  ;;  %v6756_v33 = vld [vmem:[#allocation2 + $0x151] sm:$0xff]  ;;  %v6758_v34 = vld [vmem:[#allocation2 + $0x161] sm:$0xff]  ;;  %6429 = vrot.lane.b32.xlu1 %v6428_v22, %s6588_s18  ;;  %v6448_v47 = vpack.i.bf16 %v6745_v29, %v6743_v28 }
  0x45   : > { %v6760_v35 = vld [vmem:[#allocation2 + $0x171] sm:$0xff]  ;;  %10552 = vst [vmem:[#allocation16_spill] sm:$0xff] %v6766_v37  ;;  %10553 = vst [vmem:[#allocation17_spill] sm:$0xff] %v6769_v38  ;;  %v6772_v41 = vld [vmem:[#allocation2 + $0x181] sm:$0xff] }
  0x46   : > { %10550 = vst [vmem:[#allocation14_spill] sm:$0xff] %v6760_v35  ;;  %10554 = vst [vmem:[#allocation18_spill] sm:$0xff] %v6772_v41  ;;  %v6774_v42 = vld [vmem:[#allocation2 + $0x1f1] sm:$0xff]  ;;  %v6776_v43 = vld [vmem:[#allocation2 + $0x221] sm:$0xff] }
  0x47   : > { %10555 = vst [vmem:[#allocation19_spill] sm:$0xff] %v6776_v43  ;;  %10556 = vst [vmem:[#allocation20_spill] sm:$0xff] %v6779_v44  ;;  %v6793_v50 = vld [vmem:[#allocation2 + $0x201] sm:$0xff]  ;;  %v6795_v51 = vld [vmem:[#allocation2 + $0x211] sm:$0xff]  ;;  %6434 = vrot.lane.b32.xlu0 %v6433_v39, %s6589_s21 }
  0x48   : > { %10557 = vst [vmem:[#allocation21_spill] sm:$0xff] %v6782_v45  ;;  %10558 = vst [vmem:[#allocation22_spill] sm:$0xff] %v6793_v50  ;;  %v1185_v52 = vld [vmem:[%s10382_s1] sm:$0xff]  ;;  %v6810_v58 = vld [vmem:[#allocation2 + $0x1f0] sm:$0xff]  ;;  %6439 = vrot.lane.b32.xlu1 %v6438_v40, %s6589_s21 }
  0x49   : > { %10559 = vst [vmem:[#allocation23_spill] sm:$0xff] %v6795_v51  ;;  %v5781_v55 = vld [vmem:[#allocation2 + $0x1e0] sm:$0xff]  ;;  %v6805_v56 = vrot.slane %v1185_v52, %v6748_v30  ;;  %v6808_v57 = vrot.slane %v1185_v52, %v6751_v31  ;;  %v6813_v61 = vrot.slane %v1185_v52, %v6754_v32  ;;  %v6816_v62 = vrot.slane %v1185_v52, %v6763_v36  ;;  %v6835_v7 = vld [vmem:[#allocation2 + $0x150] sm:$0xff]  ;;  %v5856_v19 = vld [vmem:[#allocation2 + $0xa8] sm:$0x1] }
  0x4a   : > { %v5789_v59 = vld [vmem:[#allocation2 + $0xa1] sm:$0xff]  ;;  %v6819_v63 = vrot.slane %v1185_v52, %v6766_v37  ;;  %v6822_v0 = vrot.slane %v1185_v52, %v6769_v38  ;;  %v6839_v9 = vld [vmem:[#allocation2 + $0x11] sm:$0xff]  ;;  %v6842_v10 = vrot.slane %v1185_v52, %v6779_v44  ;;  %v6845_v11 = vrot.slane %v1185_v52, %v6782_v45 }
  0x4b   : > { %10560 = vst [vmem:[#allocation24_spill] sm:$0xff] %v6805_v56  ;;  %10561 = vst [vmem:[#allocation25_spill] sm:$0xff] %v6808_v57  ;;  %v5797_v60 = vld [vmem:[#allocation2 + $0x1e1] sm:$0xff]  ;;  %v1202_v1 = vmul.f32 %v5781_v55, %v6805_v56  ;;  %v1203_v2 = vmul.f32 %v6810_v58, %v6805_v56  ;;  %v1224_v3 = vmul.f32 %v5789_v59, %v6808_v57  ;;  %v6863_v25 = vld [vmem:[#allocation2 + $0xb0] sm:$0xff]  ;;  %6444 = vrot.lane.b32.xlu0 %v6443_v46, %s6587_s17 }
  0x4c   : > { %v1225_v4 = vmul.f32 %v6739_v26, %v6808_v57  ;;  %v1252_v5 = vmul.f32 %v5797_v60, %v6813_v61  ;;  %v1253_v6 = vmul.f32 %v6774_v42, %v6813_v61  ;;  %v6837_v8 = vld [vmem:[#allocation2 + $0x160] sm:$0xff]  ;;  %v1280_v14 = vmul.f32 %v6835_v7, %v6816_v62  ;;  %v5858_v39 = vld [vmem:[#allocation2 + $0xb8] sm:$0x1]  ;;  %6449 = vrot.lane.b32.xlu1 %v6448_v47, %s6587_s17 }
  0x4d   : > { %v1232_v12 = vadd.f32 %v1224_v3, %v1202_v1  ;;  %v1281_v15 = vmul.f32 %v6837_v8, %v6816_v62  ;;  %v6851_v17 = vld [vmem:[#allocation2 + $0x21] sm:$0xff]  ;;  %v1308_v20 = vmul.f32 %v6839_v9, %v6819_v63  ;;  %v1336_v22 = vmul.f32 %v6756_v33, %v6822_v0  ;;  %v5872_v3 = vld [vmem:[#allocation2 + $0x1f8] sm:$0x1] }
  0x4e   : > { %v1233_v13 = vadd.f32 %v1225_v4, %v1203_v2  ;;  %v5855_v18 = vld [vmem:[#allocation2 + $0xa0] sm:$0xff]  ;;  %v1309_v21 = vmul.f32 %v6851_v17, %v6819_v63  ;;  %v1337_v23 = vmul.f32 %v6758_v34, %v6822_v0  ;;  %v1364_v60 = vmul.f32 %v6810_v58, %v6842_v10  ;;  %v5871_v2 = vld [vmem:[#allocation2 + $0x1e8] sm:$0x1] }
  0x4f   : > { %v6861_v24 = vld [vmem:[#allocation2 + $0x200] sm:$0xff]  ;;  %v1260_v40 = vadd.f32 %v1252_v5, %v1232_v12  ;;  %v6873_v4 = vmul.f32 %v6739_v26, %v6845_v11  ;;  %v1393_v54 = vmul.f32 %v6741_v27, %v6845_v11  ;;  %v1464_v46 = vmul.f32 %v5855_v18, %v6805_v56  ;;  %v5880_v18 = vld [vmem:[#allocation2 + $0xb9] sm:$0x1] }
  0x50   : > { %v1261_v52 = vadd.f32 %v1253_v6, %v1233_v13  ;;  %v1365_v1 = vmul.f32 %v6861_v24, %v6842_v10  ;;  %v1465_v5 = vmul.f32 %v5856_v19, %v6805_v56  ;;  %v5879_v6 = vld [vmem:[#allocation2 + $0xa9] sm:$0x1]  ;;  %v1466_v53 = vmul.f32 %v6863_v25, %v6805_v56 }
  0x51   : > { %v1288_v12 = vadd.f32 %v1280_v14, %v1260_v40  ;;  %v1467_v49 = vmul.f32 %v5858_v39, %v6805_v56  ;;  %v1488_v47 = vmul.f32 %v5781_v55, %v6808_v57  ;;  %v1489_v48 = vmul.f32 %v5871_v2, %v6808_v57  ;;  %v5888_v55 = vld [vmem:[#allocation2 + $0x18] sm:$0x1] }
  0x52   : > { %v1289_v13 = vadd.f32 %v1281_v15, %v1261_v52  ;;  %v1490_v29 = vmul.f32 %v6810_v58, %v6808_v57  ;;  %v1491_v28 = vmul.f32 %v5872_v3, %v6808_v57  ;;  %v10562_v14 = vpack.i.bf16 %v6758_v34, %v6756_v33 }
  0x53   : > { %v1316_v15 = vadd.f32 %v1308_v20, %v1288_v12  ;;  %v1528_v40 = vmul.f32 %v5789_v59, %v6813_v61  ;;  %v1529_v39 = vmul.f32 %v5879_v6, %v6813_v61  ;;  %v10563_v52 = vpack.i.bf16 %v6772_v41, %v6760_v35  ;;  %v6900_v59 = vld [vmem:[#allocation2 + $0x10] sm:$0xff]  ;;  %v5890_v6 = vld [vmem:[#allocation2 + $0x28] sm:$0x1] }
  0x54   : > { %6454 = vrot.lane.b32.xlu0 %v10562_v14, %s6588_s18  ;;  %v1317_v19 = vadd.f32 %v1309_v21, %v1289_v13  ;;  %v1504_v2 = vadd.f32 %v1488_v47, %v1464_v46  ;;  %v1505_v3 = vadd.f32 %v1489_v48, %v1465_v5  ;;  %v1506_v45 = vadd.f32 %v1490_v29, %v1466_v53  ;;  %v6905_v12 = vld [vmem:[%s10382_s1 + $0x8] ss:$0 sm:$0xff]  ;;  %v5903_v48 = vld [vmem:[#allocation2 + $0x158] sm:$0x1]  ;;  %v6916_v47 = vld [vmem:[#allocation2 + $0x20] sm:$0xff] }
  0x55   : > { %6459 = vrot.lane.b32.xlu1 %v10563_v52, %s6588_s18  ;;  %v1507_v44 = vadd.f32 %v1491_v28, %v1467_v49  ;;  %v1344_v38 = vadd.f32 %v1336_v22, %v1316_v15  ;;  %v1530_v20 = vmul.f32 %v6739_v26, %v6813_v61  ;;  %v1531_v21 = vmul.f32 %v5880_v18, %v6813_v61  ;;  %v5904_v18 = vld [vmem:[#allocation2 + $0x168] sm:$0x1] }
  0x56   : > { %v1345_v37 = vadd.f32 %v1337_v23, %v1317_v19  ;;  %v1544_v13 = vadd.f32 %v1528_v40, %v1504_v2  ;;  %v1545_v46 = vadd.f32 %v1529_v39, %v1505_v3  ;;  %v1576_v28 = vmul.f32 %v6900_v59, %v6816_v62 }
  0x57   : > { %v1577_v29 = vmul.f32 %v5888_v55, %v6816_v62  ;;  %v10564_v49 = vpack.i.bf16 %v6793_v50, %v6774_v42  ;;  %v1421_v22 = vmul.f32 %v6905_v12, %v6793_v50  ;;  %v1546_v23 = vadd.f32 %v1530_v20, %v1506_v45  ;;  %v5911_v55 = vld [vmem:[#allocation2 + $0x19] sm:$0x1] }
  0x58   : > { %v1373_v53 = vadd.f32 %v1365_v1, %v1345_v37  ;;  %v1547_v5 = vadd.f32 %v1531_v21, %v1507_v44  ;;  %v10565_v14 = vpack.i.bf16 %v6776_v43, %v6795_v51  ;;  %v1578_v15 = vmul.f32 %v6916_v47, %v6816_v62  ;;  %v5912_v21 = vld [vmem:[#allocation2 + $0x29] sm:$0x1] }
  0x59   : > { %6464 = vrot.lane.b32.xlu0 %v10564_v49, %s6589_s21  ;;  %v1579_v19 = vmul.f32 %v5890_v6, %v6816_v62  ;;  %v1592_v40 = vadd.f32 %v1576_v28, %v1544_v13  ;;  %v1593_v37 = vadd.f32 %v1577_v29, %v1545_v46  ;;  %v1372_v1 = vadd.f32 %v1364_v60, %v1344_v38 }
  0x5a   : > { %6469 = vrot.lane.b32.xlu1 %v10565_v14, %s6589_s21  ;;  %v1401_v39 = vadd.f32 %v1393_v54, %v1373_v53  ;;  %v1616_v44 = vmul.f32 %v6835_v7, %v6819_v63  ;;  %v1617_v45 = vmul.f32 %v5903_v48, %v6819_v63  ;;  %v1594_v52 = vadd.f32 %v1578_v15, %v1546_v23  ;;  %v5920_v54 = vld [vmem:[#allocation2 + $0xb8] sm:$0x1]  ;;  %v5922_v48 = vld [vmem:[#allocation2 + $0xc8] sm:$0x1] }
  0x5b   : > { %v1595_v2 = vadd.f32 %v1579_v19, %v1547_v5  ;;  %v1618_v3 = vmul.f32 %v6837_v8, %v6819_v63  ;;  %v1619_v20 = vmul.f32 %v5904_v18, %v6819_v63  ;;  %v1420_v6 = vmul.f32 %v6905_v12, %v6774_v42  ;;  %v5935_v18 = vld [vmem:[#allocation2 + $0x1f8] sm:$0x1]  ;;  %v6940_v19 = vld [vmem:[#allocation2 + $0xc0] sm:$0xff] }
  0x5c   : > { %v1632_v13 = vadd.f32 %v1616_v44, %v1592_v40  ;;  %v1633_v38 = vadd.f32 %v1617_v45, %v1593_v37  ;;  %v1656_v28 = vmul.f32 %v6839_v9, %v6822_v0  ;;  %v1657_v29 = vmul.f32 %v5911_v55, %v6822_v0  ;;  %v5936_v44 = vld [vmem:[#allocation2 + $0x208] sm:$0x1] }
  0x5d   : > { %v1634_v60 = vadd.f32 %v1618_v3, %v1594_v52  ;;  %v1635_v46 = vadd.f32 %v1619_v20, %v1595_v2  ;;  %v1400_v49 = vadd.f32 %v6873_v4, %v1372_v1  ;;  %v1429_v53 = vadd.f32 %v1421_v22, %v1401_v39  ;;  %v5943_v1 = vld [vmem:[#allocation2 + $0xb9] sm:$0x1]  ;;  %v5944_v20 = vld [vmem:[#allocation2 + $0xc9] sm:$0x1] }
  0x5e   : > { %v1658_v23 = vmul.f32 %v6851_v17, %v6822_v0  ;;  %v1659_v5 = vmul.f32 %v5912_v21, %v6822_v0  ;;  %v1672_v14 = vadd.f32 %v1656_v28, %v1632_v13  ;;  %v1673_v15 = vadd.f32 %v1657_v29, %v1633_v38 }
  0x5f   : > { %v1704_v40 = vmul.f32 %v6863_v25, %v6842_v10  ;;  %v1705_v37 = vmul.f32 %v5920_v54, %v6842_v10  ;;  %v1706_v4 = vmul.f32 %v6940_v19, %v6842_v10  ;;  %v1707_v22 = vmul.f32 %v5922_v48, %v6842_v10 }
  0x60   : > { %v1674_v45 = vadd.f32 %v1658_v23, %v1634_v60  ;;  %v1675_v55 = vadd.f32 %v1659_v5, %v1635_v46  ;;  %v1744_v2 = vmul.f32 %v6810_v58, %v6845_v11  ;;  %v1745_v3 = vmul.f32 %v5935_v18, %v6845_v11 }
  0x61   : > { %v1720_v39 = vadd.f32 %v1704_v40, %v1672_v14  ;;  %v1721_v52 = vadd.f32 %v1705_v37, %v1673_v15  ;;  %v1746_v38 = vmul.f32 %v6861_v24, %v6845_v11  ;;  %v1747_v54 = vmul.f32 %v5936_v44, %v6845_v11  ;;  %v6967_v44 = vld [vmem:[%s10383_s2] ss:$0 sm:$0xff] }
  0x62   : > { %v1722_v21 = vadd.f32 %v1706_v4, %v1674_v45  ;;  %v1723_v13 = vadd.f32 %v1707_v22, %v1675_v55  ;;  %v1784_v28 = vmul.f32 %v6905_v12, %v6739_v26  ;;  %v1785_v29 = vmul.f32 %v5943_v1, %v6905_v12 }
  0x63   : > { %v1760_v60 = vadd.f32 %v1744_v2, %v1720_v39  ;;  %v1761_v46 = vadd.f32 %v1745_v3, %v1721_v52  ;;  %v1786_v5 = vmul.f32 %v6905_v12, %v6741_v27  ;;  %v1787_v18 = vmul.f32 %v5944_v20, %v6905_v12 }
  0x64   : > { %v1762_v48 = vadd.f32 %v1746_v38, %v1722_v21  ;;  %v1763_v23 = vadd.f32 %v1747_v54, %v1723_v13  ;;  %v1869_v40 = vmul.f32 %v6835_v7, %v6805_v56  ;;  %v1870_v37 = vmul.f32 %v6837_v8, %v6805_v56 }
  0x65   : > { %v1800_v14 = vadd.f32 %v1784_v28, %v1760_v60  ;;  %v1801_v15 = vadd.f32 %v1785_v29, %v1761_v46  ;;  %v1888_v45 = vmul.f32 %v6839_v9, %v6808_v57  ;;  %v1889_v55 = vmul.f32 %v6851_v17, %v6808_v57  ;;  %v7000_v60 = vld [vmem:[#allocation2 + $0x170] sm:$0xff]  ;;  %v2120_v46 = vld [vmem:[#allocation2 + $0x18] sm:$0x1] }
  0x66   : > { %v6973_v4 = vadd.f32 %v1420_v6, %v1400_v49  ;;  %v6976_v22 = vadd.f32 %v6967_v44, %v1429_v53  ;;  %v1915_v1 = vmul.f32 %v6756_v33, %v6813_v61  ;;  %v1916_v39 = vmul.f32 %v6758_v34, %v6813_v61 }
  0x67   : > { %v6982_v52 = vadd.f32 %v1786_v5, %v1762_v48  ;;  %v6984_v2 = vadd.f32 %v1787_v18, %v1763_v23  ;;  %v1897_v3 = vadd.f32 %v1888_v45, %v1869_v40  ;;  %v1898_v20 = vadd.f32 %v1889_v55, %v1870_v37  ;;  %v7010_v5 = vld [vmem:[#allocation2 + $0x31] sm:$0xff]  ;;  %v2122_v18 = vld [vmem:[#allocation2 + $0x28] sm:$0x1] }
  0x68   : > { %10566 = vst [vmem:[#allocation26_spill] sm:$0xff] %v6973_v4  ;;  %v6987_v21 = vadd.f32 %v6967_v44, %v1800_v14  ;;  %v6990_v6 = vadd.f32 %v6967_v44, %v1801_v15  ;;  %v1942_v49 = vmul.f32 %v6810_v58, %v6816_v62  ;;  %v1943_v33 = vmul.f32 %v6861_v24, %v6816_v62  ;;  %v6024_v37 = vld [vmem:[#allocation2 + $0x158] sm:$0x1]  ;;  %v6025_v45 = vld [vmem:[#allocation2 + $0x168] sm:$0x1] }
  0x69   : > { %v1924_v53 = vadd.f32 %v1915_v1, %v1897_v3  ;;  %v1925_v13 = vadd.f32 %v1916_v39, %v1898_v20  ;;  %v1969_v38 = vmul.f32 %v6739_v26, %v6819_v63  ;;  %v1970_v54 = vmul.f32 %v6741_v27, %v6819_v63  ;;  %v2199_v20 = vld [vmem:[#allocation2 + $0x19] sm:$0x1] }
  0x6a   : > { %v1996_v28 = vmul.f32 %v6774_v42, %v6822_v0  ;;  %v1997_v29 = vmul.f32 %v6793_v50, %v6822_v0  ;;  %v2023_v48 = vmul.f32 %v6837_v8, %v6842_v10  ;;  %v2024_v23 = vmul.f32 %v7000_v60, %v6842_v10 }
  0x6b   : > { %v1951_v14 = vadd.f32 %v1942_v49, %v1924_v53  ;;  %v1952_v15 = vadd.f32 %v1943_v33, %v1925_v13  ;;  %v2050_v40 = vmul.f32 %v6851_v17, %v6845_v11  ;;  %v2051_v42 = vmul.f32 %v7010_v5, %v6845_v11 }
  0x6c   : > { %v2077_v55 = vmul.f32 %v6905_v12, %v6758_v34  ;;  %v2078_v1 = vmul.f32 %v6905_v12, %v6760_v35  ;;  %v2137_v39 = vmul.f32 %v6900_v59, %v6805_v56  ;;  %v2138_v3 = vmul.f32 %v2120_v46, %v6805_v56  ;;  %v2200_v35 = vld [vmem:[#allocation2 + $0x29] sm:$0x1] }
  0x6d   : > { %v1978_v49 = vadd.f32 %v1969_v38, %v1951_v14  ;;  %v1979_v33 = vadd.f32 %v1970_v54, %v1952_v15  ;;  %v2139_v53 = vmul.f32 %v6916_v47, %v6805_v56  ;;  %v2140_v13 = vmul.f32 %v2122_v18, %v6805_v56  ;;  %v6035_v14 = vld [vmem:[#allocation2 + $0xb8] sm:$0x1] }
  0x6e   : > { %v2164_v43 = vmul.f32 %v6835_v7, %v6808_v57  ;;  %v2165_v34 = vmul.f32 %v6024_v37, %v6808_v57  ;;  %v2166_v41 = vmul.f32 %v6837_v8, %v6808_v57  ;;  %v2167_v59 = vmul.f32 %v6025_v45, %v6808_v57  ;;  %v6037_v57 = vld [vmem:[#allocation2 + $0xc8] sm:$0x1] }
  0x6f   : > { %v2005_v46 = vadd.f32 %v1996_v28, %v1978_v49  ;;  %v2006_v51 = vadd.f32 %v1997_v29, %v1979_v33  ;;  %v2209_v38 = vmul.f32 %v6839_v9, %v6813_v61  ;;  %v2210_v54 = vmul.f32 %v2199_v20, %v6813_v61  ;;  %v6051_v49 = vld [vmem:[#allocation2 + $0x1f8] sm:$0x1] }
  0x70   : > { %v2182_v18 = vadd.f32 %v2164_v43, %v2137_v39  ;;  %v2183_v15 = vadd.f32 %v2165_v34, %v2138_v3  ;;  %v2184_v50 = vadd.f32 %v2166_v41, %v2139_v53  ;;  %v2185_v7 = vadd.f32 %v2167_v59, %v2140_v13 }
  0x71   : > { %v2032_v56 = vadd.f32 %v2023_v48, %v2005_v46  ;;  %v2033_v37 = vadd.f32 %v2024_v23, %v2006_v51  ;;  %v2211_v4 = vmul.f32 %v6851_v17, %v6813_v61  ;;  %v2212_v45 = vmul.f32 %v2200_v35, %v6813_v61  ;;  %v6052_v48 = vld [vmem:[#allocation2 + $0x208] sm:$0x1] }
  0x72   : > { %v2227_v28 = vadd.f32 %v2209_v38, %v2182_v18  ;;  %v2228_v29 = vadd.f32 %v2210_v54, %v2183_v15  ;;  %v2263_v9 = vmul.f32 %v6863_v25, %v6816_v62  ;;  %v2264_v20 = vmul.f32 %v6035_v14, %v6816_v62  ;;  %v6073_v54 = vld [vmem:[#allocation2 + $0x38] sm:$0x1] }
  0x73   : > { %v2059_v43 = vadd.f32 %v2050_v40, %v2032_v56  ;;  %v2060_v39 = vadd.f32 %v2051_v42, %v2033_v37  ;;  %v2229_v41 = vadd.f32 %v2211_v4, %v2184_v50  ;;  %v2230_v3 = vadd.f32 %v2212_v45, %v2185_v7  ;;  %v6060_v4 = vld [vmem:[#allocation2 + $0xb9] sm:$0x1]  ;;  %v6061_v40 = vld [vmem:[#allocation2 + $0xc9] sm:$0x1]  ;;  %v6087_v7 = vld [vmem:[#allocation2 + $0x168] sm:$0x1] }
  0x74   : > { %v2265_v51 = vmul.f32 %v6940_v19, %v6816_v62  ;;  %v2266_v23 = vmul.f32 %v6037_v57, %v6816_v62  ;;  %v2281_v35 = vadd.f32 %v2263_v9, %v2227_v28  ;;  %v2282_v33 = vadd.f32 %v2264_v20, %v2228_v29  ;;  %v7065_v28 = vld [vmem:[#allocation2 + $0x30] sm:$0xff]  ;;  %v6088_v29 = vld [vmem:[#allocation2 + $0x178] sm:$0x1] }
  0x75   : > { %v7046_v53 = vadd.f32 %v6967_v44, %v6982_v52  ;;  %v7050_v25 = vadd.f32 %v6967_v44, %v6984_v2  ;;  %v2308_v50 = vmul.f32 %v6810_v58, %v6819_v63  ;;  %v2309_v56 = vmul.f32 %v6051_v49, %v6819_v63  ;;  %v6071_v52 = vld [vmem:[#allocation2 + $0x28] sm:$0x1] }
  0x76   : > { %v2283_v42 = vadd.f32 %v2265_v51, %v2229_v41  ;;  %v2284_v13 = vadd.f32 %v2266_v23, %v2230_v3  ;;  %v2310_v57 = vmul.f32 %v6861_v24, %v6819_v63  ;;  %v2311_v34 = vmul.f32 %v6052_v48, %v6819_v63  ;;  %v6097_v51 = vld [vmem:[#allocation2 + $0x39] sm:$0x1] }
  0x77   : > { %v2086_v59 = vadd.f32 %v2077_v55, %v2059_v43  ;;  %v2087_v2 = vadd.f32 %v2078_v1, %v2060_v39  ;;  %v2326_v46 = vadd.f32 %v2308_v50, %v2281_v35  ;;  %v2327_v38 = vadd.f32 %v2309_v56, %v2282_v33  ;;  %v6096_v43 = vld [vmem:[#allocation2 + $0x29] sm:$0x1]  ;;  %v7082_v50 = vld [vmem:[%s10384_s3] sm:$0xff] }
  0x78   : > { %v2328_v58 = vadd.f32 %v2310_v57, %v2283_v42  ;;  %v2329_v14 = vadd.f32 %v2311_v34, %v2284_v13  ;;  %v2353_v18 = vmul.f32 %v6739_v26, %v6822_v0  ;;  %v2354_v15 = vmul.f32 %v6060_v4, %v6822_v0 }
  0x79   : > { %v2355_v37 = vmul.f32 %v6741_v27, %v6822_v0  ;;  %v2356_v45 = vmul.f32 %v6061_v40, %v6822_v0  ;;  %v2407_v55 = vmul.f32 %v6916_v47, %v6842_v10  ;;  %v2408_v1 = vmul.f32 %v6071_v52, %v6842_v10 }
  0x7a   : > { %v2371_v9 = vadd.f32 %v2353_v18, %v2326_v46  ;;  %v2372_v20 = vadd.f32 %v2354_v15, %v2327_v38  ;;  %v2409_v26 = vmul.f32 %v7065_v28, %v6842_v10  ;;  %v2410_v49 = vmul.f32 %v6073_v54, %v6842_v10 }
  0x7b   : > { %v2373_v39 = vadd.f32 %v2355_v37, %v2328_v58  ;;  %v2374_v41 = vadd.f32 %v2356_v45, %v2329_v14  ;;  %v2452_v3 = vmul.f32 %v6837_v8, %v6845_v11  ;;  %v2453_v48 = vmul.f32 %v6087_v7, %v6845_v11 }
  0x7c   : > { %v2425_v47 = vadd.f32 %v2407_v55, %v2371_v9  ;;  %v2426_v23 = vadd.f32 %v2408_v1, %v2372_v20  ;;  %v2454_v35 = vmul.f32 %v7000_v60, %v6845_v11  ;;  %v2455_v33 = vmul.f32 %v6088_v29, %v6845_v11 }
  0x7d   : > { %v2427_v56 = vadd.f32 %v2409_v26, %v2373_v39  ;;  %v2428_v4 = vadd.f32 %v2410_v49, %v2374_v41  ;;  %v2497_v8 = vmul.f32 %v6905_v12, %v6851_v17  ;;  %v2498_v40 = vmul.f32 %v6096_v43, %v6905_v12 }
  0x7e   : > { %v2470_v42 = vadd.f32 %v2452_v3, %v2425_v47  ;;  %v2471_v13 = vadd.f32 %v2453_v48, %v2426_v23  ;;  %v2499_v57 = vmul.f32 %v7010_v5, %v6905_v12  ;;  %v2500_v34 = vmul.f32 %v6097_v51, %v6905_v12 }
  0x7f   : > { %v2472_v52 = vadd.f32 %v2454_v35, %v2427_v56  ;;  %v2473_v46 = vadd.f32 %v2455_v33, %v2428_v4  ;;  %v7092_v38 = vrot.slane %v7082_v50, %v6748_v30  ;;  %v7096_v54 = vrot.slane %v7082_v50, %v6751_v31  ;;  %v10570_v35 = vld [vmem:[#allocation16_spill] sm:$0xff] }
  0x80   : > { %v7099_v17 = vadd.f32 %v6967_v44, %v2086_v59  ;;  %v2515_v58 = vadd.f32 %v2497_v8, %v2470_v42  ;;  %v2516_v14 = vadd.f32 %v2498_v40, %v2471_v13  ;;  %v7103_v18 = vrot.slane %v7082_v50, %v6754_v32  ;;  %v10572_v40 = vld [vmem:[#allocation17_spill] sm:$0xff] }
  0x81   : > { %10567 = vst [vmem:[#allocation27_spill] sm:$0xff] %v7092_v38  ;;  %10568 = vst [vmem:[#allocation28_spill] sm:$0xff] %v7096_v54  ;;  %v2517_v15 = vadd.f32 %v2499_v57, %v2472_v52  ;;  %v2518_v7 = vadd.f32 %v2500_v34, %v2473_v46  ;;  %v2591_v37 = vmul.f32 0.0, %v7092_v38  ;;  %v2603_v45 = vmul.f32 0.0, %v7096_v54 }
  0x82   : > { %v1841_v55 = vsel %vm1835_vm0, 0.0, %v6987_v21  ;;  %v2533_v59 = vadd.f32 %v6967_v44, %v2515_v58  ;;  %v7112_v1 = vadd.f32 %v6967_v44, %v2516_v14  ;;  %v7116_v29 = vrot.slane %v7082_v50, %v6763_v36 }
  0x83   : > { %v7119_v9 = vadd.f32 %v6967_v44, %v2087_v2  ;;  %v2535_v20 = vadd.f32 %v6967_v44, %v2517_v15  ;;  %v2604_v26 = vmul.f32 %v7096_v54, %v7099_v17  ;;  %v2623_v49 = vmul.f32 0.0, %v7103_v18 }
  0x84   : > { %10569 = vst [vmem:[#allocation29_spill] sm:$0xff] %v7116_v29  ;;  %v1843_v21 = vsel %vm1835_vm0, 0.0, %v7046_v53  ;;  %v7130_v43 = vsel %vm1835_vm0, 0.0, %v2533_v59  ;;  %v2611_v39 = vadd.f32 %v2603_v45, %v2591_v37  ;;  %v2626_v2 = vmul.f32 %v7103_v18, %v7112_v1  ;;  %v10574_v59 = vld [vmem:[#allocation20_spill] sm:$0xff] }
  0x85   : > { %v2536_v41 = vadd.f32 %v6967_v44, %v2518_v7  ;;  %v2592_v3 = vmul.f32 %v7092_v38, %v7130_v43  ;;  %v2605_v48 = vmul.f32 %v7096_v54, %v7119_v9  ;;  %v2625_v51 = vmul.f32 %v7103_v18, %v7130_v43 }
  0x86   : > { %v2656_v53 = vrot.slane %v2623_v49, 1  ;;  %v2660_v47 = vrot.slane %v2626_v2, 1  ;;  %v2700_v23 = vmul.f32 %v7116_v29, %v1841_v55  ;;  %v7144_v33 = vrot.slane %v7082_v50, %v10570_v35 }
  0x87   : > { %v7148_v56 = vsel %vm1835_vm0, 0.0, %v2535_v20  ;;  %v2612_v4 = vadd.f32 %v2604_v26, %v2592_v3  ;;  %v2659_v8 = vrot.slane %v2625_v51, 1  ;;  %v7152_v42 = vrot.slane %v7082_v50, %v10572_v40  ;;  %v7176_v26 = vld [vmem:[%s10384_s3 + $0x8] ss:$0 sm:$0xff]  ;;  %v10577_v3 = vld [vmem:[#allocation26_spill] sm:$0xff] }
  0x88   : > { %10571 = vst [vmem:[#allocation30_spill] sm:$0xff] %v7144_v33  ;;  %v2593_v13 = vmul.f32 %v7092_v38, %v7148_v56  ;;  %v7157_v57 = vmul.f32 %v7103_v18, %v2536_v41  ;;  %v2688_v34 = vadd.f32 %v2656_v53, %v2611_v39  ;;  %v2701_v52 = vmul.f32 %v7116_v29, %v1843_v21  ;;  %v7264_v29 = vld [vmem:[#allocation2 + $0x180] sm:$0xff] }
  0x89   : > { %10573 = vst [vmem:[#allocation17_spill] sm:$0xff] %v7152_v42  ;;  %v2661_v46 = vsel %vm2655_vm1, %v2659_v8, %v2660_v47  ;;  %v2740_v58 = vmul.f32 %v7152_v42, %v1841_v55  ;;  %v2741_v14 = vmul.f32 %v7152_v42, %v6990_v6  ;;  %v2742_v15 = vmul.f32 %v7152_v42, %v1843_v21 }
  0x8a   : > { %v2689_v7 = vadd.f32 %v2661_v46, %v2612_v4  ;;  %v2721_v37 = vmul.f32 %v7144_v33, %v6976_v22  ;;  %v2743_v45 = vmul.f32 %v7152_v42, %v7050_v25  ;;  %v7171_v20 = vrot.slane %v7082_v50, %v10574_v59  ;;  %10576 = vst [vmem:[#allocation32_spill] sm:$0xff] %v7176_v26  ;;  %v10578_v4 = vld [vmem:[#allocation21_spill] sm:$0xff] }
  0x8b   : > { %v2772_v49 = vrot.slane %v2740_v58, 1  ;;  %v2773_v39 = vrot.slane %v2741_v14, 1  ;;  %v2775_v2 = vrot.slane %v2742_v15, 1  ;;  %v1440_v51 = vadd.f32 %v6967_v44, %v10577_v3 }
  0x8c   : > { %10575 = vst [vmem:[#allocation31_spill] sm:$0xff] %v7171_v20  ;;  %v2709_v53 = vadd.f32 %v2701_v52, %v2689_v7  ;;  %v2776_v47 = vrot.slane %v2743_v45, 1  ;;  %v7182_v8 = vrot.slane %v7082_v50, %v10578_v4  ;;  %v7184_v46 = vadd.f32 %v2605_v48, %v2593_v13 }
  0x8d   : > { %v2708_v38 = vadd.f32 %v2700_v23, %v2688_v34  ;;  %v2774_v42 = vsel %vm2655_vm1, %v2772_v49, %v2773_v39  ;;  %v2817_v14 = vmul.f32 %v7171_v20, %v7148_v56  ;;  %v7193_v52 = vmul.f32 %v7176_v26, %v7112_v1 }
  0x8e   : > { %10579 = vst [vmem:[#allocation26_spill] sm:$0xff] %v7182_v8  ;;  %v2729_v54 = vadd.f32 %v2721_v37, %v2709_v53  ;;  %v2777_v58 = vsel %vm2655_vm1, %v2775_v2, %v2776_v47  ;;  %v2837_v50 = vmul.f32 %v7182_v8, %v7119_v9  ;;  %v7198_v48 = vmul.f32 %v7176_v26, %v2536_v41 }
  0x8f   : > { %10580 = vst [vmem:[#allocation33_spill] sm:$0xff] %v7193_v52  ;;  %v3029_v13 = vrot.slane %v1841_v55, 1  ;;  %v3030_v23 = vrot.slane %v6990_v6, 1  ;;  %v3032_v15 = vrot.slane %v1843_v21, 1  ;;  %v3033_v7 = vrot.slane %v7050_v25, 1  ;;  %v7212_v25 = vld [vmem:[%s10382_s1 + $0x10] sm:$0xff] }
  0x90   : > { %10581 = vst [vmem:[#allocation34_spill] sm:$0xff] %v7198_v48  ;;  %v2805_v34 = vadd.f32 %v2777_v58, %v2729_v54  ;;  %v3085_v37 = vrot.slane %v7130_v43, 1  ;;  %v3086_v49 = vrot.slane %v7112_v1, 1  ;;  %v3088_v39 = vrot.slane %v7148_v56, 1  ;;  %v7275_v48 = vld [vmem:[#allocation2 + $0x41] sm:$0xff]  ;;  %v10595_v52 = vld [vmem:[#allocation14_spill] sm:$0xff] }
  0x91   : > { %v3031_v45 = vsel %vm2655_vm1, %v3029_v13, %v3030_v23  ;;  %v3089_v2 = vrot.slane %v2536_v41, 1  ;;  %v2816_v3 = vmul.f32 %v7171_v20, %v7130_v43  ;;  %v3034_v55 = vsel %vm2655_vm1, %v3032_v15, %v3033_v7 }
  0x92   : > { %v2825_v53 = vadd.f32 %v2817_v14, %v2805_v34  ;;  %v3061_v6 = vmax.f32 %v1440_v51, %v3031_v45  ;;  %v7216_v54 = vmul.f32 %v7176_v26, %v7130_v43  ;;  %v3062_v1 = vmax.f32 %v6976_v22, %v3034_v55  ;;  %v10588_v45 = vld [vmem:[#allocation24_spill] sm:$0xff] }
  0x93   : > { %v3087_v21 = vsel %vm2655_vm1, %v3085_v37, %v3086_v49  ;;  %v3090_v41 = vsel %vm2655_vm1, %v3088_v39, %v3089_v2  ;;  %v7225_v58 = vmul.f32 %v7176_v26, %v7148_v56  ;;  %v2836_v43 = vmul.f32 %v7182_v8, %v7099_v17  ;;  %v7245_v37 = vld [vmem:[#allocation2 + $0x210] sm:$0xff]  ;;  %v10589_v2 = vld [vmem:[#allocation25_spill] sm:$0xff] }
  0x94   : > { %10582 = vst [vmem:[#allocation35_spill] sm:$0xff] %v7216_v54  ;;  %v7221_v47 = vadd.f32 %v2837_v50, %v2825_v53  ;;  %v3117_v14 = vmax.f32 %v7099_v17, %v3087_v21  ;;  %v3118_v13 = vmax.f32 %v7119_v9, %v3090_v41  ;;  %v7235_v34 = vrot.slane %v7212_v25, %v6748_v30  ;;  %v10591_v21 = vld [vmem:[#allocation22_spill] sm:$0xff]  ;;  %v7283_v54 = vld [vmem:[#allocation2 + $0x220] sm:$0xff] }
  0x95   : > { %10584 = vst [vmem:[#allocation37_spill] sm:$0xff] %v7225_v58  ;;  %v7239_v7 = vrot.slane %v7212_v25, %v6751_v31  ;;  %v7243_v9 = vrot.slane %v7212_v25, %v6754_v32  ;;  %v2720_v17 = vmul.f32 %v7144_v33, %v1440_v51  ;;  %v1204_v49 = vmul.f32 %v6861_v24, %v10588_v45  ;;  %v10597_v31 = vld [vmem:[#allocation10_spill] sm:$0xff] }
  0x96   : > { %10583 = vst [vmem:[#allocation36_spill] sm:$0xff] %v7221_v47  ;;  %10585 = vst [vmem:[#allocation38_spill] sm:$0xff] %v7235_v34  ;;  %v3125_v50 = vmax.f32 %v3061_v6, %v3117_v14  ;;  %v3126_v15 = vmax.f32 %v3062_v1, %v3118_v13  ;;  %v1205_v39 = vmul.f32 %v7245_v37, %v10588_v45  ;;  %v10590_v6 = vld [vmem:[#allocation9_spill] sm:$0xff]  ;;  %v10592_v14 = vld [vmem:[#allocation23_spill] sm:$0xff] }
  0x97   : > { %10586 = vst [vmem:[#allocation39_spill] sm:$0xff] %v7239_v7  ;;  %10587 = vst [vmem:[#allocation40_spill] sm:$0xff] %v7243_v9  ;;  %v1226_v53 = vmul.f32 %v6741_v27, %v10589_v2  ;;  %v1227_v1 = vmul.f32 %v10590_v6, %v10589_v2  ;;  %v1254_v41 = vmul.f32 %v10591_v21, %v6813_v61  ;;  %v5881_v7 = vld [vmem:[#allocation2 + $0xc9] sm:$0x1] }
  0x98   : > { %v6473_v55 = vpack.i.bf16 %v3126_v15, %v3125_v50  ;;  %v1255_v13 = vmul.f32 %v10592_v14, %v6813_v61  ;;  %v7262_v51 = vrot.slane %v7212_v25, %v6763_v36  ;;  %v2728_v22 = vadd.f32 %v2720_v17, %v2708_v38 }
  0x99   : > { %v1234_v23 = vadd.f32 %v1226_v53, %v1204_v49  ;;  %v1282_v50 = vmul.f32 %v7000_v60, %v6816_v62  ;;  %v7270_v15 = vrot.slane %v7212_v25, %v10570_v35  ;;  %v1235_v21 = vadd.f32 %v1227_v1, %v1205_v39  ;;  %v7285_v39 = vld [vmem:[#allocation2 + $0xd0] sm:$0xff] }
  0x9a   : > { %10593 = vst [vmem:[#allocation25_spill] sm:$0xff] %v7262_v51  ;;  %6474 = vrot.lane.b32.xlu0 %v6473_v55, %s6587_s17  ;;  %v1283_v47 = vmul.f32 %v7264_v29, %v6816_v62  ;;  %v1310_v38 = vmul.f32 %v7010_v5, %v6819_v63  ;;  %v2804_v17 = vadd.f32 %v2774_v42, %v2728_v22  ;;  %v5860_v55 = vld [vmem:[#allocation2 + $0xc8] sm:$0x1]  ;;  %v10596_v35 = vld [vmem:[#allocation18_spill] sm:$0xff] }
  0x9b   : > { %10594 = vst [vmem:[#allocation9_spill] sm:$0xff] %v7270_v15  ;;  %v1262_v49 = vadd.f32 %v1254_v41, %v1234_v23  ;;  %v1311_v53 = vmul.f32 %v7275_v48, %v6819_v63  ;;  %v1338_v58 = vmul.f32 %v10595_v52, %v6822_v0  ;;  %v1263_v1 = vadd.f32 %v1255_v13, %v1235_v21  ;;  %v5862_v23 = vld [vmem:[#allocation2 + $0xd8] sm:$0x1]  ;;  %v5873_v15 = vld [vmem:[#allocation2 + $0x208] sm:$0x1] }
  0x9c   : > { %v1339_v36 = vmul.f32 %v10596_v35, %v6822_v0  ;;  %v1366_v32 = vmul.f32 %v7245_v37, %v6842_v10  ;;  %v1367_v42 = vmul.f32 %v7283_v54, %v6842_v10  ;;  %v2824_v22 = vadd.f32 %v2816_v3, %v2804_v17  ;;  %v5874_v13 = vld [vmem:[#allocation2 + $0x218] sm:$0x1] }
  0x9d   : > { %v1290_v41 = vadd.f32 %v1282_v50, %v1262_v49  ;;  %v1394_v52 = vmul.f32 %v10590_v6, %v6845_v11  ;;  %v1395_v30 = vmul.f32 %v10597_v31, %v6845_v11  ;;  %v1291_v21 = vadd.f32 %v1283_v47, %v1263_v1  ;;  %v5882_v1 = vld [vmem:[#allocation2 + $0xd9] sm:$0x1] }
  0x9e   : > { %v1468_v35 = vmul.f32 %v6940_v19, %v10588_v45  ;;  %v1469_v51 = vmul.f32 %v5860_v55, %v10588_v45  ;;  %v1470_v9 = vmul.f32 %v7285_v39, %v10588_v45  ;;  %v7302_v3 = vadd.f32 %v2836_v43, %v2824_v22 }
  0x9f   : > { %v1318_v50 = vadd.f32 %v1310_v38, %v1290_v41  ;;  %v1471_v17 = vmul.f32 %v5862_v23, %v10588_v45  ;;  %v1492_v31 = vmul.f32 %v6861_v24, %v10589_v2  ;;  %v1319_v49 = vadd.f32 %v1311_v53, %v1291_v21  ;;  %v5892_v23 = vld [vmem:[#allocation2 + $0x38] sm:$0x1] }
  0xa0   : > { %10598 = vst [vmem:[#allocation22_spill] sm:$0xff] %v7302_v3  ;;  %v1493_v47 = vmul.f32 %v5873_v15, %v10589_v2  ;;  %v1494_v19 = vmul.f32 %v7245_v37, %v10589_v2  ;;  %v1495_v55 = vmul.f32 %v5874_v13, %v10589_v2  ;;  %v1532_v43 = vmul.f32 %v6741_v27, %v6813_v61  ;;  %v10599_v21 = vld [vmem:[#allocation19_spill] sm:$0xff]  ;;  %v7319_v27 = vld [vmem:[#allocation2 + $0x40] sm:$0xff] }
  0xa1   : > { %v1346_v34 = vadd.f32 %v1338_v58, %v1318_v50  ;;  %v1508_v26 = vadd.f32 %v1492_v31, %v1468_v35  ;;  %v1533_v38 = vmul.f32 %v5881_v7, %v6813_v61  ;;  %v1347_v22 = vadd.f32 %v1339_v36, %v1319_v49  ;;  %v5894_v35 = vld [vmem:[#allocation2 + $0x48] sm:$0x1] }
  0xa2   : > { %v1509_v41 = vadd.f32 %v1493_v47, %v1469_v51  ;;  %v1510_v24 = vadd.f32 %v1494_v19, %v1470_v9  ;;  %v1511_v53 = vadd.f32 %v1495_v55, %v1471_v17  ;;  %v1423_v15 = vmul.f32 %v6905_v12, %v10599_v21  ;;  %v5905_v9 = vld [vmem:[#allocation2 + $0x178] sm:$0x1]  ;;  %v5906_v47 = vld [vmem:[#allocation2 + $0x188] sm:$0x1] }
  0xa3   : > { %v1534_v3 = vmul.f32 %v10590_v6, %v6813_v61  ;;  %v1535_v13 = vmul.f32 %v5882_v1, %v6813_v61  ;;  %v1548_v58 = vadd.f32 %v1532_v43, %v1508_v26  ;;  %v1375_v50 = vadd.f32 %v1367_v42, %v1347_v22 }
  0xa4   : > { %v1549_v31 = vadd.f32 %v1533_v38, %v1509_v41  ;;  %v1580_v36 = vmul.f32 %v7065_v28, %v6816_v62  ;;  %v1581_v7 = vmul.f32 %v5892_v23, %v6816_v62  ;;  %v1374_v51 = vadd.f32 %v1366_v32, %v1346_v34  ;;  %v5913_v34 = vld [vmem:[#allocation2 + $0x39] sm:$0x1]  ;;  %v5914_v41 = vld [vmem:[#allocation2 + $0x49] sm:$0x1] }
  0xa5   : > { %v1550_v17 = vadd.f32 %v1534_v3, %v1510_v24  ;;  %v1551_v49 = vadd.f32 %v1535_v13, %v1511_v53  ;;  %v1582_v6 = vmul.f32 %v7319_v27, %v6816_v62  ;;  %v1403_v19 = vadd.f32 %v1395_v30, %v1375_v50 }
  0xa6   : > { %v1583_v26 = vmul.f32 %v5894_v35, %v6816_v62  ;;  %v1596_v42 = vadd.f32 %v1580_v36, %v1548_v58  ;;  %v1597_v55 = vadd.f32 %v1581_v7, %v1549_v31  ;;  %v7329_v1 = vrot.slane %v7212_v25, %v10572_v40  ;;  %v5924_v58 = vld [vmem:[#allocation2 + $0xd8] sm:$0x1]  ;;  %v5926_v35 = vld [vmem:[#allocation2 + $0xe8] sm:$0x1] }
  0xa7   : > { %v1598_v43 = vadd.f32 %v1582_v6, %v1550_v17  ;;  %v1620_v38 = vmul.f32 %v7000_v60, %v6819_v63  ;;  %v1621_v32 = vmul.f32 %v5905_v9, %v6819_v63  ;;  %v1422_v3 = vmul.f32 %v6905_v12, %v10592_v14  ;;  %v5938_v6 = vld [vmem:[#allocation2 + $0x228] sm:$0x1] }
  0xa8   : > { %10600 = vst [vmem:[#allocation23_spill] sm:$0xff] %v7329_v1  ;;  %v1599_v23 = vadd.f32 %v1583_v26, %v1551_v49  ;;  %v1622_v30 = vmul.f32 %v7264_v29, %v6819_v63  ;;  %v1623_v22 = vmul.f32 %v5906_v47, %v6819_v63  ;;  %v1402_v24 = vadd.f32 %v1394_v52, %v1374_v51  ;;  %v7345_v49 = vld [vmem:[#allocation2 + $0xe0] sm:$0xff]  ;;  %v5937_v51 = vld [vmem:[#allocation2 + $0x218] sm:$0x1] }
  0xa9   : > { %v1636_v53 = vadd.f32 %v1620_v38, %v1596_v42  ;;  %v1637_v21 = vadd.f32 %v1621_v32, %v1597_v55  ;;  %v1660_v13 = vmul.f32 %v7010_v5, %v6822_v0  ;;  %v1431_v50 = vadd.f32 %v1423_v15, %v1403_v19  ;;  %v5945_v32 = vld [vmem:[#allocation2 + $0xd9] sm:$0x1] }
  0xaa   : > { %v1638_v31 = vadd.f32 %v1622_v30, %v1598_v43  ;;  %v1639_v36 = vadd.f32 %v1623_v22, %v1599_v23  ;;  %v1661_v14 = vmul.f32 %v5913_v34, %v6822_v0  ;;  %v1662_v7 = vmul.f32 %v7275_v48, %v6822_v0  ;;  %v5946_v34 = vld [vmem:[#allocation2 + $0xe9] sm:$0x1] }
  0xab   : > { %v1663_v9 = vmul.f32 %v5914_v41, %v6822_v0  ;;  %v1676_v17 = vadd.f32 %v1660_v13, %v1636_v53  ;;  %v1708_v52 = vmul.f32 %v7285_v39, %v6842_v10  ;;  %v1709_v15 = vmul.f32 %v5924_v58, %v6842_v10  ;;  %v6546_v58 = vld [vmem:[#allocation2 + $0xd1] sm:$0xff] }
  0xac   : > { %v1677_v47 = vadd.f32 %v1661_v14, %v1637_v21  ;;  %v1710_v19 = vmul.f32 %v7345_v49, %v6842_v10  ;;  %v1711_v26 = vmul.f32 %v5926_v35, %v6842_v10  ;;  %v1678_v42 = vadd.f32 %v1662_v7, %v1638_v31  ;;  %v6547_v14 = vld [vmem:[#allocation2 + $0xe1] sm:$0xff] }
  0xad   : > { %v1679_v55 = vadd.f32 %v1663_v9, %v1639_v36  ;;  %v1724_v43 = vadd.f32 %v1708_v52, %v1676_v17  ;;  %v1748_v38 = vmul.f32 %v7245_v37, %v6845_v11  ;;  %v1749_v30 = vmul.f32 %v5937_v51, %v6845_v11  ;;  %v5963_v17 = vld [vmem:[#allocation2 + $0x171] sm:$0xff] }
  0xae   : > { %v1725_v23 = vadd.f32 %v1709_v15, %v1677_v47  ;;  %v1750_v22 = vmul.f32 %v7283_v54, %v6845_v11  ;;  %v1751_v41 = vmul.f32 %v5938_v6, %v6845_v11  ;;  %v1726_v53 = vadd.f32 %v1710_v19, %v1678_v42  ;;  %v5964_v15 = vld [vmem:[#allocation2 + $0x181] sm:$0xff] }
  0xaf   : > { %v1727_v21 = vadd.f32 %v1711_v26, %v1679_v55  ;;  %v1764_v13 = vadd.f32 %v1748_v38, %v1724_v43  ;;  %v1788_v35 = vmul.f32 %v6546_v58, %v6905_v12  ;;  %v1789_v36 = vmul.f32 %v5945_v32, %v6905_v12 }
  0xb0   : > { %v1765_v31 = vadd.f32 %v1749_v30, %v1725_v23  ;;  %v1790_v7 = vmul.f32 %v6547_v14, %v6905_v12  ;;  %v1791_v9 = vmul.f32 %v5946_v34, %v6905_v12  ;;  %v1766_v52 = vadd.f32 %v1750_v22, %v1726_v53  ;;  %v5990_v53 = vld [vmem:[#allocation2 + $0x211] sm:$0xff] }
  0xb1   : > { %v1767_v51 = vadd.f32 %v1751_v41, %v1727_v21  ;;  %v1804_v47 = vadd.f32 %v1788_v35, %v1764_v13  ;;  %v1871_v6 = vmul.f32 %v7000_v60, %v10588_v45  ;;  %v1872_v26 = vmul.f32 %v7264_v29, %v10588_v45 }
  0xb2   : > { %v1805_v19 = vadd.f32 %v1789_v36, %v1765_v31  ;;  %v1890_v42 = vmul.f32 %v7010_v5, %v10589_v2  ;;  %v1891_v55 = vmul.f32 %v7275_v48, %v10589_v2  ;;  %v7373_v43 = vrot.slane %v7212_v25, %v10574_v59  ;;  %v7396_v36 = vld [vmem:[#allocation2 + $0xe1] sm:$0xff] }
  0xb3   : > { %v7375_v38 = vadd.f32 %v1422_v3, %v1402_v24  ;;  %v1806_v32 = vadd.f32 %v1790_v7, %v1766_v52  ;;  %v1917_v34 = vmul.f32 %v5963_v17, %v6813_v61  ;;  %v7379_v23 = vadd.f32 %v6967_v44, %v1431_v50  ;;  %v7392_v24 = vld [vmem:[#allocation2 + $0xd1] sm:$0xff]  ;;  %v7400_v7 = vld [vmem:[#allocation2 + $0x221] sm:$0xff] }
  0xb4   : > { %10601 = vst [vmem:[#allocation14_spill] sm:$0xff] %v7373_v43  ;;  %v1899_v30 = vadd.f32 %v1890_v42, %v1871_v6  ;;  %v1900_v22 = vadd.f32 %v1891_v55, %v1872_v26  ;;  %v1918_v41 = vmul.f32 %v5964_v15, %v6813_v61  ;;  %v7382_v21 = vadd.f32 %v1791_v9, %v1767_v51  ;;  %v7412_v6 = vld [vmem:[#allocation2 + $0x51] sm:$0xff] }
  0xb5   : > { %10602 = vst [vmem:[#allocation18_spill] sm:$0xff] %v7375_v38  ;;  %10603 = vst [vmem:[#allocation10_spill] sm:$0xff] %v7379_v23  ;;  %v7385_v13 = vadd.f32 %v6967_v44, %v1804_v47  ;;  %v7388_v58 = vadd.f32 %v6967_v44, %v1805_v19  ;;  %v1944_v3 = vmul.f32 %v7245_v37, %v6816_v62  ;;  %v7410_v47 = vld [vmem:[#allocation2 + $0x190] sm:$0xff]  ;;  %v2124_v19 = vld [vmem:[#allocation2 + $0x38] sm:$0x1] }
  0xb6   : > { %v1926_v50 = vadd.f32 %v1917_v34, %v1899_v30  ;;  %v1927_v35 = vadd.f32 %v1918_v41, %v1900_v22  ;;  %v1945_v31 = vmul.f32 %v7283_v54, %v6816_v62  ;;  %v1971_v14 = vmul.f32 %v7392_v24, %v6819_v63  ;;  %10604 = vst [vmem:[#allocation19_spill] sm:$0xff] %v7400_v7  ;;  %v7418_v34 = vld [vmem:[#allocation2 + $0x191] sm:$0xff]  ;;  %v2126_v30 = vld [vmem:[#allocation2 + $0x48] sm:$0x1] }
  0xb7   : > { %v7403_v9 = vadd.f32 %v6967_v44, %v1806_v32  ;;  %v1972_v17 = vmul.f32 %v7396_v36, %v6819_v63  ;;  %v1998_v52 = vmul.f32 %v5990_v53, %v6822_v0  ;;  %v1999_v51 = vmul.f32 %v7400_v7, %v6822_v0  ;;  %10605 = vst [vmem:[#allocation41_spill] sm:$0xff] %v7418_v34  ;;  %v6026_v22 = vld [vmem:[#allocation2 + $0x178] sm:$0x1]  ;;  %v2201_v7 = vld [vmem:[#allocation2 + $0x39] sm:$0x1] }
  0xb8   : > { %v1953_v26 = vadd.f32 %v1944_v3, %v1926_v50  ;;  %v1954_v42 = vadd.f32 %v1945_v31, %v1927_v35  ;;  %v2025_v55 = vmul.f32 %v7264_v29, %v6842_v10  ;;  %v2026_v32 = vmul.f32 %v7410_v47, %v6842_v10  ;;  %v6027_v50 = vld [vmem:[#allocation2 + $0x188] sm:$0x1] }
  0xb9   : > { %v2052_v41 = vmul.f32 %v7275_v48, %v6845_v11  ;;  %v2053_v53 = vmul.f32 %v7412_v6, %v6845_v11  ;;  %v2079_v59 = vmul.f32 %v5964_v15, %v6905_v12  ;;  %v2080_v3 = vmul.f32 %v7418_v34, %v6905_v12 }
  0xba   : > { %v1980_v35 = vadd.f32 %v1971_v14, %v1953_v26  ;;  %v1981_v31 = vadd.f32 %v1972_v17, %v1954_v42  ;;  %v2141_v43 = vmul.f32 %v7065_v28, %v10588_v45  ;;  %v2142_v1 = vmul.f32 %v2124_v19, %v10588_v45  ;;  %v2202_v17 = vld [vmem:[#allocation2 + $0x49] sm:$0x1] }
  0xbb   : > { %v2143_v8 = vmul.f32 %v7319_v27, %v10588_v45  ;;  %v2144_v20 = vmul.f32 %v2126_v30, %v10588_v45  ;;  %v2168_v15 = vmul.f32 %v7000_v60, %v10589_v2  ;;  %v2169_v38 = vmul.f32 %v6026_v22, %v10589_v2  ;;  %v6039_v45 = vld [vmem:[#allocation2 + $0xd8] sm:$0x1] }
  0xbc   : > { %v2007_v12 = vadd.f32 %v1998_v52, %v1980_v35  ;;  %v2008_v34 = vadd.f32 %v1999_v51, %v1981_v31  ;;  %v2170_v14 = vmul.f32 %v7264_v29, %v10589_v2  ;;  %v2171_v28 = vmul.f32 %v6027_v50, %v10589_v2  ;;  %v6041_v52 = vld [vmem:[#allocation2 + $0xe8] sm:$0x1] }
  0xbd   : > { %v2186_v19 = vadd.f32 %v2168_v15, %v2141_v43  ;;  %v2187_v26 = vadd.f32 %v2169_v38, %v2142_v1  ;;  %v2213_v42 = vmul.f32 %v7010_v5, %v6813_v61  ;;  %v2214_v30 = vmul.f32 %v2201_v7, %v6813_v61  ;;  %v6053_v7 = vld [vmem:[#allocation2 + $0x218] sm:$0x1] }
  0xbe   : > { %v2034_v33 = vadd.f32 %v2025_v55, %v2007_v12  ;;  %v2035_v60 = vadd.f32 %v2026_v32, %v2008_v34  ;;  %v2188_v23 = vadd.f32 %v2170_v14, %v2143_v8  ;;  %v2189_v22 = vadd.f32 %v2171_v28, %v2144_v20  ;;  %v6054_v34 = vld [vmem:[#allocation2 + $0x228] sm:$0x1]  ;;  %v6063_v28 = vld [vmem:[#allocation2 + $0xe9] sm:$0x1] }
  0xbf   : > { %v2215_v51 = vmul.f32 %v7275_v48, %v6813_v61  ;;  %v2216_v35 = vmul.f32 %v2202_v17, %v6813_v61  ;;  %v2231_v50 = vadd.f32 %v2213_v42, %v2186_v19  ;;  %v2232_v31 = vadd.f32 %v2214_v30, %v2187_v26 }
  0xc0   : > { %v2061_v43 = vadd.f32 %v2052_v41, %v2034_v33  ;;  %v2062_v1 = vadd.f32 %v2053_v53, %v2035_v60  ;;  %v2267_v5 = vmul.f32 %v7285_v39, %v6816_v62  ;;  %v2268_v38 = vmul.f32 %v6039_v45, %v6816_v62  ;;  %v6062_v41 = vld [vmem:[#allocation2 + $0xd9] sm:$0x1] }
  0xc1   : > { %v2233_v55 = vadd.f32 %v2215_v51, %v2188_v23  ;;  %v2234_v32 = vadd.f32 %v2216_v35, %v2189_v22  ;;  %v2269_v20 = vmul.f32 %v7345_v49, %v6816_v62  ;;  %v2270_v8 = vmul.f32 %v6041_v52, %v6816_v62  ;;  %v6077_v52 = vld [vmem:[#allocation2 + $0x58] sm:$0x1]  ;;  %v6089_v35 = vld [vmem:[#allocation2 + $0x188] sm:$0x1] }
  0xc2   : > { %v7453_v15 = vadd.f32 %v6967_v44, %v7382_v21  ;;  %v7458_v33 = vsel %vm1835_vm0, 0.0, %v7385_v13  ;;  %v2285_v39 = vadd.f32 %v2267_v5, %v2231_v50  ;;  %v2286_v45 = vadd.f32 %v2268_v38, %v2232_v31  ;;  %v6075_v13 = vld [vmem:[#allocation2 + $0x48] sm:$0x1]  ;;  %v6090_v5 = vld [vmem:[#allocation2 + $0x198] sm:$0x1] }
  0xc3   : > { %v2287_v23 = vadd.f32 %v2269_v20, %v2233_v55  ;;  %v2288_v53 = vadd.f32 %v2270_v8, %v2234_v32  ;;  %v2312_v12 = vmul.f32 %v7245_v37, %v6819_v63  ;;  %v2313_v14 = vmul.f32 %v6053_v7, %v6819_v63  ;;  %v6098_v20 = vld [vmem:[#allocation2 + $0x49] sm:$0x1] }
  0xc4   : > { %v2088_v17 = vadd.f32 %v2079_v59, %v2061_v43  ;;  %v2089_v19 = vadd.f32 %v2080_v3, %v2062_v1  ;;  %v2314_v21 = vmul.f32 %v7283_v54, %v6819_v63  ;;  %v2315_v26 = vmul.f32 %v6054_v34, %v6819_v63  ;;  %v7472_v43 = vld [vmem:[#allocation2 + $0x50] sm:$0xff] }
  0xc5   : > { %v2330_v42 = vadd.f32 %v2312_v12, %v2285_v39  ;;  %v2331_v30 = vadd.f32 %v2313_v14, %v2286_v45  ;;  %v2357_v60 = vmul.f32 %v7392_v24, %v6822_v0  ;;  %v2358_v22 = vmul.f32 %v6062_v41, %v6822_v0  ;;  %v6099_v41 = vld [vmem:[#allocation2 + $0x59] sm:$0x1] }
  0xc6   : > { %v2332_v37 = vadd.f32 %v2314_v21, %v2287_v23  ;;  %v2333_v51 = vadd.f32 %v2315_v26, %v2288_v53  ;;  %v2359_v59 = vmul.f32 %v7396_v36, %v6822_v0  ;;  %v2360_v3 = vmul.f32 %v6063_v28, %v6822_v0  ;;  %v7489_v21 = vld [vmem:[%s10382_s1 + $0x8] ss:$0 sm:$0xff] }
  0xc7   : > { %v2375_v50 = vadd.f32 %v2357_v60, %v2330_v42  ;;  %v2376_v31 = vadd.f32 %v2358_v22, %v2331_v30  ;;  %v2411_v1 = vmul.f32 %v7319_v27, %v6842_v10  ;;  %v2412_v24 = vmul.f32 %v6075_v13, %v6842_v10 }
  0xc8   : > { %v2377_v38 = vadd.f32 %v2359_v59, %v2332_v37  ;;  %v2378_v7 = vadd.f32 %v2360_v3, %v2333_v51  ;;  %v2413_v55 = vmul.f32 %v7472_v43, %v6842_v10  ;;  %v2414_v32 = vmul.f32 %v6077_v52, %v6842_v10 }
  0xc9   : > { %v2429_v8 = vadd.f32 %v2411_v1, %v2375_v50  ;;  %v2430_v34 = vadd.f32 %v2412_v24, %v2376_v31  ;;  %v2456_v39 = vmul.f32 %v7264_v29, %v6845_v11  ;;  %v2457_v45 = vmul.f32 %v6089_v35, %v6845_v11 }
  0xca   : > { %v2431_v27 = vadd.f32 %v2413_v55, %v2377_v38  ;;  %v2432_v23 = vadd.f32 %v2414_v32, %v2378_v7  ;;  %v2458_v53 = vmul.f32 %v7410_v47, %v6845_v11  ;;  %v2459_v12 = vmul.f32 %v6090_v5, %v6845_v11  ;;  %v10607_v38 = vld [vmem:[#allocation17_spill] sm:$0xff] }
  0xcb   : > { %v2474_v14 = vadd.f32 %v2456_v39, %v2429_v8  ;;  %v2475_v28 = vadd.f32 %v2457_v45, %v2430_v34  ;;  %v2501_v29 = vmul.f32 %v7489_v21, %v7275_v48  ;;  %v2502_v26 = vmul.f32 %v7489_v21, %v6098_v20  ;;  %v10608_v8 = vld [vmem:[#allocation27_spill] sm:$0xff]  ;;  %v10609_v45 = vld [vmem:[#allocation29_spill] sm:$0xff] }
  0xcc   : > { %v2476_v13 = vadd.f32 %v2458_v53, %v2431_v27  ;;  %v2477_v42 = vadd.f32 %v2459_v12, %v2432_v23  ;;  %v2503_v30 = vmul.f32 %v7489_v21, %v7412_v6  ;;  %v2504_v60 = vmul.f32 %v7489_v21, %v6099_v41 }
  0xcd   : > { %v7498_v22 = vadd.f32 %v6967_v44, %v2088_v17  ;;  %v7501_v52 = vadd.f32 %v6967_v44, %v2089_v19  ;;  %v2519_v37 = vadd.f32 %v2501_v29, %v2474_v14  ;;  %v2520_v51 = vadd.f32 %v2502_v26, %v2475_v28  ;;  %v10606_v17 = vld [vmem:[#allocation28_spill] sm:$0xff] }
  0xce   : > { %v1847_v48 = vsel %vm1835_vm0, 0.0, %v7403_v9  ;;  %v2521_v59 = vadd.f32 %v2503_v30, %v2476_v13  ;;  %v2522_v3 = vadd.f32 %v2504_v60, %v2477_v42  ;;  %v2627_v35 = vmul.f32 %v7103_v18, %v7148_v56 }
  0xcf   : > { %v2537_v50 = vadd.f32 %v6967_v44, %v2519_v37  ;;  %v7510_v31 = vadd.f32 %v6967_v44, %v2520_v51  ;;  %v2606_v19 = vmul.f32 %v10606_v17, %v7498_v22  ;;  %v2607_v1 = vmul.f32 %v10606_v17, %v7501_v52  ;;  %v6323_v51 = vld [vmem:[%s10384_s3 + $0x10] sm:$0xff] }
  0xd0   : > { %v2539_v24 = vadd.f32 %v6967_v44, %v2521_v59  ;;  %v7518_v9 = vadd.f32 %v6967_v44, %v2522_v3  ;;  %v2662_v5 = vrot.slane %v2627_v35, 1  ;;  %v2744_v56 = vmul.f32 %v10607_v38, %v7458_v33 }
  0xd1   : > { %v7524_v7 = vsel %vm1835_vm0, 0.0, %v2537_v50  ;;  %v2630_v55 = vmul.f32 %v7103_v18, %v7510_v31  ;;  %v2745_v32 = vmul.f32 %v10607_v38, %v7388_v58  ;;  %v2746_v20 = vmul.f32 %v10607_v38, %v1847_v48 }
  0xd2   : > { %v7533_v44 = vsel %vm1835_vm0, 0.0, %v2539_v24  ;;  %v2594_v34 = vmul.f32 %v10608_v8, %v7524_v7  ;;  %v2629_v39 = vmul.f32 %v7103_v18, %v7524_v7  ;;  %v2702_v41 = vmul.f32 %v10609_v45, %v7458_v33  ;;  %v10615_v24 = vld [vmem:[#allocation30_spill] sm:$0xff] }
  0xd3   : > { %v7543_v27 = vmul.f32 %v7103_v18, %v7518_v9  ;;  %v10611_v23 = vrot.slane %v7157_v57, 1  ;;  %v2666_v12 = vrot.slane %v2630_v55, 1  ;;  %v2747_v14 = vmul.f32 %v10607_v38, %v7453_v15  ;;  %v10616_v55 = vld [vmem:[#allocation18_spill] sm:$0xff] }
  0xd4   : > { %v2595_v28 = vmul.f32 %v10608_v8, %v7533_v44  ;;  %v2614_v29 = vadd.f32 %v2606_v19, %v2594_v34  ;;  %v2665_v26 = vrot.slane %v2629_v39, 1  ;;  %v2703_v42 = vmul.f32 %v10609_v45, %v1847_v48  ;;  %v10614_v19 = vld [vmem:[#allocation10_spill] sm:$0xff]  ;;  %v5876_v34 = vld [vmem:[#allocation2 + $0x238] sm:$0x1] }
  0xd5   : > { %10610 = vst [vmem:[#allocation42_spill] sm:$0xff] %v7543_v27  ;;  %v2664_v53 = vsel %vm2655_vm1, %v2662_v5, %v10611_v23  ;;  %v2778_v30 = vrot.slane %v2744_v56, 1  ;;  %v2779_v60 = vrot.slane %v2745_v32, 1  ;;  %v2781_v37 = vrot.slane %v2746_v20, 1 }
  0xd6   : > { %v2690_v13 = vadd.f32 %v2664_v53, %v7184_v46  ;;  %v7556_v57 = vrot.slane %v7212_v25, %v10578_v4  ;;  %v2667_v59 = vsel %vm2655_vm1, %v2665_v26, %v2666_v12  ;;  %v2782_v35 = vrot.slane %v2747_v14, 1  ;;  %v7571_v25 = vld [vmem:[%s10383_s2] ss:$0 sm:$0xff]  ;;  %v10619_v14 = vld [vmem:[#allocation26_spill] sm:$0xff] }
  0xd7   : > { %v7563_v50 = vrot.slane %v6323_v51, %v10572_v40  ;;  %v2691_v46 = vadd.f32 %v2667_v59, %v2614_v29  ;;  %v2723_v5 = vmul.f32 %v10615_v24, %v10614_v19  ;;  %v2780_v56 = vsel %vm2655_vm1, %v2778_v30, %v2779_v60 }
  0xd8   : > { %10612 = vst [vmem:[#allocation43_spill] sm:$0xff] %v7556_v57  ;;  %v2710_v3 = vadd.f32 %v2702_v41, %v2690_v13  ;;  %v1442_v32 = vadd.f32 %v7571_v25, %v10616_v55  ;;  %v7575_v20 = vadd.f32 %v2607_v1, %v2595_v28  ;;  %v2783_v40 = vsel %vm2655_vm1, %v2781_v37, %v2782_v35  ;;  %v10618_v41 = vld [vmem:[#allocation31_spill] sm:$0xff] }
  0xd9   : > { %10613 = vst [vmem:[#allocation44_spill] sm:$0xff] %v7563_v50  ;;  %v2711_v39 = vadd.f32 %v2703_v42, %v2691_v46  ;;  %v2818_v23 = vmul.f32 %v10618_v41, %v7524_v7  ;;  %v2819_v53 = vmul.f32 %v10618_v41, %v7533_v44  ;;  %v3035_v12 = vrot.slane %v7458_v33, 1  ;;  %v7677_v41 = vld [vmem:[#allocation2 + $0x241] sm:$0xff] }
  0xda   : > { %10617 = vst [vmem:[#allocation10_spill] sm:$0xff] %v7575_v20  ;;  %v2838_v29 = vmul.f32 %v10619_v14, %v7498_v22  ;;  %v3036_v26 = vrot.slane %v7388_v58, 1  ;;  %v3038_v1 = vrot.slane %v1847_v48, 1  ;;  %v3039_v28 = vrot.slane %v7453_v15, 1  ;;  %10628 = vst [vmem:[#allocation45_spill] sm:$0xff] %v7677_v41 }
  0xdb   : > { %v2731_v13 = vadd.f32 %v2723_v5, %v2711_v39  ;;  %v2839_v42 = vmul.f32 %v10619_v14, %v7501_v52  ;;  %v3091_v30 = vrot.slane %v7524_v7, 1  ;;  %v3092_v60 = vrot.slane %v7510_v31, 1  ;;  %v7601_v39 = vld [vmem:[#allocation2 + $0x230] sm:$0xff]  ;;  %v5884_v14 = vld [vmem:[#allocation2 + $0xf9] sm:$0x1] }
  0xdc   : > { %v3037_v37 = vsel %vm2655_vm1, %v3035_v12, %v3036_v26  ;;  %v3040_v33 = vsel %vm2655_vm1, %v3038_v1, %v3039_v28  ;;  %v3094_v51 = vrot.slane %v7533_v44, 1  ;;  %v3095_v59 = vrot.slane %v7518_v9, 1  ;;  %v10620_v12 = vld [vmem:[#allocation24_spill] sm:$0xff]  ;;  %v7605_v1 = vld [vmem:[#allocation2 + $0x231] sm:$0xff] }
  0xdd   : > { %v2807_v58 = vadd.f32 %v2783_v40, %v2731_v13  ;;  %v3063_v48 = vmax.f32 %v1442_v32, %v3037_v37  ;;  %v3064_v15 = vmax.f32 %v10614_v19, %v3040_v33  ;;  %v3093_v35 = vsel %vm2655_vm1, %v3091_v30, %v3092_v60  ;;  %v7610_v13 = vld [vmem:[#allocation2 + $0xf1] sm:$0xff] }
  0xde   : > { %v3096_v46 = vsel %vm2655_vm1, %v3094_v51, %v3095_v59  ;;  %v3119_v5 = vmax.f32 %v7498_v22, %v3093_v35  ;;  %v2722_v55 = vmul.f32 %v10615_v24, %v1442_v32  ;;  %v1206_v26 = vmul.f32 %v7283_v54, %v10620_v12  ;;  %v10621_v37 = vld [vmem:[#allocation19_spill] sm:$0xff] }
  0xdf   : > { %v2827_v28 = vadd.f32 %v2819_v53, %v2807_v58  ;;  %v3120_v40 = vmax.f32 %v7501_v52, %v3096_v46  ;;  %v1207_v19 = vmul.f32 %v7601_v39, %v10620_v12  ;;  %v1228_v22 = vmul.f32 %v7396_v36, %v10589_v2  ;;  %v7622_v58 = vld [vmem:[#allocation2 + $0x1a0] sm:$0xff]  ;;  %v5896_v24 = vld [vmem:[#allocation2 + $0x58] sm:$0x1] }
  0xe0   : > { %v3127_v30 = vmax.f32 %v3063_v48, %v3119_v5  ;;  %v2730_v32 = vadd.f32 %v2722_v55, %v2710_v3  ;;  %v1229_v60 = vmul.f32 %v7610_v13, %v10589_v2  ;;  %v1256_v33 = vmul.f32 %v10621_v37, %v6813_v61  ;;  %v10623_v5 = vld [vmem:[#allocation32_spill] sm:$0xff] }
  0xe1   : > { %v7618_v51 = vadd.f32 %v2839_v42, %v2827_v28  ;;  %v3128_v53 = vmax.f32 %v3064_v15, %v3120_v40  ;;  %v1236_v52 = vadd.f32 %v1228_v22, %v1206_v26  ;;  %v1257_v59 = vmul.f32 %v7605_v1, %v6813_v61  ;;  %v7632_v26 = vld [vmem:[#allocation2 + $0x61] sm:$0xff] }
  0xe2   : > { %v2806_v35 = vadd.f32 %v2780_v56, %v2730_v32  ;;  %v1237_v46 = vadd.f32 %v1229_v60, %v1207_v19  ;;  %v1284_v3 = vmul.f32 %v7410_v47, %v6816_v62  ;;  %v1285_v48 = vmul.f32 %v7622_v58, %v6816_v62  ;;  %v7642_v32 = vld [vmem:[#allocation2 + $0x1a1] sm:$0xff] }
  0xe3   : > { %10622 = vst [vmem:[#allocation18_spill] sm:$0xff] %v7618_v51  ;;  %v7630_v55 = vmul.f32 %v10623_v5, %v7524_v7  ;;  %v6478_v42 = vpack.i.bf16 %v3128_v53, %v3127_v30  ;;  %v1264_v15 = vadd.f32 %v1256_v33, %v1236_v52  ;;  %v1312_v28 = vmul.f32 %v7412_v6, %v6819_v63  ;;  %v5864_v7 = vld [vmem:[#allocation2 + $0xe8] sm:$0x1]  ;;  %v7649_v53 = vld [vmem:[#allocation2 + $0x240] sm:$0xff]  ;;  %v5866_v52 = vld [vmem:[#allocation2 + $0xf8] sm:$0x1] }
  0xe4   : > { %v7638_v56 = vmul.f32 %v10623_v5, %v7510_v31  ;;  %v2826_v40 = vadd.f32 %v2818_v23, %v2806_v35  ;;  %v1265_v19 = vadd.f32 %v1257_v59, %v1237_v46  ;;  %v1313_v22 = vmul.f32 %v7632_v26, %v6819_v63  ;;  %v10626_v60 = vld [vmem:[#allocation41_spill] sm:$0xff]  ;;  %v7653_v23 = vld [vmem:[#allocation2 + $0xf0] sm:$0xff] }
  0xe5   : > { %10624 = vst [vmem:[#allocation19_spill] sm:$0xff] %v7630_v55  ;;  %6479 = vrot.lane.b32.xlu1 %v6478_v42, %s6587_s17  ;;  %v1292_v30 = vadd.f32 %v1284_v3, %v1264_v15  ;;  %v1340_v37 = vmul.f32 %v10626_v60, %v6822_v0  ;;  %v1341_v33 = vmul.f32 %v7642_v32, %v6822_v0  ;;  %v7659_v3 = vld [vmem:[#allocation2 + $0x101] sm:$0xff] }
  0xe6   : > { %10625 = vst [vmem:[#allocation32_spill] sm:$0xff] %v7638_v56  ;;  %v1368_v31 = vmul.f32 %v7601_v39, %v6842_v10  ;;  %v7655_v59 = vadd.f32 %v2838_v29, %v2826_v40  ;;  %v1293_v35 = vadd.f32 %v1285_v48, %v1265_v19  ;;  %v1369_v46 = vmul.f32 %v7649_v53, %v6842_v10  ;;  %v5875_v15 = vld [vmem:[#allocation2 + $0x228] sm:$0x1]  ;;  %v5883_v48 = vld [vmem:[#allocation2 + $0xe9] sm:$0x1] }
  0xe7   : > { %v1396_v42 = vmul.f32 %v7610_v13, %v6845_v11  ;;  %v1320_v51 = vadd.f32 %v1312_v28, %v1292_v30  ;;  %v1397_v55 = vmul.f32 %v7659_v3, %v6845_v11  ;;  %v1472_v4 = vmul.f32 %v7345_v49, %v10620_v12 }
  0xe8   : > { %10627 = vst [vmem:[#allocation41_spill] sm:$0xff] %v7655_v59  ;;  %v1473_v29 = vmul.f32 %v5864_v7, %v10620_v12  ;;  %v1321_v40 = vadd.f32 %v1313_v22, %v1293_v35  ;;  %v1474_v19 = vmul.f32 %v7653_v23, %v10620_v12  ;;  %v1475_v59 = vmul.f32 %v5866_v52, %v10620_v12 }
  0xe9   : > { %v1496_v50 = vmul.f32 %v7283_v54, %v10589_v2  ;;  %v1348_v57 = vadd.f32 %v1340_v37, %v1320_v51  ;;  %v1497_v28 = vmul.f32 %v5875_v15, %v10589_v2  ;;  %v1498_v30 = vmul.f32 %v7601_v39, %v10589_v2 }
  0xea   : > { %v1499_v49 = vmul.f32 %v5876_v34, %v10589_v2  ;;  %v1349_v7 = vadd.f32 %v1341_v33, %v1321_v40  ;;  %v1536_v35 = vmul.f32 %v7396_v36, %v6813_v61  ;;  %v1537_v52 = vmul.f32 %v5883_v48, %v6813_v61  ;;  %v7687_v36 = vld [vmem:[#allocation2 + $0x60] sm:$0xff] }
  0xeb   : > { %v1512_v22 = vadd.f32 %v1496_v50, %v1472_v4  ;;  %v1425_v54 = vmul.f32 %v7489_v21, %v7677_v41  ;;  %v1513_v51 = vadd.f32 %v1497_v28, %v1473_v29  ;;  %v1514_v37 = vadd.f32 %v1498_v30, %v1474_v19  ;;  %v5898_v4 = vld [vmem:[#allocation2 + $0x68] sm:$0x1]  ;;  %v5907_v29 = vld [vmem:[#allocation2 + $0x198] sm:$0x1] }
  0xec   : > { %v1515_v15 = vadd.f32 %v1499_v49, %v1475_v59  ;;  %v1377_v56 = vadd.f32 %v1369_v46, %v1349_v7  ;;  %v1538_v34 = vmul.f32 %v7610_v13, %v6813_v61  ;;  %v1539_v33 = vmul.f32 %v5884_v14, %v6813_v61  ;;  %v5908_v30 = vld [vmem:[#allocation2 + $0x1a8] sm:$0x1] }
  0xed   : > { %v1552_v40 = vadd.f32 %v1536_v35, %v1512_v22  ;;  %v1376_v50 = vadd.f32 %v1368_v31, %v1348_v57  ;;  %v1553_v20 = vadd.f32 %v1537_v52, %v1513_v51  ;;  %v1584_v48 = vmul.f32 %v7472_v43, %v6816_v62  ;;  %v5915_v22 = vld [vmem:[#allocation2 + $0x59] sm:$0x1] }
  0xee   : > { %v1585_v8 = vmul.f32 %v5896_v24, %v6816_v62  ;;  %v1405_v19 = vadd.f32 %v1397_v55, %v1377_v56  ;;  %v1554_v59 = vadd.f32 %v1538_v34, %v1514_v37  ;;  %v1555_v46 = vadd.f32 %v1539_v33, %v1515_v15  ;;  %v5916_v37 = vld [vmem:[#allocation2 + $0x69] sm:$0x1]  ;;  %v5928_v15 = vld [vmem:[#allocation2 + $0xf8] sm:$0x1] }
  0xef   : > { %v1586_v28 = vmul.f32 %v7687_v36, %v6816_v62  ;;  %v7696_v14 = vmul.f32 %v10623_v5, %v7533_v44  ;;  %v1587_v57 = vmul.f32 %v5898_v4, %v6816_v62  ;;  %v1600_v31 = vadd.f32 %v1584_v48, %v1552_v40  ;;  %v5930_v40 = vld [vmem:[#allocation2 + $0x108] sm:$0x1] }
  0xf0   : > { %v1601_v49 = vadd.f32 %v1585_v8, %v1553_v20  ;;  %v1424_v7 = vmul.f32 %v7489_v21, %v7605_v1  ;;  %v1624_v55 = vmul.f32 %v7410_v47, %v6819_v63  ;;  %v1625_v56 = vmul.f32 %v5907_v29, %v6819_v63 }
  0xf1   : > { %10629 = vst [vmem:[#allocation46_spill] sm:$0xff] %v7696_v14  ;;  %v1602_v24 = vadd.f32 %v1586_v28, %v1554_v59  ;;  %v1404_v35 = vadd.f32 %v1396_v42, %v1376_v50  ;;  %v1603_v52 = vadd.f32 %v1587_v57, %v1555_v46  ;;  %v1626_v5 = vmul.f32 %v7622_v58, %v6819_v63  ;;  %v5939_v50 = vld [vmem:[#allocation2 + $0x238] sm:$0x1]  ;;  %v7713_v28 = vld [vmem:[#allocation2 + $0x100] sm:$0xff]  ;;  %v2203_v14 = vld [vmem:[#allocation2 + $0x59] sm:$0x1] }
  0xf2   : > { %v1627_v51 = vmul.f32 %v5908_v30, %v6819_v63  ;;  %v1433_v8 = vadd.f32 %v1425_v54, %v1405_v19  ;;  %v1640_v20 = vadd.f32 %v1624_v55, %v1600_v31  ;;  %v1641_v34 = vadd.f32 %v1625_v56, %v1601_v49  ;;  %v5940_v30 = vld [vmem:[#allocation2 + $0x248] sm:$0x1]  ;;  %v5947_v55 = vld [vmem:[#allocation2 + $0xf9] sm:$0x1] }
  0xf3   : > { %v1664_v33 = vmul.f32 %v7412_v6, %v6822_v0  ;;  %v1642_v4 = vadd.f32 %v1626_v5, %v1602_v24  ;;  %v1665_v29 = vmul.f32 %v5915_v22, %v6822_v0  ;;  %v1666_v42 = vmul.f32 %v7632_v26, %v6822_v0 }
  0xf4   : > { %v1643_v48 = vadd.f32 %v1627_v51, %v1603_v52  ;;  %v1667_v59 = vmul.f32 %v5916_v37, %v6822_v0  ;;  %v1712_v54 = vmul.f32 %v7653_v23, %v6842_v10  ;;  %v1713_v19 = vmul.f32 %v5928_v15, %v6842_v10  ;;  %v5948_v51 = vld [vmem:[#allocation2 + $0x109] sm:$0x1] }
  0xf5   : > { %v1680_v46 = vadd.f32 %v1664_v33, %v1640_v20  ;;  %v1681_v57 = vadd.f32 %v1665_v29, %v1641_v34  ;;  %v1682_v31 = vadd.f32 %v1666_v42, %v1642_v4  ;;  %v1714_v49 = vmul.f32 %v7713_v28, %v6842_v10 }
  0xf6   : > { %v1715_v24 = vmul.f32 %v5930_v40, %v6842_v10  ;;  %v1683_v56 = vadd.f32 %v1667_v59, %v1643_v48  ;;  %v1752_v52 = vmul.f32 %v7601_v39, %v6845_v11  ;;  %v1753_v5 = vmul.f32 %v5939_v50, %v6845_v11 }
  0xf7   : > { %v1728_v22 = vadd.f32 %v1712_v54, %v1680_v46  ;;  %v1729_v37 = vadd.f32 %v1713_v19, %v1681_v57  ;;  %v1730_v20 = vadd.f32 %v1714_v49, %v1682_v31  ;;  %v1754_v15 = vmul.f32 %v7649_v53, %v6845_v11 }
  0xf8   : > { %v1755_v34 = vmul.f32 %v5940_v30, %v6845_v11  ;;  %v1731_v33 = vadd.f32 %v1715_v24, %v1683_v56  ;;  %v1792_v40 = vmul.f32 %v7489_v21, %v7610_v13  ;;  %v1793_v48 = vmul.f32 %v7489_v21, %v5947_v55  ;;  %v7744_v55 = vld [vmem:[%s10384_s3 + $0x8] ss:$0 sm:$0xff] }
  0xf9   : > { %v1768_v4 = vadd.f32 %v1752_v52, %v1728_v22  ;;  %v1769_v29 = vadd.f32 %v1753_v5, %v1729_v37  ;;  %v1770_v42 = vadd.f32 %v1754_v15, %v1730_v20  ;;  %v1794_v50 = vmul.f32 %v7489_v21, %v7659_v3  ;;  %10630 = vst [vmem:[#allocation47_spill] sm:$0xff] %v7744_v55 }
  0xfa   : > { %v1795_v59 = vmul.f32 %v7489_v21, %v5948_v51  ;;  %v1771_v46 = vadd.f32 %v1755_v34, %v1731_v33  ;;  %v1873_v19 = vmul.f32 %v7410_v47, %v10620_v12  ;;  %v1874_v30 = vmul.f32 %v7622_v58, %v10620_v12 }
  0xfb   : > { %v1808_v54 = vadd.f32 %v1792_v40, %v1768_v4  ;;  %v1809_v57 = vadd.f32 %v1793_v48, %v1769_v29  ;;  %v1810_v31 = vadd.f32 %v1794_v50, %v1770_v42  ;;  %v1892_v49 = vmul.f32 %v7412_v6, %v10589_v2  ;;  %v7782_v42 = vld [vmem:[#allocation2 + $0x1b0] sm:$0xff] }
  0xfc   : > { %v1893_v24 = vmul.f32 %v7632_v26, %v10589_v2  ;;  %v7748_v56 = vmul.f32 %v7744_v55, %v7518_v9  ;;  %v7750_v22 = vadd.f32 %v1424_v7, %v1404_v35  ;;  %v1919_v52 = vmul.f32 %v10626_v60, %v6813_v61 }
  0xfd   : > { %v1920_v5 = vmul.f32 %v7642_v32, %v6813_v61  ;;  %v7757_v51 = vadd.f32 %v7571_v25, %v1433_v8  ;;  %v7759_v37 = vadd.f32 %v1795_v59, %v1771_v46  ;;  %v1901_v20 = vadd.f32 %v1892_v49, %v1873_v19  ;;  %v2128_v59 = vld [vmem:[#allocation2 + $0x58] sm:$0x1]  ;;  %v2130_v46 = vld [vmem:[#allocation2 + $0x68] sm:$0x1] }
  0xfe   : > { %10631 = vst [vmem:[#allocation48_spill] sm:$0xff] %v7748_v56  ;;  %10632 = vst [vmem:[#allocation49_spill] sm:$0xff] %v7750_v22  ;;  %v1902_v15 = vadd.f32 %v1893_v24, %v1874_v30  ;;  %v7762_v34 = vadd.f32 %v7571_v25, %v1808_v54  ;;  %v7765_v9 = vadd.f32 %v7571_v25, %v1809_v57  ;;  %v7788_v57 = vld [vmem:[#allocation2 + $0x71] sm:$0xff] }
  0xff   : > { %10633 = vst [vmem:[#allocation50_spill] sm:$0xff] %v7757_v51  ;;  %v1946_v7 = vmul.f32 %v7601_v39, %v6816_v62  ;;  %v1947_v60 = vmul.f32 %v7649_v53, %v6816_v62  ;;  %v7772_v35 = vadd.f32 %v7571_v25, %v1810_v31  ;;  %v1928_v8 = vadd.f32 %v1919_v52, %v1901_v20  ;;  %v7792_v31 = vld [vmem:[#allocation2 + $0x1b1] sm:$0xff] }
 0x100   : > { %v1929_v33 = vadd.f32 %v1920_v5, %v1902_v15  ;;  %v1973_v4 = vmul.f32 %v7610_v13, %v6819_v63  ;;  %v1974_v40 = vmul.f32 %v7659_v3, %v6819_v63  ;;  %v2000_v48 = vmul.f32 %v7605_v1, %v6822_v0  ;;  %10634 = vst [vmem:[#allocation51_spill] sm:$0xff] %v7792_v31  ;;  %v6028_v49 = vld [vmem:[#allocation2 + $0x198] sm:$0x1]  ;;  %v6029_v15 = vld [vmem:[#allocation2 + $0x1a8] sm:$0x1] }
 0x101   : > { %v2001_v29 = vmul.f32 %v7677_v41, %v6822_v0  ;;  %v2027_v50 = vmul.f32 %v7622_v58, %v6842_v10  ;;  %v1955_v54 = vadd.f32 %v1946_v7, %v1928_v8  ;;  %v2028_v30 = vmul.f32 %v7782_v42, %v6842_v10 }
 0x102   : > { %v1956_v19 = vadd.f32 %v1947_v60, %v1929_v33  ;;  %v2054_v1 = vmul.f32 %v7632_v26, %v6845_v11  ;;  %v2055_v24 = vmul.f32 %v7788_v57, %v6845_v11  ;;  %v2081_v52 = vmul.f32 %v7489_v21, %v7642_v32 }
 0x103   : > { %v2082_v5 = vmul.f32 %v7489_v21, %v7792_v31  ;;  %v2145_v20 = vmul.f32 %v7472_v43, %v10620_v12  ;;  %v1982_v7 = vadd.f32 %v1973_v4, %v1955_v54  ;;  %v2146_v8 = vmul.f32 %v2128_v59, %v10620_v12 }
 0x104   : > { %v1983_v60 = vadd.f32 %v1974_v40, %v1956_v19  ;;  %v2147_v33 = vmul.f32 %v7687_v36, %v10620_v12  ;;  %v2148_v55 = vmul.f32 %v2130_v46, %v10620_v12  ;;  %v2172_v32 = vmul.f32 %v7410_v47, %v10589_v2  ;;  %v2204_v40 = vld [vmem:[#allocation2 + $0x69] sm:$0x1]  ;;  %v6043_v12 = vld [vmem:[#allocation2 + $0xf8] sm:$0x1] }
 0x105   : > { %v2173_v41 = vmul.f32 %v6028_v49, %v10589_v2  ;;  %v2174_v31 = vmul.f32 %v7622_v58, %v10589_v2  ;;  %v2009_v43 = vadd.f32 %v2000_v48, %v1982_v7  ;;  %v2175_v4 = vmul.f32 %v6029_v15, %v10589_v2  ;;  %v6045_v48 = vld [vmem:[#allocation2 + $0x108] sm:$0x1] }
 0x106   : > { %v2010_v51 = vadd.f32 %v2001_v29, %v1983_v60  ;;  %v2217_v59 = vmul.f32 %v7412_v6, %v6813_v61  ;;  %v2190_v54 = vadd.f32 %v2172_v32, %v2145_v20  ;;  %v2218_v46 = vmul.f32 %v2203_v14, %v6813_v61  ;;  %v6055_v60 = vld [vmem:[#allocation2 + $0x238] sm:$0x1] }
 0x107   : > { %v2191_v19 = vadd.f32 %v2173_v41, %v2146_v8  ;;  %v2192_v22 = vadd.f32 %v2174_v31, %v2147_v33  ;;  %v2036_v47 = vadd.f32 %v2027_v50, %v2009_v43  ;;  %v2193_v49 = vadd.f32 %v2175_v4, %v2148_v55  ;;  %v6056_v8 = vld [vmem:[#allocation2 + $0x248] sm:$0x1]  ;;  %v6065_v43 = vld [vmem:[#allocation2 + $0x109] sm:$0x1] }
 0x108   : > { %v2037_v56 = vadd.f32 %v2028_v30, %v2010_v51  ;;  %v2219_v27 = vmul.f32 %v7632_v26, %v6813_v61  ;;  %v2220_v29 = vmul.f32 %v2204_v40, %v6813_v61  ;;  %v2235_v15 = vadd.f32 %v2217_v59, %v2190_v54 }
 0x109   : > { %v2236_v7 = vadd.f32 %v2218_v46, %v2191_v19  ;;  %v2271_v6 = vmul.f32 %v7653_v23, %v6816_v62  ;;  %v2063_v20 = vadd.f32 %v2054_v1, %v2036_v47  ;;  %v2272_v14 = vmul.f32 %v6043_v12, %v6816_v62  ;;  %v6081_v47 = vld [vmem:[#allocation2 + $0x78] sm:$0x1] }
 0x10a   : > { %v2064_v41 = vadd.f32 %v2055_v24, %v2037_v56  ;;  %v2237_v31 = vadd.f32 %v2219_v27, %v2192_v22  ;;  %v2238_v50 = vadd.f32 %v2220_v29, %v2193_v49  ;;  %v2273_v55 = vmul.f32 %v7713_v28, %v6816_v62  ;;  %v6064_v56 = vld [vmem:[#allocation2 + $0xf9] sm:$0x1] }
 0x10b   : > { %v2274_v51 = vmul.f32 %v6045_v48, %v6816_v62  ;;  %v2289_v30 = vadd.f32 %v2271_v6, %v2235_v15  ;;  %v7826_v33 = vadd.f32 %v7571_v25, %v7759_v37  ;;  %v7831_v23 = vsel %vm1835_vm0, 0.0, %v7762_v34  ;;  %v6079_v34 = vld [vmem:[#allocation2 + $0x68] sm:$0x1] }
 0x10c   : > { %v2290_v27 = vadd.f32 %v2272_v14, %v2236_v7  ;;  %v2316_v12 = vmul.f32 %v7601_v39, %v6819_v63  ;;  %v2291_v22 = vadd.f32 %v2273_v55, %v2237_v31  ;;  %v2317_v24 = vmul.f32 %v6055_v60, %v6819_v63  ;;  %v6091_v15 = vld [vmem:[#allocation2 + $0x1a8] sm:$0x1]  ;;  %v6100_v55 = vld [vmem:[#allocation2 + $0x69] sm:$0x1] }
 0x10d   : > { %v2292_v1 = vadd.f32 %v2274_v51, %v2238_v50  ;;  %v2318_v32 = vmul.f32 %v7649_v53, %v6819_v63  ;;  %v2090_v37 = vadd.f32 %v2081_v52, %v2063_v20  ;;  %v2091_v4 = vadd.f32 %v2082_v5, %v2064_v41  ;;  %v7845_v52 = vld [vmem:[#allocation2 + $0x70] sm:$0xff]  ;;  %v6092_v41 = vld [vmem:[#allocation2 + $0x1b8] sm:$0x1] }
 0x10e   : > { %v2319_v40 = vmul.f32 %v6056_v8, %v6819_v63  ;;  %v2334_v59 = vadd.f32 %v2316_v12, %v2289_v30  ;;  %v2335_v54 = vadd.f32 %v2317_v24, %v2290_v27  ;;  %v2361_v39 = vmul.f32 %v7610_v13, %v6822_v0  ;;  %v6101_v27 = vld [vmem:[#allocation2 + $0x79] sm:$0x1] }
 0x10f   : > { %v2336_v19 = vadd.f32 %v2318_v32, %v2291_v22  ;;  %v2362_v46 = vmul.f32 %v6064_v56, %v6822_v0  ;;  %v2363_v48 = vmul.f32 %v7659_v3, %v6822_v0  ;;  %v2364_v29 = vmul.f32 %v6065_v43, %v6822_v0 }
 0x110   : > { %v2337_v49 = vadd.f32 %v2319_v40, %v2292_v1  ;;  %v2415_v5 = vmul.f32 %v7687_v36, %v6842_v10  ;;  %v2379_v7 = vadd.f32 %v2361_v39, %v2334_v59  ;;  %v2416_v20 = vmul.f32 %v6079_v34, %v6842_v10 }
 0x111   : > { %v2380_v6 = vadd.f32 %v2362_v46, %v2335_v54  ;;  %v2417_v13 = vmul.f32 %v7845_v52, %v6842_v10  ;;  %v2381_v31 = vadd.f32 %v2363_v48, %v2336_v19  ;;  %v2418_v60 = vmul.f32 %v6081_v47, %v6842_v10 }
 0x112   : > { %v2382_v14 = vadd.f32 %v2364_v29, %v2337_v49  ;;  %v2460_v50 = vmul.f32 %v7622_v58, %v6845_v11  ;;  %v2433_v51 = vadd.f32 %v2415_v5, %v2379_v7  ;;  %v2461_v36 = vmul.f32 %v6091_v15, %v6845_v11 }
 0x113   : > { %v2434_v30 = vadd.f32 %v2416_v20, %v2380_v6  ;;  %v2462_v8 = vmul.f32 %v7782_v42, %v6845_v11  ;;  %v2435_v12 = vadd.f32 %v2417_v13, %v2381_v31  ;;  %v2463_v22 = vmul.f32 %v6092_v41, %v6845_v11  ;;  %v10635_v41 = vld [vmem:[#allocation42_spill] sm:$0xff] }
 0x114   : > { %v2436_v56 = vadd.f32 %v2418_v60, %v2382_v14  ;;  %v2505_v1 = vmul.f32 %v7489_v21, %v7632_v26  ;;  %v2478_v24 = vadd.f32 %v2460_v50, %v2433_v51  ;;  %v2506_v58 = vmul.f32 %v7489_v21, %v6100_v55  ;;  %v10637_v55 = vld [vmem:[#allocation27_spill] sm:$0xff] }
 0x115   : > { %v2479_v32 = vadd.f32 %v2461_v36, %v2434_v30  ;;  %v2507_v43 = vmul.f32 %v7489_v21, %v7788_v57  ;;  %v7865_v40 = vadd.f32 %v7571_v25, %v2090_v37  ;;  %v2480_v59 = vadd.f32 %v2462_v8, %v2435_v12  ;;  %v10639_v12 = vld [vmem:[#allocation10_spill] sm:$0xff] }
 0x116   : > { %v2481_v34 = vadd.f32 %v2463_v22, %v2436_v56  ;;  %v2508_v54 = vmul.f32 %v7489_v21, %v6101_v27  ;;  %v1851_v19 = vsel %vm1835_vm0, 0.0, %v7772_v35  ;;  %v2523_v39 = vadd.f32 %v2505_v1, %v2478_v24 }
 0x117   : > { %v2524_v26 = vadd.f32 %v2506_v58, %v2479_v32  ;;  %v2631_v46 = vmul.f32 %v7103_v18, %v7533_v44  ;;  %v7874_v47 = vadd.f32 %v7571_v25, %v2091_v4  ;;  %v2525_v49 = vadd.f32 %v2507_v43, %v2480_v59 }
 0x118   : > { %v2526_v48 = vadd.f32 %v2508_v54, %v2481_v34  ;;  %v2608_v37 = vmul.f32 %v10606_v17, %v7865_v40  ;;  %v2541_v29 = vadd.f32 %v7571_v25, %v2523_v39  ;;  %v2704_v35 = vmul.f32 %v10609_v45, %v7831_v23 }
 0x119   : > { %v7880_v5 = vadd.f32 %v7571_v25, %v2524_v26  ;;  %v2668_v15 = vrot.slane %v2631_v46, 1  ;;  %v2543_v7 = vadd.f32 %v7571_v25, %v2525_v49  ;;  %v2748_v4 = vmul.f32 %v10607_v38, %v7831_v23  ;;  %v8010_v49 = vld [vmem:[#allocation2 + $0x261] sm:$0xff] }
 0x11a   : > { %v7886_v44 = vadd.f32 %v7571_v25, %v2526_v48  ;;  %v2749_v6 = vmul.f32 %v10607_v38, %v7765_v9  ;;  %v7894_v20 = vsel %vm1835_vm0, 0.0, %v2541_v29  ;;  %v10636_v31 = vrot.slane %v10635_v41, 1  ;;  %v10643_v41 = vld [vmem:[#allocation50_spill] sm:$0xff]  ;;  %v5877_v26 = vld [vmem:[#allocation2 + $0x248] sm:$0x1] }
 0x11b   : > { %v2634_v13 = vmul.f32 %v7103_v18, %v7880_v5  ;;  %v2750_v60 = vmul.f32 %v10607_v38, %v1851_v19  ;;  %v7904_v50 = vsel %vm1835_vm0, 0.0, %v2543_v7  ;;  %v2596_v51 = vmul.f32 %v10637_v55, %v7894_v20 }
 0x11c   : > { %v2670_v14 = vsel %vm2655_vm1, %v2668_v15, %v10636_v31  ;;  %v2609_v30 = vmul.f32 %v10606_v17, %v7874_v47  ;;  %v2633_v36 = vmul.f32 %v7103_v18, %v7894_v20  ;;  %v7914_v8 = vmul.f32 %v7103_v18, %v7886_v44  ;;  %v10642_v15 = vld [vmem:[#allocation49_spill] sm:$0xff] }
 0x11d   : > { %v2672_v27 = vrot.slane %v2634_v13, 1  ;;  %v2692_v56 = vadd.f32 %v2670_v14, %v10639_v12  ;;  %v2751_v22 = vmul.f32 %v10607_v38, %v7826_v33  ;;  %v2597_v1 = vmul.f32 %v10637_v55, %v7904_v50 }
 0x11e   : > { %10638 = vst [vmem:[#allocation42_spill] sm:$0xff] %v7914_v8  ;;  %v2616_v24 = vadd.f32 %v2608_v37, %v2596_v51  ;;  %v2671_v32 = vrot.slane %v2633_v36, 1  ;;  %v2784_v58 = vrot.slane %v2748_v4, 1  ;;  %v2705_v43 = vmul.f32 %v10609_v45, %v1851_v19  ;;  %v10644_v37 = vld [vmem:[#allocation30_spill] sm:$0xff] }
 0x11f   : > { %v2712_v59 = vadd.f32 %v2704_v35, %v2692_v56  ;;  %v2785_v34 = vrot.slane %v2749_v6, 1  ;;  %v2787_v54 = vrot.slane %v2750_v60, 1  ;;  %v2788_v29 = vrot.slane %v2751_v22, 1  ;;  %v10646_v60 = vld [vmem:[#allocation31_spill] sm:$0xff]  ;;  %v10647_v56 = vld [vmem:[#allocation26_spill] sm:$0xff] }
 0x120   : > { %v2673_v48 = vsel %vm2655_vm1, %v2671_v32, %v2672_v27  ;;  %v1444_v7 = vadd.f32 %v7571_v25, %v10642_v15  ;;  %v2725_v31 = vmul.f32 %v10644_v37, %v10643_v41  ;;  %v7930_v14 = vadd.f32 %v2609_v30, %v2597_v1 }
 0x121   : > { %v2693_v13 = vadd.f32 %v2673_v48, %v2616_v24  ;;  %v2786_v4 = vsel %vm2655_vm1, %v2784_v58, %v2785_v34  ;;  %v2789_v6 = vsel %vm2655_vm1, %v2787_v54, %v2788_v29  ;;  %v2820_v51 = vmul.f32 %v10646_v60, %v7894_v20 }
 0x122   : > { %10645 = vst [vmem:[#allocation10_spill] sm:$0xff] %v7930_v14  ;;  %v2821_v27 = vmul.f32 %v10646_v60, %v7904_v50  ;;  %v3041_v25 = vrot.slane %v7831_v23, 1  ;;  %v3042_v12 = vrot.slane %v7765_v9, 1  ;;  %v2840_v22 = vmul.f32 %v10647_v56, %v7865_v40 }
 0x123   : > { %v2713_v36 = vadd.f32 %v2705_v43, %v2693_v13  ;;  %v3044_v30 = vrot.slane %v1851_v19, 1  ;;  %v3045_v1 = vrot.slane %v7826_v33, 1  ;;  %v3097_v24 = vrot.slane %v7894_v20, 1  ;;  %v7954_v13 = vld [vmem:[#allocation2 + $0x250] sm:$0xff] }
 0x124   : > { %v2841_v58 = vmul.f32 %v10647_v56, %v7874_v47  ;;  %v3043_v43 = vsel %vm2655_vm1, %v3041_v25, %v3042_v12  ;;  %v3098_v34 = vrot.slane %v7880_v5, 1  ;;  %v3100_v9 = vrot.slane %v7904_v50, 1  ;;  %v10648_v12 = vld [vmem:[#allocation24_spill] sm:$0xff] }
 0x125   : > { %v2733_v32 = vadd.f32 %v2725_v31, %v2713_v36  ;;  %v3046_v23 = vsel %vm2655_vm1, %v3044_v30, %v3045_v1  ;;  %v3065_v54 = vmax.f32 %v1444_v7, %v3043_v43  ;;  %v3101_v48 = vrot.slane %v7886_v44, 1  ;;  %v7956_v31 = vld [vmem:[#allocation2 + $0x251] sm:$0xff] }
 0x126   : > { %v3066_v33 = vmax.f32 %v10643_v41, %v3046_v23  ;;  %v3099_v29 = vsel %vm2655_vm1, %v3097_v24, %v3098_v34  ;;  %v2724_v15 = vmul.f32 %v10644_v37, %v1444_v7  ;;  %v1208_v30 = vmul.f32 %v7649_v53, %v10648_v12 }
 0x127   : > { %v2809_v19 = vadd.f32 %v2789_v6, %v2733_v32  ;;  %v3102_v36 = vsel %vm2655_vm1, %v3100_v9, %v3101_v48  ;;  %v3121_v25 = vmax.f32 %v7865_v40, %v3099_v29  ;;  %v1209_v6 = vmul.f32 %v7954_v13, %v10648_v12  ;;  %v7965_v32 = vld [vmem:[#allocation2 + $0x111] sm:$0xff]  ;;  %v10649_v40 = vld [vmem:[#allocation45_spill] sm:$0xff] }
 0x128   : > { %v3122_v41 = vmax.f32 %v7874_v47, %v3102_v36  ;;  %v2732_v24 = vadd.f32 %v2724_v15, %v2712_v59  ;;  %v1230_v7 = vmul.f32 %v7659_v3, %v10589_v2  ;;  %v1231_v34 = vmul.f32 %v7965_v32, %v10589_v2  ;;  %v7983_v36 = vld [vmem:[#allocation2 + $0x81] sm:$0xff] }
 0x129   : > { %v2829_v1 = vadd.f32 %v2821_v27, %v2809_v19  ;;  %v3129_v43 = vmax.f32 %v3065_v54, %v3121_v25  ;;  %v1258_v23 = vmul.f32 %v10649_v40, %v6813_v61  ;;  %v1259_v9 = vmul.f32 %v7956_v31, %v6813_v61  ;;  %v7977_v19 = vld [vmem:[#allocation2 + $0x1c0] sm:$0xff] }
 0x12a   : > { %v3130_v27 = vmax.f32 %v3066_v33, %v3122_v41  ;;  %v2808_v47 = vadd.f32 %v2786_v4, %v2732_v24  ;;  %v1238_v59 = vadd.f32 %v1230_v7, %v1208_v30  ;;  %v1239_v29 = vadd.f32 %v1231_v34, %v1209_v6  ;;  %v7989_v33 = vld [vmem:[#allocation2 + $0x1c1] sm:$0xff]  ;;  %v7991_v30 = vld [vmem:[#allocation2 + $0x110] sm:$0xff]  ;;  %v10651_v41 = vld [vmem:[#allocation51_spill] sm:$0xff] }
 0x12b   : > { %v7975_v48 = vadd.f32 %v2841_v58, %v2829_v1  ;;  %v1286_v54 = vmul.f32 %v7782_v42, %v6816_v62  ;;  %v1287_v15 = vmul.f32 %v7977_v19, %v6816_v62  ;;  %v1314_v25 = vmul.f32 %v7788_v57, %v6819_v63  ;;  %v7997_v34 = vld [vmem:[#allocation2 + $0x260] sm:$0xff] }
 0x12c   : > { %v6483_v40 = vpack.i.bf16 %v3130_v27, %v3129_v43  ;;  %v2828_v58 = vadd.f32 %v2820_v51, %v2808_v47  ;;  %v1266_v1 = vadd.f32 %v1258_v23, %v1238_v59  ;;  %v1315_v4 = vmul.f32 %v7983_v36, %v6819_v63  ;;  %v5868_v43 = vld [vmem:[#allocation2 + $0x108] sm:$0x1]  ;;  %v5870_v23 = vld [vmem:[#allocation2 + $0x118] sm:$0x1] }
 0x12d   : > { %10650 = vst [vmem:[#allocation49_spill] sm:$0xff] %v7975_v48  ;;  %v1267_v6 = vadd.f32 %v1259_v9, %v1239_v29  ;;  %v1342_v24 = vmul.f32 %v10651_v41, %v6822_v0  ;;  %v1343_v7 = vmul.f32 %v7989_v33, %v6822_v0  ;;  %v1370_v51 = vmul.f32 %v7954_v13, %v6842_v10  ;;  %v8006_v59 = vld [vmem:[#allocation2 + $0x121] sm:$0xff] }
 0x12e   : > { %v8001_v27 = vadd.f32 %v2840_v22, %v2828_v58  ;;  %6484 = vrot.lane.b32.xlu0 %v6483_v40, %s6587_s17  ;;  %v1294_v47 = vadd.f32 %v1286_v54, %v1266_v1  ;;  %v1371_v9 = vmul.f32 %v7997_v34, %v6842_v10  ;;  %v1398_v29 = vmul.f32 %v7965_v32, %v6845_v11  ;;  %v5878_v40 = vld [vmem:[#allocation2 + $0x258] sm:$0x1] }
 0x12f   : > { %v1295_v35 = vadd.f32 %v1287_v15, %v1267_v6  ;;  %v1399_v48 = vmul.f32 %v8006_v59, %v6845_v11  ;;  %v1426_v22 = vmul.f32 %v7489_v21, %v7956_v31  ;;  %v1427_v54 = vmul.f32 %v7489_v21, %v8010_v49  ;;  %v5885_v15 = vld [vmem:[#allocation2 + $0x109] sm:$0x1] }
 0x130   : > { %10652 = vst [vmem:[#allocation50_spill] sm:$0xff] %v8001_v27  ;;  %v1322_v58 = vadd.f32 %v1314_v25, %v1294_v47  ;;  %v1476_v1 = vmul.f32 %v7713_v28, %v10648_v12  ;;  %v1477_v27 = vmul.f32 %v5868_v43, %v10648_v12  ;;  %v1478_v46 = vmul.f32 %v7991_v30, %v10648_v12  ;;  %v5886_v47 = vld [vmem:[#allocation2 + $0x119] sm:$0x1] }
 0x131   : > { %v1323_v6 = vadd.f32 %v1315_v4, %v1295_v35  ;;  %v1479_v39 = vmul.f32 %v5870_v23, %v10648_v12  ;;  %v1500_v56 = vmul.f32 %v7649_v53, %v10589_v2  ;;  %v1501_v60 = vmul.f32 %v5877_v26, %v10589_v2  ;;  %v5900_v23 = vld [vmem:[#allocation2 + $0x78] sm:$0x1] }
 0x132   : > { %v1350_v21 = vadd.f32 %v1342_v24, %v1322_v58  ;;  %v1502_v25 = vmul.f32 %v7954_v13, %v10589_v2  ;;  %v1503_v28 = vmul.f32 %v5878_v40, %v10589_v2  ;;  %v1540_v43 = vmul.f32 %v7659_v3, %v6813_v61  ;;  %v5902_v24 = vld [vmem:[#allocation2 + $0x88] sm:$0x1] }
 0x133   : > { %v1351_v37 = vadd.f32 %v1343_v7, %v1323_v6  ;;  %v1516_v55 = vadd.f32 %v1500_v56, %v1476_v1  ;;  %v1517_v35 = vadd.f32 %v1501_v60, %v1477_v27  ;;  %v1541_v4 = vmul.f32 %v5885_v15, %v6813_v61  ;;  %v8036_v7 = vld [vmem:[#allocation2 + $0x80] sm:$0xff]  ;;  %v5917_v6 = vld [vmem:[#allocation2 + $0x79] sm:$0x1] }
 0x134   : > { %v1378_v14 = vadd.f32 %v1370_v51, %v1350_v21  ;;  %v1518_v53 = vadd.f32 %v1502_v25, %v1478_v46  ;;  %v1519_v8 = vadd.f32 %v1503_v28, %v1479_v39  ;;  %v1542_v26 = vmul.f32 %v7965_v32, %v6813_v61  ;;  %v5909_v46 = vld [vmem:[#allocation2 + $0x1b8] sm:$0x1]  ;;  %v5918_v28 = vld [vmem:[#allocation2 + $0x89] sm:$0x1] }
 0x135   : > { %v1379_v58 = vadd.f32 %v1371_v9, %v1351_v37  ;;  %v1543_v40 = vmul.f32 %v5886_v47, %v6813_v61  ;;  %v1556_v38 = vadd.f32 %v1540_v43, %v1516_v55  ;;  %v1557_v45 = vadd.f32 %v1541_v4, %v1517_v35  ;;  %v5910_v9 = vld [vmem:[#allocation2 + $0x1c8] sm:$0x1]  ;;  %v10653_v55 = vld [vmem:[#allocation47_spill] sm:$0xff] }
 0x136   : > { %v1406_v17 = vadd.f32 %v1398_v29, %v1378_v14  ;;  %v1558_v3 = vadd.f32 %v1542_v26, %v1518_v53  ;;  %v1588_v60 = vmul.f32 %v7845_v52, %v6816_v62  ;;  %v1589_v56 = vmul.f32 %v5900_v23, %v6816_v62  ;;  %v5932_v43 = vld [vmem:[#allocation2 + $0x118] sm:$0x1]  ;;  %v5934_v53 = vld [vmem:[#allocation2 + $0x128] sm:$0x1] }
 0x137   : > { %v1407_v39 = vadd.f32 %v1399_v48, %v1379_v58  ;;  %v1559_v51 = vadd.f32 %v1543_v40, %v1519_v8  ;;  %v1590_v27 = vmul.f32 %v8036_v7, %v6816_v62  ;;  %v1591_v37 = vmul.f32 %v5902_v24, %v6816_v62  ;;  %v5941_v58 = vld [vmem:[#allocation2 + $0x258] sm:$0x1] }
 0x138   : > { %v8046_v14 = vmul.f32 %v10653_v55, %v7894_v20  ;;  %v1604_v29 = vadd.f32 %v1588_v60, %v1556_v38  ;;  %v1605_v1 = vadd.f32 %v1589_v56, %v1557_v45  ;;  %v1628_v15 = vmul.f32 %v7782_v42, %v6819_v63  ;;  %v8064_v60 = vld [vmem:[#allocation2 + $0x120] sm:$0xff] }
 0x139   : > { %v8052_v48 = vmul.f32 %v10653_v55, %v7880_v5  ;;  %v1606_v8 = vadd.f32 %v1590_v27, %v1558_v3  ;;  %v1607_v21 = vadd.f32 %v1591_v37, %v1559_v51  ;;  %v1629_v25 = vmul.f32 %v5909_v46, %v6819_v63  ;;  %v5942_v46 = vld [vmem:[#allocation2 + $0x268] sm:$0x1] }
 0x13a   : > { %10654 = vst [vmem:[#allocation24_spill] sm:$0xff] %v8046_v14  ;;  %v1434_v47 = vadd.f32 %v1426_v22, %v1406_v17  ;;  %v1630_v20 = vmul.f32 %v7977_v19, %v6819_v63  ;;  %v1631_v38 = vmul.f32 %v5910_v9, %v6819_v63  ;;  %v1644_v45 = vadd.f32 %v1628_v15, %v1604_v29  ;;  %v5949_v9 = vld [vmem:[#allocation2 + $0x119] sm:$0x1] }
 0x13b   : > { %10655 = vst [vmem:[#allocation45_spill] sm:$0xff] %v8052_v48  ;;  %v1435_v35 = vadd.f32 %v1427_v54, %v1407_v39  ;;  %v1645_v4 = vadd.f32 %v1629_v25, %v1605_v1  ;;  %v1668_v23 = vmul.f32 %v7788_v57, %v6822_v0  ;;  %v1669_v5 = vmul.f32 %v5917_v6, %v6822_v0 }
 0x13c   : > { %v1646_v26 = vadd.f32 %v1630_v20, %v1606_v8  ;;  %v1647_v24 = vadd.f32 %v1631_v38, %v1607_v21  ;;  %v1670_v17 = vmul.f32 %v7983_v36, %v6822_v0  ;;  %v1671_v22 = vmul.f32 %v5918_v28, %v6822_v0  ;;  %v5950_v8 = vld [vmem:[#allocation2 + $0x129] sm:$0x1] }
 0x13d   : > { %v1684_v40 = vadd.f32 %v1668_v23, %v1644_v45  ;;  %v1685_v3 = vadd.f32 %v1669_v5, %v1645_v4  ;;  %v1716_v54 = vmul.f32 %v7991_v30, %v6842_v10  ;;  %v1717_v56 = vmul.f32 %v5932_v43, %v6842_v10  ;;  %v8081_v43 = vld [vmem:[%s10382_s1 + $0x8] ss:$0 sm:$0xff] }
 0x13e   : > { %v1686_v39 = vadd.f32 %v1670_v17, %v1646_v26  ;;  %v1687_v51 = vadd.f32 %v1671_v22, %v1647_v24  ;;  %v1718_v27 = vmul.f32 %v8064_v60, %v6842_v10  ;;  %v1719_v37 = vmul.f32 %v5934_v53, %v6842_v10 }
 0x13f   : > { %v1732_v29 = vadd.f32 %v1716_v54, %v1684_v40  ;;  %v1733_v1 = vadd.f32 %v1717_v56, %v1685_v3  ;;  %v1756_v15 = vmul.f32 %v7954_v13, %v6845_v11  ;;  %v1757_v6 = vmul.f32 %v5941_v58, %v6845_v11 }
 0x140   : > { %v1734_v21 = vadd.f32 %v1718_v27, %v1686_v39  ;;  %v1735_v25 = vadd.f32 %v1719_v37, %v1687_v51  ;;  %v1758_v28 = vmul.f32 %v7997_v34, %v6845_v11  ;;  %v1759_v20 = vmul.f32 %v5942_v46, %v6845_v11  ;;  %v8104_v39 = vld [vmem:[%s10383_s2] ss:$0 sm:$0xff] }
 0x141   : > { %v1772_v38 = vadd.f32 %v1756_v15, %v1732_v29  ;;  %v1773_v45 = vadd.f32 %v1757_v6, %v1733_v1  ;;  %v1796_v4 = vmul.f32 %v8081_v43, %v7965_v32  ;;  %v1797_v23 = vmul.f32 %v8081_v43, %v5949_v9 }
 0x142   : > { %v1774_v5 = vadd.f32 %v1758_v28, %v1734_v21  ;;  %v1775_v53 = vadd.f32 %v1759_v20, %v1735_v25  ;;  %v1798_v26 = vmul.f32 %v8081_v43, %v8006_v59  ;;  %v1799_v24 = vmul.f32 %v8081_v43, %v5950_v8  ;;  %v8135_v28 = vld [vmem:[#allocation2 + $0x1d0] sm:$0xff] }
 0x143   : > { %v1812_v17 = vadd.f32 %v1796_v4, %v1772_v38  ;;  %v1813_v22 = vadd.f32 %v1797_v23, %v1773_v45  ;;  %v1875_v58 = vmul.f32 %v7782_v42, %v10648_v12  ;;  %v1876_v40 = vmul.f32 %v7977_v19, %v10648_v12  ;;  %v6022_v20 = vld [vmem:[#allocation2 + $0x1d1] sm:$0xff] }
 0x144   : > { %v8095_v3 = vmul.f32 %v10653_v55, %v7886_v44  ;;  %v1814_v54 = vadd.f32 %v1798_v26, %v1774_v5  ;;  %v1894_v56 = vmul.f32 %v7788_v57, %v10589_v2  ;;  %v1895_v46 = vmul.f32 %v7983_v36, %v10589_v2  ;;  %v2132_v38 = vld [vmem:[#allocation2 + $0x78] sm:$0x1]  ;;  %v2134_v26 = vld [vmem:[#allocation2 + $0x88] sm:$0x1] }
 0x145   : > { %v8107_v51 = vadd.f32 %v8104_v39, %v1434_v47  ;;  %v8110_v27 = vadd.f32 %v8104_v39, %v1435_v35  ;;  %v1921_v44 = vmul.f32 %v10651_v41, %v6813_v61  ;;  %v1922_v55 = vmul.f32 %v7989_v33, %v6813_v61 }
 0x146   : > { %10656 = vst [vmem:[#allocation51_spill] sm:$0xff] %v8095_v3  ;;  %v8116_v37 = vadd.f32 %v1799_v24, %v1775_v53  ;;  %v8119_v9 = vadd.f32 %v8104_v39, %v1812_v17  ;;  %v1903_v29 = vadd.f32 %v1894_v56, %v1875_v58  ;;  %v1904_v1 = vadd.f32 %v1895_v46, %v1876_v40  ;;  %v8145_v53 = vld [vmem:[#allocation2 + $0x91] sm:$0xff]  ;;  %v6031_v40 = vld [vmem:[#allocation2 + $0x1c8] sm:$0x1] }
 0x147   : > { %v8122_v15 = vadd.f32 %v8104_v39, %v1813_v22  ;;  %v8125_v47 = vadd.f32 %v8104_v39, %v1814_v54  ;;  %v1948_v35 = vmul.f32 %v7954_v13, %v6816_v62  ;;  %v1949_v41 = vmul.f32 %v7997_v34, %v6816_v62  ;;  %v6030_v58 = vld [vmem:[#allocation2 + $0x1b8] sm:$0x1] }
 0x148   : > { %v1930_v6 = vadd.f32 %v1921_v44, %v1903_v29  ;;  %v1931_v8 = vadd.f32 %v1922_v55, %v1904_v1  ;;  %v1975_v21 = vmul.f32 %v7965_v32, %v6819_v63  ;;  %v1976_v25 = vmul.f32 %v8006_v59, %v6819_v63  ;;  %v2205_v44 = vld [vmem:[#allocation2 + $0x79] sm:$0x1] }
 0x149   : > { %v2002_v45 = vmul.f32 %v7956_v31, %v6822_v0  ;;  %v2003_v4 = vmul.f32 %v8010_v49, %v6822_v0  ;;  %v2029_v23 = vmul.f32 %v7977_v19, %v6842_v10  ;;  %v2030_v5 = vmul.f32 %v8135_v28, %v6842_v10 }
 0x14a   : > { %v1957_v24 = vadd.f32 %v1948_v35, %v1930_v6  ;;  %v1958_v17 = vadd.f32 %v1949_v41, %v1931_v8  ;;  %v2056_v22 = vmul.f32 %v7983_v36, %v6845_v11  ;;  %v2057_v31 = vmul.f32 %v8145_v53, %v6845_v11  ;;  %v2206_v8 = vld [vmem:[#allocation2 + $0x89] sm:$0x1] }
 0x14b   : > { %v2083_v49 = vmul.f32 %v8081_v43, %v7989_v33  ;;  %v2084_v54 = vmul.f32 %v8081_v43, %v6022_v20  ;;  %v2149_v56 = vmul.f32 %v7845_v52, %v10648_v12  ;;  %v2150_v46 = vmul.f32 %v2132_v38, %v10648_v12 }
 0x14c   : > { %v1984_v55 = vadd.f32 %v1975_v21, %v1957_v24  ;;  %v1985_v29 = vadd.f32 %v1976_v25, %v1958_v17  ;;  %v2151_v1 = vmul.f32 %v8036_v7, %v10648_v12  ;;  %v2152_v35 = vmul.f32 %v2134_v26, %v10648_v12  ;;  %v6047_v24 = vld [vmem:[#allocation2 + $0x118] sm:$0x1] }
 0x14d   : > { %v2176_v41 = vmul.f32 %v7782_v42, %v10589_v2  ;;  %v2177_v33 = vmul.f32 %v6030_v58, %v10589_v2  ;;  %v2178_v6 = vmul.f32 %v7977_v19, %v10589_v2  ;;  %v2179_v52 = vmul.f32 %v6031_v40, %v10589_v2  ;;  %v6049_v40 = vld [vmem:[#allocation2 + $0x128] sm:$0x1] }
 0x14e   : > { %v2011_v20 = vadd.f32 %v2002_v45, %v1984_v55  ;;  %v2012_v38 = vadd.f32 %v2003_v4, %v1985_v29  ;;  %v2221_v21 = vmul.f32 %v7788_v57, %v6813_v61  ;;  %v2222_v25 = vmul.f32 %v2205_v44, %v6813_v61  ;;  %v6057_v55 = vld [vmem:[#allocation2 + $0x258] sm:$0x1] }
 0x14f   : > { %v2194_v12 = vadd.f32 %v2176_v41, %v2149_v56  ;;  %v2195_v26 = vadd.f32 %v2177_v33, %v2150_v46  ;;  %v2196_v17 = vadd.f32 %v2178_v6, %v2151_v1  ;;  %v2197_v42 = vadd.f32 %v2179_v52, %v2152_v35  ;;  %v6083_v52 = vld [vmem:[#allocation2 + $0x88] sm:$0x1] }
 0x150   : > { %v2038_v14 = vadd.f32 %v2029_v23, %v2011_v20  ;;  %v2039_v58 = vadd.f32 %v2030_v5, %v2012_v38  ;;  %v2223_v3 = vmul.f32 %v7983_v36, %v6813_v61  ;;  %v2224_v2 = vmul.f32 %v2206_v8, %v6813_v61  ;;  %v6058_v23 = vld [vmem:[#allocation2 + $0x268] sm:$0x1] }
 0x151   : > { %v2239_v45 = vadd.f32 %v2221_v21, %v2194_v12  ;;  %v2240_v4 = vadd.f32 %v2222_v25, %v2195_v26  ;;  %v2275_v57 = vmul.f32 %v7991_v30, %v6816_v62  ;;  %v2276_v44 = vmul.f32 %v6047_v24, %v6816_v62  ;;  %v6084_v21 = vld [vmem:[#allocation2 + $0x90] sm:$0xff]  ;;  %v6085_v25 = vld [vmem:[#allocation2 + $0x98] sm:$0x1] }
 0x152   : > { %v2065_v56 = vadd.f32 %v2056_v22, %v2038_v14  ;;  %v2066_v46 = vadd.f32 %v2057_v31, %v2039_v58  ;;  %v2241_v29 = vadd.f32 %v2223_v3, %v2196_v17  ;;  %v2242_v1 = vadd.f32 %v2224_v2, %v2197_v42  ;;  %v6066_v22 = vld [vmem:[#allocation2 + $0x119] sm:$0x1]  ;;  %v6093_v17 = vld [vmem:[#allocation2 + $0x1c8] sm:$0x1]  ;;  %v6094_v42 = vld [vmem:[#allocation2 + $0x1d8] sm:$0x1] }
 0x153   : > { %v2277_v5 = vmul.f32 %v8064_v60, %v6816_v62  ;;  %v2278_v35 = vmul.f32 %v6049_v40, %v6816_v62  ;;  %v2293_v61 = vadd.f32 %v2275_v57, %v2239_v45  ;;  %v2294_v41 = vadd.f32 %v2276_v44, %v2240_v4  ;;  %v6102_v45 = vld [vmem:[#allocation2 + $0x89] sm:$0x1] }
 0x154   : > { %v8180_v33 = vadd.f32 %v8104_v39, %v8116_v37  ;;  %v8185_v30 = vsel %vm1835_vm0, 0.0, %v8119_v9  ;;  %v2320_v14 = vmul.f32 %v7954_v13, %v6819_v63  ;;  %v2321_v3 = vmul.f32 %v6057_v55, %v6819_v63  ;;  %v6067_v37 = vld [vmem:[#allocation2 + $0x129] sm:$0x1] }
 0x155   : > { %v2295_v60 = vadd.f32 %v2277_v5, %v2241_v29  ;;  %v2296_v31 = vadd.f32 %v2278_v35, %v2242_v1  ;;  %v2322_v62 = vmul.f32 %v7997_v34, %v6819_v63  ;;  %v2323_v6 = vmul.f32 %v6058_v23, %v6819_v63 }
 0x156   : > { %v2092_v8 = vadd.f32 %v2083_v49, %v2065_v56  ;;  %v2093_v20 = vadd.f32 %v2084_v54, %v2066_v46  ;;  %v2338_v38 = vadd.f32 %v2320_v14, %v2293_v61  ;;  %v2339_v9 = vadd.f32 %v2321_v3, %v2294_v41  ;;  %v6103_v46 = vld [vmem:[#allocation2 + $0x99] sm:$0x1] }
 0x157   : > { %v2340_v24 = vadd.f32 %v2322_v62, %v2295_v60  ;;  %v2341_v13 = vadd.f32 %v2323_v6, %v2296_v31  ;;  %v2365_v12 = vmul.f32 %v7965_v32, %v6822_v0  ;;  %v2366_v26 = vmul.f32 %v6066_v22, %v6822_v0  ;;  %v10657_v62 = vld [vmem:[#allocation28_spill] sm:$0xff] }
 0x158   : > { %v2367_v34 = vmul.f32 %v8006_v59, %v6822_v0  ;;  %v2368_v63 = vmul.f32 %v6067_v37, %v6822_v0  ;;  %v2419_v49 = vmul.f32 %v8036_v7, %v6842_v10  ;;  %v2420_v54 = vmul.f32 %v6083_v52, %v6842_v10  ;;  %v10658_v37 = vld [vmem:[#allocation29_spill] sm:$0xff] }
 0x159   : > { %v2383_v58 = vadd.f32 %v2365_v12, %v2338_v38  ;;  %v2384_v2 = vadd.f32 %v2366_v26, %v2339_v9  ;;  %v2421_v40 = vmul.f32 %v6084_v21, %v6842_v10  ;;  %v2422_v32 = vmul.f32 %v6085_v25, %v6842_v10  ;;  %v10660_v25 = vld [vmem:[#allocation42_spill] sm:$0xff] }
 0x15a   : > { %v2385_v4 = vadd.f32 %v2367_v34, %v2340_v24  ;;  %v2386_v57 = vadd.f32 %v2368_v63, %v2341_v13  ;;  %v2464_v59 = vmul.f32 %v7977_v19, %v6845_v11  ;;  %v2465_v0 = vmul.f32 %v6093_v17, %v6845_v11  ;;  %v10662_v34 = vld [vmem:[#allocation10_spill] sm:$0xff] }
 0x15b   : > { %v2437_v44 = vadd.f32 %v2419_v49, %v2383_v58  ;;  %v2438_v55 = vadd.f32 %v2420_v54, %v2384_v2  ;;  %v2466_v7 = vmul.f32 %v8135_v28, %v6845_v11  ;;  %v2467_v56 = vmul.f32 %v6094_v42, %v6845_v11  ;;  %v10663_v54 = vld [vmem:[#allocation27_spill] sm:$0xff] }
 0x15c   : > { %v2439_v29 = vadd.f32 %v2421_v40, %v2385_v4  ;;  %v2440_v1 = vadd.f32 %v2422_v32, %v2386_v57  ;;  %v2509_v10 = vmul.f32 %v8081_v43, %v7983_v36  ;;  %v2510_v23 = vmul.f32 %v8081_v43, %v6102_v45 }
 0x15d   : > { %v8214_v5 = vadd.f32 %v8104_v39, %v2092_v8  ;;  %v2482_v19 = vadd.f32 %v2464_v59, %v2437_v44  ;;  %v2483_v35 = vadd.f32 %v2465_v0, %v2438_v55  ;;  %v2511_v61 = vmul.f32 %v8081_v43, %v8145_v53  ;;  %v10664_v44 = vld [vmem:[#allocation30_spill] sm:$0xff] }
 0x15e   : > { %v2484_v41 = vadd.f32 %v2466_v7, %v2439_v29  ;;  %v2485_v28 = vadd.f32 %v2467_v56, %v2440_v1  ;;  %v2512_v11 = vmul.f32 %v8081_v43, %v6103_v46  ;;  %v2635_v14 = vmul.f32 %v7103_v18, %v7904_v50  ;;  %v10665_v29 = vld [vmem:[#allocation31_spill] sm:$0xff] }
 0x15f   : > { %v1855_v36 = vsel %vm1835_vm0, 0.0, %v8125_v47  ;;  %v8225_v3 = vadd.f32 %v8104_v39, %v2093_v20  ;;  %v2527_v22 = vadd.f32 %v2509_v10, %v2482_v19  ;;  %v2528_v60 = vadd.f32 %v2510_v23, %v2483_v35  ;;  %v10659_v47 = vld [vmem:[#allocation17_spill] sm:$0xff]  ;;  %v10666_v35 = vld [vmem:[#allocation26_spill] sm:$0xff] }
 0x160   : > { %v2529_v31 = vadd.f32 %v2511_v61, %v2484_v41  ;;  %v2610_v53 = vmul.f32 %v10657_v62, %v8214_v5  ;;  %v2674_v6 = vrot.slane %v2635_v14, 1  ;;  %v2706_v43 = vmul.f32 %v10658_v37, %v8185_v30 }
 0x161   : > { %v2545_v52 = vadd.f32 %v8104_v39, %v2527_v22  ;;  %v8233_v8 = vadd.f32 %v8104_v39, %v2528_v60  ;;  %v2752_v38 = vmul.f32 %v10659_v47, %v8185_v30  ;;  %v2753_v20 = vmul.f32 %v10659_v47, %v8122_v15 }
 0x162   : > { %v2530_v9 = vadd.f32 %v2512_v11, %v2485_v28  ;;  %v2547_v21 = vadd.f32 %v8104_v39, %v2529_v31  ;;  %v10661_v24 = vrot.slane %v10660_v25, 1  ;;  %v2754_v12 = vmul.f32 %v10659_v47, %v1855_v36 }
 0x163   : > { %v8246_v26 = vsel %vm1835_vm0, 0.0, %v2545_v52  ;;  %v2638_v17 = vmul.f32 %v7103_v18, %v8233_v8  ;;  %v2755_v49 = vmul.f32 %v10659_v47, %v8180_v33  ;;  %v2707_v2 = vmul.f32 %v10658_v37, %v1855_v36 }
 0x164   : > { %v2676_v13 = vsel %vm2655_vm1, %v2674_v6, %v10661_v24  ;;  %v2598_v42 = vmul.f32 %v10663_v54, %v8246_v26  ;;  %v2637_v58 = vmul.f32 %v7103_v18, %v8246_v26  ;;  %v2790_v40 = vrot.slane %v2752_v38, 1 }
 0x165   : > { %v2694_v63 = vadd.f32 %v2676_v13, %v10662_v34  ;;  %v2678_v32 = vrot.slane %v2638_v17, 1  ;;  %v2791_v4 = vrot.slane %v2753_v20, 1  ;;  %v2793_v57 = vrot.slane %v2754_v12, 1  ;;  %v8297_v12 = vld [vmem:[#allocation2 + $0x1f0] sm:$0xff] }
 0x166   : > { %v2618_v59 = vadd.f32 %v2610_v53, %v2598_v42  ;;  %v2677_v0 = vrot.slane %v2637_v58, 1  ;;  %v2727_v55 = vmul.f32 %v10664_v44, %v8110_v27  ;;  %v2794_v7 = vrot.slane %v2755_v49, 1  ;;  %v10667_v17 = vld [vmem:[#allocation38_spill] sm:$0xff]  ;;  %v10668_v58 = vld [vmem:[#allocation39_spill] sm:$0xff] }
 0x167   : > { %v2714_v45 = vadd.f32 %v2706_v43, %v2694_v63  ;;  %v2548_v56 = vadd.f32 %v8104_v39, %v2530_v9  ;;  %v2565_v46 = vsel %vm1835_vm0, 0.0, %v2547_v21  ;;  %v2792_v18 = vsel %vm2655_vm1, %v2790_v40, %v2791_v4  ;;  %v8276_v39 = vld [vmem:[%s10384_s3 + $0x8] ss:$0 sm:$0xff]  ;;  %v8306_v42 = vld [vmem:[#allocation2 + $0xb1] sm:$0xff] }
 0x168   : > { %v2822_v1 = vmul.f32 %v10665_v29, %v8246_v26  ;;  %v2679_v10 = vsel %vm2655_vm1, %v2677_v0, %v2678_v32  ;;  %v2795_v23 = vsel %vm2655_vm1, %v2793_v57, %v2794_v7  ;;  %v2823_v19 = vmul.f32 %v10665_v29, %v2565_v46  ;;  %v6128_v21 = vld [vmem:[#allocation2 + $0x1e1] sm:$0xff]  ;;  %v8310_v40 = vld [vmem:[#allocation2 + $0x1f1] sm:$0xff] }
 0x169   : > { %v8271_v61 = vmul.f32 %v10666_v35, %v8214_v5  ;;  %v2695_v41 = vadd.f32 %v2679_v10, %v2618_v59  ;;  %v2870_v28 = vmul.f32 %v8276_v39, %v2565_v46  ;;  %v2871_v11 = vmul.f32 %v8276_v39, %v2548_v56  ;;  %v8301_v63 = vld [vmem:[#allocation2 + $0xa1] sm:$0xff] }
 0x16a   : > { %v3047_v14 = vrot.slane %v8185_v30, 1  ;;  %v2843_v22 = vmul.f32 %v10666_v35, %v8225_v3  ;;  %v3048_v60 = vrot.slane %v8122_v15, 1  ;;  %v3050_v31 = vrot.slane %v1855_v36, 1  ;;  %v10669_v57 = vld [vmem:[#allocation40_spill] sm:$0xff] }
 0x16b   : > { %v3051_v62 = vrot.slane %v8180_v33, 1  ;;  %v2715_v53 = vadd.f32 %v2707_v2, %v2695_v41  ;;  %v2909_v6 = vrot.slane %v2870_v28, 1  ;;  %v2910_v37 = vrot.slane %v2871_v11, 1  ;;  %v8292_v33 = vld [vmem:[#allocation2 + $0x1e0] sm:$0xff]  ;;  %v8329_v28 = vld [vmem:[#allocation2 + $0x11] sm:$0xff] }
 0x16c   : > { %v3103_v43 = vrot.slane %v8246_v26, 1  ;;  %v3049_v52 = vsel %vm2655_vm1, %v3047_v14, %v3048_v60  ;;  %v3104_v38 = vrot.slane %v8233_v8, 1  ;;  %v3106_v30 = vrot.slane %v2565_v46, 1  ;;  %v8325_v41 = vld [vmem:[#allocation2 + $0x160] sm:$0xff]  ;;  %v10672_v60 = vld [vmem:[#allocation9_spill] sm:$0xff] }
 0x16d   : > { %v3052_v47 = vsel %vm2655_vm1, %v3050_v31, %v3051_v62  ;;  %v2735_v20 = vadd.f32 %v2727_v55, %v2715_v53  ;;  %v2911_v9 = vsel %vm2655_vm1, %v2909_v6, %v2910_v37  ;;  %v3067_v15 = vmax.f32 %v8107_v51, %v3049_v52  ;;  %v8333_v14 = vld [vmem:[#allocation2 + $0x21] sm:$0xff]  ;;  %v8339_v37 = vld [vmem:[#allocation2 + $0x151] sm:$0xff] }
 0x16e   : > { %v3068_v36 = vmax.f32 %v8110_v27, %v3052_v47  ;;  %v3105_v25 = vsel %vm2655_vm1, %v3103_v43, %v3104_v38  ;;  %v3107_v24 = vrot.slane %v2548_v56, 1  ;;  %v2726_v13 = vmul.f32 %v10664_v44, %v8107_v51  ;;  %v8341_v43 = vld [vmem:[#allocation2 + $0x161] sm:$0xff]  ;;  %v10674_v47 = vld [vmem:[#allocation23_spill] sm:$0xff] }
 0x16f   : > { %v3299_v34 = vmul.f32 %v8292_v33, %v10667_v17  ;;  %v2811_v49 = vadd.f32 %v2795_v23, %v2735_v20  ;;  %v3123_v54 = vmax.f32 %v8214_v5, %v3105_v25  ;;  %v3300_v27 = vmul.f32 %v8297_v12, %v10667_v17  ;;  %v6186_v20 = vld [vmem:[#allocation2 + $0xa0] sm:$0xff]  ;;  %v6187_v25 = vld [vmem:[#allocation2 + $0xa8] sm:$0x1] }
 0x170   : > { %v3319_v2 = vmul.f32 %v8301_v63, %v10668_v58  ;;  %v3108_v51 = vsel %vm2655_vm1, %v3106_v30, %v3107_v24  ;;  %v2734_v32 = vadd.f32 %v2726_v13, %v2714_v45  ;;  %v3320_v4 = vmul.f32 %v8306_v42, %v10668_v58  ;;  %v8323_v45 = vld [vmem:[#allocation2 + $0x150] sm:$0xff]  ;;  %v8360_v13 = vld [vmem:[#allocation2 + $0xb8] sm:$0x1] }
 0x171   : > { %v3347_v59 = vmul.f32 %v6128_v21, %v10669_v57  ;;  %v2831_v0 = vadd.f32 %v2823_v19, %v2811_v49  ;;  %v3124_v5 = vmax.f32 %v8225_v3, %v3108_v51  ;;  %v3131_v44 = vmax.f32 %v3067_v15, %v3123_v54  ;;  %v10671_v19 = vld [vmem:[#allocation25_spill] sm:$0xff]  ;;  %v10676_v21 = vld [vmem:[#allocation14_spill] sm:$0xff] }
 0x172   : > { %v3327_v55 = vadd.f32 %v3319_v2, %v3299_v34  ;;  %v8319_v7 = vmul.f32 %v8276_v39, %v8233_v8  ;;  %v2810_v56 = vadd.f32 %v2792_v18, %v2734_v32  ;;  %v3328_v46 = vadd.f32 %v3320_v4, %v3300_v27  ;;  %v8358_v24 = vld [vmem:[#allocation2 + $0xb0] sm:$0xff]  ;;  %v8368_v27 = vld [vmem:[#allocation2 + $0x200] sm:$0xff]  ;;  %v6202_v51 = vld [vmem:[#allocation2 + $0x1e8] sm:$0x1] }
 0x173   : > { %v3348_v29 = vmul.f32 %v8310_v40, %v10669_v57  ;;  %v2851_v10 = vadd.f32 %v2843_v22, %v2831_v0  ;;  %v3132_v23 = vmax.f32 %v3068_v36, %v3124_v5  ;;  %v3375_v3 = vmul.f32 %v8323_v45, %v10671_v19  ;;  %v8370_v32 = vld [vmem:[#allocation2 + $0x201] sm:$0xff]  ;;  %v10679_v0 = vld [vmem:[#allocation43_spill] sm:$0xff] }
 0x174   : > { %10670 = vst [vmem:[#allocation47_spill] sm:$0xff] %v8319_v7  ;;  %v3355_v35 = vadd.f32 %v3347_v59, %v3327_v55  ;;  %v2830_v11 = vadd.f32 %v2822_v1, %v2810_v56  ;;  %v3376_v18 = vmul.f32 %v8325_v41, %v10671_v19  ;;  %v3403_v31 = vmul.f32 %v8329_v28, %v10672_v60  ;;  %v8377_v55 = vld [vmem:[#allocation2 + $0x1f8] sm:$0x1]  ;;  %v8460_v7 = vld [vmem:[#allocation2 + $0x29] sm:$0x1] }
 0x175   : > { %v3356_v8 = vadd.f32 %v3348_v29, %v3328_v46  ;;  %v2927_v22 = vadd.f32 %v2911_v9, %v2851_v10  ;;  %v6488_v62 = vpack.i.bf16 %v3132_v23, %v3131_v44  ;;  %v3404_v6 = vmul.f32 %v8333_v14, %v10672_v60  ;;  %v6105_v29 = vld [vmem:[%s10385_s4] ss:$0 sm:$0xff]  ;;  %v8387_v10 = vld [vmem:[#allocation2 + $0xc1] sm:$0xff] }
 0x176   : > { %v3383_v53 = vadd.f32 %v3375_v3, %v3355_v35  ;;  %v8344_v1 = vadd.f32 %v8271_v61, %v2830_v11  ;;  %v3431_v38 = vmul.f32 %v8339_v37, %v10674_v47  ;;  %v3432_v30 = vmul.f32 %v8341_v43, %v10674_v47  ;;  %v6267_v34 = vld [vmem:[#allocation2 + $0x208] sm:$0x1] }
 0x177   : > { %v3384_v52 = vadd.f32 %v3376_v18, %v3356_v8  ;;  %v8352_v9 = vmul.f32 %v8276_v39, %v7904_v50  ;;  %6489 = vrot.lane.b32.xlu1 %v6488_v62, %s6587_s17  ;;  %v3459_v61 = vmul.f32 %v8297_v12, %v10676_v21  ;;  %v8365_v54 = vmul.f32 %v8276_v39, %v8246_v26  ;;  %v6210_v8 = vld [vmem:[#allocation2 + $0xa9] sm:$0x1] }
 0x178   : > { %10673 = vst [vmem:[#allocation28_spill] sm:$0xff] %v8344_v1  ;;  %v3411_v36 = vadd.f32 %v3403_v31, %v3383_v53  ;;  %v3460_v59 = vmul.f32 %v8368_v27, %v10676_v21  ;;  %v3487_v5 = vmul.f32 %v8306_v42, %v10679_v0  ;;  %v3559_v44 = vmul.f32 %v6186_v20, %v10667_v17 }
 0x179   : > { %10675 = vst [vmem:[#allocation29_spill] sm:$0xff] %v8352_v9  ;;  %10678 = vst [vmem:[#allocation17_spill] sm:$0xff] %v8365_v54  ;;  %v3412_v2 = vadd.f32 %v3404_v6, %v3384_v52  ;;  %v3560_v39 = vmul.f32 %v6187_v25, %v10667_v17  ;;  %v3561_v56 = vmul.f32 %v8358_v24, %v10667_v17  ;;  %v8404_v6 = vld [vmem:[#allocation2 + $0xb9] sm:$0x1] }
 0x17a   : > { %v3439_v4 = vadd.f32 %v3431_v38, %v3411_v36  ;;  %v3562_v46 = vmul.f32 %v8360_v13, %v10667_v17  ;;  %v3583_v35 = vmul.f32 %v8292_v33, %v10668_v58  ;;  %v3584_v3 = vmul.f32 %v6202_v51, %v10668_v58  ;;  %v8406_v33 = vld [vmem:[#allocation2 + $0x171] sm:$0xff] }
 0x17b   : > { %v3440_v26 = vadd.f32 %v3432_v30, %v3412_v2  ;;  %v3585_v11 = vmul.f32 %v8297_v12, %v10668_v58  ;;  %v8394_v18 = vadd.f32 %v6105_v29, %v2927_v22  ;;  %v8398_v31 = vmul.f32 %v8370_v32, %v10669_v57  ;;  %v8411_v22 = vld [vmem:[%s10382_s1 + $0x18] ss:$0 sm:$0xff] }
 0x17c   : > { %v3467_v23 = vadd.f32 %v3459_v61, %v3439_v4  ;;  %v3488_v62 = vmul.f32 %v8387_v10, %v10679_v0  ;;  %v3586_v53 = vmul.f32 %v8377_v55, %v10668_v58  ;;  %v3599_v38 = vadd.f32 %v3583_v35, %v3559_v44  ;;  %v6234_v35 = vld [vmem:[#allocation2 + $0x158] sm:$0x1] }
 0x17d   : > { %10680 = vst [vmem:[#allocation42_spill] sm:$0xff] %v8394_v18  ;;  %10681 = vst [vmem:[#allocation10_spill] sm:$0xff] %v8398_v31  ;;  %v3468_v52 = vadd.f32 %v3460_v59, %v3440_v26  ;;  %v3600_v30 = vadd.f32 %v3584_v3, %v3560_v39  ;;  %v3601_v20 = vadd.f32 %v3585_v11, %v3561_v56  ;;  %v8422_v59 = vld [vmem:[#allocation2 + $0x208] sm:$0x1]  ;;  %v6219_v39 = vld [vmem:[#allocation2 + $0x18] sm:$0x1] }
 0x17e   : > { %v8415_v36 = vmul.f32 %v8406_v33, %v10674_v47  ;;  %v3602_v61 = vadd.f32 %v3586_v53, %v3562_v46  ;;  %v3623_v25 = vmul.f32 %v8301_v63, %v10669_v57  ;;  %v3624_v2 = vmul.f32 %v6210_v8, %v10669_v57  ;;  %v8428_v56 = vld [vmem:[#allocation2 + $0x28] sm:$0x1]  ;;  %v8438_v53 = vld [vmem:[#allocation2 + $0x20] sm:$0xff] }
 0x17f   : > { %v3495_v51 = vadd.f32 %v3487_v5, %v3467_v23  ;;  %v3515_v4 = vmul.f32 %v8411_v22, %v8310_v40  ;;  %v3625_v44 = vmul.f32 %v8306_v42, %v10669_v57  ;;  %v3626_v26 = vmul.f32 %v8404_v6, %v10669_v57  ;;  %v8436_v23 = vld [vmem:[#allocation2 + $0x10] sm:$0xff] }
 0x180   : > { %10682 = vst [vmem:[#allocation27_spill] sm:$0xff] %v8415_v36  ;;  %v3516_v63 = vmul.f32 %v8411_v22, %v8370_v32  ;;  %v8434_v5 = vmul.f32 %v8368_v27, %v10668_v58  ;;  %v3639_v46 = vadd.f32 %v3623_v25, %v3599_v38  ;;  %v3640_v29 = vadd.f32 %v3624_v2, %v3600_v30  ;;  %v6242_v2 = vld [vmem:[#allocation2 + $0x19] sm:$0x1]  ;;  %v6275_v36 = vld [vmem:[#allocation2 + $0xc9] sm:$0x1] }
 0x181   : > { %v3496_v3 = vadd.f32 %v3488_v62, %v3468_v52  ;;  %v3641_v11 = vadd.f32 %v3625_v44, %v3601_v20  ;;  %v3642_v8 = vadd.f32 %v3626_v26, %v3602_v61  ;;  %v3671_v50 = vmul.f32 %v8436_v23, %v10671_v19  ;;  %v8451_v62 = vld [vmem:[#allocation2 + $0x168] sm:$0x1]  ;;  %v8456_v44 = vld [vmem:[#allocation2 + $0xc9] sm:$0x1] }
 0x182   : > { %10683 = vst [vmem:[#allocation30_spill] sm:$0xff] %v8434_v5  ;;  %v8444_v49 = vmul.f32 %v8422_v59, %v10668_v58  ;;  %v3672_v15 = vmul.f32 %v6219_v39, %v10671_v19  ;;  %v3673_v38 = vmul.f32 %v8438_v53, %v10671_v19  ;;  %v3674_v30 = vmul.f32 %v8428_v56, %v10671_v19 }
 0x183   : > { %v3523_v52 = vadd.f32 %v3515_v4, %v3495_v51  ;;  %v3687_v20 = vadd.f32 %v3671_v50, %v3639_v46  ;;  %v3711_v61 = vmul.f32 %v8323_v45, %v10672_v60  ;;  %v3712_v25 = vmul.f32 %v6234_v35, %v10672_v60 }
 0x184   : > { %10684 = vst [vmem:[#allocation31_spill] sm:$0xff] %v8444_v49  ;;  %v3688_v26 = vadd.f32 %v3672_v15, %v3640_v29  ;;  %v3689_v39 = vadd.f32 %v3673_v38, %v3641_v11  ;;  %v3690_v1 = vadd.f32 %v3674_v30, %v3642_v8  ;;  %v3713_v18 = vmul.f32 %v8325_v41, %v10672_v60  ;;  %v6251_v11 = vld [vmem:[#allocation2 + $0xb8] sm:$0x1]  ;;  %v6253_v30 = vld [vmem:[#allocation2 + $0xc8] sm:$0x1] }
 0x185   : > { %v3524_v54 = vadd.f32 %v3516_v63, %v3496_v3  ;;  %v8464_v50 = vmul.f32 %v8387_v10, %v10669_v57  ;;  %v3714_v51 = vmul.f32 %v8451_v62, %v10672_v60  ;;  %v3727_v4 = vadd.f32 %v3711_v61, %v3687_v20  ;;  %v8474_v63 = vld [vmem:[%s10383_s2 + $0x1] ss:$0 sm:$0xff]  ;;  %v6266_v20 = vld [vmem:[#allocation2 + $0x1f8] sm:$0x1] }
 0x186   : > { %v3728_v46 = vadd.f32 %v3712_v25, %v3688_v26  ;;  %v3729_v35 = vadd.f32 %v3713_v18, %v3689_v39  ;;  %v3751_v15 = vmul.f32 %v8329_v28, %v10674_v47  ;;  %v3752_v29 = vmul.f32 %v6242_v2, %v10674_v47  ;;  %v8487_v25 = vld [vmem:[#allocation2 + $0xc0] sm:$0xff] }
 0x187   : > { %10685 = vst [vmem:[#allocation26_spill] sm:$0xff] %v8464_v50  ;;  %v8478_v3 = vmul.f32 %v8456_v44, %v10669_v57  ;;  %v3730_v8 = vadd.f32 %v3714_v51, %v3690_v1  ;;  %v3753_v38 = vmul.f32 %v8333_v14, %v10674_v47  ;;  %v3754_v18 = vmul.f32 %v8460_v7, %v10674_v47  ;;  %v8494_v50 = vld [vmem:[#allocation2 + $0x170] sm:$0xff] }
 0x188   : > { %v8485_v61 = vadd.f32 %v8474_v63, %v3523_v52  ;;  %v3767_v2 = vadd.f32 %v3751_v15, %v3727_v4  ;;  %v3768_v26 = vadd.f32 %v3752_v29, %v3728_v46  ;;  %v3799_v39 = vmul.f32 %v8358_v24, %v10676_v21  ;;  %v8496_v52 = vld [vmem:[#allocation2 + $0x38] sm:$0x1] }
 0x189   : > { %10686 = vst [vmem:[#allocation39_spill] sm:$0xff] %v8478_v3  ;;  %v3769_v1 = vadd.f32 %v3753_v38, %v3729_v35  ;;  %v3770_v51 = vadd.f32 %v3754_v18, %v3730_v8  ;;  %v3800_v48 = vmul.f32 %v6251_v11, %v10676_v21  ;;  %v3801_v9 = vmul.f32 %v8487_v25, %v10676_v21  ;;  %v6274_v3 = vld [vmem:[#allocation2 + $0xb9] sm:$0x1] }
 0x18a   : > { %10687 = vst [vmem:[#allocation40_spill] sm:$0xff] %v8485_v61  ;;  %v3802_v49 = vmul.f32 %v6253_v30, %v10676_v21  ;;  %v3815_v4 = vadd.f32 %v3799_v39, %v3767_v2  ;;  %v3839_v46 = vmul.f32 %v8297_v12, %v10679_v0  ;;  %v3840_v15 = vmul.f32 %v6266_v20, %v10679_v0  ;;  %v8527_v39 = vld [vmem:[#allocation2 + $0x39] sm:$0x1] }
 0x18b   : > { %v3816_v35 = vadd.f32 %v3800_v48, %v3768_v26  ;;  %v3817_v29 = vadd.f32 %v3801_v9, %v3769_v1  ;;  %v3841_v11 = vmul.f32 %v8368_v27, %v10679_v0  ;;  %v3842_v8 = vmul.f32 %v6267_v34, %v10679_v0 }
 0x18c   : > { %v3818_v38 = vadd.f32 %v3802_v49, %v3770_v51  ;;  %v3855_v18 = vadd.f32 %v3839_v46, %v3815_v4  ;;  %v3879_v5 = vmul.f32 %v8411_v22, %v8306_v42  ;;  %v3880_v30 = vmul.f32 %v6274_v3, %v8411_v22  ;;  %v8519_v49 = vld [vmem:[#allocation2 + $0x178] sm:$0x1] }
 0x18d   : > { %v8509_v2 = vadd.f32 %v8474_v63, %v3524_v54  ;;  %v8513_v48 = vmul.f32 %v8496_v52, %v10671_v19  ;;  %v8517_v9 = vmul.f32 %v8494_v50, %v10672_v60  ;;  %v3856_v34 = vadd.f32 %v3840_v15, %v3816_v35  ;;  %v8534_v15 = vld [vmem:[#allocation2 + $0x31] sm:$0xff] }
 0x18e   : > { %v3857_v20 = vadd.f32 %v3841_v11, %v3817_v29  ;;  %v3881_v26 = vmul.f32 %v8411_v22, %v8387_v10  ;;  %v3953_v3 = vmul.f32 %v8323_v45, %v10667_v17  ;;  %v3954_v54 = vmul.f32 %v8325_v41, %v10667_v17 }
 0x18f   : > { %10688 = vst [vmem:[#allocation25_spill] sm:$0xff] %v8509_v2  ;;  %10689 = vst [vmem:[#allocation9_spill] sm:$0xff] %v8513_v48  ;;  %v3858_v1 = vadd.f32 %v3842_v8, %v3818_v38  ;;  %v3882_v51 = vmul.f32 %v6275_v36, %v8411_v22  ;;  %v3971_v4 = vmul.f32 %v8329_v28, %v10668_v58 }
 0x190   : > { %10690 = vst [vmem:[#allocation23_spill] sm:$0xff] %v8517_v9  ;;  %v3972_v46 = vmul.f32 %v8333_v14, %v10668_v58  ;;  %v3895_v35 = vadd.f32 %v3879_v5, %v3855_v18  ;;  %v3896_v29 = vadd.f32 %v3880_v30, %v3856_v34  ;;  %v3998_v11 = vmul.f32 %v8339_v37, %v10669_v57 }
 0x191   : > { %v3999_v9 = vmul.f32 %v8341_v43, %v10669_v57  ;;  %v8542_v8 = vmul.f32 %v8519_v49, %v10672_v60  ;;  %v8546_v36 = vmul.f32 %v8534_v15, %v10674_v47  ;;  %v3980_v38 = vadd.f32 %v3971_v4, %v3953_v3  ;;  %v4150_v4 = vld [vmem:[#allocation2 + $0x18] sm:$0x1] }
 0x192   : > { %v3981_v48 = vadd.f32 %v3972_v46, %v3954_v54  ;;  %v8550_v5 = vmul.f32 %v8527_v39, %v10674_v47  ;;  %v3897_v18 = vadd.f32 %v3881_v26, %v3857_v20  ;;  %v4017_v37 = vmul.f32 %v8297_v12, %v10671_v19  ;;  %v4152_v46 = vld [vmem:[#allocation2 + $0x28] sm:$0x1] }
 0x193   : > { %10691 = vst [vmem:[#allocation14_spill] sm:$0xff] %v8542_v8  ;;  %10692 = vst [vmem:[#allocation43_spill] sm:$0xff] %v8546_v36  ;;  %v4018_v30 = vmul.f32 %v8368_v27, %v10671_v19  ;;  %v8556_v34 = vadd.f32 %v3882_v51, %v3858_v1  ;;  %v4007_v8 = vadd.f32 %v3998_v11, %v3980_v38 }
 0x194   : > { %10693 = vst [vmem:[#allocation52_spill] sm:$0xff] %v8550_v5  ;;  %v4008_v31 = vadd.f32 %v3999_v9, %v3981_v48  ;;  %v4036_v36 = vmul.f32 %v8306_v42, %v10672_v60  ;;  %v8561_v3 = vadd.f32 %v8474_v63, %v3895_v35  ;;  %v8564_v54 = vadd.f32 %v8474_v63, %v3896_v29  ;;  %v6307_v35 = vld [vmem:[#allocation2 + $0x158] sm:$0x1]  ;;  %v4229_v5 = vld [vmem:[#allocation2 + $0x19] sm:$0x1] }
 0x195   : > { %10694 = vst [vmem:[#allocation53_spill] sm:$0xff] %v8556_v34  ;;  %v4037_v20 = vmul.f32 %v8387_v10, %v10672_v60  ;;  %v4055_v26 = vmul.f32 %v8310_v40, %v10674_v47  ;;  %v4026_v1 = vadd.f32 %v4017_v37, %v4007_v8  ;;  %v4056_v48 = vmul.f32 %v8370_v32, %v10674_v47  ;;  %v6308_v8 = vld [vmem:[#allocation2 + $0x168] sm:$0x1] }
 0x196   : > { %10695 = vst [vmem:[#allocation54_spill] sm:$0xff] %v8561_v3  ;;  %10696 = vst [vmem:[#allocation55_spill] sm:$0xff] %v8564_v54  ;;  %v4027_v51 = vadd.f32 %v4018_v30, %v4008_v31  ;;  %v4074_v9 = vmul.f32 %v8325_v41, %v10676_v21  ;;  %v4075_v29 = vmul.f32 %v8494_v50, %v10676_v21 }
 0x197   : > { %v4093_v11 = vmul.f32 %v8333_v14, %v10679_v0  ;;  %v4094_v40 = vmul.f32 %v8534_v15, %v10679_v0  ;;  %v4167_v31 = vmul.f32 %v8436_v23, %v10667_v17  ;;  %v4045_v38 = vadd.f32 %v4036_v36, %v4026_v1 }
 0x198   : > { %v4046_v32 = vadd.f32 %v4037_v20, %v4027_v51  ;;  %v4168_v37 = vmul.f32 %v4150_v4, %v10667_v17  ;;  %v4169_v30 = vmul.f32 %v8438_v53, %v10667_v17  ;;  %v4170_v61 = vmul.f32 %v4152_v46, %v10667_v17  ;;  %v4230_v20 = vld [vmem:[#allocation2 + $0x29] sm:$0x1] }
 0x199   : > { %v4194_v2 = vmul.f32 %v8323_v45, %v10668_v58  ;;  %v4195_v54 = vmul.f32 %v6307_v35, %v10668_v58  ;;  %v4196_v16 = vmul.f32 %v8325_v41, %v10668_v58  ;;  %v4064_v23 = vadd.f32 %v4055_v26, %v4045_v38 }
 0x19a   : > { %v4065_v3 = vadd.f32 %v4056_v48, %v4046_v32  ;;  %v4197_v36 = vmul.f32 %v6308_v8, %v10668_v58  ;;  %v4239_v4 = vmul.f32 %v8329_v28, %v10669_v57  ;;  %v4240_v46 = vmul.f32 %v4229_v5, %v10669_v57 }
 0x19b   : > { %v4212_v1 = vadd.f32 %v4194_v2, %v4167_v31  ;;  %v4213_v51 = vadd.f32 %v4195_v54, %v4168_v37  ;;  %v4214_v34 = vadd.f32 %v4196_v16, %v4169_v30  ;;  %v4083_v17 = vadd.f32 %v4074_v9, %v4064_v23  ;;  %v8602_v2 = vld [vmem:[#allocation2 + $0xc8] sm:$0x1] }
 0x19c   : > { %v4112_v45 = vmul.f32 %v8411_v22, %v8341_v43  ;;  %v4215_v35 = vadd.f32 %v4197_v36, %v4170_v61  ;;  %v4241_v26 = vmul.f32 %v8333_v14, %v10669_v57  ;;  %v4242_v48 = vmul.f32 %v4230_v20, %v10669_v57 }
 0x19d   : > { %v4257_v8 = vadd.f32 %v4239_v4, %v4212_v1  ;;  %v4258_v38 = vadd.f32 %v4240_v46, %v4213_v51  ;;  %v4277_v28 = vmul.f32 %v8358_v24, %v10671_v19  ;;  %v4084_v16 = vadd.f32 %v4075_v29, %v4065_v3  ;;  %v8627_v51 = vld [vmem:[#allocation2 + $0x30] sm:$0xff] }
 0x19e   : > { %v4102_v54 = vadd.f32 %v4093_v11, %v4083_v17  ;;  %v4259_v5 = vadd.f32 %v4241_v26, %v4214_v34  ;;  %v4278_v9 = vmul.f32 %v8360_v13, %v10671_v19  ;;  %v4260_v43 = vadd.f32 %v4242_v48, %v4215_v35 }
 0x19f   : > { %v4279_v61 = vmul.f32 %v8487_v25, %v10671_v19  ;;  %v4280_v31 = vmul.f32 %v8602_v2, %v10671_v19  ;;  %v4295_v32 = vadd.f32 %v4277_v28, %v4257_v8  ;;  %v8611_v37 = vadd.f32 %v8474_v63, %v3897_v18 }
 0x1a0   : > { %v4113_v24 = vmul.f32 %v8411_v22, %v8406_v33  ;;  %v4296_v3 = vadd.f32 %v4278_v9, %v4258_v38  ;;  %v4314_v17 = vmul.f32 %v8297_v12, %v10672_v60  ;;  %v4315_v29 = vmul.f32 %v8377_v55, %v10672_v60 }
 0x1a1   : > { %v4297_v34 = vadd.f32 %v4279_v61, %v4259_v5  ;;  %v4298_v13 = vadd.f32 %v4280_v31, %v4260_v43  ;;  %v4316_v11 = vmul.f32 %v8368_v27, %v10672_v60  ;;  %v4103_v30 = vadd.f32 %v4094_v40, %v4084_v16 }
 0x1a2   : > { %v4121_v23 = vadd.f32 %v4112_v45, %v4102_v54  ;;  %v4317_v18 = vmul.f32 %v8422_v59, %v10672_v60  ;;  %v4332_v36 = vadd.f32 %v4314_v17, %v4295_v32  ;;  %v4333_v20 = vadd.f32 %v4315_v29, %v4296_v3  ;;  %v10697_v3 = vld [vmem:[#allocation11_spill] sm:$0xff] }
 0x1a3   : > { %v4334_v4 = vadd.f32 %v4316_v11, %v4297_v34  ;;  %v4351_v1 = vmul.f32 %v8306_v42, %v10674_v47  ;;  %v4352_v12 = vmul.f32 %v8404_v6, %v10674_v47  ;;  %v4353_v46 = vmul.f32 %v8387_v10, %v10674_v47 }
 0x1a4   : > { %v4335_v55 = vadd.f32 %v4317_v18, %v4298_v13  ;;  %v4354_v40 = vmul.f32 %v8456_v44, %v10674_v47  ;;  %v4389_v59 = vmul.f32 %v8438_v53, %v10676_v21  ;;  %v4390_v42 = vmul.f32 %v8428_v56, %v10676_v21  ;;  %v10699_v13 = vld [vmem:[#allocation12_spill] sm:$0xff] }
 0x1a5   : > { %v4369_v45 = vadd.f32 %v4351_v1, %v4332_v36  ;;  %v4370_v35 = vadd.f32 %v4352_v12, %v4333_v20  ;;  %v4391_v6 = vmul.f32 %v8627_v51, %v10676_v21  ;;  %v4371_v26 = vadd.f32 %v4353_v46, %v4334_v4  ;;  %v10703_v46 = vld [vmem:[#allocation53_spill] sm:$0xff] }
 0x1a6   : > { %v4372_v48 = vadd.f32 %v4354_v40, %v4335_v55  ;;  %v4392_v8 = vmul.f32 %v8496_v52, %v10676_v21  ;;  %v4426_v38 = vmul.f32 %v8325_v41, %v10679_v0  ;;  %v4427_v53 = vmul.f32 %v8451_v62, %v10679_v0 }
 0x1a7   : > { %v4407_v44 = vadd.f32 %v4389_v59, %v4369_v45  ;;  %v4408_v28 = vadd.f32 %v4390_v42, %v4370_v35  ;;  %v4428_v16 = vmul.f32 %v8494_v50, %v10679_v0  ;;  %v4409_v56 = vadd.f32 %v4391_v6, %v4371_v26  ;;  %v10706_v45 = vld [vmem:[#allocation54_spill] sm:$0xff]  ;;  %v4234_v35 = vld [vmem:[#allocation2 + $0x69] sm:$0x1] }
 0x1a8   : > { %v4410_v54 = vadd.f32 %v4392_v8, %v4372_v48  ;;  %v4429_v5 = vmul.f32 %v8519_v49, %v10679_v0  ;;  %v4463_v9 = vmul.f32 %v8411_v22, %v8333_v14  ;;  %v4464_v41 = vmul.f32 %v8460_v7, %v8411_v22  ;;  %v6554_v49 = vld [vmem:[%s10384_s3 + $0x10] sm:$0xff]  ;;  %v10701_v7 = vld [vmem:[#allocation13_spill] sm:$0xff] }
 0x1a9   : > { %v4444_v52 = vadd.f32 %v4426_v38, %v4407_v44  ;;  %v4445_v43 = vadd.f32 %v4427_v53, %v4408_v28  ;;  %v4465_v61 = vmul.f32 %v8411_v22, %v8534_v15  ;;  %v4446_v62 = vadd.f32 %v4428_v16, %v4409_v56 }
 0x1aa   : > { %v4447_v31 = vadd.f32 %v4429_v5, %v4410_v54  ;;  %v4466_v32 = vmul.f32 %v8527_v39, %v8411_v22  ;;  %v8661_v17 = vrot.slane %v6554_v49, %v10697_v3  ;;  %v8664_v29 = vrot.slane %v6554_v49, %v10699_v13 }
 0x1ab   : > { %v4481_v14 = vadd.f32 %v4463_v9, %v4444_v52  ;;  %v4482_v34 = vadd.f32 %v4464_v41, %v4445_v43  ;;  %v8667_v11 = vrot.slane %v6554_v49, %v10701_v7  ;;  %v4122_v18 = vadd.f32 %v4113_v24, %v4103_v30  ;;  %v10708_v52 = vld [vmem:[#allocation16_spill] sm:$0xff] }
 0x1ac   : > { %10698 = vst [vmem:[#allocation11_spill] sm:$0xff] %v8661_v17  ;;  %10700 = vst [vmem:[#allocation12_spill] sm:$0xff] %v8664_v29  ;;  %v8670_v36 = vadd.f32 %v8474_v63, %v4121_v23  ;;  %v4483_v39 = vadd.f32 %v4465_v61, %v4446_v62  ;;  %v4558_v20 = vmul.f32 0.0, %v8661_v17  ;;  %v4484_v4 = vadd.f32 %v4466_v32, %v4447_v31  ;;  %v10704_v23 = vld [vmem:[#allocation15_spill] sm:$0xff]  ;;  %v10711_v62 = vld [vmem:[#allocation44_spill] sm:$0xff] }
 0x1ad   : > { %10702 = vst [vmem:[#allocation13_spill] sm:$0xff] %v8667_v11  ;;  %v4499_v1 = vadd.f32 %v8474_v63, %v4481_v14  ;;  %v8675_v12 = vadd.f32 %v8474_v63, %v4482_v34  ;;  %v4570_v55 = vmul.f32 0.0, %v8664_v29  ;;  %v8680_v40 = vadd.f32 %v8474_v63, %v10703_v46  ;;  %v10712_v32 = vld [vmem:[#allocation55_spill] sm:$0xff] }
 0x1ae   : > { %v4571_v24 = vmul.f32 %v8664_v29, %v8670_v36  ;;  %v4590_v30 = vmul.f32 0.0, %v8667_v11  ;;  %v8686_v59 = vrot.slane %v6554_v49, %v10704_v23  ;;  %v3927_v42 = vsel %vm1835_vm0, 0.0, %v10706_v45  ;;  %v10717_v45 = vld [vmem:[#allocation21_spill] sm:$0xff] }
 0x1af   : > { %v3929_v6 = vsel %vm1835_vm0, 0.0, %v8611_v37  ;;  %v8696_v26 = vsel %vm1835_vm0, 0.0, %v4499_v1  ;;  %v4593_v48 = vmul.f32 %v8667_v11, %v8675_v12  ;;  %v8701_v8 = vadd.f32 %v8474_v63, %v4122_v18 }
 0x1b0   : > { %10705 = vst [vmem:[#allocation53_spill] sm:$0xff] %v8686_v59  ;;  %v4559_v38 = vmul.f32 %v8661_v17, %v8696_v26  ;;  %v4578_v44 = vadd.f32 %v4570_v55, %v4558_v20  ;;  %v4592_v28 = vmul.f32 %v8667_v11, %v8696_v26  ;;  %v4501_v53 = vadd.f32 %v8474_v63, %v4483_v39  ;;  %v10713_v39 = vld [vmem:[#allocation25_spill] sm:$0xff]  ;;  %v8732_v55 = vld [vmem:[%s10384_s3 + $0x18] ss:$0 sm:$0xff] }
 0x1b1   : > { %v8709_v37 = vadd.f32 %v8474_v63, %v4484_v4  ;;  %v4622_v16 = vrot.slane %v4590_v30, 1  ;;  %v4626_v56 = vrot.slane %v4593_v48, 1  ;;  %v4666_v9 = vmul.f32 %v8686_v59, %v3927_v42  ;;  %10714 = vst [vmem:[#allocation16_spill] sm:$0xff] %v8732_v55  ;;  %v10715_v30 = vld [vmem:[#allocation20_spill] sm:$0xff] }
 0x1b2   : > { %v4579_v54 = vadd.f32 %v4571_v24, %v4559_v38  ;;  %v4625_v5 = vrot.slane %v4592_v28, 1  ;;  %v8713_v43 = vrot.slane %v6554_v49, %v10708_v52  ;;  %v4667_v61 = vmul.f32 %v8686_v59, %v3929_v6 }
 0x1b3   : > { %v8717_v41 = vmul.f32 %v8667_v11, %v8709_v37  ;;  %v4706_v31 = vmul.f32 %v10711_v62, %v3927_v42  ;;  %v4707_v3 = vmul.f32 %v10711_v62, %v10712_v32  ;;  %v4654_v34 = vadd.f32 %v4622_v16, %v4578_v44 }
 0x1b4   : > { %10709 = vst [vmem:[#allocation15_spill] sm:$0xff] %v8713_v43  ;;  %v4627_v14 = vsel %vm2655_vm1, %v4625_v5, %v4626_v56  ;;  %v4708_v13 = vmul.f32 %v10711_v62, %v3929_v6  ;;  %v4709_v7 = vmul.f32 %v10711_v62, %v8680_v40  ;;  %v4687_v20 = vmul.f32 %v8713_v43, %v10713_v39  ;;  %v10748_v62 = vld [vmem:[#allocation52_spill] sm:$0xff] }
 0x1b5   : > { %10710 = vst [vmem:[#allocation54_spill] sm:$0xff] %v8717_v41  ;;  %v4655_v18 = vadd.f32 %v4627_v14, %v4579_v54  ;;  %v4738_v4 = vrot.slane %v4706_v31, 1  ;;  %v4739_v1 = vrot.slane %v4707_v3, 1  ;;  %v8735_v23 = vrot.slane %v6554_v49, %v10715_v30  ;;  %v10735_v54 = vld [vmem:[#allocation31_spill] sm:$0xff] }
 0x1b6   : > { %v4741_v46 = vrot.slane %v4708_v13, 1  ;;  %v4742_v24 = vrot.slane %v4709_v7, 1  ;;  %v8738_v48 = vrot.slane %v6554_v49, %v10717_v45  ;;  %v8742_v38 = vsel %vm1835_vm0, 0.0, %v4501_v53  ;;  %v10747_v41 = vld [vmem:[#allocation43_spill] sm:$0xff] }
 0x1b7   : > { %10716 = vst [vmem:[#allocation55_spill] sm:$0xff] %v8735_v23  ;;  %10719 = vst [vmem:[#allocation20_spill] sm:$0xff] %v8742_v38  ;;  %v4572_v44 = vmul.f32 %v8664_v29, %v8701_v8  ;;  %v4675_v28 = vadd.f32 %v4667_v61, %v4655_v18  ;;  %v4740_v16 = vsel %vm2655_vm1, %v4738_v4, %v4739_v1  ;;  %v4995_v14 = vrot.slane %v3927_v42, 1  ;;  %v4231_v29 = vld [vmem:[#allocation2 + $0x39] sm:$0x1] }
 0x1b8   : > { %10718 = vst [vmem:[#allocation25_spill] sm:$0xff] %v8738_v48  ;;  %v4560_v56 = vmul.f32 %v8661_v17, %v8742_v38  ;;  %v4674_v5 = vadd.f32 %v4666_v9, %v4654_v34  ;;  %v4743_v52 = vsel %vm2655_vm1, %v4741_v46, %v4742_v24  ;;  %v4782_v31 = vmul.f32 %v8735_v23, %v8696_v26  ;;  %v8943_v17 = vld [vmem:[#allocation2 + $0xe0] sm:$0xff] }
 0x1b9   : > { %v4695_v49 = vadd.f32 %v4687_v20, %v4675_v28  ;;  %v4783_v53 = vmul.f32 %v8735_v23, %v8742_v38  ;;  %v8757_v61 = vmul.f32 %v8732_v55, %v8675_v12  ;;  %v4802_v3 = vmul.f32 %v8738_v48, %v8670_v36  ;;  %v8774_v28 = vld [vmem:[#allocation2 + $0x211] sm:$0xff] }
 0x1ba   : > { %v4996_v13 = vrot.slane %v10712_v32, 1  ;;  %v4998_v9 = vrot.slane %v3929_v6, 1  ;;  %v4803_v7 = vmul.f32 %v8738_v48, %v8701_v8  ;;  %v4999_v18 = vrot.slane %v8680_v40, 1  ;;  %v10721_v6 = vld [vmem:[#allocation40_spill] sm:$0xff] }
 0x1bb   : > { %10720 = vst [vmem:[#allocation21_spill] sm:$0xff] %v8757_v61  ;;  %v4771_v34 = vadd.f32 %v4743_v52, %v4695_v49  ;;  %v5051_v20 = vrot.slane %v8696_v26, 1  ;;  %v5052_v1 = vrot.slane %v8675_v12, 1  ;;  %v5054_v46 = vrot.slane %v8742_v38, 1  ;;  %v10722_v49 = vld [vmem:[#allocation38_spill] sm:$0xff] }
 0x1bc   : > { %v4997_v4 = vsel %vm2655_vm1, %v4995_v14, %v4996_v13  ;;  %v5055_v24 = vrot.slane %v8709_v37, 1  ;;  %v5000_v32 = vsel %vm2655_vm1, %v4998_v9, %v4999_v18  ;;  %v4686_v45 = vmul.f32 %v8713_v43, %v10721_v6  ;;  %v8785_v18 = vld [vmem:[#allocation2 + $0x210] sm:$0xff] }
 0x1bd   : > { %v4791_v42 = vadd.f32 %v4783_v53, %v4771_v34  ;;  %v5027_v30 = vmax.f32 %v10721_v6, %v4997_v4  ;;  %v5028_v40 = vmax.f32 %v10713_v39, %v5000_v32  ;;  %v5053_v52 = vsel %vm2655_vm1, %v5051_v20, %v5052_v1  ;;  %v8787_v4 = vld [vmem:[#allocation2 + $0xd1] sm:$0xff] }
 0x1be   : > { %v5056_v12 = vsel %vm2655_vm1, %v5054_v46, %v5055_v24  ;;  %v3301_v14 = vmul.f32 %v8368_v27, %v10722_v49  ;;  %v5083_v53 = vmax.f32 %v8670_v36, %v5053_v52  ;;  %v4694_v34 = vadd.f32 %v4686_v45, %v4674_v5  ;;  %v8801_v46 = vld [vmem:[#allocation2 + $0x180] sm:$0xff] }
 0x1bf   : > { %v8781_v13 = vadd.f32 %v4803_v7, %v4791_v42  ;;  %v5084_v9 = vmax.f32 %v8701_v8, %v5056_v12  ;;  %v3302_v39 = vmul.f32 %v8785_v18, %v10722_v49  ;;  %v3321_v20 = vmul.f32 %v8387_v10, %v10668_v58 }
 0x1c0   : > { %v3322_v27 = vmul.f32 %v8787_v4, %v10668_v58  ;;  %v3350_v7 = vmul.f32 %v8774_v28, %v10669_v57  ;;  %v8799_v36 = vmul.f32 %v8732_v55, %v8709_v37  ;;  %v5091_v8 = vmax.f32 %v5027_v30, %v5083_v53  ;;  %v8820_v53 = vld [vmem:[#allocation2 + $0xd0] sm:$0xff] }
 0x1c1   : > { %10723 = vst [vmem:[#allocation40_spill] sm:$0xff] %v8781_v13  ;;  %v5092_v5 = vmax.f32 %v5028_v40, %v5084_v9  ;;  %v4770_v1 = vadd.f32 %v4740_v16, %v4694_v34  ;;  %v3329_v24 = vadd.f32 %v3321_v20, %v3301_v14  ;;  %v3377_v10 = vmul.f32 %v8494_v50, %v10671_v19  ;;  %v8813_v40 = vld [vmem:[#allocation2 + $0x41] sm:$0xff]  ;;  %v10727_v16 = vld [vmem:[#allocation10_spill] sm:$0xff]  ;;  %v8833_v34 = vld [vmem:[#allocation2 + $0xd8] sm:$0x1] }
 0x1c2   : > { %10724 = vst [vmem:[#allocation56_spill] sm:$0xff] %v8799_v36  ;;  %v3330_v42 = vadd.f32 %v3322_v27, %v3302_v39  ;;  %v3378_v32 = vmul.f32 %v8801_v46, %v10671_v19  ;;  %v8807_v6 = vadd.f32 %v4572_v44, %v4560_v56  ;;  %v8811_v45 = vmul.f32 %v8732_v55, %v8696_v26  ;;  %v8831_v9 = vld [vmem:[#allocation2 + $0x181] sm:$0xff] }
 0x1c3   : > { %v6493_v37 = vpack.i.bf16 %v5092_v5, %v5091_v8  ;;  %v4790_v30 = vadd.f32 %v4782_v31, %v4770_v1  ;;  %v3357_v52 = vadd.f32 %v10727_v16, %v3329_v24  ;;  %v3405_v14 = vmul.f32 %v8534_v15, %v10672_v60  ;;  %v8835_v39 = vld [vmem:[#allocation2 + $0x220] sm:$0xff] }
 0x1c4   : > { %10725 = vst [vmem:[#allocation57_spill] sm:$0xff] %v8807_v6  ;;  %10726 = vst [vmem:[#allocation58_spill] sm:$0xff] %v8811_v45  ;;  %v3358_v12 = vadd.f32 %v3350_v7, %v3330_v42  ;;  %v3406_v50 = vmul.f32 %v8813_v40, %v10672_v60  ;;  %v8824_v44 = vmul.f32 %v8732_v55, %v8742_v38  ;;  %v8837_v20 = vld [vmem:[#allocation2 + $0x221] sm:$0xff]  ;;  %v8915_v6 = vld [vmem:[#allocation2 + $0x49] sm:$0x1] }
 0x1c5   : > { %v8828_v31 = vadd.f32 %v4802_v3, %v4790_v30  ;;  %6494 = vrot.lane.b32.xlu0 %v6493_v37, %s6587_s17  ;;  %v3385_v27 = vadd.f32 %v3377_v10, %v3357_v52  ;;  %v3434_v8 = vmul.f32 %v8831_v9, %v10674_v47  ;;  %v3461_v5 = vmul.f32 %v8785_v18, %v10676_v21  ;;  %v8843_v3 = vld [vmem:[#allocation2 + $0x218] sm:$0x1]  ;;  %v8874_v36 = vld [vmem:[#allocation2 + $0xe1] sm:$0xff] }
 0x1c6   : > { %10728 = vst [vmem:[#allocation10_spill] sm:$0xff] %v8824_v44  ;;  %v3386_v7 = vadd.f32 %v3378_v32, %v3358_v12  ;;  %v3462_v1 = vmul.f32 %v8835_v39, %v10676_v21  ;;  %v3563_v24 = vmul.f32 %v8487_v25, %v10722_v49  ;;  %v3564_v42 = vmul.f32 %v8602_v2, %v10722_v49  ;;  %v8853_v30 = vld [vmem:[#allocation2 + $0x191] sm:$0xff]  ;;  %v8859_v12 = vld [vmem:[#allocation2 + $0xd9] sm:$0x1] }
 0x1c7   : > { %10729 = vst [vmem:[#allocation59_spill] sm:$0xff] %v8828_v31  ;;  %v3565_v10 = vmul.f32 %v8820_v53, %v10722_v49  ;;  %v3413_v32 = vadd.f32 %v3405_v14, %v3385_v27  ;;  %10730 = vst [vmem:[#allocation60_spill] sm:$0xff] %v8853_v30  ;;  %v3566_v16 = vmul.f32 %v8833_v34, %v10722_v49 }
 0x1c8   : > { %v3414_v37 = vadd.f32 %v3406_v50, %v3386_v7  ;;  %v3589_v52 = vmul.f32 %v8785_v18, %v10668_v58  ;;  %v8863_v25 = vmul.f32 %v8837_v20, %v10669_v57  ;;  %v8867_v2 = vmul.f32 %v8853_v30, %v10674_v47  ;;  %v10733_v50 = vld [vmem:[#allocation30_spill] sm:$0xff]  ;;  %v10734_v7 = vld [vmem:[#allocation27_spill] sm:$0xff] }
 0x1c9   : > { %v3590_v14 = vmul.f32 %v8843_v3, %v10668_v58  ;;  %v3603_v27 = vadd.f32 %v10733_v50, %v3563_v24  ;;  %v3441_v56 = vadd.f32 %v10734_v7, %v3413_v32  ;;  %v3604_v13 = vadd.f32 %v10735_v54, %v3564_v42 }
 0x1ca   : > { %10731 = vst [vmem:[#allocation61_spill] sm:$0xff] %v8863_v25  ;;  %10732 = vst [vmem:[#allocation62_spill] sm:$0xff] %v8867_v2  ;;  %v3442_v26 = vadd.f32 %v3434_v8, %v3414_v37  ;;  %v3605_v31 = vadd.f32 %v3589_v52, %v3565_v10  ;;  %v3489_v61 = vmul.f32 %v8787_v4, %v10679_v0  ;;  %v8882_v25 = vld [vmem:[#allocation2 + $0x48] sm:$0x1]  ;;  %v10736_v8 = vld [vmem:[#allocation26_spill] sm:$0xff] }
 0x1cb   : > { %v3606_v44 = vadd.f32 %v3590_v14, %v3566_v16  ;;  %v3629_v45 = vmul.f32 %v8787_v4, %v10669_v57  ;;  %v3630_v2 = vmul.f32 %v8859_v12, %v10669_v57  ;;  %v3469_v24 = vadd.f32 %v3461_v5, %v3441_v56  ;;  %v10737_v10 = vld [vmem:[#allocation39_spill] sm:$0xff]  ;;  %v8888_v16 = vld [vmem:[#allocation2 + $0x40] sm:$0xff]  ;;  %v8896_v56 = vld [vmem:[#allocation2 + $0x228] sm:$0x1] }
 0x1cc   : > { %v3470_v32 = vadd.f32 %v3462_v1, %v3442_v26  ;;  %v3490_v54 = vmul.f32 %v8874_v36, %v10679_v0  ;;  %v3643_v42 = vadd.f32 %v10736_v8, %v3603_v27  ;;  %v3644_v37 = vadd.f32 %v10737_v10, %v3604_v13  ;;  %v8906_v1 = vld [vmem:[#allocation2 + $0x58] sm:$0x1]  ;;  %v10738_v27 = vld [vmem:[#allocation9_spill] sm:$0xff] }
 0x1cd   : > { %v3645_v52 = vadd.f32 %v3629_v45, %v3605_v31  ;;  %v3646_v50 = vadd.f32 %v3630_v2, %v3606_v44  ;;  %v3675_v14 = vmul.f32 %v8627_v51, %v10671_v19  ;;  %v3517_v7 = vmul.f32 %v8411_v22, %v8774_v28  ;;  %v8902_v45 = vld [vmem:[#allocation2 + $0x188] sm:$0x1]  ;;  %v8904_v31 = vld [vmem:[#allocation2 + $0xe9] sm:$0x1] }
 0x1ce   : > { %v3518_v26 = vmul.f32 %v8411_v22, %v8837_v20  ;;  %v3677_v5 = vmul.f32 %v8888_v16, %v10671_v19  ;;  %v3678_v13 = vmul.f32 %v8882_v25, %v10671_v19  ;;  %v3497_v44 = vadd.f32 %v3489_v61, %v3469_v24 }
 0x1cf   : > { %v3691_v2 = vadd.f32 %v3675_v14, %v3643_v42  ;;  %v3692_v8 = vadd.f32 %v10738_v27, %v3644_v37  ;;  %v3717_v10 = vmul.f32 %v8801_v46, %v10672_v60  ;;  %v3498_v55 = vadd.f32 %v3490_v54, %v3470_v32  ;;  %v10742_v32 = vld [vmem:[#allocation23_spill] sm:$0xff] }
 0x1d0   : > { %v8913_v48 = vmul.f32 %v8835_v39, %v10668_v58  ;;  %v3693_v23 = vadd.f32 %v3677_v5, %v3645_v52  ;;  %v3694_v43 = vadd.f32 %v3678_v13, %v3646_v50  ;;  %v8919_v61 = vmul.f32 %v8896_v56, %v10668_v58  ;;  %v10745_v50 = vld [vmem:[#allocation14_spill] sm:$0xff]  ;;  %v6255_v13 = vld [vmem:[#allocation2 + $0xd8] sm:$0x1] }
 0x1d1   : > { %v8923_v24 = vmul.f32 %v8874_v36, %v10669_v57  ;;  %v3718_v42 = vmul.f32 %v8902_v45, %v10672_v60  ;;  %v3731_v54 = vadd.f32 %v10742_v32, %v3691_v2  ;;  %v8930_v37 = vmul.f32 %v8904_v31, %v10669_v57  ;;  %v6257_v32 = vld [vmem:[#allocation2 + $0xe8] sm:$0x1] }
 0x1d2   : > { %10739 = vst [vmem:[#allocation30_spill] sm:$0xff] %v8913_v48  ;;  %10740 = vst [vmem:[#allocation27_spill] sm:$0xff] %v8919_v61  ;;  %v8934_v52 = vmul.f32 %v8906_v1, %v10671_v19  ;;  %v3732_v14 = vadd.f32 %v10745_v50, %v3692_v8  ;;  %v3733_v5 = vadd.f32 %v3717_v10, %v3693_v23  ;;  %v6268_v48 = vld [vmem:[#allocation2 + $0x218] sm:$0x1]  ;;  %v6276_v50 = vld [vmem:[#allocation2 + $0xd9] sm:$0x1] }
 0x1d3   : > { %10741 = vst [vmem:[#allocation31_spill] sm:$0xff] %v8923_v24  ;;  %10743 = vst [vmem:[#allocation26_spill] sm:$0xff] %v8930_v37  ;;  %v8937_v27 = vadd.f32 %v3517_v7, %v3497_v44  ;;  %v3734_v24 = vadd.f32 %v3718_v42, %v3694_v43  ;;  %v3757_v61 = vmul.f32 %v8813_v40, %v10674_v47  ;;  %v6269_v7 = vld [vmem:[#allocation2 + $0x228] sm:$0x1] }
 0x1d4   : > { %10744 = vst [vmem:[#allocation39_spill] sm:$0xff] %v8934_v52  ;;  %v3758_v2 = vmul.f32 %v8915_v6, %v10674_v47  ;;  %v3526_v37 = vadd.f32 %v3518_v26, %v3498_v55  ;;  %v3771_v52 = vadd.f32 %v10747_v41, %v3731_v54  ;;  %v3772_v8 = vadd.f32 %v10748_v62, %v3732_v14  ;;  %v6277_v54 = vld [vmem:[#allocation2 + $0xe9] sm:$0x1] }
 0x1d5   : > { %10746 = vst [vmem:[#allocation9_spill] sm:$0xff] %v8937_v27  ;;  %v3803_v23 = vmul.f32 %v8820_v53, %v10676_v21  ;;  %v3773_v43 = vadd.f32 %v3757_v61, %v3733_v5  ;;  %v3804_v10 = vmul.f32 %v6255_v13, %v10676_v21  ;;  %v3805_v42 = vmul.f32 %v8943_v17, %v10676_v21 }
 0x1d6   : > { %v3774_v44 = vadd.f32 %v3758_v2, %v3734_v24  ;;  %v3806_v55 = vmul.f32 %v6257_v32, %v10676_v21  ;;  %v3843_v41 = vmul.f32 %v8785_v18, %v10679_v0  ;;  %v3844_v62 = vmul.f32 %v6268_v48, %v10679_v0  ;;  %v8962_v32 = vld [vmem:[#allocation2 + $0x198] sm:$0x1] }
 0x1d7   : > { %v3819_v26 = vadd.f32 %v3803_v23, %v3771_v52  ;;  %v3820_v14 = vadd.f32 %v3804_v10, %v3772_v8  ;;  %v3821_v27 = vadd.f32 %v3805_v42, %v3773_v43  ;;  %v3845_v61 = vmul.f32 %v8835_v39, %v10679_v0  ;;  %v6285_v43 = vld [vmem:[#allocation2 + $0x170] sm:$0xff] }
 0x1d8   : > { %v3846_v24 = vmul.f32 %v6269_v7, %v10679_v0  ;;  %v3822_v5 = vadd.f32 %v3806_v55, %v3774_v44  ;;  %v3883_v2 = vmul.f32 %v8411_v22, %v8787_v4  ;;  %v3884_v52 = vmul.f32 %v6276_v50, %v8411_v22  ;;  %v8970_v55 = vld [vmem:[#allocation2 + $0x190] sm:$0xff] }
 0x1d9   : > { %v3859_v13 = vadd.f32 %v3843_v41, %v3819_v26  ;;  %v3860_v23 = vadd.f32 %v3844_v62, %v3820_v14  ;;  %v3861_v59 = vadd.f32 %v3845_v61, %v3821_v27  ;;  %v3885_v48 = vmul.f32 %v8411_v22, %v8874_v36 }
 0x1da   : > { %v3886_v8 = vmul.f32 %v6277_v54, %v8411_v22  ;;  %v3862_v10 = vadd.f32 %v3846_v24, %v3822_v5  ;;  %v3955_v7 = vmul.f32 %v6285_v43, %v10722_v49  ;;  %v3956_v44 = vmul.f32 %v8801_v46, %v10722_v49 }
 0x1db   : > { %v3899_v42 = vadd.f32 %v3883_v2, %v3859_v13  ;;  %v3900_v50 = vadd.f32 %v3884_v52, %v3860_v23  ;;  %v3901_v26 = vadd.f32 %v3885_v48, %v3861_v59  ;;  %v3973_v27 = vmul.f32 %v8534_v15, %v10668_v58 }
 0x1dc   : > { %v3974_v41 = vmul.f32 %v8813_v40, %v10668_v58  ;;  %v8978_v62 = vmul.f32 %v8970_v55, %v10672_v60  ;;  %v8982_v54 = vmul.f32 %v8962_v32, %v10672_v60  ;;  %v4000_v14 = vmul.f32 %v8406_v33, %v10669_v57 }
 0x1dd   : > { %v4001_v59 = vmul.f32 %v8831_v9, %v10669_v57  ;;  %v8989_v61 = vadd.f32 %v8474_v63, %v3526_v37  ;;  %v8991_v24 = vadd.f32 %v3886_v8, %v3862_v10  ;;  %v3982_v5 = vadd.f32 %v3973_v27, %v3955_v7 }
 0x1de   : > { %10749 = vst [vmem:[#allocation23_spill] sm:$0xff] %v8978_v62  ;;  %10750 = vst [vmem:[#allocation14_spill] sm:$0xff] %v8982_v54  ;;  %v3983_v13 = vadd.f32 %v3974_v41, %v3956_v44  ;;  %v3915_v2 = vadd.f32 %v8474_v63, %v3899_v42  ;;  %v8995_v52 = vadd.f32 %v8474_v63, %v3900_v50  ;;  %v4154_v50 = vld [vmem:[#allocation2 + $0x38] sm:$0x1] }
 0x1df   : > { %10751 = vst [vmem:[#allocation43_spill] sm:$0xff] %v8989_v61  ;;  %v4019_v23 = vmul.f32 %v8785_v18, %v10671_v19  ;;  %v4020_v33 = vmul.f32 %v8835_v39, %v10671_v19  ;;  %v9002_v48 = vadd.f32 %v8474_v63, %v3901_v26  ;;  %v4009_v37 = vadd.f32 %v4000_v14, %v3982_v5  ;;  %v9014_v26 = vld [vmem:[#allocation2 + $0x51] sm:$0xff]  ;;  %v4156_v5 = vld [vmem:[#allocation2 + $0x48] sm:$0x1] }
 0x1e0   : > { %10752 = vst [vmem:[#allocation52_spill] sm:$0xff] %v8995_v52  ;;  %v4010_v54 = vadd.f32 %v4001_v59, %v3983_v13  ;;  %v4038_v8 = vmul.f32 %v8787_v4, %v10672_v60  ;;  %v4039_v10 = vmul.f32 %v8874_v36, %v10672_v60  ;;  %v4057_v42 = vmul.f32 %v8774_v28, %v10674_v47  ;;  %v6309_v13 = vld [vmem:[#allocation2 + $0x178] sm:$0x1] }
 0x1e1   : > { %10753 = vst [vmem:[#allocation63_spill] sm:$0xff] %v9002_v48  ;;  %v4058_v7 = vmul.f32 %v8837_v20, %v10674_v47  ;;  %v4076_v44 = vmul.f32 %v8801_v46, %v10676_v21  ;;  %10754 = vst [vmem:[#allocation64_spill] sm:$0xff] %v9014_v26  ;;  %v4028_v27 = vadd.f32 %v4019_v23, %v4009_v37  ;;  %v6310_v23 = vld [vmem:[#allocation2 + $0x188] sm:$0x1] }
 0x1e2   : > { %v4029_v41 = vadd.f32 %v4020_v33, %v4010_v54  ;;  %v4077_v14 = vmul.f32 %v8970_v55, %v10676_v21  ;;  %v4095_v59 = vmul.f32 %v8813_v40, %v10679_v0  ;;  %v4096_v28 = vmul.f32 %v9014_v26, %v10679_v0 }
 0x1e3   : > { %v4114_v20 = vmul.f32 %v8411_v22, %v8831_v9  ;;  %v4115_v62 = vmul.f32 %v8411_v22, %v8853_v30  ;;  %v4171_v54 = vmul.f32 %v8627_v51, %v10722_v49  ;;  %v4047_v33 = vadd.f32 %v4038_v8, %v4028_v27 }
 0x1e4   : > { %v4048_v37 = vadd.f32 %v4039_v10, %v4029_v41  ;;  %v4172_v61 = vmul.f32 %v4154_v50, %v10722_v49  ;;  %v4173_v52 = vmul.f32 %v8888_v16, %v10722_v49  ;;  %v4174_v11 = vmul.f32 %v4156_v5, %v10722_v49  ;;  %v4232_v10 = vld [vmem:[#allocation2 + $0x49] sm:$0x1]  ;;  %v9040_v49 = vld [vmem:[#allocation2 + $0xe8] sm:$0x1] }
 0x1e5   : > { %v4198_v38 = vmul.f32 %v6285_v43, %v10668_v58  ;;  %v4199_v9 = vmul.f32 %v6309_v13, %v10668_v58  ;;  %v4200_v22 = vmul.f32 %v8801_v46, %v10668_v58  ;;  %v4066_v30 = vadd.f32 %v4057_v42, %v4047_v33 }
 0x1e6   : > { %v4067_v51 = vadd.f32 %v4058_v7, %v4048_v37  ;;  %v4201_v8 = vmul.f32 %v6310_v23, %v10668_v58  ;;  %v4243_v50 = vmul.f32 %v8534_v15, %v10669_v57  ;;  %v4244_v5 = vmul.f32 %v4231_v29, %v10669_v57 }
 0x1e7   : > { %v4216_v27 = vadd.f32 %v4198_v38, %v4171_v54  ;;  %v4217_v41 = vadd.f32 %v4199_v9, %v4172_v61  ;;  %v4218_v48 = vadd.f32 %v4200_v22, %v4173_v52  ;;  %v4085_v43 = vadd.f32 %v4076_v44, %v4066_v30 }
 0x1e8   : > { %v4086_v13 = vadd.f32 %v4077_v14, %v4067_v51  ;;  %v4219_v26 = vadd.f32 %v4201_v8, %v4174_v11  ;;  %v4245_v42 = vmul.f32 %v8813_v40, %v10669_v57  ;;  %v4246_v7 = vmul.f32 %v4232_v10, %v10669_v57 }
 0x1e9   : > { %v4261_v23 = vadd.f32 %v4243_v50, %v4216_v27  ;;  %v4262_v33 = vadd.f32 %v4244_v5, %v4217_v41  ;;  %v4281_v15 = vmul.f32 %v8820_v53, %v10671_v19  ;;  %v4104_v38 = vadd.f32 %v4095_v59, %v4085_v43  ;;  %v9073_v50 = vld [vmem:[#allocation2 + $0x50] sm:$0xff] }
 0x1ea   : > { %v4105_v61 = vadd.f32 %v4096_v28, %v4086_v13  ;;  %v4263_v52 = vadd.f32 %v4245_v42, %v4218_v48  ;;  %v4282_v29 = vmul.f32 %v8833_v34, %v10671_v19  ;;  %v4264_v54 = vadd.f32 %v4246_v7, %v4219_v26 }
 0x1eb   : > { %v4283_v11 = vmul.f32 %v8943_v17, %v10671_v19  ;;  %v4284_v30 = vmul.f32 %v9040_v49, %v10671_v19  ;;  %v4299_v44 = vadd.f32 %v4281_v15, %v4261_v23  ;;  %v9055_v14 = vadd.f32 %v8474_v63, %v8991_v24 }
 0x1ec   : > { %v9059_v53 = vsel %vm1835_vm0, 0.0, %v3915_v2  ;;  %v4300_v48 = vadd.f32 %v4282_v29, %v4262_v33  ;;  %v4318_v34 = vmul.f32 %v8785_v18, %v10672_v60  ;;  %v4319_v28 = vmul.f32 %v8843_v3, %v10672_v60  ;;  %v10755_v29 = vld [vmem:[#allocation64_spill] sm:$0xff] }
 0x1ed   : > { %v4301_v26 = vadd.f32 %v4283_v11, %v4263_v52  ;;  %v4302_v59 = vadd.f32 %v4284_v30, %v4264_v54  ;;  %v4320_v37 = vmul.f32 %v8835_v39, %v10672_v60  ;;  %v4123_v9 = vadd.f32 %v4114_v20, %v4104_v38 }
 0x1ee   : > { %v4124_v22 = vadd.f32 %v4115_v62, %v4105_v61  ;;  %v4321_v24 = vmul.f32 %v8896_v56, %v10672_v60  ;;  %v4336_v51 = vadd.f32 %v4318_v34, %v4299_v44  ;;  %v4337_v2 = vadd.f32 %v4319_v28, %v4300_v48  ;;  %v10756_v48 = vld [vmem:[#allocation63_spill] sm:$0xff]  ;;  %v10758_v28 = vld [vmem:[#allocation13_spill] sm:$0xff] }
 0x1ef   : > { %v4338_v8 = vadd.f32 %v4320_v37, %v4301_v26  ;;  %v4355_v10 = vmul.f32 %v8787_v4, %v10674_v47  ;;  %v4356_v18 = vmul.f32 %v8859_v12, %v10674_v47  ;;  %v4357_v27 = vmul.f32 %v8874_v36, %v10674_v47 }
 0x1f0   : > { %v4339_v3 = vadd.f32 %v4321_v24, %v4302_v59  ;;  %v4358_v62 = vmul.f32 %v8904_v31, %v10674_v47  ;;  %v4393_v56 = vmul.f32 %v8888_v16, %v10676_v21  ;;  %v4394_v4 = vmul.f32 %v8882_v25, %v10676_v21  ;;  %v6246_v31 = vld [vmem:[#allocation2 + $0x59] sm:$0x1]  ;;  %v10757_v59 = vld [vmem:[#allocation20_spill] sm:$0xff] }
 0x1f1   : > { %v4373_v20 = vadd.f32 %v4355_v10, %v4336_v51  ;;  %v4374_v41 = vadd.f32 %v4356_v18, %v4337_v2  ;;  %v4395_v12 = vmul.f32 %v9073_v50, %v10676_v21  ;;  %v4375_v5 = vadd.f32 %v4357_v27, %v4338_v8  ;;  %v10759_v51 = vld [vmem:[#allocation12_spill] sm:$0xff]  ;;  %v10760_v27 = vld [vmem:[#allocation53_spill] sm:$0xff] }
 0x1f2   : > { %v4376_v43 = vadd.f32 %v4358_v62, %v4339_v3  ;;  %v4396_v13 = vmul.f32 %v8906_v1, %v10676_v21  ;;  %v4430_v42 = vmul.f32 %v8801_v46, %v10679_v0  ;;  %v4431_v16 = vmul.f32 %v8902_v45, %v10679_v0  ;;  %v9098_v1 = vld [vmem:[%s10382_s1 + $0x18] ss:$0 sm:$0xff]  ;;  %v9126_v10 = vld [vmem:[%s10383_s2 + $0x1] ss:$0 sm:$0xff] }
 0x1f3   : > { %v4411_v7 = vadd.f32 %v4393_v56, %v4373_v20  ;;  %v4412_v23 = vadd.f32 %v4394_v4, %v4374_v41  ;;  %v4432_v25 = vmul.f32 %v8970_v55, %v10679_v0  ;;  %v4413_v33 = vadd.f32 %v4395_v12, %v4375_v5  ;;  %v10761_v20 = vld [vmem:[#allocation44_spill] sm:$0xff] }
 0x1f4   : > { %v4414_v15 = vadd.f32 %v4396_v13, %v4376_v43  ;;  %v4433_v38 = vmul.f32 %v8962_v32, %v10679_v0  ;;  %v4467_v46 = vmul.f32 %v9098_v1, %v8813_v40  ;;  %v4468_v45 = vmul.f32 %v9098_v1, %v8915_v6  ;;  %v10762_v41 = vld [vmem:[#allocation52_spill] sm:$0xff]  ;;  %v10763_v43 = vld [vmem:[#allocation54_spill] sm:$0xff] }
 0x1f5   : > { %v4448_v61 = vadd.f32 %v4430_v42, %v4411_v7  ;;  %v4449_v52 = vadd.f32 %v4431_v16, %v4412_v23  ;;  %v4469_v54 = vmul.f32 %v9098_v1, %v10755_v29  ;;  %v9107_v11 = vadd.f32 %v8474_v63, %v4123_v9  ;;  %v10766_v16 = vld [vmem:[#allocation11_spill] sm:$0xff] }
 0x1f6   : > { %v4450_v32 = vadd.f32 %v4432_v25, %v4413_v33  ;;  %v4451_v30 = vadd.f32 %v4433_v38, %v4414_v15  ;;  %v4470_v44 = vmul.f32 %v9098_v1, %v6246_v31  ;;  %v9113_v34 = vsel %vm1835_vm0, 0.0, %v10756_v48 }
 0x1f7   : > { %v4485_v40 = vadd.f32 %v4467_v46, %v4448_v61  ;;  %v4486_v26 = vadd.f32 %v4468_v45, %v4449_v52  ;;  %v4594_v6 = vmul.f32 %v10758_v28, %v10757_v59  ;;  %v9118_v37 = vadd.f32 %v8474_v63, %v4124_v22  ;;  %v10768_v61 = vld [vmem:[#allocation57_spill] sm:$0xff] }
 0x1f8   : > { %v4487_v24 = vadd.f32 %v4469_v54, %v4450_v32  ;;  %v4488_v9 = vadd.f32 %v4470_v44, %v4451_v30  ;;  %v4573_v2 = vmul.f32 %v10759_v51, %v9107_v11  ;;  %v4668_v22 = vmul.f32 %v10760_v27, %v9059_v53 }
 0x1f9   : > { %v4503_v8 = vadd.f32 %v8474_v63, %v4485_v40  ;;  %v9129_v18 = vadd.f32 %v9126_v10, %v4486_v26  ;;  %v4628_v3 = vrot.slane %v4594_v6, 1  ;;  %v4710_v63 = vmul.f32 %v10761_v20, %v9059_v53  ;;  %v10769_v6 = vld [vmem:[#allocation9_spill] sm:$0xff] }
 0x1fa   : > { %v4505_v62 = vadd.f32 %v9126_v10, %v4487_v24  ;;  %v9135_v56 = vadd.f32 %v9126_v10, %v4488_v9  ;;  %v4711_v4 = vmul.f32 %v10761_v20, %v10762_v41  ;;  %v10764_v13 = vrot.slane %v10763_v43, 1 }
 0x1fb   : > { %v9143_v12 = vsel %vm1835_vm0, 0.0, %v4503_v8  ;;  %v4597_v5 = vmul.f32 %v10758_v28, %v9129_v18  ;;  %v4712_v7 = vmul.f32 %v10761_v20, %v9113_v34  ;;  %v4574_v33 = vmul.f32 %v10759_v51, %v9118_v37 }
 0x1fc   : > { %v4630_v42 = vsel %vm2655_vm1, %v4628_v3, %v10764_v13  ;;  %v9154_v23 = vsel %vm1835_vm0, 0.0, %v4505_v62  ;;  %v4561_v25 = vmul.f32 %v10766_v16, %v9143_v12  ;;  %v4596_v15 = vmul.f32 %v10758_v28, %v9143_v12 }
 0x1fd   : > { %10765 = vst [vmem:[#allocation64_spill] sm:$0xff] %v9154_v23  ;;  %v9164_v38 = vmul.f32 %v10758_v28, %v9135_v56  ;;  %v4632_v46 = vrot.slane %v4597_v5, 1  ;;  %v4656_v52 = vadd.f32 %v4630_v42, %v10768_v61  ;;  %v4713_v45 = vmul.f32 %v10761_v20, %v9055_v14  ;;  %v10771_v5 = vld [vmem:[#allocation15_spill] sm:$0xff] }
 0x1fe   : > { %v4562_v54 = vmul.f32 %v10766_v16, %v9154_v23  ;;  %v4581_v32 = vadd.f32 %v4573_v2, %v4561_v25  ;;  %v4631_v30 = vrot.slane %v4596_v15, 1  ;;  %v4744_v44 = vrot.slane %v4710_v63, 1  ;;  %v10770_v63 = vld [vmem:[#allocation43_spill] sm:$0xff] }
 0x1ff   : > { %10767 = vst [vmem:[#allocation63_spill] sm:$0xff] %v9164_v38  ;;  %v4669_v48 = vmul.f32 %v10760_v27, %v9113_v34  ;;  %v4676_v40 = vadd.f32 %v4668_v22, %v4656_v52  ;;  %v4745_v26 = vrot.slane %v4711_v4, 1  ;;  %v4747_v59 = vrot.slane %v4712_v7, 1  ;;  %v10773_v7 = vld [vmem:[#allocation55_spill] sm:$0xff]  ;;  %v10774_v52 = vld [vmem:[#allocation25_spill] sm:$0xff] }
 0x200   : > { %v3537_v24 = vadd.f32 %v9126_v10, %v10769_v6  ;;  %v9177_v9 = vmul.f32 %v10755_v29, %v10674_v47  ;;  %v4633_v8 = vsel %vm2655_vm1, %v4631_v30, %v4632_v46  ;;  %v4748_v3 = vrot.slane %v4713_v45, 1 }
 0x201   : > { %v9181_v2 = vmul.f32 %v6246_v31, %v10674_v47  ;;  %v4657_v62 = vadd.f32 %v4633_v8, %v4581_v32  ;;  %v4689_v43 = vmul.f32 %v10771_v5, %v10770_v63  ;;  %v4746_v22 = vsel %vm2655_vm1, %v4744_v44, %v4745_v26 }
 0x202   : > { %v9186_v4 = vadd.f32 %v4574_v33, %v4562_v54  ;;  %v4749_v42 = vsel %vm2655_vm1, %v4747_v59, %v4748_v3  ;;  %v4784_v25 = vmul.f32 %v10773_v7, %v9143_v12  ;;  %v4785_v31 = vmul.f32 %v10773_v7, %v9154_v23  ;;  %v9318_v7 = vld [vmem:[#allocation2 + $0x68] sm:$0x1] }
 0x203   : > { %v4677_v15 = vadd.f32 %v4669_v48, %v4657_v62  ;;  %v5001_v46 = vrot.slane %v9059_v53, 1  ;;  %v5002_v61 = vrot.slane %v10762_v41, 1  ;;  %v4804_v45 = vmul.f32 %v10774_v52, %v9107_v11  ;;  %v9211_v62 = vld [vmem:[#allocation2 + $0x230] sm:$0xff] }
 0x204   : > { %10772 = vst [vmem:[#allocation20_spill] sm:$0xff] %v9186_v4  ;;  %v5004_v33 = vrot.slane %v9113_v34, 1  ;;  %v5005_v54 = vrot.slane %v9055_v14, 1  ;;  %v5057_v32 = vrot.slane %v9143_v12, 1  ;;  %v4805_v44 = vmul.f32 %v10774_v52, %v9118_v37 }
 0x205   : > { %v4697_v30 = vadd.f32 %v4689_v43, %v4677_v15  ;;  %v5003_v48 = vsel %vm2655_vm1, %v5001_v46, %v5002_v61  ;;  %v5058_v26 = vrot.slane %v9129_v18, 1  ;;  %v5060_v59 = vrot.slane %v9154_v23, 1  ;;  %v9213_v43 = vld [vmem:[#allocation2 + $0x231] sm:$0xff] }
 0x206   : > { %v5006_v53 = vsel %vm2655_vm1, %v5004_v33, %v5005_v54  ;;  %v5029_v41 = vmax.f32 %v3537_v24, %v5003_v48  ;;  %v5061_v6 = vrot.slane %v9135_v56, 1  ;;  %v4688_v3 = vmul.f32 %v10771_v5, %v3537_v24  ;;  %v10775_v61 = vld [vmem:[#allocation38_spill] sm:$0xff]  ;;  %v10776_v48 = vld [vmem:[#allocation16_spill] sm:$0xff] }
 0x207   : > { %v4773_v34 = vadd.f32 %v4749_v42, %v4697_v30  ;;  %v5030_v14 = vmax.f32 %v10770_v63, %v5006_v53  ;;  %v5059_v8 = vsel %vm2655_vm1, %v5057_v32, %v5058_v26  ;;  %v3303_v33 = vmul.f32 %v8835_v39, %v10775_v61  ;;  %v9222_v30 = vld [vmem:[#allocation2 + $0xf1] sm:$0xff] }
 0x208   : > { %v5062_v15 = vsel %vm2655_vm1, %v5060_v59, %v5061_v6  ;;  %v5085_v46 = vmax.f32 %v9107_v11, %v5059_v8  ;;  %v3304_v42 = vmul.f32 %v9211_v62, %v10775_v61  ;;  %v4696_v32 = vadd.f32 %v4688_v3, %v4676_v40  ;;  %v9236_v6 = vld [vmem:[#allocation2 + $0x1a0] sm:$0xff] }
 0x209   : > { %v4793_v54 = vadd.f32 %v4785_v31, %v4773_v34  ;;  %v5086_v63 = vmax.f32 %v9118_v37, %v5062_v15  ;;  %v3323_v24 = vmul.f32 %v8874_v36, %v10668_v58  ;;  %v9228_v26 = vmul.f32 %v10776_v48, %v9129_v18  ;;  %v9242_v34 = vld [vmem:[#allocation2 + $0x241] sm:$0xff] }
 0x20a   : > { %v5093_v11 = vmax.f32 %v5029_v41, %v5085_v46  ;;  %v3324_v39 = vmul.f32 %v9222_v30, %v10668_v58  ;;  %v3352_v53 = vmul.f32 %v9213_v43, %v10669_v57  ;;  %v4772_v40 = vadd.f32 %v4746_v22, %v4696_v32  ;;  %v9249_v15 = vld [vmem:[#allocation2 + $0x61] sm:$0xff] }
 0x20b   : > { %10777 = vst [vmem:[#allocation52_spill] sm:$0xff] %v9228_v26  ;;  %v9234_v31 = vadd.f32 %v4805_v44, %v4793_v54  ;;  %v5094_v37 = vmax.f32 %v5030_v14, %v5086_v63  ;;  %v3331_v59 = vadd.f32 %v3323_v24, %v3303_v33  ;;  %v9240_v36 = vmul.f32 %v10776_v48, %v9143_v12  ;;  %v10780_v14 = vld [vmem:[#allocation61_spill] sm:$0xff]  ;;  %v9265_v63 = vld [vmem:[#allocation2 + $0xf0] sm:$0xff] }
 0x20c   : > { %v3332_v18 = vadd.f32 %v3324_v39, %v3304_v42  ;;  %v3379_v41 = vmul.f32 %v8970_v55, %v10671_v19  ;;  %v3380_v8 = vmul.f32 %v9236_v6, %v10671_v19  ;;  %v4792_v3 = vadd.f32 %v4784_v25, %v4772_v40  ;;  %v9261_v42 = vld [vmem:[#allocation2 + $0x240] sm:$0xff]  ;;  %v9277_v39 = vld [vmem:[#allocation2 + $0xf8] sm:$0x1] }
 0x20d   : > { %10778 = vst [vmem:[#allocation54_spill] sm:$0xff] %v9234_v31  ;;  %10779 = vst [vmem:[#allocation57_spill] sm:$0xff] %v9240_v36  ;;  %v6498_v44 = vpack.i.bf16 %v5094_v37, %v5093_v11  ;;  %v3359_v22 = vadd.f32 %v10780_v14, %v3331_v59  ;;  %v3407_v46 = vmul.f32 %v10755_v29, %v10672_v60 }
 0x20e   : > { %v9255_v12 = vmul.f32 %v10776_v48, %v9154_v23  ;;  %v9259_v33 = vmul.f32 %v10776_v48, %v9135_v56  ;;  %v3360_v54 = vadd.f32 %v3352_v53, %v3332_v18  ;;  %v3408_v25 = vmul.f32 %v9249_v15, %v10672_v60  ;;  %v9275_v48 = vld [vmem:[#allocation2 + $0x1a1] sm:$0xff]  ;;  %v9279_v53 = vld [vmem:[#allocation2 + $0x238] sm:$0x1] }
 0x20f   : > { %v9268_v24 = vadd.f32 %v4804_v45, %v4792_v3  ;;  %6499 = vrot.lane.b32.xlu1 %v6498_v44, %s6587_s17  ;;  %v9273_v11 = vmul.f32 %v9242_v34, %v10669_v57  ;;  %v3387_v56 = vadd.f32 %v3379_v41, %v3359_v22  ;;  %v3436_v40 = vmul.f32 %v9275_v48, %v10674_v47 }
 0x210   : > { %10781 = vst [vmem:[#allocation9_spill] sm:$0xff] %v9255_v12  ;;  %10782 = vst [vmem:[#allocation43_spill] sm:$0xff] %v9259_v33  ;;  %v3388_v37 = vadd.f32 %v3380_v8, %v3360_v54  ;;  %v3463_v45 = vmul.f32 %v9211_v62, %v10676_v21  ;;  %v3464_v59 = vmul.f32 %v9261_v42, %v10676_v21  ;;  %v9293_v8 = vld [vmem:[#allocation2 + $0x101] sm:$0xff]  ;;  %v9310_v33 = vld [vmem:[#allocation2 + $0x1b1] sm:$0xff] }
 0x211   : > { %10783 = vst [vmem:[#allocation16_spill] sm:$0xff] %v9268_v24  ;;  %10784 = vst [vmem:[#allocation61_spill] sm:$0xff] %v9273_v11  ;;  %v3415_v18 = vadd.f32 %v3407_v46, %v3387_v56  ;;  %v3567_v41 = vmul.f32 %v8943_v17, %v10775_v61  ;;  %v3568_v44 = vmul.f32 %v9040_v49, %v10775_v61  ;;  %v9301_v56 = vld [vmem:[#allocation2 + $0xf9] sm:$0x1]  ;;  %v10785_v17 = vld [vmem:[#allocation62_spill] sm:$0xff] }
 0x212   : > { %v3569_v3 = vmul.f32 %v9265_v63, %v10775_v61  ;;  %v3416_v14 = vadd.f32 %v3408_v25, %v3388_v37  ;;  %v3570_v22 = vmul.f32 %v9277_v39, %v10775_v61  ;;  %v3593_v54 = vmul.f32 %v9211_v62, %v10668_v58  ;;  %v10786_v25 = vld [vmem:[#allocation30_spill] sm:$0xff]  ;;  %v10787_v24 = vld [vmem:[#allocation27_spill] sm:$0xff] }
 0x213   : > { %v3594_v46 = vmul.f32 %v9279_v53, %v10668_v58  ;;  %v3443_v32 = vadd.f32 %v10785_v17, %v3415_v18  ;;  %v3491_v49 = vmul.f32 %v9222_v30, %v10679_v0  ;;  %v3492_v13 = vmul.f32 %v9293_v8, %v10679_v0 }
 0x214   : > { %v3607_v37 = vadd.f32 %v10786_v25, %v3567_v41  ;;  %v3444_v31 = vadd.f32 %v3436_v40, %v3416_v14  ;;  %v3608_v12 = vadd.f32 %v10787_v24, %v3568_v44  ;;  %v3609_v26 = vadd.f32 %v3593_v54, %v3569_v3  ;;  %v10789_v41 = vld [vmem:[#allocation31_spill] sm:$0xff]  ;;  %v10790_v3 = vld [vmem:[#allocation26_spill] sm:$0xff]  ;;  %v9326_v54 = vld [vmem:[#allocation2 + $0x60] sm:$0xff] }
 0x215   : > { %v3610_v36 = vadd.f32 %v3594_v46, %v3570_v22  ;;  %v3471_v11 = vadd.f32 %v3463_v45, %v3443_v32  ;;  %v3519_v52 = vmul.f32 %v9098_v1, %v9213_v43  ;;  %v3633_v18 = vmul.f32 %v9222_v30, %v10669_v57  ;;  %v9330_v25 = vld [vmem:[#allocation2 + $0x1a8] sm:$0x1] }
 0x216   : > { %v3634_v17 = vmul.f32 %v9301_v56, %v10669_v57  ;;  %v9322_v40 = vmul.f32 %v9310_v33, %v10674_v47  ;;  %v3472_v24 = vadd.f32 %v3464_v59, %v3444_v31  ;;  %v3647_v44 = vadd.f32 %v10789_v41, %v3607_v37  ;;  %v9336_v31 = vld [vmem:[#allocation2 + $0x109] sm:$0x1] }
 0x217   : > { %v3648_v32 = vadd.f32 %v10790_v3, %v3608_v12  ;;  %v3499_v45 = vadd.f32 %v3491_v49, %v3471_v11  ;;  %v3649_v14 = vadd.f32 %v3633_v18, %v3609_v26  ;;  %v3679_v46 = vmul.f32 %v9073_v50, %v10671_v19  ;;  %v9342_v11 = vld [vmem:[#allocation2 + $0x78] sm:$0x1]  ;;  %v9353_v3 = vld [vmem:[#allocation2 + $0x69] sm:$0x1] }
 0x218   : > { %10788 = vst [vmem:[#allocation62_spill] sm:$0xff] %v9322_v40  ;;  %v3650_v22 = vadd.f32 %v3634_v17, %v3610_v36  ;;  %v3500_v5 = vadd.f32 %v3492_v13, %v3472_v24  ;;  %v3520_v4 = vmul.f32 %v9098_v1, %v9242_v34  ;;  %v9334_v40 = vld [vmem:[#allocation2 + $0x248] sm:$0x1]  ;;  %v3681_v12 = vmul.f32 %v9326_v54, %v10671_v19  ;;  %v10791_v49 = vld [vmem:[#allocation39_spill] sm:$0xff] }
 0x219   : > { %v3682_v26 = vmul.f32 %v9318_v7, %v10671_v19  ;;  %v3527_v36 = vadd.f32 %v3519_v52, %v3499_v45  ;;  %v3695_v59 = vadd.f32 %v3679_v46, %v3647_v44  ;;  %v3696_v37 = vadd.f32 %v10791_v49, %v3648_v32  ;;  %v10796_v45 = vld [vmem:[#allocation23_spill] sm:$0xff] }
 0x21a   : > { %v3721_v13 = vmul.f32 %v9236_v6, %v10672_v60  ;;  %v9349_v18 = vmul.f32 %v9261_v42, %v10668_v58  ;;  %v3697_v17 = vadd.f32 %v3681_v12, %v3649_v14  ;;  %v3722_v41 = vmul.f32 %v9330_v25, %v10672_v60  ;;  %v10798_v12 = vld [vmem:[#allocation14_spill] sm:$0xff] }
 0x21b   : > { %v3698_v24 = vadd.f32 %v3682_v26, %v3650_v22  ;;  %v9357_v52 = vmul.f32 %v9334_v40, %v10668_v58  ;;  %v9361_v44 = vmul.f32 %v9293_v8, %v10669_v57  ;;  %v9365_v32 = vmul.f32 %v9336_v31, %v10669_v57  ;;  %v6259_v22 = vld [vmem:[#allocation2 + $0xf8] sm:$0x1] }
 0x21c   : > { %10792 = vst [vmem:[#allocation30_spill] sm:$0xff] %v9349_v18  ;;  %v3735_v14 = vadd.f32 %v10796_v45, %v3695_v59  ;;  %v9370_v46 = vmul.f32 %v9342_v11, %v10671_v19  ;;  %v3736_v26 = vadd.f32 %v10798_v12, %v3696_v37  ;;  %v3737_v49 = vadd.f32 %v3721_v13, %v3697_v17  ;;  %v6270_v45 = vld [vmem:[#allocation2 + $0x238] sm:$0x1]  ;;  %v6278_v12 = vld [vmem:[#allocation2 + $0xf9] sm:$0x1] }
 0x21d   : > { %10793 = vst [vmem:[#allocation27_spill] sm:$0xff] %v9357_v52  ;;  %10794 = vst [vmem:[#allocation31_spill] sm:$0xff] %v9361_v44  ;;  %v3738_v18 = vadd.f32 %v3722_v41, %v3698_v24  ;;  %v6261_v52 = vld [vmem:[#allocation2 + $0x108] sm:$0x1]  ;;  %v3528_v16 = vadd.f32 %v3520_v4, %v3500_v5  ;;  %v9374_v38 = vadd.f32 %v9126_v10, %v3527_v36 }
 0x21e   : > { %10795 = vst [vmem:[#allocation26_spill] sm:$0xff] %v9365_v32  ;;  %10797 = vst [vmem:[#allocation39_spill] sm:$0xff] %v9370_v46  ;;  %v3761_v44 = vmul.f32 %v9249_v15, %v10674_v47  ;;  %v3762_v59 = vmul.f32 %v9353_v3, %v10674_v47  ;;  %v9380_v32 = vld [vmem:[#allocation2 + $0x100] sm:$0xff]  ;;  %v3775_v46 = vadd.f32 %v9177_v9, %v3735_v14  ;;  %v6271_v4 = vld [vmem:[#allocation2 + $0x248] sm:$0x1] }
 0x21f   : > { %10799 = vst [vmem:[#allocation23_spill] sm:$0xff] %v9374_v38  ;;  %v3776_v37 = vadd.f32 %v9181_v2, %v3736_v26  ;;  %v3807_v13 = vmul.f32 %v9265_v63, %v10676_v21  ;;  %v3808_v5 = vmul.f32 %v6259_v22, %v10676_v21  ;;  %v3809_v24 = vmul.f32 %v9380_v32, %v10676_v21  ;;  %v6513_v14 = vld [vmem:[%s10386_s5] sm:$0xff]  }
 0x220   : > { %v3777_v36 = vadd.f32 %v3761_v44, %v3737_v49  ;;  %v3778_v17 = vadd.f32 %v3762_v59, %v3738_v18  ;;  %v3810_v41 = vmul.f32 %v6261_v52, %v10676_v21  ;;  %v3847_v9 = vmul.f32 %v9211_v62, %v10679_v0  ;;  %v6279_v52 = vld [vmem:[#allocation2 + $0x109] sm:$0x1]  ;;  %v9399_v49 = vld [vmem:[#allocation2 + $0x1b0] sm:$0xff]  ;;  %6382 = vmatprep.subr.bf16.mxu1 %v6513_v14 }
 0x221   : > { %v3823_v38 = vadd.f32 %v3807_v13, %v3775_v46  ;;  %v3824_v27 = vadd.f32 %v3808_v5, %v3776_v37  ;;  %v3848_v2 = vmul.f32 %v6270_v45, %v10679_v0  ;;  %v3849_v18 = vmul.f32 %v9261_v42, %v10679_v0  ;;  %v9401_v46 = vld [vmem:[#allocation2 + $0x1b8] sm:$0x1]  ;;  %6383 = vmatpush3.bf16.msra.mxu1 %v6513_v14 }
 0x222   : > { %v3825_v22 = vadd.f32 %v3809_v24, %v3777_v36  ;;  %v3826_v44 = vadd.f32 %v3810_v41, %v3778_v17  ;;  %v3850_v26 = vmul.f32 %v6271_v4, %v10679_v0  ;;  %v3887_v45 = vmul.f32 %v9098_v1, %v9222_v30  ;;  %v9412_v24 = vld [vmem:[#allocation2 + $0x79] sm:$0x1]  ;;  %6352 = vmatprep.subr.bf16.mxu0 %v6513_v14 }
 0x223   : > { %v3863_v59 = vadd.f32 %v3847_v9, %v3823_v38  ;;  %v3864_v37 = vadd.f32 %v3848_v2, %v3824_v27  ;;  %v3888_v13 = vmul.f32 %v9098_v1, %v6278_v12  ;;  %v9408_v5 = vmul.f32 %v9399_v49, %v10672_v60  ;;  %10801 = vst [vmem:[#allocation65_spill] sm:$0xff] %v9412_v24 }
 0x224   : > { %v3865_v36 = vadd.f32 %v3849_v18, %v3825_v22  ;;  %v3866_v17 = vadd.f32 %v3850_v26, %v3826_v44  ;;  %v3889_v4 = vmul.f32 %v9098_v1, %v9293_v8  ;;  %v3890_v27 = vmul.f32 %v9098_v1, %v6279_v52  ;;  %6353 = vmatpush3.bf16.msra.mxu0 %v6513_v14  ;;  %v9430_v18 = vld [vmem:[#allocation2 + $0x71] sm:$0xff] }
 0x225   : > { %10800 = vst [vmem:[#allocation14_spill] sm:$0xff] %v9408_v5  ;;  %v3903_v38 = vadd.f32 %v3887_v45, %v3863_v59  ;;  %v3957_v41 = vmul.f32 %v8970_v55, %v10775_v61  ;;  %v3958_v12 = vmul.f32 %v9236_v6, %v10775_v61  ;;  %v9420_v9 = vadd.f32 %v9126_v10, %v3528_v16  ;;  %v10804_v59 = vld [vmem:[#allocation60_spill] sm:$0xff] }
 0x226   : > { %v9424_v2 = vmul.f32 %v9401_v46, %v10672_v60  ;;  %v3975_v22 = vmul.f32 %v10755_v29, %v10668_v58  ;;  %v3976_v44 = vmul.f32 %v9249_v15, %v10668_v58  ;;  %v3904_v26 = vadd.f32 %v3888_v13, %v3864_v37 }
 0x227   : > { %10802 = vst [vmem:[#allocation66_spill] sm:$0xff] %v9420_v9  ;;  %v3905_v52 = vadd.f32 %v3889_v4, %v3865_v36  ;;  %v4002_v45 = vmul.f32 %v10804_v59, %v10669_v57  ;;  %v4003_v16 = vmul.f32 %v9275_v48, %v10669_v57  ;;  %v9442_v5 = vmul.f32 %v9412_v24, %v10674_v47 }
 0x228   : > { %10803 = vst [vmem:[#allocation67_spill] sm:$0xff] %v9424_v2  ;;  %v9438_v2 = vmul.f32 %v9430_v18, %v10674_v47  ;;  %v3984_v9 = vadd.f32 %v3975_v22, %v3957_v41  ;;  %v3985_v14 = vadd.f32 %v3976_v44, %v3958_v12  ;;  %v3906_v20 = vadd.f32 %v3890_v27, %v3866_v17  ;;  %v4158_v41 = vld [vmem:[#allocation2 + $0x58] sm:$0x1] }
 0x229   : > { %10806 = vst [vmem:[#allocation68_spill] sm:$0xff] %v9442_v5  ;;  %v9445_v37 = vadd.f32 %v9126_v10, %v3903_v38  ;;  %v4021_v13 = vmul.f32 %v9211_v62, %v10671_v19  ;;  %v4022_v36 = vmul.f32 %v9261_v42, %v10671_v19  ;;  %v4041_v5 = vmul.f32 %v9293_v8, %v10672_v60 }
 0x22a   : > { %10805 = vst [vmem:[#allocation60_spill] sm:$0xff] %v9438_v2  ;;  %v4011_v4 = vadd.f32 %v4002_v45, %v3984_v9  ;;  %v4012_v59 = vadd.f32 %v4003_v16, %v3985_v14  ;;  %v4040_v2 = vmul.f32 %v9222_v30, %v10672_v60  ;;  %v9456_v17 = vadd.f32 %v9126_v10, %v3904_v26  ;;  %v4160_v9 = vld [vmem:[#allocation2 + $0x68] sm:$0x1]  ;;  %v6311_v26 = vld [vmem:[#allocation2 + $0x198] sm:$0x1] }
 0x22b   : > { %10807 = vst [vmem:[#allocation69_spill] sm:$0xff] %v9445_v37  ;;  %v9459_v27 = vadd.f32 %v9126_v10, %v3905_v52  ;;  %v4059_v38 = vmul.f32 %v9213_v43, %v10674_v47  ;;  %v4060_v12 = vmul.f32 %v9242_v34, %v10674_v47  ;;  %v4078_v45 = vmul.f32 %v9236_v6, %v10676_v21  ;;  %v6312_v14 = vld [vmem:[#allocation2 + $0x1a8] sm:$0x1] }
 0x22c   : > { %10808 = vst [vmem:[#allocation70_spill] sm:$0xff] %v9456_v17  ;;  %v4030_v22 = vadd.f32 %v4021_v13, %v4011_v4  ;;  %v4031_v44 = vadd.f32 %v4022_v36, %v4012_v59  ;;  %v4079_v16 = vmul.f32 %v9399_v49, %v10676_v21  ;;  %v4097_v52 = vmul.f32 %v9249_v15, %v10679_v0  ;;  %v4233_v36 = vld [vmem:[#allocation2 + $0x59] sm:$0x1] }
 0x22d   : > { %10809 = vst [vmem:[#allocation71_spill] sm:$0xff] %v9459_v27  ;;  %v4098_v43 = vmul.f32 %v9430_v18, %v10679_v0  ;;  %v4175_v34 = vmul.f32 %v9073_v50, %v10775_v61  ;;  %v4176_v13 = vmul.f32 %v4158_v41, %v10775_v61  ;;  %v4177_v17 = vmul.f32 %v9326_v54, %v10775_v61 }
 0x22e   : > { %v4049_v4 = vadd.f32 %v4040_v2, %v4030_v22  ;;  %v4050_v59 = vadd.f32 %v4041_v5, %v4031_v44  ;;  %v4178_v51 = vmul.f32 %v4160_v9, %v10775_v61  ;;  %v4202_v28 = vmul.f32 %v8970_v55, %v10668_v58 }
 0x22f   : > { %v4203_v23 = vmul.f32 %v6311_v26, %v10668_v58  ;;  %v4204_v27 = vmul.f32 %v9236_v6, %v10668_v58  ;;  %v4205_v50 = vmul.f32 %v6312_v14, %v10668_v58  ;;  %v4247_v5 = vmul.f32 %v10755_v29, %v10669_v57 }
 0x230   : > { %v4068_v41 = vadd.f32 %v4059_v38, %v4049_v4  ;;  %v4069_v37 = vadd.f32 %v4060_v12, %v4050_v59  ;;  %v4248_v2 = vmul.f32 %v4233_v36, %v10669_v57  ;;  %v4220_v22 = vadd.f32 %v4202_v28, %v4175_v34 }
 0x231   : > { %v4221_v9 = vadd.f32 %v4203_v23, %v4176_v13  ;;  %v4222_v44 = vadd.f32 %v4204_v27, %v4177_v17  ;;  %v4223_v61 = vadd.f32 %v4205_v50, %v4178_v51  ;;  %v4116_v26 = vmul.f32 %v9098_v1, %v9275_v48  ;;  %v9497_v23 = vld [vmem:[#allocation2 + $0x108] sm:$0x1] }
 0x232   : > { %v4087_v55 = vadd.f32 %v4078_v45, %v4068_v41  ;;  %v4249_v24 = vmul.f32 %v9249_v15, %v10669_v57  ;;  %v4250_v14 = vmul.f32 %v4234_v35, %v10669_v57  ;;  %v4265_v38 = vadd.f32 %v4247_v5, %v4220_v22 }
 0x233   : > { %v4266_v12 = vadd.f32 %v4248_v2, %v4221_v9  ;;  %v4285_v29 = vmul.f32 %v9265_v63, %v10671_v19  ;;  %v4286_v28 = vmul.f32 %v9277_v39, %v10671_v19  ;;  %v4088_v51 = vadd.f32 %v4079_v16, %v4069_v37  ;;  %v9520_v2 = vld [vmem:[#allocation2 + $0x70] sm:$0xff] }
 0x234   : > { %v4106_v17 = vadd.f32 %v4097_v52, %v4087_v55  ;;  %v4267_v27 = vadd.f32 %v4249_v24, %v4222_v44  ;;  %v4268_v45 = vadd.f32 %v4250_v14, %v4223_v61  ;;  %v4287_v48 = vmul.f32 %v9380_v32, %v10671_v19 }
 0x235   : > { %v4288_v35 = vmul.f32 %v9497_v23, %v10671_v19  ;;  %v4303_v34 = vadd.f32 %v4285_v29, %v4265_v38  ;;  %v4304_v13 = vadd.f32 %v4286_v28, %v4266_v12  ;;  %v9504_v36 = vadd.f32 %v9126_v10, %v3906_v20 }
 0x236   : > { %v4117_v63 = vmul.f32 %v9098_v1, %v9310_v33  ;;  %v4322_v39 = vmul.f32 %v9211_v62, %v10672_v60  ;;  %v4323_v61 = vmul.f32 %v9279_v53, %v10672_v60  ;;  %v4305_v24 = vadd.f32 %v4287_v48, %v4267_v27 }
 0x237   : > { %v4306_v37 = vadd.f32 %v4288_v35, %v4268_v45  ;;  %v4324_v16 = vmul.f32 %v9261_v42, %v10672_v60  ;;  %v4325_v52 = vmul.f32 %v9334_v40, %v10672_v60  ;;  %v4107_v4 = vadd.f32 %v4098_v43, %v4088_v51  ;;  %v10810_v45 = vld [vmem:[#allocation65_spill] sm:$0xff] }
 0x238   : > { %v4125_v20 = vadd.f32 %v4116_v26, %v4106_v17  ;;  %v4340_v59 = vadd.f32 %v4322_v39, %v4303_v34  ;;  %v4341_v50 = vadd.f32 %v4323_v61, %v4304_v13  ;;  %v4359_v62 = vmul.f32 %v9222_v30, %v10674_v47  ;;  %v10811_v35 = vld [vmem:[#allocation69_spill] sm:$0xff]  ;;  %v10813_v61 = vld [vmem:[#allocation71_spill] sm:$0xff] }
 0x239   : > { %v4342_v41 = vadd.f32 %v4324_v16, %v4305_v24  ;;  %v4343_v5 = vadd.f32 %v4325_v52, %v4306_v37  ;;  %v4360_v53 = vmul.f32 %v9301_v56, %v10674_v47  ;;  %v4361_v22 = vmul.f32 %v9293_v8, %v10674_v47  ;;  %v10814_v16 = vld [vmem:[#allocation64_spill] sm:$0xff]  ;;  %v10815_v52 = vld [vmem:[#allocation13_spill] sm:$0xff] }
 0x23a   : > { %v4362_v40 = vmul.f32 %v9336_v31, %v10674_v47  ;;  %v4397_v43 = vmul.f32 %v9326_v54, %v10676_v21  ;;  %v4398_v9 = vmul.f32 %v9318_v7, %v10676_v21  ;;  %v4377_v44 = vadd.f32 %v4359_v62, %v4340_v59  ;;  %v10816_v62 = vld [vmem:[#allocation12_spill] sm:$0xff] }
 0x23b   : > { %v4378_v55 = vadd.f32 %v4360_v53, %v4341_v50  ;;  %v4399_v30 = vmul.f32 %v9520_v2, %v10676_v21  ;;  %v4400_v56 = vmul.f32 %v9342_v11, %v10676_v21  ;;  %v4379_v26 = vadd.f32 %v4361_v22, %v4342_v41 }
 0x23c   : > { %v4380_v14 = vadd.f32 %v4362_v40, %v4343_v5  ;;  %v4434_v38 = vmul.f32 %v9236_v6, %v10679_v0  ;;  %v4435_v31 = vmul.f32 %v9330_v25, %v10679_v0  ;;  %v4415_v54 = vadd.f32 %v4397_v43, %v4377_v44  ;;  %v10817_v43 = vld [vmem:[#allocation44_spill] sm:$0xff] }
 0x23d   : > { %v4416_v12 = vadd.f32 %v4398_v9, %v4378_v55  ;;  %v4436_v7 = vmul.f32 %v9399_v49, %v10679_v0  ;;  %v4437_v29 = vmul.f32 %v9401_v46, %v10679_v0  ;;  %v4417_v28 = vadd.f32 %v4399_v30, %v4379_v26  ;;  %v10819_v55 = vld [vmem:[#allocation53_spill] sm:$0xff] }
 0x23e   : > { %v4418_v51 = vadd.f32 %v4400_v56, %v4380_v14  ;;  %v4471_v11 = vmul.f32 %v9098_v1, %v9249_v15  ;;  %v4472_v17 = vmul.f32 %v9098_v1, %v9353_v3  ;;  %v4452_v6 = vadd.f32 %v4434_v38, %v4415_v54  ;;  %v10820_v56 = vld [vmem:[#allocation70_spill] sm:$0xff]  ;;  %v10822_v38 = vld [vmem:[#allocation63_spill] sm:$0xff] }
 0x23f   : > { %v4453_v27 = vadd.f32 %v4435_v31, %v4416_v12  ;;  %v4473_v25 = vmul.f32 %v9098_v1, %v9430_v18  ;;  %v4474_v48 = vmul.f32 %v9098_v1, %v10810_v45  ;;  %v3935_v46 = vsel %vm1835_vm0, 0.0, %v10811_v35 }
 0x240   : > { %v9554_v13 = vadd.f32 %v9126_v10, %v4125_v20  ;;  %v4454_v39 = vadd.f32 %v4436_v7, %v4417_v28  ;;  %v4455_v15 = vadd.f32 %v4437_v29, %v4418_v51  ;;  %v3937_v3 = vsel %vm1835_vm0, 0.0, %v10813_v61  ;;  %v10824_v28 = vld [vmem:[#allocation11_spill] sm:$0xff] }
 0x241   : > { %v4489_v24 = vadd.f32 %v4471_v11, %v4452_v6  ;;  %v4490_v37 = vadd.f32 %v4472_v17, %v4453_v27  ;;  %v4598_v59 = vmul.f32 %v10815_v52, %v10814_v16  ;;  %v4126_v50 = vadd.f32 %v4117_v63, %v4107_v4  ;;  %v10826_v27 = vld [vmem:[#allocation20_spill] sm:$0xff] }
 0x242   : > { %v4491_v41 = vadd.f32 %v4473_v25, %v4454_v39  ;;  %v4492_v5 = vadd.f32 %v4474_v48, %v4455_v15  ;;  %v4575_v53 = vmul.f32 %v10816_v62, %v9554_v13  ;;  %v4714_v9 = vmul.f32 %v10817_v43, %v3935_v46 }
 0x243   : > { %v4507_v20 = vadd.f32 %v9126_v10, %v4489_v24  ;;  %v9565_v22 = vadd.f32 %v9126_v10, %v4490_v37  ;;  %v4634_v40 = vrot.slane %v4598_v59, 1  ;;  %v4670_v30 = vmul.f32 %v10819_v55, %v3935_v46 }
 0x244   : > { %v9569_v44 = vadd.f32 %v9126_v10, %v4492_v5  ;;  %v4715_v63 = vmul.f32 %v10817_v43, %v10820_v56  ;;  %v4716_v4 = vmul.f32 %v10817_v43, %v3937_v3  ;;  %v10823_v31 = vrot.slane %v10822_v38, 1 }
 0x245   : > { %v9577_v26 = vsel %vm1835_vm0, 0.0, %v4507_v20  ;;  %v4601_v14 = vmul.f32 %v10815_v52, %v9565_v22  ;;  %v4717_v12 = vmul.f32 %v10817_v43, %v9504_v36  ;;  %v9587_v7 = vadd.f32 %v9126_v10, %v4126_v50  ;;  %v10827_v50 = vld [vmem:[#allocation66_spill] sm:$0xff] }
 0x246   : > { %10818 = vst [vmem:[#allocation65_spill] sm:$0xff] %v9569_v44  ;;  %10821 = vst [vmem:[#allocation69_spill] sm:$0xff] %v9577_v26  ;;  %v4636_v54 = vsel %vm2655_vm1, %v4634_v40, %v10823_v31  ;;  %v4509_v29 = vadd.f32 %v9126_v10, %v4491_v41  ;;  %v4563_v51 = vmul.f32 %v10824_v28, %v9577_v26  ;;  %v4750_v45 = vrot.slane %v4714_v9, 1  ;;  %v10828_v41 = vld [vmem:[#allocation15_spill] sm:$0xff] }
 0x247   : > { %v4600_v11 = vmul.f32 %v10815_v52, %v9577_v26  ;;  %v9596_v17 = vmul.f32 %v10815_v52, %v9569_v44  ;;  %v4638_v6 = vrot.slane %v4601_v14, 1  ;;  %v4658_v25 = vadd.f32 %v4636_v54, %v10826_v27 }
 0x248   : > { %v9601_v48 = vmul.f32 %v10816_v62, %v9587_v7  ;;  %v4583_v35 = vadd.f32 %v4575_v53, %v4563_v51  ;;  %v4751_v39 = vrot.slane %v4715_v63, 1  ;;  %v4671_v15 = vmul.f32 %v10819_v55, %v3937_v3  ;;  %v10829_v63 = vld [vmem:[#allocation55_spill] sm:$0xff] }
 0x249   : > { %10825 = vst [vmem:[#allocation8_spill] sm:$0xff] %v9596_v17  ;;  %v4637_v10 = vrot.slane %v4600_v11, 1  ;;  %v4678_v61 = vadd.f32 %v4670_v30, %v4658_v25  ;;  %v4753_v24 = vrot.slane %v4716_v4, 1  ;;  %v4754_v37 = vrot.slane %v4717_v12, 1  ;;  %v10830_v11 = vld [vmem:[#allocation25_spill] sm:$0xff] }
 0x24a   : > { %v9606_v16 = vsel %vm1835_vm0, 0.0, %v4509_v29  ;;  %v4691_v5 = vmul.f32 %v10828_v41, %v10827_v50  ;;  %v4752_v20 = vsel %vm2655_vm1, %v4750_v45, %v4751_v39  ;;  %v4786_v4 = vmul.f32 %v10829_v63, %v9577_v26 }
 0x24b   : > { %v4639_v59 = vsel %vm2655_vm1, %v4637_v10, %v4638_v6  ;;  %v9614_v53 = vmul.f32 %v10824_v28, %v9606_v16  ;;  %v4755_v30 = vsel %vm2655_vm1, %v4753_v24, %v4754_v37  ;;  %v4787_v14 = vmul.f32 %v10829_v63, %v9606_v16  ;;  %v9639_v37 = vld [vmem:[#allocation2 + $0x250] sm:$0xff] }
 0x24c   : > { %v4659_v9 = vadd.f32 %v4639_v59, %v4583_v35  ;;  %v5007_v38 = vrot.slane %v3935_v46, 1  ;;  %v5008_v31 = vrot.slane %v10820_v56, 1  ;;  %v5010_v12 = vrot.slane %v3937_v3, 1  ;;  %v10831_v56 = vld [vmem:[#allocation23_spill] sm:$0xff] }
 0x24d   : > { %v5011_v29 = vrot.slane %v9504_v36, 1  ;;  %v5063_v51 = vrot.slane %v9577_v26, 1  ;;  %v4806_v6 = vmul.f32 %v10830_v11, %v9554_v13  ;;  %v4807_v27 = vmul.f32 %v10830_v11, %v9587_v7  ;;  %v9641_v59 = vld [vmem:[#allocation2 + $0x251] sm:$0xff]  ;;  %v9723_v26 = vld [vmem:[#allocation2 + $0x88] sm:$0x1] }
 0x24e   : > { %v4679_v54 = vadd.f32 %v4671_v15, %v4659_v9  ;;  %v5009_v25 = vsel %vm2655_vm1, %v5007_v38, %v5008_v31  ;;  %v5064_v45 = vrot.slane %v9565_v22, 1  ;;  %v5066_v3 = vrot.slane %v9606_v16, 1  ;;  %v10832_v38 = vld [vmem:[#allocation38_spill] sm:$0xff] }
 0x24f   : > { %v5012_v46 = vsel %vm2655_vm1, %v5010_v12, %v5011_v29  ;;  %v5031_v10 = vmax.f32 %v10831_v56, %v5009_v25  ;;  %v5067_v15 = vrot.slane %v9569_v44, 1  ;;  %v4690_v24 = vmul.f32 %v10828_v41, %v10831_v56  ;;  %v10839_v41 = vld [vmem:[#allocation31_spill] sm:$0xff] }
 0x250   : > { %v4699_v35 = vadd.f32 %v4691_v5, %v4679_v54  ;;  %v5032_v36 = vmax.f32 %v10827_v50, %v5012_v46  ;;  %v5065_v39 = vsel %vm2655_vm1, %v5063_v51, %v5064_v45  ;;  %v3305_v31 = vmul.f32 %v9261_v42, %v10832_v38  ;;  %v9648_v54 = vld [vmem:[#allocation2 + $0x111] sm:$0xff] }
 0x251   : > { %v5087_v9 = vmax.f32 %v9554_v13, %v5065_v39  ;;  %v3306_v50 = vmul.f32 %v9639_v37, %v10832_v38  ;;  %v5068_v12 = vsel %vm2655_vm1, %v5066_v3, %v5067_v15  ;;  %v4698_v29 = vadd.f32 %v4690_v24, %v4678_v61  ;;  %v9658_v39 = vld [vmem:[#allocation2 + $0x1c0] sm:$0xff] }
 0x252   : > { %v4775_v5 = vadd.f32 %v4755_v30, %v4699_v35  ;;  %v3325_v51 = vmul.f32 %v9293_v8, %v10668_v58  ;;  %v3326_v25 = vmul.f32 %v9648_v54, %v10668_v58  ;;  %v5088_v13 = vmax.f32 %v9587_v7, %v5068_v12  ;;  %v9666_v15 = vld [vmem:[#allocation2 + $0x81] sm:$0xff] }
 0x253   : > { %v5095_v45 = vmax.f32 %v5031_v10, %v5087_v9  ;;  %v3354_v42 = vmul.f32 %v9641_v59, %v10669_v57  ;;  %v4774_v35 = vadd.f32 %v4752_v20, %v4698_v29  ;;  %v3381_v61 = vmul.f32 %v9399_v49, %v10671_v19  ;;  %v10834_v20 = vld [vmem:[#allocation61_spill] sm:$0xff]  ;;  %v9683_v29 = vld [vmem:[#allocation2 + $0x110] sm:$0xff] }
 0x254   : > { %v4795_v30 = vadd.f32 %v4787_v14, %v4775_v5  ;;  %v3333_v46 = vadd.f32 %v3325_v51, %v3305_v31  ;;  %v3334_v56 = vadd.f32 %v3326_v25, %v3306_v50  ;;  %v5096_v8 = vmax.f32 %v5032_v36, %v5088_v13  ;;  %v9673_v31 = vld [vmem:[#allocation2 + $0x1c1] sm:$0xff]  ;;  %v9685_v51 = vld [vmem:[#allocation2 + $0x118] sm:$0x1] }
 0x255   : > { %v3382_v14 = vmul.f32 %v9658_v39, %v10671_v19  ;;  %v3409_v7 = vmul.f32 %v9430_v18, %v10672_v60  ;;  %v4794_v10 = vadd.f32 %v4786_v4, %v4774_v35  ;;  %v3410_v9 = vmul.f32 %v9666_v15, %v10672_v60  ;;  %v9693_v35 = vld [vmem:[#allocation2 + $0x261] sm:$0xff] }
 0x256   : > { %v9662_v3 = vadd.f32 %v4807_v27, %v4795_v30  ;;  %v3361_v24 = vadd.f32 %v10834_v20, %v3333_v46  ;;  %v3362_v5 = vadd.f32 %v3354_v42, %v3334_v56  ;;  %v9675_v27 = vld [vmem:[#allocation2 + $0x260] sm:$0xff]  ;;  %v6503_v36 = vpack.i.bf16 %v5096_v8, %v5095_v45  ;;  %v9695_v46 = vld [vmem:[#allocation2 + $0x258] sm:$0x1] }
 0x257   : > { %v3438_v50 = vmul.f32 %v9673_v31, %v10674_v47  ;;  %v3465_v12 = vmul.f32 %v9639_v37, %v10676_v21  ;;  %v3466_v4 = vmul.f32 %v9675_v27, %v10676_v21  ;;  %v9687_v25 = vadd.f32 %v4806_v6, %v4794_v10  ;;  %v9689_v42 = vld [vmem:[#allocation2 + $0x121] sm:$0xff] }
 0x258   : > { %10833 = vst [vmem:[#allocation71_spill] sm:$0xff] %v9662_v3  ;;  %v3389_v30 = vadd.f32 %v3381_v61, %v3361_v24  ;;  %v3390_v13 = vadd.f32 %v3382_v14, %v3362_v5  ;;  %v3493_v45 = vmul.f32 %v9648_v54, %v10679_v0  ;;  %6504 = vrot.lane.b32.xlu0 %v6503_v36, %s6587_s17  ;;  %v9710_v5 = vld [vmem:[#allocation2 + $0x119] sm:$0x1] }
 0x259   : > { %10835 = vst [vmem:[#allocation64_spill] sm:$0xff] %v9687_v25  ;;  %v3494_v56 = vmul.f32 %v9689_v42, %v10679_v0  ;;  %v3521_v6 = vmul.f32 %v9098_v1, %v9641_v59  ;;  %v3522_v61 = vmul.f32 %v9098_v1, %v9693_v35  ;;  %v3571_v8 = vmul.f32 %v9380_v32, %v10832_v38  ;;  %v10836_v32 = vld [vmem:[#allocation30_spill] sm:$0xff] }
 0x25a   : > { %v3417_v14 = vadd.f32 %v3409_v7, %v3389_v30  ;;  %v3418_v10 = vadd.f32 %v3410_v9, %v3390_v13  ;;  %v3572_v20 = vmul.f32 %v9497_v23, %v10832_v38  ;;  %v3573_v24 = vmul.f32 %v9683_v29, %v10832_v38  ;;  %v10837_v9 = vld [vmem:[#allocation62_spill] sm:$0xff]  ;;  %v10838_v23 = vld [vmem:[#allocation27_spill] sm:$0xff] }
 0x25b   : > { %v3574_v36 = vmul.f32 %v9685_v51, %v10832_v38  ;;  %v3597_v40 = vmul.f32 %v9639_v37, %v10668_v58  ;;  %v3598_v1 = vmul.f32 %v9695_v46, %v10668_v58  ;;  %v3611_v7 = vadd.f32 %v10836_v32, %v3571_v8  ;;  %v10840_v8 = vld [vmem:[#allocation26_spill] sm:$0xff] }
 0x25c   : > { %v3445_v30 = vadd.f32 %v10837_v9, %v3417_v14  ;;  %v3446_v13 = vadd.f32 %v3438_v50, %v3418_v10  ;;  %v3612_v3 = vadd.f32 %v10838_v23, %v3572_v20  ;;  %v3637_v25 = vmul.f32 %v9648_v54, %v10669_v57  ;;  %v9729_v14 = vld [vmem:[#allocation2 + $0x80] sm:$0xff]  ;;  %v9733_v10 = vld [vmem:[#allocation2 + $0x1c8] sm:$0x1] }
 0x25d   : > { %v3613_v44 = vadd.f32 %v3597_v40, %v3573_v24  ;;  %v3614_v11 = vadd.f32 %v3598_v1, %v3574_v36  ;;  %v3638_v63 = vmul.f32 %v9710_v5, %v10669_v57  ;;  %v3651_v28 = vadd.f32 %v10839_v41, %v3611_v7  ;;  %v10841_v36 = vld [vmem:[#allocation39_spill] sm:$0xff]  ;;  %v9740_v1 = vld [vmem:[#allocation2 + $0x89] sm:$0x1] }
 0x25e   : > { %v3473_v17 = vadd.f32 %v3465_v12, %v3445_v30  ;;  %v3474_v43 = vadd.f32 %v3466_v4, %v3446_v13  ;;  %v3652_v32 = vadd.f32 %v10840_v8, %v3612_v3  ;;  %v3683_v50 = vmul.f32 %v9520_v2, %v10671_v19 }
 0x25f   : > { %v3653_v20 = vadd.f32 %v3637_v25, %v3613_v44  ;;  %v3654_v9 = vadd.f32 %v3638_v63, %v3614_v11  ;;  %v3685_v40 = vmul.f32 %v9729_v14, %v10671_v19  ;;  %v3686_v24 = vmul.f32 %v9723_v26, %v10671_v19  ;;  %v10846_v25 = vld [vmem:[#allocation67_spill] sm:$0xff] }
 0x260   : > { %v3501_v41 = vadd.f32 %v3493_v45, %v3473_v17  ;;  %v3502_v12 = vadd.f32 %v3494_v56, %v3474_v43  ;;  %v3699_v4 = vadd.f32 %v3683_v50, %v3651_v28  ;;  %v3700_v3 = vadd.f32 %v10841_v36, %v3652_v32  ;;  %v9753_v43 = vld [vmem:[%s10384_s3 + $0x18] ss:$0 sm:$0xff]  ;;  %v10845_v17 = vld [vmem:[#allocation14_spill] sm:$0xff]  ;;  %v6265_v32 = vld [vmem:[#allocation2 + $0x128] sm:$0x1] }
 0x261   : > { %v3701_v7 = vadd.f32 %v3685_v40, %v3653_v20  ;;  %v3702_v30 = vadd.f32 %v3686_v24, %v3654_v9  ;;  %v3725_v13 = vmul.f32 %v9658_v39, %v10672_v60  ;;  %v3726_v44 = vmul.f32 %v9733_v10, %v10672_v60  ;;  %10843 = vst [vmem:[#allocation70_spill] sm:$0xff] %v9753_v43  ;;  %v6263_v56 = vld [vmem:[#allocation2 + $0x118] sm:$0x1]  ;;  %v10847_v40 = vld [vmem:[#allocation60_spill] sm:$0xff] }
 0x262   : > { %v9748_v63 = vadd.f32 %v9601_v48, %v9614_v53  ;;  %v9757_v28 = vmul.f32 %v9753_v43, %v9565_v22  ;;  %v3739_v11 = vadd.f32 %v10845_v17, %v3699_v4  ;;  %v3740_v45 = vadd.f32 %v10846_v25, %v3700_v3  ;;  %v6272_v50 = vld [vmem:[#allocation2 + $0x258] sm:$0x1]  ;;  %v10848_v24 = vld [vmem:[#allocation68_spill] sm:$0xff]  ;;  %v6273_v4 = vld [vmem:[#allocation2 + $0x268] sm:$0x1] }
 0x263   : > { %v3741_v23 = vadd.f32 %v3725_v13, %v3701_v7  ;;  %v3742_v8 = vadd.f32 %v3726_v44, %v3702_v30  ;;  %v3765_v48 = vmul.f32 %v9666_v15, %v10674_v47  ;;  %v3766_v53 = vmul.f32 %v9740_v1, %v10674_v47  ;;  %v9767_v25 = vld [vmem:[#allocation2 + $0x120] sm:$0xff]  ;;  %v6280_v13 = vld [vmem:[#allocation2 + $0x119] sm:$0x1] }
 0x264   : > { %10842 = vst [vmem:[#allocation13_spill] sm:$0xff] %v9748_v63  ;;  %10844 = vst [vmem:[#allocation63_spill] sm:$0xff] %v9757_v28  ;;  %v3529_v20 = vadd.f32 %v3521_v6, %v3501_v41  ;;  %v3530_v9 = vadd.f32 %v3522_v61, %v3502_v12  ;;  %v3779_v22 = vadd.f32 %v10847_v40, %v3739_v11  ;;  %v6281_v12 = vld [vmem:[#allocation2 + $0x129] sm:$0x1]  ;;  %v4235_v43 = vld [vmem:[#allocation2 + $0x79] sm:$0x1] }
 0x265   : > { %v3780_v36 = vadd.f32 %v10848_v24, %v3740_v45  ;;  %v3781_v17 = vadd.f32 %v3765_v48, %v3741_v23  ;;  %v3782_v3 = vadd.f32 %v3766_v53, %v3742_v8  ;;  %v3811_v7 = vmul.f32 %v9683_v29, %v10676_v21  ;;  %v9784_v53 = vld [vmem:[%s10382_s1 + $0x18] ss:$0 sm:$0xff] }
 0x266   : > { %v3812_v30 = vmul.f32 %v6263_v56, %v10676_v21  ;;  %v3813_v44 = vmul.f32 %v9767_v25, %v10676_v21  ;;  %v3814_v6 = vmul.f32 %v6265_v32, %v10676_v21  ;;  %v3851_v61 = vmul.f32 %v9639_v37, %v10679_v0 }
 0x267   : > { %v3852_v41 = vmul.f32 %v6272_v50, %v10679_v0  ;;  %v3827_v11 = vadd.f32 %v3811_v7, %v3779_v22  ;;  %v3853_v23 = vmul.f32 %v9675_v27, %v10679_v0  ;;  %v3854_v8 = vmul.f32 %v6273_v4, %v10679_v0 }
 0x268   : > { %v3828_v45 = vadd.f32 %v3812_v30, %v3780_v36  ;;  %v3829_v56 = vadd.f32 %v3813_v44, %v3781_v17  ;;  %v3830_v48 = vadd.f32 %v3814_v6, %v3782_v3  ;;  %v3891_v32 = vmul.f32 %v9784_v53, %v9648_v54 }
 0x269   : > { %v3892_v50 = vmul.f32 %v9784_v53, %v6280_v13  ;;  %v3867_v40 = vadd.f32 %v3851_v61, %v3827_v11  ;;  %v3893_v24 = vmul.f32 %v9784_v53, %v9689_v42  ;;  %v3894_v36 = vmul.f32 %v9784_v53, %v6281_v12 }
 0x26a   : > { %v3868_v22 = vadd.f32 %v3852_v41, %v3828_v45  ;;  %v3869_v4 = vadd.f32 %v3853_v23, %v3829_v56  ;;  %v3870_v17 = vadd.f32 %v3854_v8, %v3830_v48  ;;  %v3959_v3 = vmul.f32 %v9399_v49, %v10832_v38  ;;  %v9807_v45 = vld [vmem:[%s10383_s2 + $0x1] ss:$0 sm:$0xff] }
 0x26b   : > { %v3960_v7 = vmul.f32 %v9658_v39, %v10832_v38  ;;  %v3907_v30 = vadd.f32 %v3891_v32, %v3867_v40  ;;  %v3977_v13 = vmul.f32 %v9430_v18, %v10668_v58  ;;  %v3978_v6 = vmul.f32 %v9666_v15, %v10668_v58 }
 0x26c   : > { %v3908_v44 = vadd.f32 %v3892_v50, %v3868_v22  ;;  %v3909_v61 = vadd.f32 %v3893_v24, %v3869_v4  ;;  %v3910_v41 = vadd.f32 %v3894_v36, %v3870_v17  ;;  %v4004_v12 = vmul.f32 %v9310_v33, %v10669_v57  ;;  %v6305_v36 = vld [vmem:[#allocation2 + $0x1d1] sm:$0xff] }
 0x26d   : > { %v4005_v11 = vmul.f32 %v9673_v31, %v10669_v57  ;;  %v9810_v23 = vadd.f32 %v9807_v45, %v3529_v20  ;;  %v9813_v8 = vadd.f32 %v9807_v45, %v3530_v9  ;;  %v3986_v56 = vadd.f32 %v3977_v13, %v3959_v3 }
 0x26e   : > { %v3987_v48 = vadd.f32 %v3978_v6, %v3960_v7  ;;  %v9816_v32 = vadd.f32 %v9807_v45, %v3907_v30  ;;  %v9819_v33 = vadd.f32 %v9807_v45, %v3908_v44  ;;  %v4023_v50 = vmul.f32 %v9639_v37, %v10671_v19  ;;  %v9839_v30 = vld [vmem:[#allocation2 + $0x1d0] sm:$0xff]  ;;  %v4162_v44 = vld [vmem:[#allocation2 + $0x78] sm:$0x1] }
 0x26f   : > { %10849 = vst [vmem:[#allocation20_spill] sm:$0xff] %v9810_v23  ;;  %10850 = vst [vmem:[#allocation66_spill] sm:$0xff] %v9813_v8  ;;  %v4024_v40 = vmul.f32 %v9675_v27, %v10671_v19  ;;  %v9826_v20 = vadd.f32 %v9807_v45, %v3909_v61  ;;  %v4013_v22 = vadd.f32 %v4004_v12, %v3986_v56  ;;  %v9845_v12 = vld [vmem:[#allocation2 + $0x91] sm:$0xff] }
 0x270   : > { %10851 = vst [vmem:[#allocation23_spill] sm:$0xff] %v9819_v33  ;;  %v4014_v9 = vadd.f32 %v4005_v11, %v3987_v48  ;;  %v4042_v24 = vmul.f32 %v9648_v54, %v10672_v60  ;;  %v9831_v4 = vadd.f32 %v9807_v45, %v3910_v41  ;;  %v4043_v17 = vmul.f32 %v9689_v42, %v10672_v60  ;;  %v4164_v11 = vld [vmem:[#allocation2 + $0x88] sm:$0x1]  ;;  %v6313_v56 = vld [vmem:[#allocation2 + $0x1b8] sm:$0x1] }
 0x271   : > { %v4061_v3 = vmul.f32 %v9641_v59, %v10674_v47  ;;  %v4062_v7 = vmul.f32 %v9693_v35, %v10674_v47  ;;  %v4032_v13 = vadd.f32 %v4023_v50, %v4013_v22  ;;  %v4080_v61 = vmul.f32 %v9658_v39, %v10676_v21 }
 0x272   : > { %10852 = vst [vmem:[#allocation38_spill] sm:$0xff] %v9831_v4  ;;  %v4033_v6 = vadd.f32 %v4024_v40, %v4014_v9  ;;  %v4081_v41 = vmul.f32 %v9839_v30, %v10676_v21  ;;  %v4099_v59 = vmul.f32 %v9666_v15, %v10679_v0  ;;  %v4100_v35 = vmul.f32 %v9845_v12, %v10679_v0  ;;  %v6314_v40 = vld [vmem:[#allocation2 + $0x1c8] sm:$0x1] }
 0x273   : > { %v4118_v48 = vmul.f32 %v9784_v53, %v9673_v31  ;;  %v4119_v50 = vmul.f32 %v9784_v53, %v6305_v36  ;;  %v4051_v22 = vadd.f32 %v4042_v24, %v4032_v13  ;;  %v4179_v28 = vmul.f32 %v9520_v2, %v10832_v38 }
 0x274   : > { %v4052_v9 = vadd.f32 %v4043_v17, %v4033_v6  ;;  %v4180_v23 = vmul.f32 %v4162_v44, %v10832_v38  ;;  %v4181_v4 = vmul.f32 %v9729_v14, %v10832_v38  ;;  %v4182_v8 = vmul.f32 %v4164_v11, %v10832_v38  ;;  %v4236_v17 = vld [vmem:[#allocation2 + $0x89] sm:$0x1] }
 0x275   : > { %v4206_v63 = vmul.f32 %v9399_v49, %v10668_v58  ;;  %v4207_v31 = vmul.f32 %v6313_v56, %v10668_v58  ;;  %v4070_v36 = vadd.f32 %v4061_v3, %v4051_v22  ;;  %v4208_v24 = vmul.f32 %v9658_v39, %v10668_v58  ;;  %v6316_v56 = vld [vmem:[#allocation2 + $0x128] sm:$0x1] }
 0x276   : > { %v4071_v33 = vadd.f32 %v4062_v7, %v4052_v9  ;;  %v4209_v2 = vmul.f32 %v6314_v40, %v10668_v58  ;;  %v4251_v6 = vmul.f32 %v9430_v18, %v10669_v57  ;;  %v4252_v38 = vmul.f32 %v4235_v43, %v10669_v57 }
 0x277   : > { %v4224_v44 = vadd.f32 %v4206_v63, %v4179_v28  ;;  %v4225_v13 = vadd.f32 %v4207_v31, %v4180_v23  ;;  %v4089_v11 = vadd.f32 %v4080_v61, %v4070_v36  ;;  %v4226_v49 = vadd.f32 %v4208_v24, %v4181_v4  ;;  %v6317_v4 = vld [vmem:[#allocation2 + $0x268] sm:$0x1]  ;;  %v6319_v24 = vld [vmem:[#allocation2 + $0x90] sm:$0xff] }
 0x278   : > { %v4090_v55 = vadd.f32 %v4081_v41, %v4071_v33  ;;  %v4227_v62 = vadd.f32 %v4209_v2, %v4182_v8  ;;  %v4253_v3 = vmul.f32 %v9666_v15, %v10669_v57  ;;  %v4254_v7 = vmul.f32 %v4236_v17, %v10669_v57 }
 0x279   : > { %v4269_v22 = vadd.f32 %v4251_v6, %v4224_v44  ;;  %v4270_v58 = vadd.f32 %v4252_v38, %v4225_v13  ;;  %v4108_v40 = vadd.f32 %v4099_v59, %v4089_v11  ;;  %v4289_v28 = vmul.f32 %v9683_v29, %v10671_v19  ;;  %v6321_v6 = vld [vmem:[#allocation2 + $0x1d8] sm:$0x1] }
 0x27a   : > { %v4109_v63 = vadd.f32 %v4100_v35, %v4090_v55  ;;  %v4290_v18 = vmul.f32 %v9685_v51, %v10671_v19  ;;  %v4271_v43 = vadd.f32 %v4253_v3, %v4226_v49  ;;  %v4272_v23 = vadd.f32 %v4254_v7, %v4227_v62  ;;  %v6322_v7 = vld [vmem:[#allocation2 + $0x99] sm:$0x1] }
 0x27b   : > { %v4291_v8 = vmul.f32 %v9767_v25, %v10671_v19  ;;  %v4292_v33 = vmul.f32 %v6316_v56, %v10671_v19  ;;  %v9882_v57 = vsel %vm1835_vm0, 0.0, %v9816_v32  ;;  %v4127_v55 = vadd.f32 %v4118_v48, %v4108_v40  ;;  %v6318_v25 = vld [vmem:[#allocation2 + $0x129] sm:$0x1]  ;;  %v9914_v40 = vpop.permute.xlu0 %6414 }
 0x27c   : > { %v4307_v61 = vadd.f32 %v4289_v28, %v4269_v22  ;;  %v4308_v41 = vadd.f32 %v4290_v18, %v4270_v58  ;;  %v4326_v51 = vmul.f32 %v9639_v37, %v10672_v60  ;;  %v4327_v62 = vmul.f32 %v9695_v46, %v10672_v60  ;;  %v6320_v46 = vld [vmem:[#allocation2 + $0x98] sm:$0x1] }
 0x27d   : > { %v4309_v29 = vadd.f32 %v4291_v8, %v4271_v43  ;;  %v4310_v59 = vadd.f32 %v4292_v33, %v4272_v23  ;;  %v4128_v35 = vadd.f32 %v4119_v50, %v4109_v63  ;;  %v9889_v19 = vadd.f32 %v9807_v45, %v4127_v55  ;;  %v9916_v63 = vpop.permute.xlu1 %6424 }
 0x27e   : > { %v4328_v32 = vmul.f32 %v9675_v27, %v10672_v60  ;;  %v4329_v48 = vmul.f32 %v6317_v4, %v10672_v60  ;;  %v4344_v9 = vadd.f32 %v4326_v51, %v4307_v61  ;;  %v4345_v31 = vadd.f32 %v4327_v62, %v4308_v41  ;;  %v10853_v41 = vld [vmem:[#allocation12_spill] sm:$0xff] }
 0x27f   : > { %v4363_v36 = vmul.f32 %v9648_v54, %v10674_v47  ;;  %v4364_v37 = vmul.f32 %v9710_v5, %v10674_v47  ;;  %v4365_v17 = vmul.f32 %v9689_v42, %v10674_v47  ;;  %v4366_v44 = vmul.f32 %v6318_v25, %v10674_v47 }
 0x280   : > { %v4346_v2 = vadd.f32 %v4328_v32, %v4309_v29  ;;  %v4347_v50 = vadd.f32 %v4329_v48, %v4310_v59  ;;  %v4401_v60 = vmul.f32 %v9729_v14, %v10676_v21  ;;  %v4402_v54 = vmul.f32 %v9723_v26, %v10676_v21  ;;  %v10854_v59 = vld [vmem:[#allocation53_spill] sm:$0xff]  ;;  %v10856_v48 = vld [vmem:[#allocation23_spill] sm:$0xff] }
 0x281   : > { %v4381_v27 = vadd.f32 %v4363_v36, %v4344_v9  ;;  %v4382_v13 = vadd.f32 %v4364_v37, %v4345_v31  ;;  %v4403_v11 = vmul.f32 %v6319_v24, %v10676_v21  ;;  %v4404_v49 = vmul.f32 %v6320_v46, %v10676_v21  ;;  %v9950_v31 = vpop.permute.xlu0 %6419  ;;  %v9952_v36 = vpop.permute.xlu1 %6429  ;;  %v10857_v46 = vld [vmem:[#allocation8_spill] sm:$0xff] }
 0x282   : > { %v4383_v38 = vadd.f32 %v4365_v17, %v4346_v2  ;;  %v4384_v5 = vadd.f32 %v4366_v44, %v4347_v50  ;;  %v4438_v47 = vmul.f32 %v9658_v39, %v10679_v0  ;;  %v4439_v42 = vmul.f32 %v9733_v10, %v10679_v0  ;;  %v10859_v44 = vld [vmem:[#allocation11_spill] sm:$0xff] }
 0x283   : > { %v4419_v56 = vadd.f32 %v4401_v60, %v4381_v27  ;;  %v4420_v3 = vadd.f32 %v4402_v54, %v4382_v13  ;;  %v4440_v26 = vmul.f32 %v9839_v30, %v10679_v0  ;;  %v4441_v58 = vmul.f32 %v6321_v6, %v10679_v0  ;;  %v10860_v60 = vld [vmem:[#allocation13_spill] sm:$0xff]  ;;  %v10861_v6 = vld [vmem:[#allocation66_spill] sm:$0xff] }
 0x284   : > { %v4421_v14 = vadd.f32 %v4403_v11, %v4383_v38  ;;  %v4422_v22 = vadd.f32 %v4404_v49, %v4384_v5  ;;  %v4475_v39 = vmul.f32 %v9784_v53, %v9666_v15  ;;  %v4476_v10 = vmul.f32 %v9784_v53, %v9740_v1  ;;  %v10862_v38 = vld [vmem:[#allocation15_spill] sm:$0xff]  ;;  %v10863_v49 = vld [vmem:[#allocation38_spill] sm:$0xff] }
 0x285   : > { %v4456_v21 = vadd.f32 %v4438_v47, %v4419_v56  ;;  %v4457_v28 = vadd.f32 %v4439_v42, %v4420_v3  ;;  %v4477_v23 = vmul.f32 %v9784_v53, %v9845_v12  ;;  %v4478_v30 = vmul.f32 %v9784_v53, %v6322_v7 }
 0x286   : > { %v4458_v18 = vadd.f32 %v4440_v26, %v4421_v14  ;;  %v4459_v43 = vadd.f32 %v4441_v58, %v4422_v22  ;;  %v9928_v0 = vsel %vm1835_vm0, 0.0, %v9826_v20  ;;  %v4602_v4 = vmul.f32 %v10815_v52, %v9606_v16 }
 0x287   : > { %v4493_v8 = vadd.f32 %v4475_v39, %v4456_v21  ;;  %v4494_v33 = vadd.f32 %v4476_v10, %v4457_v28  ;;  %v9933_v55 = vadd.f32 %v9807_v45, %v4128_v35  ;;  %v4577_v12 = vmul.f32 %v10853_v41, %v9889_v19  ;;  %v10855_v35 = vld [vmem:[#allocation44_spill] sm:$0xff]  ;;  %v10864_v39 = vld [vmem:[#allocation55_spill] sm:$0xff] }
 0x288   : > { %v4495_v1 = vadd.f32 %v4477_v23, %v4458_v18  ;;  %v4496_v61 = vadd.f32 %v4478_v30, %v4459_v43  ;;  %v4640_v20 = vrot.slane %v4602_v4, 1  ;;  %v4672_v51 = vmul.f32 %v10854_v59, %v9882_v57  ;;  %v10865_v43 = vld [vmem:[#allocation25_spill] sm:$0xff]  ;;  %v9984_v30 = vpop.permute.xlu0 %6434 }
 0x289   : > { %v4511_v53 = vadd.f32 %v9807_v45, %v4493_v8  ;;  %v9939_v29 = vadd.f32 %v9807_v45, %v4494_v33  ;;  %v4673_v25 = vmul.f32 %v10854_v59, %v9928_v0  ;;  %v4718_v32 = vmul.f32 %v10855_v35, %v9882_v57  ;;  %v9986_v8 = vpop.permute.xlu1 %6439  ;;  %v10866_v33 = vld [vmem:[#allocation70_spill] sm:$0xff] }
 0x28a   : > { %v4513_v62 = vadd.f32 %v9807_v45, %v4495_v1  ;;  %v4719_v9 = vmul.f32 %v10855_v35, %v10856_v48  ;;  %v10858_v2 = vrot.slane %v10857_v46, 1  ;;  %v4720_v17 = vmul.f32 %v10855_v35, %v9928_v0 }
 0x28b   : > { %v9956_v37 = vsel %vm1835_vm0, 0.0, %v4511_v53  ;;  %v4605_v24 = vmul.f32 %v10815_v52, %v9939_v29  ;;  %v4693_v5 = vmul.f32 %v10862_v38, %v10861_v6  ;;  %v4721_v56 = vmul.f32 %v10855_v35, %v10863_v49 }
 0x28c   : > { %v4642_v50 = vsel %vm2655_vm1, %v4640_v20, %v10858_v2  ;;  %v4565_v27 = vmul.f32 %v10859_v44, %v9956_v37  ;;  %v4604_v13 = vmul.f32 %v10815_v52, %v9956_v37  ;;  %v4756_v3 = vrot.slane %v4718_v32, 1 }
 0x28d   : > { %v4660_v54 = vadd.f32 %v4642_v50, %v10860_v60  ;;  %v4644_v11 = vrot.slane %v4605_v24, 1  ;;  %v4757_v47 = vrot.slane %v4719_v9, 1  ;;  %v4759_v22 = vrot.slane %v4720_v17, 1  ;;  %v6450_v60 = vpop.permute.xlu1 %6449 }
 0x28e   : > { %v4585_v42 = vadd.f32 %v4577_v12, %v4565_v27  ;;  %v4643_v7 = vrot.slane %v4604_v13, 1  ;;  %v4514_v26 = vadd.f32 %v9807_v45, %v4496_v61  ;;  %v4531_v52 = vsel %vm1835_vm0, 0.0, %v4513_v62  ;;  %v5748_v27 = vld [vmem:[#allocation2 + $0x61] sm:$0xff]  ;;  %v6445_v13 = vpop.permute.xlu0 %6444 }
 0x28f   : > { %v4680_v14 = vadd.f32 %v4672_v51, %v4660_v54  ;;  %v4758_v58 = vsel %vm2655_vm1, %v4756_v3, %v4757_v47  ;;  %v4760_v21 = vrot.slane %v4721_v56, 1  ;;  %v4788_v10 = vmul.f32 %v10864_v39, %v9956_v37 }
 0x290   : > { %v4645_v28 = vsel %vm2655_vm1, %v4643_v7, %v4644_v11  ;;  %v4789_v18 = vmul.f32 %v10864_v39, %v4531_v52  ;;  %v4808_v23 = vmul.f32 %v10865_v43, %v9889_v19  ;;  %v4836_v4 = vmul.f32 %v10866_v33, %v4531_v52 }
 0x291   : > { %v4661_v45 = vadd.f32 %v4645_v28, %v4585_v42  ;;  %v4761_v34 = vsel %vm2655_vm1, %v4759_v22, %v4760_v21  ;;  %v4837_v1 = vmul.f32 %v10866_v33, %v4514_v26  ;;  %v4809_v61 = vmul.f32 %v10865_v43, %v9933_v55  ;;  %v5749_v28 = vld [vmem:[#allocation2 + $0x71] sm:$0xff] }
 0x292   : > { %v5013_v41 = vrot.slane %v9882_v57, 1  ;;  %v5014_v12 = vrot.slane %v10856_v48, 1  ;;  %v5016_v53 = vrot.slane %v9928_v0, 1  ;;  %v4875_v59 = vrot.slane %v4836_v4, 1  ;;  %v10867_v48 = vld [vmem:[#allocation20_spill] sm:$0xff] }
 0x293   : > { %v4681_v20 = vadd.f32 %v4673_v25, %v4661_v45  ;;  %v4876_v51 = vrot.slane %v4837_v1, 1  ;;  %v5017_v62 = vrot.slane %v10863_v49, 1  ;;  %v5069_v32 = vrot.slane %v9956_v37, 1  ;;  %v5747_v49 = vld [vmem:[#allocation2 + $0x51] sm:$0xff]  ;;  %v6455_v45 = vpop.permute.xlu0 %6454 }
 0x294   : > { %v5015_v35 = vsel %vm2655_vm1, %v5013_v41, %v5014_v12  ;;  %v5070_v9 = vrot.slane %v9939_v29, 1  ;;  %v5072_v24 = vrot.slane %v4531_v52, 1  ;;  %v5073_v17 = vrot.slane %v4514_v26, 1  ;;  %v5744_v12 = vld [vmem:[#allocation2 + $0x21] sm:$0xff] }
 0x295   : > { %v4701_v46 = vadd.f32 %v4693_v5, %v4681_v20  ;;  %v4877_v2 = vsel %vm2655_vm1, %v4875_v59, %v4876_v51  ;;  %v5018_v57 = vsel %vm2655_vm1, %v5016_v53, %v5017_v62  ;;  %v5033_v50 = vmax.f32 %v10867_v48, %v5015_v35  ;;  %v5743_v59 = vld [vmem:[#allocation2 + $0x11] sm:$0xff]  ;;  %v5746_v62 = vld [vmem:[#allocation2 + $0x41] sm:$0xff] }
 0x296   : > { %v5034_v0 = vmax.f32 %v10861_v6, %v5018_v57  ;;  %v5071_v25 = vsel %vm2655_vm1, %v5069_v32, %v5070_v9  ;;  %v4692_v44 = vmul.f32 %v10862_v38, %v10867_v48  ;;  %v6417_v11 = vunpack.i.h.bf16 %v9914_v40  ;;  %v5745_v51 = vld [vmem:[#allocation2 + $0x31] sm:$0xff] }
 0x297   : > { %v4777_v54 = vadd.f32 %v4761_v34, %v4701_v46  ;;  %v5089_v5 = vmax.f32 %v9889_v19, %v5071_v25  ;;  %v5074_v56 = vsel %vm2655_vm1, %v5072_v24, %v5073_v17  ;;  %v6416_v6 = vunpack.i.l.bf16 %v9914_v40  ;;  %v6460_v34 = vpop.permute.xlu1 %6459 }
 0x298   : > { %v4700_v3 = vadd.f32 %v4692_v44, %v4680_v14  ;;  %v6427_v47 = vunpack.i.h.bf16 %v9916_v63  ;;  %v5090_v38 = vmax.f32 %v9933_v55, %v5074_v56  ;;  %v1051_v22 = vsel %vm1045_vm2, %v5748_v27, %v6417_v11 }
 0x299   : > { %v4797_v42 = vadd.f32 %v4789_v18, %v4777_v54  ;;  %v5097_v7 = vmax.f32 %v5033_v50, %v5089_v5  ;;  %v1050_v19 = vsel %vm1045_vm2, %v5747_v49, %v6416_v6  ;;  %v6426_v52 = vunpack.i.l.bf16 %v9916_v63 }
 0x29a   : > { %v4776_v26 = vadd.f32 %v4758_v58, %v4700_v3  ;;  %v6422_v21 = vunpack.i.h.bf16 %v9950_v31  ;;  %v5098_v14 = vmax.f32 %v5034_v0, %v5090_v38  ;;  %v6421_v40 = vunpack.i.l.bf16 %v9950_v31  ;;  %v6465_v0 = vpop.permute.xlu0 %6464 }
 0x29b   : > { %v4817_v39 = vadd.f32 %v4809_v61, %v4797_v42  ;;  %v6432_v18 = vunpack.i.h.bf16 %v9952_v36  ;;  %v6431_v58 = vunpack.i.l.bf16 %v9952_v36  ;;  %v6437_v61 = vunpack.i.h.bf16 %v9984_v30  ;;  %v6470_v25 = vpop.permute.xlu1 %6469 }
 0x29c   : > { %v4796_v43 = vadd.f32 %v4788_v10, %v4776_v26  ;;  %v1053_v55 = vsel %vm1045_vm2, %v9666_v15, %v6422_v21  ;;  %v6508_v63 = vpack.i.bf16 %v5098_v14, %v5097_v7  ;;  %v1052_v1 = vsel %vm1045_vm2, %v5749_v28, %v6421_v40  ;;  %v3185_v7 = vld [vmem:[%s10387_s6] sm:$0xf]  ;;  %v10868_v14 = vld [vmem:[#allocation35_spill] sm:$0xff] }
 0x29d   : > { %v10022_v4 = vadd.f32 %v4877_v2, %v4817_v39  ;;  %v1061_v31 = vsel %vm1054_vm3, %v1052_v1, %v6431_v58  ;;  %v1062_v10 = vsel %vm1054_vm3, %v1053_v55, %v6432_v18  ;;  %v6436_v15 = vunpack.i.l.bf16 %v9984_v30  ;;  %v10870_v18 = vld [vmem:[#allocation65_spill] sm:$0xff]  ;;  %6384 = vmatprep.subr.msk.bf16.mxu1 %vm3198_vm6, %v3185_v7  ;;  %v10872_v1 = vld [vmem:[#allocation63_spill] sm:$0xff] }
 0x29e   : > { %v10026_v41 = vadd.f32 %v4808_v23, %v4796_v43  ;;  %6509 = vrot.lane.b32.xlu1 %v6508_v63, %s6587_s17  ;;  %v6442_v36 = vunpack.i.h.bf16 %v9986_v8  ;;  %v6441_v53 = vunpack.i.l.bf16 %v9986_v8  ;;  %v6447_v20 = vunpack.i.h.bf16 %v6445_v13  ;;  %v10869_v43 = vld [vmem:[#allocation43_spill] sm:$0xff] }
 0x29f   : > { %v6446_v23 = vunpack.i.l.bf16 %v6445_v13  ;;  %v6452_v35 = vunpack.i.h.bf16 %v6450_v60  ;;  %v6451_v32 = vunpack.i.l.bf16 %v6450_v60  ;;  %v1059_v9 = vsel %vm1054_vm3, %v1050_v19, %v6426_v52 }
 0x2a0   : > { %v1070_v24 = vsel %vm1063_vm4, %v1061_v31, %v6441_v53  ;;  %v1071_v30 = vsel %vm1063_vm4, %v1062_v10, %v6442_v36  ;;  %v1047_v46 = vsel %vm1045_vm2, %v5744_v12, %v6447_v20  ;;  %v1060_v2 = vsel %vm1054_vm3, %v1051_v22, %v6427_v47  ;;  %v10055_v22 = vld [vmem:[%s10387_s6 + $0x4] sm:$0xf]  ;;  %v10873_v31 = vld [vmem:[#allocation33_spill] sm:$0xff]  ;;  %v10875_v12 = vld [vmem:[#allocation19_spill] sm:$0xff] }
 0x2a1   : > { %v1076_v57 = vpack.c.bf16 %v1071_v30, %v1070_v24  ;;  %v1046_v8 = vsel %vm1045_vm2, %v5743_v59, %v6446_v23  ;;  %v1048_v48 = vsel %vm1045_vm2, %v5745_v51, %v6451_v32  ;;  %v1049_v50 = vsel %vm1045_vm2, %v5746_v62, %v6452_v35  ;;  %6385 = vmatprep.subr.msk.bf16.mxu0 %vm3198_vm6, %v10055_v22  ;;  %v10876_v53 = vld [vmem:[#allocation46_spill] sm:$0xff]  ;;  %v10881_v30 = vld [vmem:[#allocation36_spill] sm:$0xff] }
 0x2a2   : > { %v1068_v17 = vsel %vm1063_vm4, %v1059_v9, %v6436_v15  ;;  %v1069_v44 = vsel %vm1063_vm4, %v1060_v2, %v6437_v61  ;;  %v6457_v27 = vunpack.i.h.bf16 %v6455_v45  ;;  %v6456_v60 = vunpack.i.l.bf16 %v6455_v45  ;;  %v10877_v51 = vld [vmem:[#allocation34_spill] sm:$0xff]  ;;  %v10880_v9 = vld [vmem:[#allocation24_spill] sm:$0xff] }
 0x2a3   : > { %v1075_v13 = vpack.c.bf16 %v1069_v44, %v1068_v17  ;;  %v6462_v54 = vunpack.i.h.bf16 %v6460_v34  ;;  %v6461_v5 = vunpack.i.l.bf16 %v6460_v34  ;;  %v6467_v11 = vunpack.i.h.bf16 %v6465_v0  ;;  %v10871_v34 = vld [vmem:[#allocation37_spill] sm:$0xff]  ;;  %v10879_v35 = vld [vmem:[#allocation22_spill] sm:$0xff]  ;;  %v10882_v2 = vld [vmem:[#allocation32_spill] sm:$0xff] }
 0x2a4   : > { %v6466_v49 = vunpack.i.l.bf16 %v6465_v0  ;;  %v6472_v56 = vunpack.i.h.bf16 %v6470_v25  ;;  %v6471_v3 = vunpack.i.l.bf16 %v6470_v25  ;;  %v1055_v42 = vsel %vm1054_vm3, %v1046_v8, %v6456_v60  ;;  %v10886_v0 = vld [vmem:[#allocation29_spill] sm:$0xff]  ;;  %v6560_v17 = vld [vmem:[%s10385_s4] ss:$0 sm:$0xff]  ;;  %v10888_v60 = vld [vmem:[#allocation18_spill] sm:$0xff] }
 0x2a5   : > { %6358 = vmatprep.mubr.msk.bf16.mxu1 %vm1085_vm5, %v1075_v13  ;;  %v1057_v6 = vsel %vm1054_vm3, %v1048_v48, %v6461_v5  ;;  %v1058_v47 = vsel %vm1054_vm3, %v1049_v50, %v6462_v54  ;;  %v1056_v38 = vsel %vm1054_vm3, %v1047_v46, %v6457_v27  ;;  %v2888_v40 = vrot.slane %v10868_v14, 1  ;;  %v10884_v48 = vld [vmem:[#allocation48_spill] sm:$0xff]  ;;  %v10887_v27 = vld [vmem:[#allocation41_spill] sm:$0xff] }
 0x2a6   : > { %6359 = vmatmul.mubr.msk.bf16.vlgmr.msra.gmra.mxu1 %vm1085_vm5, %v1076_v57  ;;  %v1066_v26 = vsel %vm1063_vm4, %v1057_v6, %v6471_v3  ;;  %v1067_v19 = vsel %vm1063_vm4, %v1058_v47, %v6472_v56  ;;  %v1064_v52 = vsel %vm1063_vm4, %v1055_v42, %v6466_v49  ;;  %v1065_v21 = vsel %vm1063_vm4, %v1056_v38, %v6467_v11  ;;  %v10889_v5 = vld [vmem:[#allocation45_spill] sm:$0xff]  ;;  %v10891_v6 = vld [vmem:[#allocation51_spill] sm:$0xff]  ;;  %v10893_v38 = vld [vmem:[#allocation50_spill] sm:$0xff] }
 0x2a7   : > { %v1074_v28 = vpack.c.bf16 %v1067_v19, %v1066_v26  ;;  %v1073_v39 = vpack.c.bf16 %v1065_v21, %v1064_v52  ;;  %v4864_v55 = vrot.slane %v10869_v43, 1  ;;  %v10066_v58 = vmul.f32 %v10866_v33, %v10870_v18  ;;  %v10894_v21 = vld [vmem:[#allocation49_spill] sm:$0xff] }
 0x2a8   : > { %v3200_v45 = vsel %vm3198_vm6, %v3185_v7, 0  ;;  %v2891_v63 = vrot.slane %v10871_v34, 1  ;;  %v4867_v61 = vrot.slane %v10872_v1, 1  ;;  %v10874_v10 = vrot.slane %v10873_v31, 1  ;;  %v10895_v18 = vld [vmem:[#allocation17_spill] sm:$0xff] }
 0x2a9   : > { %6354 = vmatprep.mubr.msk.bf16.mxu0 %vm1085_vm5, %v1073_v39  ;;  %6363 = vmatpush3.bf16.msra.mxu1 %v3200_v45  ;;  %v2894_v36 = vrot.slane %v10875_v12, 1  ;;  %v2897_v20 = vrot.slane %v10876_v53, 1  ;;  %v10082_v59 = vmul.f32 %v10866_v33, %v9939_v29  ;;  %v10878_v62 = vrot.slane %v10877_v51, 1  ;;  %v10898_v51 = vld [vmem:[#allocation42_spill] sm:$0xff] }
 0x2aa   : > { %v2890_v15 = vsel %vm2655_vm1, %v2888_v40, %v10874_v10  ;;  %6355 = vmatmul.mubr.msk.bf16.vlgmr.msra.gmra.mxu0 %vm1085_vm5, %v1074_v28  ;;  %v2900_v24 = vrot.slane %v10880_v9, 1  ;;  %v10883_v57 = vrot.slane %v10882_v2, 1  ;;  %v10885_v50 = vrot.slane %v10884_v48, 1 }
 0x2ab   : > { %v2893_v23 = vsel %vm2655_vm1, %v2891_v63, %v10878_v62  ;;  %v2920_v32 = vadd.f32 %v2890_v15, %v10879_v35  ;;  %v2903_v25 = vrot.slane %v10886_v0, 1  ;;  %v10890_v11 = vrot.slane %v10889_v5, 1 }
 0x2ac   : > { %v2921_v46 = vadd.f32 %v2893_v23, %v10881_v30  ;;  %v2896_v8 = vsel %vm2655_vm1, %v2894_v36, %v10883_v57  ;;  %v2899_v29 = vsel %vm2655_vm1, %v2897_v20, %v10885_v50  ;;  %v4870_v56 = vrot.slane %v10066_v58, 1  ;;  %v10896_v36 = vld [vmem:[#allocation47_spill] sm:$0xff] }
 0x2ad   : > { %v10101_v44 = vadd.f32 %v6560_v17, %v2920_v32  ;;  %v2922_v13 = vadd.f32 %v2896_v8, %v10887_v27  ;;  %v2923_v54 = vadd.f32 %v2899_v29, %v10888_v60  ;;  %v2902_v49 = vsel %vm2655_vm1, %v2900_v24, %v10890_v11 }
 0x2ae   : > { %v10109_v3 = vadd.f32 %v6560_v17, %v2921_v46  ;;  %v10892_v47 = vrot.slane %v10891_v6, 1  ;;  %v2924_v7 = vadd.f32 %v2902_v49, %v10893_v38  ;;  %v4873_v39 = vrot.slane %v10082_v59, 1  ;;  %v10899_v46 = vld [vmem:[#allocation28_spill] sm:$0xff] }
 0x2af   : > { %v2941_v26 = vmul.f32 %v10101_v44, %v10101_v44  ;;  %v10117_v19 = vadd.f32 %v6560_v17, %v2922_v13  ;;  %v10119_v52 = vadd.f32 %v6560_v17, %v2923_v54  ;;  %v2906_v45 = vrot.slane %v10895_v18, 1  ;;  %v10155_v54 = vpop.permute.xlu0 %6474 }
 0x2b0   : > { %v2905_v42 = vsel %vm2655_vm1, %v2903_v25, %v10892_v47  ;;  %v2942_v14 = vmul.f32 %v10109_v3, %v10109_v3  ;;  %v10125_v40 = vadd.f32 %v6560_v17, %v2924_v7  ;;  %v10897_v53 = vrot.slane %v10896_v36, 1  ;;  %v10901_v36 = vld [vmem:[#allocation10_spill] sm:$0xff] }
 0x2b1   : > { %v2925_v28 = vadd.f32 %v2905_v42, %v10894_v21  ;;  %v2949_v34 = vmul.f32 %v2941_v26, %v10101_v44  ;;  %v2943_v63 = vmul.f32 %v10117_v19, %v10117_v19  ;;  %v2944_v31 = vmul.f32 %v10119_v52, %v10119_v52 }
 0x2b2   : > { %v2950_v15 = vmul.f32 %v2942_v14, %v10109_v3  ;;  %v2945_v12 = vmul.f32 %v10125_v40, %v10125_v40  ;;  %v2908_v20 = vsel %vm2655_vm1, %v2906_v45, %v10897_v53  ;;  %v2948_v62 = vmul.f32 %v10898_v51, %v10898_v51 }
 0x2b3   : > { %v10133_v10 = vadd.f32 %v6560_v17, %v2925_v28  ;;  %v2957_v23 = vmul.f32 0.044715, %v2949_v34  ;;  %v2951_v35 = vmul.f32 %v2943_v63, %v10117_v19  ;;  %v2952_v32 = vmul.f32 %v2944_v31, %v10119_v52  ;;  %v10165_v28 = vpop.permute.xlu1 %6479 }
 0x2b4   : > { %v2958_v24 = vmul.f32 0.044715, %v2950_v15  ;;  %v2953_v30 = vmul.f32 %v2945_v12, %v10125_v40  ;;  %v2926_v2 = vadd.f32 %v2908_v20, %v10899_v46  ;;  %v2956_v57 = vmul.f32 %v2948_v62, %v10898_v51  ;;  %v10900_v15 = vld [vmem:[#allocation58_spill] sm:$0xff]  ;;  %v10905_v46 = vld [vmem:[#allocation56_spill] sm:$0xff] }
 0x2b5   : > { %v2946_v9 = vmul.f32 %v10133_v10, %v10133_v10  ;;  %v2965_v8 = vadd.f32 %v2957_v23, %v10101_v44  ;;  %v2959_v48 = vmul.f32 0.044715, %v2951_v35  ;;  %v2960_v50 = vmul.f32 0.044715, %v2952_v32  ;;  %v10902_v23 = vld [vmem:[#allocation57_spill] sm:$0xff] }
 0x2b6   : > { %v2966_v0 = vadd.f32 %v2958_v24, %v10109_v3  ;;  %v2961_v25 = vmul.f32 0.044715, %v2953_v30  ;;  %v10153_v27 = vadd.f32 %v6560_v17, %v2926_v2  ;;  %v2964_v13 = vmul.f32 0.044715, %v2956_v57 }
 0x2b7   : > { %v2954_v29 = vmul.f32 %v2946_v9, %v10133_v10  ;;  %v2973_v60 = vmul.f32 0.7978846, %v2965_v8  ;;  %v2967_v5 = vadd.f32 %v2959_v48, %v10117_v19  ;;  %v2968_v11 = vadd.f32 %v2960_v50, %v10119_v52  ;;  %v10903_v9 = vld [vmem:[#allocation21_spill] sm:$0xff]  ;;  %v10184_v8 = vld [vmem:[%s10385_s4 + $0x1] ss:$0 sm:$0xff]  ;;  %v10186_v48 = vpop.permute.xlu0 %6484  ;;  %v10907_v50 = vld [vmem:[#allocation59_spill] sm:$0xff] }
 0x2b8   : > { %v2974_v6 = vmul.f32 0.7978846, %v2966_v0  ;;  %v2969_v47 = vadd.f32 %v2961_v25, %v10125_v40  ;;  %v2947_v42 = vmul.f32 %v10153_v27, %v10153_v27  ;;  %v2972_v38 = vadd.f32 %v2964_v13, %v10898_v51  ;;  %v10908_v0 = vld [vmem:[#allocation40_spill] sm:$0xff] }
 0x2b9   : > { %v2962_v49 = vmul.f32 0.044715, %v2954_v29  ;;  %6514 = vtanh.f32 %v2973_v60  ;;  %v2975_v17 = vmul.f32 0.7978846, %v2967_v5  ;;  %v2976_v7 = vmul.f32 0.7978846, %v2968_v11 }
 0x2ba   : > { %6516 = vtanh.f32 %v2974_v6  ;;  %v6477_v21 = vunpack.i.h.bf16 %v10155_v54  ;;  %v2977_v14 = vmul.f32 0.7978846, %v2969_v47  ;;  %v2955_v18 = vmul.f32 %v2947_v42, %v10153_v27  ;;  %v10909_v13 = vld [vmem:[#allocation52_spill] sm:$0xff]  ;;  %v10911_v6 = vld [vmem:[#allocation9_spill] sm:$0xff] }
 0x2bb   : > { %v2970_v26 = vadd.f32 %v2962_v49, %v10133_v10  ;;  %v6476_v45 = vunpack.i.l.bf16 %v10155_v54  ;;  %6518 = vtanh.f32 %v2975_v17  ;;  %v2980_v63 = vmul.f32 0.7978846, %v2972_v38  ;;  %v10912_v42 = vld [vmem:[#allocation16_spill] sm:$0xff] }
 0x2bc   : > { %6520 = vtanh.f32 %v2976_v7  ;;  %v2963_v31 = vmul.f32 0.044715, %v2955_v18  ;;  %v4854_v12 = vrot.slane %v10900_v15, 1  ;;  %v4857_v53 = vrot.slane %v10901_v36, 1  ;;  %v10213_v15 = vpop.permute.xlu1 %6489  ;;  %v10914_v36 = vld [vmem:[#allocation54_spill] sm:$0xff] }
 0x2bd   : > { %v2978_v34 = vmul.f32 0.7978846, %v2970_v26  ;;  %v6482_v20 = vunpack.i.h.bf16 %v10165_v28  ;;  %v6481_v62 = vunpack.i.l.bf16 %v10165_v28  ;;  %6522 = vtanh.f32 %v2977_v14 }
 0x2be   : > { %v4860_v35 = vrot.slane %v10902_v23, 1  ;;  %v2971_v32 = vadd.f32 %v2963_v31, %v10153_v27  ;;  %v10904_v24 = vrot.slane %v10903_v9, 1  ;;  %v10906_v2 = vrot.slane %v10905_v46, 1 }
 0x2bf   : > { %6524 = vtanh.f32 %v2978_v34  ;;  %v10910_v60 = vrot.slane %v10909_v13, 1  ;;  %v6487_v11 = vunpack.i.h.bf16 %v10186_v48  ;;  %v4863_v47 = vrot.slane %v10911_v6, 1 }
 0x2c0   : > { %v4856_v30 = vsel %vm2655_vm1, %v4854_v12, %v10904_v24  ;;  %v4859_v57 = vsel %vm2655_vm1, %v4857_v53, %v10906_v2  ;;  %6526 = vtanh.f32 %v2980_v63  ;;  %v2979_v49 = vmul.f32 0.7978846, %v2971_v32  ;;  %v10913_v63 = vld [vmem:[#allocation69_spill] sm:$0xff] }
 0x2c1   : > { %v4886_v29 = vadd.f32 %v4856_v30, %v10907_v50  ;;  %v4887_v25 = vadd.f32 %v4859_v57, %v10908_v0  ;;  %v4862_v5 = vsel %vm2655_vm1, %v4860_v35, %v10910_v60  ;;  %v6486_v17 = vunpack.i.l.bf16 %v10186_v48 }
 0x2c2   : > { %v4888_v38 = vadd.f32 %v4862_v5, %v10912_v42  ;;  %v5166_v14 = vsel %vm3198_vm6, %v10055_v22, 0  ;;  %6528 = vtanh.f32 %v2979_v49  ;;  %v4865_v18 = vsel %vm2655_vm1, %v4863_v47, %v4864_v55  ;;  %v10915_v47 = vld [vmem:[#allocation64_spill] sm:$0xff] }
 0x2c3   : > { %v10198_v7 = vadd.f32 %v10184_v8, %v4886_v29  ;;  %v10201_v26 = vadd.f32 %v10184_v8, %v4887_v25  ;;  %6373 = vmatpush3.bf16.msra.mxu0 %v5166_v14  ;;  %v4830_v31 = vmul.f32 %v10866_v33, %v10913_v63  ;;  %v4889_v53 = vadd.f32 %v4865_v18, %v10914_v36 }
 0x2c4   : > { %v10209_v34 = vadd.f32 %v10184_v8, %v4888_v38  ;;  %v4832_v43 = vmul.f32 %v10866_v33, %v9606_v16  ;;  %v6492_v55 = vunpack.i.h.bf16 %v10213_v15  ;;  %v10227_v32 = vmul.f32 %v10866_v33, %v9956_v37 }
 0x2c5   : > { %v4907_v12 = vmul.f32 %v10198_v7, %v10198_v7  ;;  %v4908_v22 = vmul.f32 %v10201_v26, %v10201_v26  ;;  %v4866_v35 = vrot.slane %v4830_v31, 1  ;;  %v10232_v30 = vadd.f32 %v10184_v8, %v4889_v53 }
 0x2c6   : > { %v4909_v23 = vmul.f32 %v10209_v34, %v10209_v34  ;;  %v4869_v46 = vrot.slane %v4832_v43, 1  ;;  %v6515_v2 = vpop.eup %6514  ;;  %v6491_v16 = vunpack.i.l.bf16 %v10213_v15  ;;  %v4872_v37 = vrot.slane %v10227_v32, 1 }
 0x2c7   : > { %v4915_v9 = vmul.f32 %v4907_v12, %v10198_v7  ;;  %v4916_v24 = vmul.f32 %v4908_v22, %v10201_v26  ;;  %v4868_v50 = vsel %vm2655_vm1, %v4866_v35, %v4867_v61  ;;  %v6517_v33 = vpop.eup %6516  ;;  %v2989_v29 = vadd.f32 1.0, %v6515_v2 }
 0x2c8   : > { %v4917_v57 = vmul.f32 %v4909_v23, %v10209_v34  ;;  %v4910_v13 = vmul.f32 %v10232_v30, %v10232_v30  ;;  %v6519_v60 = vpop.eup %6518  ;;  %v2990_v5 = vadd.f32 1.0, %v6517_v33  ;;  %v4871_v6 = vsel %vm2655_vm1, %v4869_v46, %v4870_v56 }
 0x2c9   : > { %v4923_v0 = vmul.f32 0.044715, %v4915_v9  ;;  %v4924_v25 = vmul.f32 0.044715, %v4916_v24  ;;  %v4890_v1 = vadd.f32 %v4868_v50, %v10915_v47  ;;  %v6521_v42 = vpop.eup %6520  ;;  %v2997_v61 = vmul.f32 0.5, %v2989_v29 }
 0x2ca   : > { %v4925_v49 = vmul.f32 0.044715, %v4917_v57  ;;  %v2991_v38 = vadd.f32 1.0, %v6519_v60  ;;  %v6523_v63 = vpop.eup %6522  ;;  %v2998_v31 = vmul.f32 0.5, %v2990_v5  ;;  %v2992_v12 = vadd.f32 1.0, %v6521_v42  ;;  %v10916_v42 = vld [vmem:[#allocation71_spill] sm:$0xff] }
 0x2cb   : > { %v4931_v14 = vadd.f32 %v4923_v0, %v10198_v7  ;;  %v4932_v18 = vadd.f32 %v4924_v25, %v10201_v26  ;;  %v4918_v22 = vmul.f32 %v4910_v13, %v10232_v30  ;;  %v3005_v58 = vmul.f32 %v2997_v61, %v10101_v44 }
 0x2cc   : > { %v4933_v36 = vadd.f32 %v4925_v49, %v10209_v34  ;;  %v6525_v53 = vpop.eup %6524  ;;  %v2999_v56 = vmul.f32 0.5, %v2991_v38  ;;  %v2993_v43 = vadd.f32 1.0, %v6523_v63  ;;  %v3006_v9 = vmul.f32 %v2998_v31, %v10109_v3 }
 0x2cd   : > { %v4939_v23 = vmul.f32 0.7978846, %v4931_v14  ;;  %v6527_v35 = vpop.eup %6526  ;;  %v3000_v24 = vmul.f32 0.5, %v2992_v12  ;;  %v2994_v46 = vadd.f32 1.0, %v6525_v53  ;;  %v4940_v2 = vmul.f32 0.7978846, %v4932_v18 }
 0x2ce   : > { %v3165_v57 = vsel %vm1045_vm2, %v3005_v58, %v6476_v45  ;;  %v3007_v50 = vmul.f32 %v2999_v56, %v10117_v19  ;;  %v3001_v33 = vmul.f32 0.5, %v2993_v43  ;;  %v2996_v29 = vadd.f32 1.0, %v6527_v35 }
 0x2cf   : > { %v3166_v44 = vsel %vm1045_vm2, %v3006_v9, %v6477_v21  ;;  %v3008_v0 = vmul.f32 %v3000_v24, %v10119_v52  ;;  %v3002_v25 = vmul.f32 0.5, %v2994_v46  ;;  %6530 = vtanh.f32 %v4939_v23  ;;  %v6529_v3 = vpop.eup %6528 }
 0x2d0   : > { %v3181_v13 = vpack.c.bf16 %v3166_v44, %v3165_v57  ;;  %v3167_v60 = vsel %vm1045_vm2, %v3007_v50, %v6481_v62  ;;  %v3009_v45 = vmul.f32 %v3001_v33, %v10125_v40  ;;  %v3004_v5 = vmul.f32 0.5, %v2996_v29  ;;  %v6500_v29 = vpop.permute.xlu1 %6499 }
 0x2d1   : > { %v3168_v19 = vsel %vm1045_vm2, %v3008_v0, %v6482_v20  ;;  %v3010_v54 = vmul.f32 %v3002_v25, %v10133_v10  ;;  %v2995_v21 = vadd.f32 1.0, %v6529_v3  ;;  %6532 = vtanh.f32 %v4940_v2 }
 0x2d2   : > { %v3182_v52 = vpack.c.bf16 %v3168_v19, %v3167_v60  ;;  %v3169_v49 = vsel %vm1045_vm2, %v3009_v45, %v6486_v17  ;;  %v3012_v47 = vmul.f32 %v3004_v5, %v10898_v51  ;;  %6364 = vmatprep.mubr.msk.bf16.mxu1 %vm1054_vm3, %v3181_v13  ;;  %v4926_v62 = vmul.f32 0.044715, %v4918_v22 }
 0x2d3   : > { %v3170_v40 = vsel %vm1045_vm2, %v3010_v54, %v6487_v11  ;;  %v3003_v28 = vmul.f32 0.5, %v2995_v21  ;;  %v4941_v20 = vmul.f32 0.7978846, %v4933_v36  ;;  %v4891_v10 = vadd.f32 %v4871_v6, %v10916_v42  ;;  %v6495_v36 = vpop.permute.xlu0 %6494 }
 0x2d4   : > { %v3183_v61 = vpack.c.bf16 %v3170_v40, %v3169_v49  ;;  %6365 = vmatmul.mubr.msk.bf16.vlgmr.msra.gmra.mxu1 %vm1054_vm3, %v3182_v52  ;;  %v4934_v38 = vadd.f32 %v4926_v62, %v10232_v30  ;;  %v10280_v17 = vadd.f32 %v10184_v8, %v4890_v1  ;;  %v3172_v48 = vsel %vm1045_vm2, %v3012_v47, %v6492_v55 }
 0x2d5   : > { %v3011_v51 = vmul.f32 %v3003_v28, %v10153_v27  ;;  %6534 = vtanh.f32 %v4941_v20  ;;  %v10287_v11 = vadd.f32 %v10184_v8, %v4891_v10  ;;  %v4874_v27 = vsel %vm2655_vm1, %v4872_v37, %v4873_v39 }
 0x2d6   : > { %v4942_v14 = vmul.f32 0.7978846, %v4934_v38  ;;  %6368 = vmatprep.mubr.msk.bf16.mxu1 %vm1054_vm3, %v3183_v61  ;;  %v4911_v6 = vmul.f32 %v10280_v17, %v10280_v17  ;;  %v4892_v18 = vadd.f32 %v4874_v27, %v10026_v41  ;;  %v6496_v56 = vunpack.i.l.bf16 %v6495_v36 }
 0x2d7   : > { %v3171_v55 = vsel %vm1045_vm2, %v3011_v51, %v6491_v16  ;;  %v4912_v1 = vmul.f32 %v10287_v11, %v10287_v11  ;;  %v6497_v23 = vunpack.i.h.bf16 %v6495_v36  ;;  %v4906_v35 = vadd.f32 %v10184_v8, %v10022_v4  ;;  %v6505_v40 = vpop.permute.xlu0 %6504 }
 0x2d8   : > { %v3184_v63 = vpack.c.bf16 %v3172_v48, %v3171_v55  ;;  %6536 = vtanh.f32 %v4942_v14  ;;  %v4919_v31 = vmul.f32 %v4911_v6, %v10280_v17  ;;  %v4905_v46 = vadd.f32 %v10184_v8, %v4892_v18 }
 0x2d9   : > { %v4920_v12 = vmul.f32 %v4912_v1, %v10287_v11  ;;  %v4914_v44 = vmul.f32 %v4906_v35, %v4906_v35  ;;  %v6501_v45 = vunpack.i.l.bf16 %v6500_v29  ;;  %v6502_v8 = vunpack.i.h.bf16 %v6500_v29 }
 0x2da   : > { %v4927_v59 = vmul.f32 0.044715, %v4919_v31  ;;  %v4913_v13 = vmul.f32 %v4905_v46, %v4905_v46  ;;  %v6506_v61 = vunpack.i.l.bf16 %v6505_v40  ;;  %v6507_v48 = vunpack.i.h.bf16 %v6505_v40 }
 0x2db   : > { %v4928_v22 = vmul.f32 0.044715, %v4920_v12 }
 0x2dc   : > { %v6531_v32 = vpop.eup %6530  ;;  %6369 = vmatmul.mubr.msk.bf16.gmra.mxu1 %vm1054_vm3, %v3184_v63  ;;  %v4935_v39 = vadd.f32 %v4927_v59, %v10280_v17  ;;  %v4921_v19 = vmul.f32 %v4913_v13, %v4905_v46 }
 0x2dd   : > { %v4955_v15 = vadd.f32 1.0, %v6531_v32  ;;  %v4936_v16 = vadd.f32 %v4928_v22, %v10287_v11 }
 0x2de   : > { %v6533_v37 = vpop.eup %6532  ;;  %v4943_v53 = vmul.f32 0.7978846, %v4935_v39  ;;  %v4929_v28 = vmul.f32 0.044715, %v4921_v19 }
 0x2df   : > { %v4956_v41 = vadd.f32 1.0, %v6533_v37  ;;  %v4963_v58 = vmul.f32 0.5, %v4955_v15  ;;  %v4944_v43 = vmul.f32 0.7978846, %v4936_v16 }
 0x2e0   : > { %6538 = vtanh.f32 %v4943_v53 }
 0x2e1   : > { %v4964_v9 = vmul.f32 0.5, %v4956_v41  ;;  %v4971_v24 = vmul.f32 %v4963_v58, %v10198_v7  ;;  %6540 = vtanh.f32 %v4944_v43  ;;  %v5780_v58 = vld [vmem:[%s10388_s7] ss:$0 sm:$0xff] }
 0x2e2   : > { %v6535_v2 = vpop.eup %6534 }
 0x2e3   : > { %v4972_v57 = vmul.f32 %v4964_v9, %v10201_v26  ;;  %v5131_v50 = vsel %vm1045_vm2, %v4971_v24, %v6496_v56  ;;  %v4957_v33 = vadd.f32 1.0, %v6535_v2  ;;  %v4922_v26 = vmul.f32 %v4914_v44, %v4906_v35 }
 0x2e5   : > { %v6537_v0 = vpop.eup %6536  ;;  %v5132_v25 = vsel %vm1045_vm2, %v4972_v57, %v6497_v23  ;;  %v4965_v3 = vmul.f32 0.5, %v4957_v33  ;;  %v4930_v49 = vmul.f32 0.044715, %v4922_v26 }
 0x2e6   : > { %v5147_v4 = vpack.c.bf16 %v5132_v25, %v5131_v50  ;;  %v4958_v60 = vadd.f32 1.0, %v6537_v0 }
 0x2e7   : > { %v4973_v7 = vmul.f32 %v4965_v3, %v10209_v34  ;;  %v4938_v38 = vadd.f32 %v4930_v49, %v4906_v35 }
 0x2e8   : > { %v4966_v5 = vmul.f32 0.5, %v4958_v60  ;;  %6374 = vmatprep.mubr.msk.bf16.mxu0 %vm1054_vm3, %v5147_v4 }
 0x2e9   : > { %v5133_v21 = vsel %vm1045_vm2, %v4973_v7, %v6501_v45  ;;  %v4946_v55 = vmul.f32 0.7978846, %v4938_v38 }
 0x2ea   : > { %v4974_v54 = vmul.f32 %v4966_v5, %v10232_v30  ;;  %v4937_v30 = vadd.f32 %v4929_v28, %v4905_v46 }
 0x2eb   : > { %6542 = vtanh.f32 %v4946_v55 }
 0x2ec   : > { %v5134_v52 = vsel %vm1045_vm2, %v4974_v54, %v6502_v8  ;;  %v4945_v18 = vmul.f32 0.7978846, %v4937_v30 }
 0x2ed   : > { %v6539_v47 = vpop.eup %6538  ;;  %v5148_v62 = vpack.c.bf16 %v5134_v52, %v5133_v21 }
 0x2ee   : > { %v6541_v20 = vpop.eup %6540  ;;  %v4959_v42 = vadd.f32 1.0, %v6539_v47  ;;  %6544 = vtanh.f32 %v4945_v18 }
 0x2ef   : > { %6375 = vmatmul.mubr.msk.bf16.vlgmr.msra.gmra.mxu0 %vm1054_vm3, %v5148_v62  ;;  %v4960_v34 = vadd.f32 1.0, %v6541_v20 }
 0x2f0   : > { %v4967_v10 = vmul.f32 0.5, %v4959_v42 }
 0x2f1   : > { %v4968_v51 = vmul.f32 0.5, %v4960_v34 }
 0x2f2   : > { %v4975_v14 = vmul.f32 %v4967_v10, %v10280_v17 }
 0x2f3   : > { %v4976_v6 = vmul.f32 %v4968_v51, %v10287_v11 }
 0x2f4   : > { %v5135_v27 = vsel %vm1045_vm2, %v4975_v14, %v6506_v61 }
 0x2f5   : > { %v5136_v1 = vsel %vm1045_vm2, %v4976_v6, %v6507_v48 }
 0x2f6   : > { %v5149_v63 = vpack.c.bf16 %v5136_v1, %v5135_v27 }
 0x2f8   : > { %6378 = vmatprep.mubr.msk.bf16.mxu0 %vm1054_vm3, %v5149_v63  ;;  %v6543_v31 = vpop.eup %6542 }
 0x2f9   : > { %v4962_v22 = vadd.f32 1.0, %v6543_v31 }
 0x2fb   : > { %v6545_v12 = vpop.eup %6544  ;;  %v4970_v36 = vmul.f32 0.5, %v4962_v22 }
 0x2fc   : > { %v4961_v59 = vadd.f32 1.0, %v6545_v12 }
 0x2fd   : > { %v4978_v39 = vmul.f32 %v4970_v36, %v4906_v35 }
 0x2fe   : > { %v4969_v32 = vmul.f32 0.5, %v4961_v59 }
 0x300   : > { %v4977_v17 = vmul.f32 %v4969_v32, %v4905_v46 }
 0x310   : > { %v6510_v11 = vpop.permute.xlu1 %6509 }
 0x311   : > { %v6512_v15 = vunpack.i.h.bf16 %v6510_v11  ;;  %v6511_v16 = vunpack.i.l.bf16 %v6510_v11 }
 0x313   : > { %v5138_v37 = vsel %vm1045_vm2, %v4978_v39, %v6512_v15  ;;  %v5137_v53 = vsel %vm1045_vm2, %v4977_v17, %v6511_v16 }
 0x314   : > { %v5150_v41 = vpack.c.bf16 %v5138_v37, %v5137_v53 }
 0x316   : > { %6379 = vmatmul.mubr.msk.bf16.gmra.mxu0 %vm1054_vm3, %v5150_v41 }
 0x366   : > { %v6360_v56 = vpop.f32.mrf.mxu1 }
 0x367   : > { %v1175_v43 = vadd.f32 %v6360_v56, %v5780_v58 }
 0x368   : > { %v1148_v23 = vpop.f32.mrf.mxu1 }
 0x369   : > { %1183 = vst.msk [vmem:[#allocation3 + $0x30] sm:$0xff] %vm1054_vm3, %v1175_v43  ;;  %v1173_v35 = vadd.f32 %v5780_v58, %v1148_v23 }
 0x36a   : > { %v6361_v9 = vpop.f32.mrf.mxu1  ;;  %v6356_v24 = vpop.f32.mrf.mxu0 }
 0x36b   : > { %1181 = vst.msk [vmem:[#allocation3 + $0x20] sm:$0xff] %vm1054_vm3, %v1173_v35  ;;  %v1176_v46 = vadd.f32 %v6361_v9, %v5780_v58  ;;  %v1171_v2 = vadd.f32 %v6356_v24, %v5780_v58 }
 0x36c   : > { %v1151_v57 = vpop.f32.mrf.mxu1  ;;  %v1132_v50 = vpop.f32.mrf.mxu0 }
 0x36d   : > { %1184 = vst.msk [vmem:[#allocation3 + $0x38] sm:$0xff] %vm1054_vm3, %v1176_v46  ;;  %v1174_v33 = vadd.f32 %v5780_v58, %v1151_v57  ;;  %1179 = vst.msk [vmem:[#allocation3 + $0x10] sm:$0xff] %vm1054_vm3, %v1171_v2  ;;  %v1169_v29 = vadd.f32 %v5780_v58, %v1132_v50 }
 0x36e   : > { %v6357_v44 = vpop.f32.mrf.mxu0 }
 0x36f   : > { %1182 = vst.msk [vmem:[#allocation3 + $0x28] sm:$0xff] %vm1054_vm3, %v1174_v33  ;;  %1177 = vst.msk [vmem:[#allocation3] sm:$0xff] %vm1054_vm3, %v1169_v29  ;;  %v1172_v0 = vadd.f32 %v6357_v44, %v5780_v58 }
 0x370   : > { %v1135_v25 = vpop.f32.mrf.mxu0  ;;  %v3179_v49 = vld [vmem:[#allocation3 + $0x30] sm:$0xff] }
 0x371   : > { %1180 = vst.msk [vmem:[#allocation3 + $0x18] sm:$0xff] %vm1054_vm3, %v1172_v0  ;;  %v1170_v3 = vadd.f32 %v5780_v58, %v1135_v25 }
 0x372   : > { %v3177_v40 = vld [vmem:[#allocation3 + $0x20] sm:$0xff] }
 0x373   : > { %1178 = vst.msk [vmem:[#allocation3 + $0x8] sm:$0xff] %vm1054_vm3, %v1170_v3 }
 0x374   : > { %v3175_v13 = vld [vmem:[#allocation3 + $0x10] sm:$0xff]  ;;  %v3180_v42 = vld [vmem:[#allocation3 + $0x38] sm:$0xff] }
 0x376   : > { %v3173_v60 = vld [vmem:[#allocation3] sm:$0xff]  ;;  %v3178_v61 = vld [vmem:[#allocation3 + $0x28] sm:$0xff] }
 0x378   : > { %v3176_v5 = vld [vmem:[#allocation3 + $0x18] sm:$0xff] }
 0x37a   : > { %v3174_v19 = vld [vmem:[#allocation3 + $0x8] sm:$0xff] }
 0x394   : > { %v6366_v4 = vpop.f32.mrf.mxu1 }
 0x395   : > { %v3269_v45 = vadd.f32 %v6366_v4, %v3175_v13 }
 0x396   : > { %v3236_v7 = vpop.f32.mrf.mxu1 }
 0x397   : > { %3277 = vst.msk [vmem:[#allocation3 + $0x10] sm:$0xff] %vm1054_vm3, %v3269_v45  ;;  %v3267_v8 = vadd.f32 %v3236_v7, %v3173_v60 }
 0x398   : > { %v6367_v26 = vpop.f32.mrf.mxu1 }
 0x399   : > { %3275 = vst.msk [vmem:[#allocation3] sm:$0xff] %vm1054_vm3, %v3267_v8  ;;  %v3270_v54 = vadd.f32 %v6367_v26, %v3176_v5 }
 0x39a   : > { %v3239_v21 = vpop.f32.mrf.mxu1 }
 0x39b   : > { %3278 = vst.msk [vmem:[#allocation3 + $0x18] sm:$0xff] %vm1054_vm3, %v3270_v54  ;;  %v3268_v52 = vadd.f32 %v3239_v21, %v3174_v19 }
 0x39c   : > { %v6370_v47 = vpop.f32.mrf.mxu1 }
 0x39d   : > { %3276 = vst.msk [vmem:[#allocation3 + $0x8] sm:$0xff] %vm1054_vm3, %v3268_v52  ;;  %v3273_v62 = vadd.f32 %v6370_v47, %v3179_v49 }
 0x39e   : > { %v3252_v28 = vpop.f32.mrf.mxu1  ;;  %v5141_v48 = vld [vmem:[#allocation3 + $0x10] sm:$0xff] }
 0x39f   : > { %3281 = vst.msk [vmem:[#allocation3 + $0x30] sm:$0xff] %vm1054_vm3, %v3273_v62  ;;  %v3271_v20 = vadd.f32 %v3252_v28, %v3177_v40 }
 0x3a0   : > { %v6371_v34 = vpop.f32.mrf.mxu1  ;;  %v5139_v14 = vld [vmem:[#allocation3] sm:$0xff] }
 0x3a1   : > { %3279 = vst.msk [vmem:[#allocation3 + $0x20] sm:$0xff] %vm1054_vm3, %v3271_v20  ;;  %v3274_v10 = vadd.f32 %v6371_v34, %v3180_v42 }
 0x3a2   : > { %v3255_v38 = vpop.f32.mrf.mxu1  ;;  %v5142_v55 = vld [vmem:[#allocation3 + $0x18] sm:$0xff] }
 0x3a3   : > { %3282 = vst.msk [vmem:[#allocation3 + $0x38] sm:$0xff] %vm1054_vm3, %v3274_v10  ;;  %v3272_v51 = vadd.f32 %v3255_v38, %v3178_v61 }
 0x3a4   : > { %v5140_v63 = vld [vmem:[#allocation3 + $0x8] sm:$0xff] }
 0x3a5   : > { %3280 = vst.msk [vmem:[#allocation3 + $0x28] sm:$0xff] %vm1054_vm3, %v3272_v51 }
 0x3a6   : > { %v5145_v39 = vld [vmem:[#allocation3 + $0x30] sm:$0xff] }
 0x3a8   : > { %v5143_v15 = vld [vmem:[#allocation3 + $0x20] sm:$0xff] }
 0x3aa   : > { %v5146_v53 = vld [vmem:[#allocation3 + $0x38] sm:$0xff] }
 0x3ac   : > { %v5144_v56 = vld [vmem:[#allocation3 + $0x28] sm:$0xff] }
 0x3af   : > { %v6376_v30 = vpop.f32.mrf.mxu0 }
 0x3b0   : > { %v5235_v6 = vadd.f32 %v6376_v30, %v5141_v48 }
 0x3b1   : > { %v5202_v27 = vpop.f32.mrf.mxu0 }
 0x3b2   : > { %5243 = vst.msk [vmem:[#allocation3 + $0x10] sm:$0xff] %vm1054_vm3, %v5235_v6  ;;  %v5233_v1 = vadd.f32 %v5202_v27, %v5139_v14 }
 0x3b3   : > { %v6377_v18 = vpop.f32.mrf.mxu0 }
 0x3b4   : > { %5241 = vst.msk [vmem:[#allocation3] sm:$0xff] %vm1054_vm3, %v5233_v1  ;;  %v5236_v31 = vadd.f32 %v6377_v18, %v5142_v55 }
 0x3b5   : > { %v5205_v12 = vpop.f32.mrf.mxu0 }
 0x3b6   : > { %5244 = vst.msk [vmem:[#allocation3 + $0x18] sm:$0xff] %vm1054_vm3, %v5236_v31  ;;  %v5234_v59 = vadd.f32 %v5205_v12, %v5140_v63 }
 0x3b8   : > { %5242 = vst.msk [vmem:[#allocation3 + $0x8] sm:$0xff] %vm1054_vm3, %v5234_v59 }
 0x3b9   : > { %v5251_v22 = vld [vmem:[#allocation3 + $0x10] sm:$0xff] }
 0x3ba   : > { %5259 = vst.msk [vmem:[%s6663_s16 + $0x10] sm:$0xff] %vm1054_vm3, %v5251_v22 }
 0x3bb   : > { %v5249_v32 = vld [vmem:[#allocation3] sm:$0xff] }
 0x3bc   : > { %5257 = vst.msk [vmem:[%s6663_s16] sm:$0xff] %vm1054_vm3, %v5249_v32 }
 0x3bd   : > { %v5252_v36 = vld [vmem:[#allocation3 + $0x18] sm:$0xff] }
 0x3be   : > { %5260 = vst.msk [vmem:[%s6663_s16 + $0x18] sm:$0xff] %vm1054_vm3, %v5252_v36 }
 0x3bf   : > { %v5250_v17 = vld [vmem:[#allocation3 + $0x8] sm:$0xff] }
 0x3c0   : > { %5258 = vst.msk [vmem:[%s6663_s16 + $0x8] sm:$0xff] %vm1054_vm3, %v5250_v17 }
 0x3d6   : > { %v6380_v11 = vpop.f32.mrf.mxu0 }
 0x3d7   : > { %v5239_v16 = vadd.f32 %v6380_v11, %v5145_v39 }
 0x3d8   : > { %v5218_v37 = vpop.f32.mrf.mxu0 }
 0x3d9   : > { %5247 = vst.msk [vmem:[#allocation3 + $0x30] sm:$0xff] %vm1054_vm3, %v5239_v16  ;;  %v5237_v41 = vadd.f32 %v5218_v37, %v5143_v15 }
 0x3da   : > { %v6381_v58 = vpop.f32.mrf.mxu0 }
 0x3db   : > { %5245 = vst.msk [vmem:[#allocation3 + $0x20] sm:$0xff] %vm1054_vm3, %v5237_v41  ;;  %v5240_v43 = vadd.f32 %v6381_v58, %v5146_v53 }
 0x3dc   : > { %v5221_v23 = vpop.f32.mrf.mxu0 }
 0x3dd   : > { %5248 = vst.msk [vmem:[#allocation3 + $0x38] sm:$0xff] %vm1054_vm3, %v5240_v43  ;;  %v5238_v35 = vadd.f32 %v5221_v23, %v5144_v56 }
 0x3df   : > { %5246 = vst.msk [vmem:[#allocation3 + $0x28] sm:$0xff] %vm1054_vm3, %v5238_v35 }
 0x3e0   : > { %v5255_v9 = vld [vmem:[#allocation3 + $0x30] sm:$0xff] }
 0x3e1   : > { %5263 = vst.msk [vmem:[%s6663_s16 + $0x30] sm:$0xff] %vm1054_vm3, %v5255_v9 }
 0x3e2   : > { %v5253_v24 = vld [vmem:[#allocation3 + $0x20] sm:$0xff] }
 0x3e3   : > { %5261 = vst.msk [vmem:[%s6663_s16 + $0x20] sm:$0xff] %vm1054_vm3, %v5253_v24 }
 0x3e4   : > { %v5256_v46 = vld [vmem:[#allocation3 + $0x38] sm:$0xff] }
 0x3e5   : > { %5264 = vst.msk [vmem:[%s6663_s16 + $0x38] sm:$0xff] %vm1054_vm3, %v5256_v46 }
 0x3e6   : > { %v5254_v2 = vld [vmem:[#allocation3 + $0x28] sm:$0xff] }
 0x3e7   : > { %5262 = vst.msk [vmem:[%s6663_s16 + $0x28] sm:$0xff] %vm1054_vm3, %v5254_v2 }
 0x3e8 PF: > { %s18_s29 = sadd.s32 1, %s6585_s29   ;;  %s10917_s27 = smov %s6581_s28 }
 0x3e9   : > { %p15_p5 = scmp.ge.s32.totalorder %s18_s29, 4   ;;  %s10918_s28 = smov %s10920_s30 }
 0x3eb   :  { %17 = sbr.rel (!%p15_p5) target bundleno = 2 (0x2), region = 204 }
 0x3f0   :  { %5295 = vsyncmov [#allocation4] }
 0x3f3   :  { %s5296_s26 = vpop.sfrf %5295 }
 0x3f4   :  { %p6334_p6 = scmp.ne.s32.totalorder %s5296_s26, 0 }
 0x3f6   :  { %5300 = shalt.err (%p6334_p6)  }
 0x3f7   :  { %5302 = vsyncmov [#allocation4 + $0x1] }
 0x3fa   :  { %s5303_s9 = vpop.sfrf %5302 }
 0x3fb   :  { %p6335_p7 = scmp.ne.s32.totalorder %s5303_s9, 0 }
 0x3fd   :  { %5307 = shalt.err (%p6335_p7)  }

</bundles_post_ra>
